<compile_context>
chip_gen: v7x
topology: tpu7x:2x2x1
jax: 0.10.0
libtpu: 0.0.40
codegen_flags: <defaults>
</compile_context>

<pallas_src>
import math

import jax
import jax.numpy as jnp
from jax.experimental import pallas as pl
from jax.experimental.pallas import tpu as pltpu


STATE_DIM = 6
STATE_DIM_PAD = 8            # pad tiny input-feature dim for clean layout
ACTION_DIM = 4
HEAD_OUT_LANES = 8           # head layer-2 output width (cols 0..3 = A, 4 = V)
BIAS_WIDTH = 1024            # packed-bias row width (= max fan_out)
FEATURE_DIMS = [256, 512, 1024, 1024, 1024]
HEAD_DIMS = [512, 256]


# --------------------------------------------------------------------------
# Kernel
# --------------------------------------------------------------------------
def dueling_q_kernel(x_ref, w0_ref, w1_ref, hw2_ref, b_ref,          # VMEM in
                     w2_hbm, w3_hbm, w4_hbm, hw0_hbm, hw1_hbm,        # HBM in
                     q_ref,                                           # VMEM out
                     w2_buf, wbuf, hw1_buf, sems):                    # scratch
    def silu(z):
        return z * jax.nn.sigmoid(z)

    def mm(h, w):
        # bf16 x bf16 MXU matmul, f32 accumulation.
        return jnp.dot(h.astype(jnp.bfloat16), w,
                       preferred_element_type=jnp.float32)

    # ---- P4: start weight prefetches; big-layer DMA overlaps MXU compute ----
    cp_w2 = pltpu.make_async_copy(w2_hbm, w2_buf, sems.at[0])
    cp_w3 = pltpu.make_async_copy(w3_hbm, wbuf.at[0], sems.at[1])
    cp_hw1 = pltpu.make_async_copy(hw1_hbm, hw1_buf, sems.at[4])
    cp_w2.start()
    cp_w3.start()
    cp_hw1.start()

    # trunk layers 0-1 (tiny, VMEM-resident weights) run under the W2/W3 DMAs
    h = silu(mm(x_ref[...], w0_ref[...]) + b_ref[0:1, :256])
    h = silu(mm(h, w1_ref[...]) + b_ref[1:2, :512])

    # trunk layer 2 (W2: 512x1024) — W3's DMA continues underneath
    cp_w2.wait()
    h = silu(mm(h, w2_buf[...]) + b_ref[2:3, :])

    # trunk layer 3 (W3) — prefetch W4 into the other slot
    cp_w3.wait()
    cp_w4 = pltpu.make_async_copy(w4_hbm, wbuf.at[1], sems.at[2])
    cp_w4.start()
    h = silu(mm(h, wbuf[0]) + b_ref[3:4, :])

    # trunk layer 4 (W4) — prefetch fused head layer 0 into slot 0
    cp_w4.wait()
    cp_hw0 = pltpu.make_async_copy(hw0_hbm, wbuf.at[0], sems.at[3])
    cp_hw0.start()
    h = silu(mm(h, wbuf[1]) + b_ref[4:5, :])

    # fused head layer 0: [advantage-stream | value-stream] -> (B, 1024)
    cp_hw0.wait()
    g = silu(mm(h, wbuf[0]) + b_ref[5:6, :])

    # head layer 1: two lane-aligned half matmuls on the row-stacked weight
    # (no block-diag zeros shipped or streamed through the MXU)
    cp_hw1.wait()
    a1 = mm(g[:, :512], hw1_buf[:512, :])
    v1 = mm(g[:, 512:], hw1_buf[512:, :])
    g2 = silu(jnp.concatenate([a1, v1], axis=1) + b_ref[6:7, :512])

    # head layer 2: block-diag (512, 8) -> cols 0..3 = A, col 4 = V
    head = mm(g2, hw2_ref[...]) + b_ref[7:8, :HEAD_OUT_LANES]

    # dueling combine q = V + A - mean(A); non-action lanes masked to zero
    col = jax.lax.broadcasted_iota(jnp.int32, head.shape, 1)
    a_mask = col < ACTION_DIM
    a_mean = jnp.sum(jnp.where(a_mask, head, 0.0), axis=1,
                     keepdims=True) * (1.0 / ACTION_DIM)
    v = jnp.sum(jnp.where(col == ACTION_DIM, head, 0.0), axis=1,
                keepdims=True)
    q_ref[...] = jnp.where(a_mask, head + v - a_mean, 0.0)


# --------------------------------------------------------------------------
# Parameter construction
# --------------------------------------------------------------------------
def init_linear(key, fan_in, fan_out):
    """Xavier-uniform weight stored as (in, out) bf16, zero bias (1, out) f32."""
    bound = math.sqrt(6.0 / (fan_in + fan_out))
    w = jax.random.uniform(key, (fan_in, fan_out), jnp.float32, -bound, bound)
    return w.astype(jnp.bfloat16), jnp.zeros((1, fan_out), jnp.float32)


def make_raw_params(seed=0):
    """Un-fused per-layer (w, b) pairs matching the PyTorch module layout."""
    key = jax.random.PRNGKey(seed)
    keys = jax.random.split(key, 11)

    trunk_dims = [STATE_DIM] + FEATURE_DIMS
    trunk = [init_linear(keys[i], trunk_dims[i], trunk_dims[i + 1])
             for i in range(5)]

    vdims = [FEATURE_DIMS[-1]] + HEAD_DIMS + [1]
    value_layers = [init_linear(keys[5 + i], vdims[i], vdims[i + 1])
                    for i in range(3)]

    adims = [FEATURE_DIMS[-1]] + HEAD_DIMS + [ACTION_DIM]
    adv_layers = [init_linear(keys[8 + i], adims[i], adims[i + 1])
                  for i in range(3)]

    return trunk, value_layers, adv_layers


def _block_diag(w_a, w_b):
    ra, ca = w_a.shape
    rb, cb = w_b.shape
    top = jnp.concatenate([w_a, jnp.zeros((ra, cb), w_a.dtype)], axis=1)
    bot = jnp.concatenate([jnp.zeros((rb, ca), w_b.dtype), w_b], axis=1)
    return jnp.concatenate([top, bot], axis=0)


def fuse_params(trunk, value_layers, adv_layers):
    """Fused / packed kernel parameters (bf16 weights, packed f32 biases)."""
    (w0, b0), (w1, b1), (w2, b2), (w3, b3), (w4, b4) = trunk
    (vw0, vb0), (vw1, vb1), (vw2, vb2) = value_layers
    (aw0, ab0), (aw1, ab1), (aw2, ab2) = adv_layers

    # pad first-layer input rows 6 -> 8 with zeros
    w0 = jnp.pad(w0, ((0, STATE_DIM_PAD - STATE_DIM), (0, 0)))

    # fused head layer 0: advantage columns first, then value columns
    hw0 = jnp.concatenate([aw0, vw0], axis=1)                  # (1024, 1024)
    # head layer 1: row-stacked (no structural zeros); rows 0..511 = adv,
    # rows 512..1023 = value
    hw1 = jnp.concatenate([aw1, vw1], axis=0)                  # (1024, 256)
    # head layer 2: block-diag (512, 5) padded only to 8 lanes
    hw2 = _block_diag(aw2, vw2)                                 # (512, 5)
    hw2 = jnp.pad(hw2, ((0, 0), (0, HEAD_OUT_LANES - hw2.shape[1])))

    hb0 = jnp.concatenate([ab0, vb0], axis=1)                   # (1, 1024)
    hb1 = jnp.concatenate([ab1, vb1], axis=1)                   # (1, 512)
    hb2 = jnp.concatenate([ab2, vb2], axis=1)                   # (1, 5)

    def pad_row(b):
        return jnp.pad(b, ((0, 0), (0, BIAS_WIDTH - b.shape[1])))

    biases = jnp.concatenate(
        [pad_row(b) for b in (b0, b1, b2, b3, b4, hb0, hb1, hb2)], axis=0)

    return dict(w0=w0, w1=w1, w2=w2, w3=w3, w4=w4,
                hw0=hw0, hw1=hw1, hw2=hw2, biases=biases)


# --------------------------------------------------------------------------
# Wrapper
# --------------------------------------------------------------------------
def dueling_q_forward(x, params):
    """x: (B, STATE_DIM) f32. Returns q_values: (B, ACTION_DIM) f32."""
    batch = x.shape[0]
    x_pad = jnp.pad(x, ((0, 0), (0, STATE_DIM_PAD - STATE_DIM)))

    vmem = pl.BlockSpec(memory_space=pltpu.MemorySpace.VMEM)
    hbm = pl.BlockSpec(memory_space=pl.ANY)   # stays in HBM; kernel DMAs it

    w_elems = (STATE_DIM_PAD * 256 + 256 * 512 + 512 * 1024
               + 3 * 1024 * 1024 + 1024 * 256 + 512 * HEAD_OUT_LANES)
    cost = pl.CostEstimate(
        flops=2 * batch * w_elems,
        transcendentals=batch * (256 + 512 + 3 * 1024 + 1024 + 512),
        bytes_accessed=(2 * w_elems + 4 * 8 * BIAS_WIDTH
                        + 4 * batch * (STATE_DIM_PAD + HEAD_OUT_LANES)))

    # NOTE: for batch >> 8 or multi-step inference, add a grid axis over batch
    # chunks with constant (weight-resident) index_maps to amortize the weight
    # fetch; at small batch the kernel stays single-core / gridless by design.
    q_slab = pl.pallas_call(
        dueling_q_kernel,
        out_shape=jax.ShapeDtypeStruct((batch, HEAD_OUT_LANES), jnp.float32),
        in_specs=[vmem, vmem, vmem, vmem, vmem,    # x, w0, w1, hw2, biases
                  hbm, hbm, hbm, hbm, hbm],        # w2, w3, w4, hw0, hw1
        out_specs=vmem,
        scratch_shapes=[
            pltpu.VMEM((512, 1024), jnp.bfloat16),       # W2 buffer
            pltpu.VMEM((2, 1024, 1024), jnp.bfloat16),   # double buffer (W3/W4/HW0)
            pltpu.VMEM((1024, 256), jnp.bfloat16),       # HW1 buffer
            pltpu.SemaphoreType.DMA((5,)),
        ],
        compiler_params=pltpu.CompilerParams(
            vmem_limit_bytes=32 * 1024 * 1024),          # portable to v7x
        cost_estimate=cost,
    )(x_pad, params["w0"], params["w1"], params["hw2"], params["biases"],
      params["w2"], params["w3"], params["w4"], params["hw0"], params["hw1"])

    return q_slab[:, :ACTION_DIM]


# --------------------------------------------------------------------------
# Pure-JAX reference (un-fused, matches PyTorch forward semantics with the
# same bf16 weights / f32 accumulation)
# --------------------------------------------------------------------------
def reference_forward(x, trunk, value_layers, adv_layers):
    def silu(z):
        return z * jax.nn.sigmoid(z)

    def linear(h, w, b):
        return jnp.dot(h.astype(jnp.bfloat16), w,
                       preferred_element_type=jnp.float32) + b

    h = x
    for w, b in trunk:
        h = silu(linear(h, w, b))

    v = h
    for i, (w, b) in enumerate(value_layers):
        v = linear(v, w, b)
        if i < 2:
            v = silu(v)

    a = h
    for i, (w, b) in enumerate(adv_layers):
        a = linear(a, w, b)
        if i < 2:
            a = silu(a)

    return v + a - jnp.mean(a, axis=1, keepdims=True)


if __name__ == "__main__":
    batch = 8
    key = jax.random.PRNGKey(0)
    x = jax.random.normal(key, (batch, STATE_DIM), dtype=jnp.float32)

    trunk, value_layers, adv_layers = make_raw_params(seed=0)
    params = fuse_params(trunk, value_layers, adv_layers)

    q = dueling_q_forward(x, params)
    q = jax.block_until_ready(q)

    q_ref = reference_forward(x, trunk, value_layers, adv_layers)
    assert q.shape == (batch, ACTION_DIM)
    assert jnp.allclose(q, q_ref, atol=1e-2, rtol=1e-2), "mismatch vs. reference"

    print("KERNEL_OK")
</pallas_src>

<mosaic_0001>
module attributes {stable_mosaic.version = 11 : i64} {
  func.func @dueling_q_kernel(%arg0: memref<8x8xf32, #tpu.memory_space<vmem>>, %arg1: memref<8x256xbf16, #tpu.memory_space<vmem>>, %arg2: memref<256x512xbf16, #tpu.memory_space<vmem>>, %arg3: memref<512x8xbf16, #tpu.memory_space<vmem>>, %arg4: memref<8x1024xf32, #tpu.memory_space<vmem>>, %arg5: memref<512x1024xbf16, #tpu.memory_space<any>>, %arg6: memref<1024x1024xbf16, #tpu.memory_space<any>>, %arg7: memref<1024x1024xbf16, #tpu.memory_space<any>>, %arg8: memref<1024x1024xbf16, #tpu.memory_space<any>>, %arg9: memref<1024x256xbf16, #tpu.memory_space<any>>, %arg10: memref<8x8xf32, #tpu.memory_space<vmem>>, %arg11: memref<512x1024xbf16, #tpu.memory_space<vmem>>, %arg12: memref<2x1024x1024xbf16, #tpu.memory_space<vmem>>, %arg13: memref<1024x256xbf16, #tpu.memory_space<vmem>>, %arg14: memref<5x!tpu.dma_semaphore, #tpu.memory_space<semaphore_mem>>) attributes {dimension_semantics = [], scalar_prefetch = 0 : i64, scratch_operands = 4 : i64, tpu.core_type = #tpu.core_type<tc>} {
    %c0_i32 = arith.constant 0 : i32
    %0 = tpu.memref_slice %arg14[%c0_i32] : memref<5x!tpu.dma_semaphore, #tpu.memory_space<semaphore_mem>> -> memref<1x!tpu.dma_semaphore, #tpu.memory_space<semaphore_mem>>
    %1 = tpu.memref_squeeze %0 : memref<1x!tpu.dma_semaphore, #tpu.memory_space<semaphore_mem>> -> memref<!tpu.dma_semaphore, #tpu.memory_space<semaphore_mem>>
    tpu.enqueue_dma source(%arg5 : memref<512x1024xbf16, #tpu.memory_space<any>>) target(%arg11 : memref<512x1024xbf16, #tpu.memory_space<vmem>>) target_semaphore(%1 : memref<!tpu.dma_semaphore, #tpu.memory_space<semaphore_mem>>)
    %c0_i32_0 = arith.constant 0 : i32
    %c1_i32 = arith.constant 1 : i32
    %c0_i32_1 = arith.constant 0 : i32
    %c0_i32_2 = arith.constant 0 : i32
    %2 = tpu.memref_slice %arg12[%c0_i32_0, %c0_i32_1, %c0_i32_2] : memref<2x1024x1024xbf16, #tpu.memory_space<vmem>> -> memref<1x1024x1024xbf16, #tpu.memory_space<vmem>>
    %3 = tpu.memref_squeeze %2 : memref<1x1024x1024xbf16, #tpu.memory_space<vmem>> -> memref<1024x1024xbf16, #tpu.memory_space<vmem>>
    %4 = tpu.memref_slice %arg14[%c1_i32] : memref<5x!tpu.dma_semaphore, #tpu.memory_space<semaphore_mem>> -> memref<1x!tpu.dma_semaphore, #tpu.memory_space<semaphore_mem>>
    %5 = tpu.memref_squeeze %4 : memref<1x!tpu.dma_semaphore, #tpu.memory_space<semaphore_mem>> -> memref<!tpu.dma_semaphore, #tpu.memory_space<semaphore_mem>>
    tpu.enqueue_dma source(%arg6 : memref<1024x1024xbf16, #tpu.memory_space<any>>) target(%3 : memref<1024x1024xbf16, #tpu.memory_space<vmem>>) target_semaphore(%5 : memref<!tpu.dma_semaphore, #tpu.memory_space<semaphore_mem>>)
    %c4_i32 = arith.constant 4 : i32
    %6 = tpu.memref_slice %arg14[%c4_i32] : memref<5x!tpu.dma_semaphore, #tpu.memory_space<semaphore_mem>> -> memref<1x!tpu.dma_semaphore, #tpu.memory_space<semaphore_mem>>
    %7 = tpu.memref_squeeze %6 : memref<1x!tpu.dma_semaphore, #tpu.memory_space<semaphore_mem>> -> memref<!tpu.dma_semaphore, #tpu.memory_space<semaphore_mem>>
    tpu.enqueue_dma source(%arg9 : memref<1024x256xbf16, #tpu.memory_space<any>>) target(%arg13 : memref<1024x256xbf16, #tpu.memory_space<vmem>>) target_semaphore(%7 : memref<!tpu.dma_semaphore, #tpu.memory_space<semaphore_mem>>)
    %c0 = arith.constant 0 : index
    %c0_3 = arith.constant 0 : index
    %8 = vector.load %arg0[%c0, %c0_3] : memref<8x8xf32, #tpu.memory_space<vmem>>, vector<8x8xf32>
    %c0_4 = arith.constant 0 : index
    %c0_5 = arith.constant 0 : index
    %9 = vector.load %arg1[%c0_4, %c0_5] : memref<8x256xbf16, #tpu.memory_space<vmem>>, vector<8x256xbf16>
    %10 = arith.truncf %8 : vector<8x8xf32> to vector<8x8xbf16>
    %cst = arith.constant dense<0.000000e+00> : vector<8x256xf32>
    %11 = tpu.matmul %10, %9, %cst {dimension_numbers = #tpu.dot_dimension_numbers<[1], [0], [0], [1], [0, 0, 1, 1], [], []>} : vector<8x8xbf16>, vector<8x256xbf16>, vector<8x256xf32> -> vector<8x256xf32>
    %c0_6 = arith.constant 0 : index
    %c0_7 = arith.constant 0 : index
    %12 = vector.load %arg4[%c0_6, %c0_7] : memref<8x1024xf32, #tpu.memory_space<vmem>>, vector<1x256xf32>
    %13 = vector.broadcast %12 : vector<1x256xf32> to vector<8x256xf32>
    %14 = arith.addf %11, %13 : vector<8x256xf32>
    %15 = arith.negf %14 : vector<8x256xf32>
    %16 = math.exp %15 : vector<8x256xf32>
    %cst_8 = arith.constant 1.000000e+00 : f32
    %17 = vector.broadcast %cst_8 : f32 to vector<8x256xf32>
    %18 = arith.addf %17, %16 : vector<8x256xf32>
    %19 = arith.divf %17, %18 : vector<8x256xf32>
    %20 = arith.mulf %14, %19 : vector<8x256xf32>
    %c0_9 = arith.constant 0 : index
    %c0_10 = arith.constant 0 : index
    %21 = vector.load %arg2[%c0_9, %c0_10] : memref<256x512xbf16, #tpu.memory_space<vmem>>, vector<256x512xbf16>
    %22 = arith.truncf %20 : vector<8x256xf32> to vector<8x256xbf16>
    %cst_11 = arith.constant dense<0.000000e+00> : vector<8x512xf32>
    %23 = tpu.matmul %22, %21, %cst_11 {dimension_numbers = #tpu.dot_dimension_numbers<[1], [0], [0], [1], [0, 0, 1, 1], [], []>} : vector<8x256xbf16>, vector<256x512xbf16>, vector<8x512xf32> -> vector<8x512xf32>
    %c1 = arith.constant 1 : index
    %c0_12 = arith.constant 0 : index
    %24 = vector.load %arg4[%c1, %c0_12] : memref<8x1024xf32, #tpu.memory_space<vmem>>, vector<1x512xf32>
    %25 = vector.broadcast %24 : vector<1x512xf32> to vector<8x512xf32>
    %26 = arith.addf %23, %25 : vector<8x512xf32>
    %27 = arith.negf %26 : vector<8x512xf32>
    %28 = math.exp %27 : vector<8x512xf32>
    %cst_13 = arith.constant 1.000000e+00 : f32
    %29 = vector.broadcast %cst_13 : f32 to vector<8x512xf32>
    %30 = arith.addf %29, %28 : vector<8x512xf32>
    %31 = arith.divf %29, %30 : vector<8x512xf32>
    %32 = arith.mulf %26, %31 : vector<8x512xf32>
    %c0_i32_14 = arith.constant 0 : i32
    %33 = tpu.memref_slice %arg14[%c0_i32_14] : memref<5x!tpu.dma_semaphore, #tpu.memory_space<semaphore_mem>> -> memref<1x!tpu.dma_semaphore, #tpu.memory_space<semaphore_mem>>
    %34 = tpu.memref_squeeze %33 : memref<1x!tpu.dma_semaphore, #tpu.memory_space<semaphore_mem>> -> memref<!tpu.dma_semaphore, #tpu.memory_space<semaphore_mem>>
    tpu.wait_dma2 semaphore(%34 : memref<!tpu.dma_semaphore, #tpu.memory_space<semaphore_mem>>) src(%arg5 : memref<512x1024xbf16, #tpu.memory_space<any>>) dst(%arg11 : memref<512x1024xbf16, #tpu.memory_space<vmem>>)
    %c0_15 = arith.constant 0 : index
    %c0_16 = arith.constant 0 : index
    %35 = vector.load %arg11[%c0_15, %c0_16] : memref<512x1024xbf16, #tpu.memory_space<vmem>>, vector<512x1024xbf16>
    %36 = arith.truncf %32 : vector<8x512xf32> to vector<8x512xbf16>
    %cst_17 = arith.constant dense<0.000000e+00> : vector<8x1024xf32>
    %37 = tpu.matmul %36, %35, %cst_17 {dimension_numbers = #tpu.dot_dimension_numbers<[1], [0], [0], [1], [0, 0, 1, 1], [], []>} : vector<8x512xbf16>, vector<512x1024xbf16>, vector<8x1024xf32> -> vector<8x1024xf32>
    %c2 = arith.constant 2 : index
    %c0_18 = arith.constant 0 : index
    %38 = vector.load %arg4[%c2, %c0_18] : memref<8x1024xf32, #tpu.memory_space<vmem>>, vector<1x1024xf32>
    %39 = vector.broadcast %38 : vector<1x1024xf32> to vector<8x1024xf32>
    %40 = arith.addf %37, %39 : vector<8x1024xf32>
    %41 = arith.negf %40 : vector<8x1024xf32>
    %42 = math.exp %41 : vector<8x1024xf32>
    %cst_19 = arith.constant 1.000000e+00 : f32
    %43 = vector.broadcast %cst_19 : f32 to vector<8x1024xf32>
    %44 = arith.addf %43, %42 : vector<8x1024xf32>
    %45 = arith.divf %43, %44 : vector<8x1024xf32>
    %46 = arith.mulf %40, %45 : vector<8x1024xf32>
    %c0_i32_20 = arith.constant 0 : i32
    %c1_i32_21 = arith.constant 1 : i32
    %c0_i32_22 = arith.constant 0 : i32
    %c0_i32_23 = arith.constant 0 : i32
    %47 = tpu.memref_slice %arg12[%c0_i32_20, %c0_i32_22, %c0_i32_23] : memref<2x1024x1024xbf16, #tpu.memory_space<vmem>> -> memref<1x1024x1024xbf16, #tpu.memory_space<vmem>>
    %48 = tpu.memref_squeeze %47 : memref<1x1024x1024xbf16, #tpu.memory_space<vmem>> -> memref<1024x1024xbf16, #tpu.memory_space<vmem>>
    %49 = tpu.memref_slice %arg14[%c1_i32_21] : memref<5x!tpu.dma_semaphore, #tpu.memory_space<semaphore_mem>> -> memref<1x!tpu.dma_semaphore, #tpu.memory_space<semaphore_mem>>
    %50 = tpu.memref_squeeze %49 : memref<1x!tpu.dma_semaphore, #tpu.memory_space<semaphore_mem>> -> memref<!tpu.dma_semaphore, #tpu.memory_space<semaphore_mem>>
    tpu.wait_dma2 semaphore(%50 : memref<!tpu.dma_semaphore, #tpu.memory_space<semaphore_mem>>) src(%arg6 : memref<1024x1024xbf16, #tpu.memory_space<any>>) dst(%48 : memref<1024x1024xbf16, #tpu.memory_space<vmem>>)
    %c1_i32_24 = arith.constant 1 : i32
    %c2_i32 = arith.constant 2 : i32
    %c0_i32_25 = arith.constant 0 : i32
    %c0_i32_26 = arith.constant 0 : i32
    %51 = tpu.memref_slice %arg12[%c1_i32_24, %c0_i32_25, %c0_i32_26] : memref<2x1024x1024xbf16, #tpu.memory_space<vmem>> -> memref<1x1024x1024xbf16, #tpu.memory_space<vmem>>
    %52 = tpu.memref_squeeze %51 : memref<1x1024x1024xbf16, #tpu.memory_space<vmem>> -> memref<1024x1024xbf16, #tpu.memory_space<vmem>>
    %53 = tpu.memref_slice %arg14[%c2_i32] : memref<5x!tpu.dma_semaphore, #tpu.memory_space<semaphore_mem>> -> memref<1x!tpu.dma_semaphore, #tpu.memory_space<semaphore_mem>>
    %54 = tpu.memref_squeeze %53 : memref<1x!tpu.dma_semaphore, #tpu.memory_space<semaphore_mem>> -> memref<!tpu.dma_semaphore, #tpu.memory_space<semaphore_mem>>
    tpu.enqueue_dma source(%arg7 : memref<1024x1024xbf16, #tpu.memory_space<any>>) target(%52 : memref<1024x1024xbf16, #tpu.memory_space<vmem>>) target_semaphore(%54 : memref<!tpu.dma_semaphore, #tpu.memory_space<semaphore_mem>>)
    %c0_27 = arith.constant 0 : index
    %c0_28 = arith.constant 0 : index
    %c0_29 = arith.constant 0 : index
    %55 = vector.load %arg12[%c0_27, %c0_28, %c0_29] : memref<2x1024x1024xbf16, #tpu.memory_space<vmem>>, vector<1x1024x1024xbf16>
    %56 = vector.shape_cast %55 : vector<1x1024x1024xbf16> to vector<1024x1024xbf16>
    %57 = arith.truncf %46 : vector<8x1024xf32> to vector<8x1024xbf16>
    %cst_30 = arith.constant dense<0.000000e+00> : vector<8x1024xf32>
    %58 = tpu.matmul %57, %56, %cst_30 {dimension_numbers = #tpu.dot_dimension_numbers<[1], [0], [0], [1], [0, 0, 1, 1], [], []>} : vector<8x1024xbf16>, vector<1024x1024xbf16>, vector<8x1024xf32> -> vector<8x1024xf32>
    %c3 = arith.constant 3 : index
    %c0_31 = arith.constant 0 : index
    %59 = vector.load %arg4[%c3, %c0_31] : memref<8x1024xf32, #tpu.memory_space<vmem>>, vector<1x1024xf32>
    %60 = vector.broadcast %59 : vector<1x1024xf32> to vector<8x1024xf32>
    %61 = arith.addf %58, %60 : vector<8x1024xf32>
    %62 = arith.negf %61 : vector<8x1024xf32>
    %63 = math.exp %62 : vector<8x1024xf32>
    %cst_32 = arith.constant 1.000000e+00 : f32
    %64 = vector.broadcast %cst_32 : f32 to vector<8x1024xf32>
    %65 = arith.addf %64, %63 : vector<8x1024xf32>
    %66 = arith.divf %64, %65 : vector<8x1024xf32>
    %67 = arith.mulf %61, %66 : vector<8x1024xf32>
    %c1_i32_33 = arith.constant 1 : i32
    %c2_i32_34 = arith.constant 2 : i32
    %c0_i32_35 = arith.constant 0 : i32
    %c0_i32_36 = arith.constant 0 : i32
    %68 = tpu.memref_slice %arg12[%c1_i32_33, %c0_i32_35, %c0_i32_36] : memref<2x1024x1024xbf16, #tpu.memory_space<vmem>> -> memref<1x1024x1024xbf16, #tpu.memory_space<vmem>>
    %69 = tpu.memref_squeeze %68 : memref<1x1024x1024xbf16, #tpu.memory_space<vmem>> -> memref<1024x1024xbf16, #tpu.memory_space<vmem>>
    %70 = tpu.memref_slice %arg14[%c2_i32_34] : memref<5x!tpu.dma_semaphore, #tpu.memory_space<semaphore_mem>> -> memref<1x!tpu.dma_semaphore, #tpu.memory_space<semaphore_mem>>
    %71 = tpu.memref_squeeze %70 : memref<1x!tpu.dma_semaphore, #tpu.memory_space<semaphore_mem>> -> memref<!tpu.dma_semaphore, #tpu.memory_space<semaphore_mem>>
    tpu.wait_dma2 semaphore(%71 : memref<!tpu.dma_semaphore, #tpu.memory_space<semaphore_mem>>) src(%arg7 : memref<1024x1024xbf16, #tpu.memory_space<any>>) dst(%69 : memref<1024x1024xbf16, #tpu.memory_space<vmem>>)
    %c0_i32_37 = arith.constant 0 : i32
    %c3_i32 = arith.constant 3 : i32
    %c0_i32_38 = arith.constant 0 : i32
    %c0_i32_39 = arith.constant 0 : i32
    %72 = tpu.memref_slice %arg12[%c0_i32_37, %c0_i32_38, %c0_i32_39] : memref<2x1024x1024xbf16, #tpu.memory_space<vmem>> -> memref<1x1024x1024xbf16, #tpu.memory_space<vmem>>
    %73 = tpu.memref_squeeze %72 : memref<1x1024x1024xbf16, #tpu.memory_space<vmem>> -> memref<1024x1024xbf16, #tpu.memory_space<vmem>>
    %74 = tpu.memref_slice %arg14[%c3_i32] : memref<5x!tpu.dma_semaphore, #tpu.memory_space<semaphore_mem>> -> memref<1x!tpu.dma_semaphore, #tpu.memory_space<semaphore_mem>>
    %75 = tpu.memref_squeeze %74 : memref<1x!tpu.dma_semaphore, #tpu.memory_space<semaphore_mem>> -> memref<!tpu.dma_semaphore, #tpu.memory_space<semaphore_mem>>
    tpu.enqueue_dma source(%arg8 : memref<1024x1024xbf16, #tpu.memory_space<any>>) target(%73 : memref<1024x1024xbf16, #tpu.memory_space<vmem>>) target_semaphore(%75 : memref<!tpu.dma_semaphore, #tpu.memory_space<semaphore_mem>>)
    %c1_40 = arith.constant 1 : index
    %c0_41 = arith.constant 0 : index
    %c0_42 = arith.constant 0 : index
    %76 = vector.load %arg12[%c1_40, %c0_41, %c0_42] : memref<2x1024x1024xbf16, #tpu.memory_space<vmem>>, vector<1x1024x1024xbf16>
    %77 = vector.shape_cast %76 : vector<1x1024x1024xbf16> to vector<1024x1024xbf16>
    %78 = arith.truncf %67 : vector<8x1024xf32> to vector<8x1024xbf16>
    %cst_43 = arith.constant dense<0.000000e+00> : vector<8x1024xf32>
    %79 = tpu.matmul %78, %77, %cst_43 {dimension_numbers = #tpu.dot_dimension_numbers<[1], [0], [0], [1], [0, 0, 1, 1], [], []>} : vector<8x1024xbf16>, vector<1024x1024xbf16>, vector<8x1024xf32> -> vector<8x1024xf32>
    %c4 = arith.constant 4 : index
    %c0_44 = arith.constant 0 : index
    %80 = vector.load %arg4[%c4, %c0_44] : memref<8x1024xf32, #tpu.memory_space<vmem>>, vector<1x1024xf32>
    %81 = vector.broadcast %80 : vector<1x1024xf32> to vector<8x1024xf32>
    %82 = arith.addf %79, %81 : vector<8x1024xf32>
    %83 = arith.negf %82 : vector<8x1024xf32>
    %84 = math.exp %83 : vector<8x1024xf32>
    %cst_45 = arith.constant 1.000000e+00 : f32
    %85 = vector.broadcast %cst_45 : f32 to vector<8x1024xf32>
    %86 = arith.addf %85, %84 : vector<8x1024xf32>
    %87 = arith.divf %85, %86 : vector<8x1024xf32>
    %88 = arith.mulf %82, %87 : vector<8x1024xf32>
    %c0_i32_46 = arith.constant 0 : i32
    %c3_i32_47 = arith.constant 3 : i32
    %c0_i32_48 = arith.constant 0 : i32
    %c0_i32_49 = arith.constant 0 : i32
    %89 = tpu.memref_slice %arg12[%c0_i32_46, %c0_i32_48, %c0_i32_49] : memref<2x1024x1024xbf16, #tpu.memory_space<vmem>> -> memref<1x1024x1024xbf16, #tpu.memory_space<vmem>>
    %90 = tpu.memref_squeeze %89 : memref<1x1024x1024xbf16, #tpu.memory_space<vmem>> -> memref<1024x1024xbf16, #tpu.memory_space<vmem>>
    %91 = tpu.memref_slice %arg14[%c3_i32_47] : memref<5x!tpu.dma_semaphore, #tpu.memory_space<semaphore_mem>> -> memref<1x!tpu.dma_semaphore, #tpu.memory_space<semaphore_mem>>
    %92 = tpu.memref_squeeze %91 : memref<1x!tpu.dma_semaphore, #tpu.memory_space<semaphore_mem>> -> memref<!tpu.dma_semaphore, #tpu.memory_space<semaphore_mem>>
    tpu.wait_dma2 semaphore(%92 : memref<!tpu.dma_semaphore, #tpu.memory_space<semaphore_mem>>) src(%arg8 : memref<1024x1024xbf16, #tpu.memory_space<any>>) dst(%90 : memref<1024x1024xbf16, #tpu.memory_space<vmem>>)
    %c0_50 = arith.constant 0 : index
    %c0_51 = arith.constant 0 : index
    %c0_52 = arith.constant 0 : index
    %93 = vector.load %arg12[%c0_50, %c0_51, %c0_52] : memref<2x1024x1024xbf16, #tpu.memory_space<vmem>>, vector<1x1024x1024xbf16>
    %94 = vector.shape_cast %93 : vector<1x1024x1024xbf16> to vector<1024x1024xbf16>
    %95 = arith.truncf %88 : vector<8x1024xf32> to vector<8x1024xbf16>
    %cst_53 = arith.constant dense<0.000000e+00> : vector<8x1024xf32>
    %96 = tpu.matmul %95, %94, %cst_53 {dimension_numbers = #tpu.dot_dimension_numbers<[1], [0], [0], [1], [0, 0, 1, 1], [], []>} : vector<8x1024xbf16>, vector<1024x1024xbf16>, vector<8x1024xf32> -> vector<8x1024xf32>
    %c5 = arith.constant 5 : index
    %c0_54 = arith.constant 0 : index
    %97 = vector.load %arg4[%c5, %c0_54] : memref<8x1024xf32, #tpu.memory_space<vmem>>, vector<1x1024xf32>
    %98 = vector.broadcast %97 : vector<1x1024xf32> to vector<8x1024xf32>
    %99 = arith.addf %96, %98 : vector<8x1024xf32>
    %100 = arith.negf %99 : vector<8x1024xf32>
    %101 = math.exp %100 : vector<8x1024xf32>
    %cst_55 = arith.constant 1.000000e+00 : f32
    %102 = vector.broadcast %cst_55 : f32 to vector<8x1024xf32>
    %103 = arith.addf %102, %101 : vector<8x1024xf32>
    %104 = arith.divf %102, %103 : vector<8x1024xf32>
    %105 = arith.mulf %99, %104 : vector<8x1024xf32>
    %c4_i32_56 = arith.constant 4 : i32
    %106 = tpu.memref_slice %arg14[%c4_i32_56] : memref<5x!tpu.dma_semaphore, #tpu.memory_space<semaphore_mem>> -> memref<1x!tpu.dma_semaphore, #tpu.memory_space<semaphore_mem>>
    %107 = tpu.memref_squeeze %106 : memref<1x!tpu.dma_semaphore, #tpu.memory_space<semaphore_mem>> -> memref<!tpu.dma_semaphore, #tpu.memory_space<semaphore_mem>>
    tpu.wait_dma2 semaphore(%107 : memref<!tpu.dma_semaphore, #tpu.memory_space<semaphore_mem>>) src(%arg9 : memref<1024x256xbf16, #tpu.memory_space<any>>) dst(%arg13 : memref<1024x256xbf16, #tpu.memory_space<vmem>>)
    %108 = vector.extract_strided_slice %105 {offsets = [0, 0], sizes = [8, 512], strides = [1, 1]} : vector<8x1024xf32> to vector<8x512xf32>
    %c0_57 = arith.constant 0 : index
    %c0_58 = arith.constant 0 : index
    %109 = vector.load %arg13[%c0_57, %c0_58] : memref<1024x256xbf16, #tpu.memory_space<vmem>>, vector<512x256xbf16>
    %110 = arith.truncf %108 : vector<8x512xf32> to vector<8x512xbf16>
    %cst_59 = arith.constant dense<0.000000e+00> : vector<8x256xf32>
    %111 = tpu.matmul %110, %109, %cst_59 {dimension_numbers = #tpu.dot_dimension_numbers<[1], [0], [0], [1], [0, 0, 1, 1], [], []>} : vector<8x512xbf16>, vector<512x256xbf16>, vector<8x256xf32> -> vector<8x256xf32>
    %112 = vector.extract_strided_slice %105 {offsets = [0, 512], sizes = [8, 512], strides = [1, 1]} : vector<8x1024xf32> to vector<8x512xf32>
    %c512 = arith.constant 512 : index
    %c0_60 = arith.constant 0 : index
    %113 = vector.load %arg13[%c512, %c0_60] : memref<1024x256xbf16, #tpu.memory_space<vmem>>, vector<512x256xbf16>
    %114 = arith.truncf %112 : vector<8x512xf32> to vector<8x512xbf16>
    %cst_61 = arith.constant dense<0.000000e+00> : vector<8x256xf32>
    %115 = tpu.matmul %114, %113, %cst_61 {dimension_numbers = #tpu.dot_dimension_numbers<[1], [0], [0], [1], [0, 0, 1, 1], [], []>} : vector<8x512xbf16>, vector<512x256xbf16>, vector<8x256xf32> -> vector<8x256xf32>
    %116 = tpu.concatenate %111, %115 in 1 : vector<8x256xf32>, vector<8x256xf32> -> vector<8x512xf32>
    %c6 = arith.constant 6 : index
    %c0_62 = arith.constant 0 : index
    %117 = vector.load %arg4[%c6, %c0_62] : memref<8x1024xf32, #tpu.memory_space<vmem>>, vector<1x512xf32>
    %118 = vector.broadcast %117 : vector<1x512xf32> to vector<8x512xf32>
    %119 = arith.addf %116, %118 : vector<8x512xf32>
    %120 = arith.negf %119 : vector<8x512xf32>
    %121 = math.exp %120 : vector<8x512xf32>
    %cst_63 = arith.constant 1.000000e+00 : f32
    %122 = vector.broadcast %cst_63 : f32 to vector<8x512xf32>
    %123 = arith.addf %122, %121 : vector<8x512xf32>
    %124 = arith.divf %122, %123 : vector<8x512xf32>
    %125 = arith.mulf %119, %124 : vector<8x512xf32>
    %c0_64 = arith.constant 0 : index
    %c0_65 = arith.constant 0 : index
    %126 = vector.load %arg3[%c0_64, %c0_65] : memref<512x8xbf16, #tpu.memory_space<vmem>>, vector<512x8xbf16>
    %127 = arith.truncf %125 : vector<8x512xf32> to vector<8x512xbf16>
    %cst_66 = arith.constant dense<0.000000e+00> : vector<8x8xf32>
    %128 = tpu.matmul %127, %126, %cst_66 {dimension_numbers = #tpu.dot_dimension_numbers<[1], [0], [0], [1], [0, 0, 1, 1], [], []>} : vector<8x512xbf16>, vector<512x8xbf16>, vector<8x8xf32> -> vector<8x8xf32>
    %c7 = arith.constant 7 : index
    %c0_67 = arith.constant 0 : index
    %129 = vector.load %arg4[%c7, %c0_67] : memref<8x1024xf32, #tpu.memory_space<vmem>>, vector<1x8xf32>
    %130 = vector.broadcast %129 : vector<1x8xf32> to vector<8x8xf32>
    %131 = arith.addf %128, %130 : vector<8x8xf32>
    %132 = tpu.iota {dimensions = array<i32: 1>} : vector<8x8xi32>
    %c4_i32_68 = arith.constant 4 : i32
    %133 = vector.broadcast %c4_i32_68 : i32 to vector<8x8xi32>
    %134 = arith.cmpi slt, %132, %133 : vector<8x8xi32>
    %cst_69 = arith.constant 0.000000e+00 : f32
    %135 = vector.broadcast %cst_69 : f32 to vector<8x8xf32>
    %136 = arith.select %134, %131, %135 : vector<8x8xi1>, vector<8x8xf32>
    %cst_70 = arith.constant dense<0.000000e+00> : vector<8xf32>
    %137 = vector.multi_reduction <add>, %136, %cst_70 [1] : vector<8x8xf32> to vector<8xf32>
    %138 = vector.shape_cast %137 : vector<8xf32> to vector<8x1xf32>
    %cst_71 = arith.constant 2.500000e-01 : f32
    %139 = vector.broadcast %cst_71 : f32 to vector<8x1xf32>
    %140 = arith.mulf %138, %139 : vector<8x1xf32>
    %c4_i32_72 = arith.constant 4 : i32
    %141 = vector.broadcast %c4_i32_72 : i32 to vector<8x8xi32>
    %142 = arith.cmpi eq, %132, %141 : vector<8x8xi32>
    %cst_73 = arith.constant 0.000000e+00 : f32
    %143 = vector.broadcast %cst_73 : f32 to vector<8x8xf32>
    %144 = arith.select %142, %131, %143 : vector<8x8xi1>, vector<8x8xf32>
    %cst_74 = arith.constant dense<0.000000e+00> : vector<8xf32>
    %145 = vector.multi_reduction <add>, %144, %cst_74 [1] : vector<8x8xf32> to vector<8xf32>
    %146 = vector.shape_cast %145 : vector<8xf32> to vector<8x1xf32>
    %147 = vector.broadcast %146 : vector<8x1xf32> to vector<8x8xf32>
    %148 = arith.addf %131, %147 : vector<8x8xf32>
    %149 = vector.broadcast %140 : vector<8x1xf32> to vector<8x8xf32>
    %150 = arith.subf %148, %149 : vector<8x8xf32>
    %cst_75 = arith.constant 0.000000e+00 : f32
    %151 = vector.broadcast %cst_75 : f32 to vector<8x8xf32>
    %152 = arith.select %134, %150, %151 : vector<8x8xi1>, vector<8x8xf32>
    %c0_76 = arith.constant 0 : index
    %c0_77 = arith.constant 0 : index
    %153 = vector.load %arg10[%c0_76, %c0_77] : memref<8x8xf32, #tpu.memory_space<vmem>>, vector<8x8xf32>
    tpu.vector_store %arg10[%c0_76, %c0_77], %152 {strides = array<i32>} : memref<8x8xf32, #tpu.memory_space<vmem>>, vector<8x8xf32>,
    return
  }
}

</mosaic_0001>

<bundles_post_ra>
// kernel: tpu_custom_call.1
= control target key start
LH: loop header
LB: loop body
LE: loop exit
PB: predicated region body
PF: predicated region fallthrough
CT: control target
= control target key end

     0   :  { %15 = vsyncpa [#allocation7], 0  ;;  %s7778_s0 = inlined_call_operand.hbm [shape: f32[8,8], index: 0, kind: input, shape index: {}]   ;;  %s7779_s1 = inlined_call_operand.hbm [shape: bf16[8,256], index: 1, kind: input, shape index: {}]   ;;  %s7780_s2 = inlined_call_operand.hbm [shape: bf16[256,512], index: 2, kind: input, shape index: {}]   ;;  %s7781_s3 = inlined_call_operand.vmem [shape: bf16[512,8], index: 3, kind: input, shape index: {}]   ;;  %s7782_s4 = inlined_call_operand.hbm [shape: f32[8,1024], index: 4, kind: input, shape index: {}]   ;;  %s7783_s5 = inlined_call_operand.hbm [shape: bf16[512,1024], index: 5, kind: input, shape index: {}]   ;;  %s7784_s6 = inlined_call_operand.hbm [shape: bf16[1024,1024], index: 6, kind: input, shape index: {}]   ;;  %s7785_s7 = inlined_call_operand.hbm [shape: bf16[1024,1024], index: 7, kind: input, shape index: {}]   ;;  %s7786_s8 = inlined_call_operand.hbm [shape: bf16[1024,1024], index: 8, kind: input, shape index: {}]   ;;  %s7787_s9 = inlined_call_operand.hbm [shape: bf16[1024,256], index: 9, kind: input, shape index: {}]   ;;  %s7788_s10 = inlined_call_operand.hbm [shape: f32[8,8], index: 10, kind: output, shape index: {}]  }
   0x1   :  { %16 = vsyncpa [#allocation10], 0 }
   0x2   :  { %17 = vsyncpa [#allocation13], 0 }
   0x3   :  { %18 = vsyncpa [#allocation8], 0  ;;  %s7004_s13 = smov [#allocation9]   ;;  %s7005_s15 = smov [#allocation6]  }
   0x4   :  { %s35_s14 = sshll.u32 %s7004_s13, 4  ;;  %s25_s16 = sshll.u32 %s7005_s15, 4  ;;  %s36_s14 = int_to_ptr.vmem [resolvable:$true] %s35_s14  ;;  %s26_s16 = int_to_ptr.vmem [resolvable:$true] %s25_s16 }
   0x5   :  { %s6876_s19 = scalar_lea.hbm %s7779_s1, 128 }
   0x6   :  { %p6877_p0 = scmp.ne.s32.totalorder %s7779_s1, %s6876_s19  ;;  %p6880_p1 = scmp.lt.u32.totalorder %s6876_s19, %s7779_s1 }
   0x8   :  { %p6882_p2 = pnand %p6880_p1, %p6877_p0 }
   0xa   :  { %6885 = shalt.err (!%p6882_p2)
}
   0xb   :  { %s6886_s24 = scalar_lea.vmem %s36_s14, 128  ;;  %p6891_p4 = scmp.lt.s32.totalorder %s36_s14, %s36_s14 }
   0xc   :  { %p6887_p3 = scmp.ne.s32.totalorder %s36_s14, %s6886_s24  ;;  %p6892_p5 = scmp.lt.s32.totalorder %s6886_s24, %s6886_s24 }
   0xe   :  { %p6893_p6 = por %p6892_p5, %p6891_p4 }
  0x10   :  { %p6894_p7 = pnand %p6893_p6, %p6887_p3 }
  0x12   :  { %6897 = shalt.err (!%p6894_p7)
}
  0x13   :  { %38 = dma.hbm_to_vmem [thread:$0]  %s7779_s1, 128, %s36_s14, [#allocation10]  }
  0x14   :  { %s6898_s29 = scalar_lea.hbm %s7778_s0, 128 }
  0x15   :  { %p6899_p8 = scmp.ne.s32.totalorder %s7778_s0, %s6898_s29  ;;  %p6902_p9 = scmp.lt.u32.totalorder %s6898_s29, %s7778_s0 }
  0x17   :  { %p6904_p10 = pnand %p6902_p9, %p6899_p8 }
  0x19   :  { %6907 = shalt.err (!%p6904_p10)
}
  0x1a   :  { %s6908_s15 = scalar_lea.vmem %s26_s16, 128  ;;  %p6913_p12 = scmp.lt.s32.totalorder %s26_s16, %s26_s16 }
  0x1b   :  { %p6909_p11 = scmp.ne.s32.totalorder %s26_s16, %s6908_s15  ;;  %p6914_p13 = scmp.lt.s32.totalorder %s6908_s15, %s6908_s15 }
  0x1d   :  { %p6915_p0 = por %p6914_p13, %p6913_p12 }
  0x1f   :  { %p6916_p1 = pnand %p6915_p0, %p6909_p11 }
  0x21   :  { %6919 = shalt.err (!%p6916_p1)
}
  0x22   :  { %28 = dma.hbm_to_vmem [thread:$0]  %s7778_s0, 128, %s26_s16, [#allocation7]  }
  0x23   :  { %s7006_s17 = smov [#allocation11]   ;;  %s6920_s21 = scalar_lea.hbm %s7780_s2, 8192 }
  0x24   :  { %s44_s18 = sshll.u32 %s7006_s17, 4  ;;  %p6921_p2 = scmp.ne.s32.totalorder %s7780_s2, %s6920_s21  ;;  %s45_s18 = int_to_ptr.vmem [resolvable:$true] %s44_s18 }
  0x25   :  { %p6924_p3 = scmp.lt.u32.totalorder %s6920_s21, %s7780_s2 }
  0x27   :  { %p6926_p4 = pnand %p6924_p3, %p6921_p2 }
  0x29   :  { %6929 = shalt.err (!%p6926_p4)
}
  0x2a   :  { %s6930_s26 = scalar_lea.vmem %s45_s18, 8192  ;;  %p6935_p6 = scmp.lt.s32.totalorder %s45_s18, %s45_s18 }
  0x2b   :  { %p6931_p5 = scmp.ne.s32.totalorder %s45_s18, %s6930_s26  ;;  %p6936_p7 = scmp.lt.s32.totalorder %s6930_s26, %s6930_s26 }
  0x2d   :  { %p6937_p8 = por %p6936_p7, %p6935_p6 }
  0x2f   :  { %p6938_p9 = pnand %p6937_p8, %p6931_p5 }
  0x31   :  { %6941 = shalt.err (!%p6938_p9)
}
  0x32   :  { %s7007_s0 = smov 256   ;;  %s7008_s16 = smov 16  }
  0x33   :  { %50 = dma.hbm_to_vmem [thread:$0]  %s7780_s2, 8192, %s45_s18, [#allocation10], %s7007_s0, %s7007_s0, %s7008_s16  }
  0x34   :  { %s7009_s29 = smov [#allocation12]   ;;  %s6942_s13 = scalar_lea.hbm %s7782_s4, 1024 }
  0x35   :  { %s59_s30 = sshll.u32 %s7009_s29, 4  ;;  %p6943_p10 = scmp.ne.s32.totalorder %s7782_s4, %s6942_s13  ;;  %s60_s30 = int_to_ptr.vmem [resolvable:$true] %s59_s30 }
  0x36   :  { %p6946_p11 = scmp.lt.u32.totalorder %s6942_s13, %s7782_s4 }
  0x38   :  { %p6948_p12 = pnand %p6946_p11, %p6943_p10 }
  0x3a   :  { %6951 = shalt.err (!%p6948_p12)
}
  0x3b   :  { %s6952_s19 = scalar_lea.vmem %s60_s30, 1024  ;;  %p6957_p0 = scmp.lt.s32.totalorder %s60_s30, %s60_s30 }
  0x3c   :  { %p6953_p13 = scmp.ne.s32.totalorder %s60_s30, %s6952_s19  ;;  %p6958_p1 = scmp.lt.s32.totalorder %s6952_s19, %s6952_s19 }
  0x3e   :  { %p6959_p2 = por %p6958_p1, %p6957_p0 }
  0x40   :  { %p6960_p3 = pnand %p6959_p2, %p6953_p13 }
  0x42   :  { %6963 = shalt.err (!%p6960_p3)
}
  0x43   :  { %62 = dma.hbm_to_vmem [thread:$0]  %s7782_s4, 1024, %s60_s30, [#allocation13]  }
  0x44   :  { %6986 = dma.done.wait [#allocation7], 128  }
  0x45   :  { %6987 = vsyncadd [#allocation7], 4294967168 }
  0x46   :  { %6988 = dma.done.wait [#allocation10], 8320  }
  0x47   :  { %6989 = vsyncadd [#allocation10], 4294958976 }
  0x48   :  { %6990 = dma.done.wait [#allocation13], 1024  }
  0x49   :  { %6991 = vsyncadd [#allocation13], 4294966272  ;;  %s80_s20 = sld [smem:[#allocation0]]   ;;  %s7010_s21 = smov 64   ;;  %v7011_v0 = vmov 0   ;;  %vm205_vm0 = vcmask 1043456  }
  0x4a   :  { %98 = sst [smem:[#allocation16 + $0x3]] %s7010_s21  ;;  %244 = vmatprep.mubr.bf16.mxu0 %v7011_v0  ;;  %s7012_s22 = smov [#allocation2]   ;;  %vm201_vm1 = vcmask 64512  }
  0x4b   :  { %106 = sst [smem:[#allocation16 + $0x7]] %s7010_s21  ;;  %s88_s23 = sshll.u32 %s7012_s22, 4  ;;  %s89_s23 = int_to_ptr.vmem [resolvable:$true] %s88_s23 }
  0x4c   :  { %s7013_s24 = smov 1024   ;;  %s7014_s4 = smov 8  }
  0x4d   :  { %92 = sst [smem:[#allocation16]] %s7013_s24  ;;  %s7015_s26 = smov 128  }
  0x4e   :  { %94 = sst [smem:[#allocation16 + $0x1]] %s7013_s24  ;;  %s7016_s27 = smov 2  }
  0x4f   :  { %96 = sst [smem:[#allocation16 + $0x2]] %s7014_s4  ;;  %s6156_s25 = sshll.u32 %s80_s20, 26 }
  0x50   :  { %100 = sst [smem:[#allocation16 + $0x4]] %s7015_s26  ;;  %s7144_s16 = sadd.s32 134217728, %s6156_s25 }
  0x51   :  { %102 = sst [smem:[#allocation16 + $0x5]] %s7016_s27  ;;  %s7017_s28 = smov 512  }
  0x52   :  { %104 = sst [smem:[#allocation16 + $0x6]] %s7017_s28  ;;  %s7018_s29 = smov 4  }
  0x53   :  { %108 = sst [smem:[#allocation16 + $0x8]] %s7018_s29  ;;  %s7019_s30 = smov [#allocation5]  }
  0x54   :  { %s7020_s11 = smov [#allocation15]   ;;  %s7021_s15 = smov [#allocation3]  }
  0x55   :  { %110 = dma.general %s7783_s5, 32768, %s89_s23, %s7019_s30, %s7020_s11, [#allocation16], %s7144_s16, 0  }
  0x56   :  { %127 = sst [smem:[#allocation18]] %s7013_s24  ;;  %s7155_s1 = sshll.u32 %s7021_s15, 4  ;;  %s124_s1 = int_to_ptr.vmem [resolvable:$true] %s7155_s1 }
  0x57   :  { %129 = sst [smem:[#allocation18 + $0x1]] %s7013_s24  ;;  %s7022_s5 = smov [#allocation5 + $0x1]  }
  0x58   :  { %131 = sst [smem:[#allocation18 + $0x2]] %s7014_s4  ;;  %s7023_s14 = smov [#allocation17]  }
  0x59   :  { %133 = sst [smem:[#allocation18 + $0x3]] %s7010_s21  ;;  %s7024_s2 = smov [#allocation4]  }
  0x5a   :  { %135 = sst [smem:[#allocation18 + $0x4]] %s7015_s26  ;;  %s158_s18 = sshll.u32 %s7024_s2, 4  ;;  %s159_s18 = int_to_ptr.vmem [resolvable:$true] %s158_s18 }
  0x5b   :  { %137 = sst [smem:[#allocation18 + $0x5]] %s7016_s27  ;;  %s7026_s20 = smov [#allocation19]  }
  0x5c   :  { %139 = sst [smem:[#allocation18 + $0x6]] %s7017_s28 }
  0x5d   :  { %141 = sst [smem:[#allocation18 + $0x7]] %s7010_s21 }
  0x5e   :  { %143 = sst [smem:[#allocation18 + $0x8]] %s7018_s29 }
  0x5f   :  { %145 = dma.general %s7784_s6, 65536, %s124_s1, %s7022_s5, %s7023_s14, [#allocation18], %s7144_s16, 0  }
  0x60   :  { %162 = sst [smem:[#allocation20]] %s7007_s0  ;;  %s7025_s6 = smov [#allocation5 + $0x4]  }
  0x61   :  { %164 = sst [smem:[#allocation20 + $0x1]] %s7007_s0 }
  0x62   :  { %166 = sst [smem:[#allocation20 + $0x2]] %s7016_s27 }
  0x63   :  { %168 = sst [smem:[#allocation20 + $0x3]] %s7010_s21 }
  0x64   :  { %170 = sst [smem:[#allocation20 + $0x4]] %s7015_s26 }
  0x65   :  { %172 = sst [smem:[#allocation20 + $0x5]] %s7016_s27 }
  0x66   :  { %174 = sst [smem:[#allocation20 + $0x6]] %s7015_s26 }
  0x67   :  { %176 = sst [smem:[#allocation20 + $0x7]] %s7010_s21 }
  0x68   :  { %178 = sst [smem:[#allocation20 + $0x8]] %s7018_s29 }
  0x69   :  { %180 = dma.general %s7787_s9, 16384, %s159_s18, %s7025_s6, %s7026_s20, [#allocation20], %s7144_s16, 0  }
  0x6a   :  { %v182_v1 = vld [vmem:[#allocation9] sm:$0xff]  ;;  %v181_v2 = vld [vmem:[#allocation6] sm:$0xff] }
  0x6b   :  { %v6163_v3 = vcombine.high %v182_v1, %v182_v1  ;;  %v6162_v4 = vcombine.low %v182_v1, %v182_v1  ;;  %v6580_v5 = vld [vmem:[#allocation11 + $0x4] ss:$16 sps:$4 sm:$0xff]   ;;  %v6582_v6 = vld [vmem:[#allocation11 + $0x8] ss:$16 sps:$4 sm:$0xff]   ;;  %v6584_v7 = vld [vmem:[#allocation11 + $0xc] ss:$16 sps:$4 sm:$0xff]   ;;  %v183_v9 = vpack.c.bf16 %v181_v2, %v181_v2 }
  0x6c   :  { %676 = vmatprep.subr.bf16.mxu1 %v6580_v5  ;;  %v6585_v10 = vld [vmem:[#allocation11] ss:$16 sps:$4 sm:$0xff]   ;;  %v6586_v11 = vld [vmem:[#allocation11 + $0x24] ss:$16 sps:$4 sm:$0xff]   ;;  %v6590_v12 = vld [vmem:[#allocation11 + $0x2c] ss:$16 sps:$4 sm:$0xff]  }
  0x6d   :  { %6164 = vmatprep.subr.msk.bf16.mxu0 %vm205_vm0, %v6163_v3  ;;  %v207_v8 = vsel %vm205_vm0, %v6162_v4, 0  ;;  %677 = vmatpush1.bf16.msra.mxu1 %v6585_v10  ;;  %v6591_v13 = vld [vmem:[#allocation11 + $0x20] ss:$16 sps:$4 sm:$0xff]   ;;  %v6592_v14 = vld [vmem:[#allocation11 + $0x44] ss:$16 sps:$4 sm:$0xff]  }
  0x6e   :  { %213 = vmatpush1.bf16.msra.mxu0 %v207_v8  ;;  %678 = vmatprep.subr.bf16.mxu1 %v6586_v11  ;;  %v6588_v15 = vld [vmem:[#allocation11 + $0x28] ss:$16 sps:$4 sm:$0xff]   ;;  %v6596_v16 = vld [vmem:[#allocation11 + $0x4c] ss:$16 sps:$4 sm:$0xff]   ;;  %v6597_v17 = vld [vmem:[#allocation11 + $0x40] ss:$16 sps:$4 sm:$0xff]  }
  0x6f   :  { %717 = vmatprep.subr.bf16.mxu0 %v6584_v7  ;;  %v6598_v18 = vld [vmem:[#allocation11 + $0x64] ss:$16 sps:$4 sm:$0xff]   ;;  %v6594_v19 = vld [vmem:[#allocation11 + $0x48] ss:$16 sps:$4 sm:$0xff]   ;;  %v6602_v20 = vld [vmem:[#allocation11 + $0x6c] ss:$16 sps:$4 sm:$0xff]   ;;  %v186_v7 = vlaneseq }
  0x70   :  { %v6603_v21 = vld [vmem:[#allocation11 + $0x60] ss:$16 sps:$4 sm:$0xff]   ;;  %v6604_v22 = vld [vmem:[#allocation11 + $0x84] ss:$16 sps:$4 sm:$0xff]   ;;  %v6600_v23 = vld [vmem:[#allocation11 + $0x68] ss:$16 sps:$4 sm:$0xff]  }
  0x71   :  { %6165 = vmatmul.mubr.msk.bf16.vlgmr.msra.gmra.mrb[0].mxu0 %vm201_vm1, %v183_v9  ;;  %679 = vmatpush1.bf16.msra.mxu1 %v6591_v13  ;;  %v6608_v24 = vld [vmem:[#allocation11 + $0x8c] ss:$16 sps:$4 sm:$0xff]   ;;  %v6609_v25 = vld [vmem:[#allocation11 + $0x80] ss:$16 sps:$4 sm:$0xff]   ;;  %v6610_v26 = vld [vmem:[#allocation11 + $0xa4] ss:$16 sps:$4 sm:$0xff]  }
  0x72   :  { %718 = vmatpush1.bf16.msra.mxu0 %v6582_v6  ;;  %680 = vmatprep.subr.bf16.mxu1 %v6592_v14  ;;  %v6606_v27 = vld [vmem:[#allocation11 + $0x88] ss:$16 sps:$4 sm:$0xff]   ;;  %v6614_v28 = vld [vmem:[#allocation11 + $0xac] ss:$16 sps:$4 sm:$0xff]   ;;  %v6615_v29 = vld [vmem:[#allocation11 + $0xa0] ss:$16 sps:$4 sm:$0xff]  }
  0x73   :  { %719 = vmatprep.subr.bf16.mxu0 %v6590_v12  ;;  %v6612_v30 = vld [vmem:[#allocation11 + $0xa8] ss:$16 sps:$4 sm:$0xff]   ;;  %v6616_v31 = vld [vmem:[#allocation11 + $0xc4] ss:$16 sps:$4 sm:$0xff]   ;;  %v6620_v32 = vld [vmem:[#allocation11 + $0xcc] ss:$16 sps:$4 sm:$0xff]  }
  0x74   :  { %v6621_v33 = vld [vmem:[#allocation11 + $0xc0] ss:$16 sps:$4 sm:$0xff]   ;;  %v6622_v34 = vld [vmem:[#allocation11 + $0xe4] ss:$16 sps:$4 sm:$0xff]   ;;  %v6618_v35 = vld [vmem:[#allocation11 + $0xc8] ss:$16 sps:$4 sm:$0xff]  }
  0x75   :  { %681 = vmatpush1.bf16.msra.mxu1 %v6597_v17  ;;  %v6626_v36 = vld [vmem:[#allocation11 + $0xec] ss:$16 sps:$4 sm:$0xff]   ;;  %v6624_v37 = vld [vmem:[#allocation11 + $0xe8] ss:$16 sps:$4 sm:$0xff]   ;;  %v6627_v38 = vld [vmem:[#allocation11 + $0xe0] ss:$16 sps:$4 sm:$0xff]  }
  0x76   :  { %720 = vmatpush1.bf16.msra.mxu0 %v6588_v15  ;;  %682 = vmatprep.subr.bf16.mxu1 %v6598_v18  ;;  %v6628_v39 = vld [vmem:[#allocation11 + $0x104] ss:$16 sps:$4 sm:$0xff]   ;;  %v6632_v40 = vld [vmem:[#allocation11 + $0x10c] ss:$16 sps:$4 sm:$0xff]   ;;  %v6630_v41 = vld [vmem:[#allocation11 + $0x108] ss:$16 sps:$4 sm:$0xff]  }
  0x77   :  { %721 = vmatprep.subr.bf16.mxu0 %v6596_v16  ;;  %v6633_v42 = vld [vmem:[#allocation11 + $0x100] ss:$16 sps:$4 sm:$0xff]   ;;  %v6634_v43 = vld [vmem:[#allocation11 + $0x124] ss:$16 sps:$4 sm:$0xff]   ;;  %v6638_v44 = vld [vmem:[#allocation11 + $0x12c] ss:$16 sps:$4 sm:$0xff]  }
  0x78   :  { %v6636_v45 = vld [vmem:[#allocation11 + $0x128] ss:$16 sps:$4 sm:$0xff]   ;;  %v6639_v46 = vld [vmem:[#allocation11 + $0x120] ss:$16 sps:$4 sm:$0xff]   ;;  %v6640_v47 = vld [vmem:[#allocation11 + $0x144] ss:$16 sps:$4 sm:$0xff]  }
  0x79   :  { %683 = vmatpush1.bf16.msra.mxu1 %v6603_v21  ;;  %v6644_v48 = vld [vmem:[#allocation11 + $0x14c] ss:$16 sps:$4 sm:$0xff]   ;;  %v6642_v49 = vld [vmem:[#allocation11 + $0x148] ss:$16 sps:$4 sm:$0xff]   ;;  %v6645_v50 = vld [vmem:[#allocation11 + $0x140] ss:$16 sps:$4 sm:$0xff]  }
  0x7a   :  { %722 = vmatpush1.bf16.msra.mxu0 %v6594_v19  ;;  %684 = vmatprep.subr.bf16.mxu1 %v6604_v22  ;;  %v6646_v51 = vld [vmem:[#allocation11 + $0x164] ss:$16 sps:$4 sm:$0xff]   ;;  %v6650_v52 = vld [vmem:[#allocation11 + $0x16c] ss:$16 sps:$4 sm:$0xff]   ;;  %v6648_v53 = vld [vmem:[#allocation11 + $0x168] ss:$16 sps:$4 sm:$0xff]  }
  0x7b   :  { %723 = vmatprep.subr.bf16.mxu0 %v6602_v20  ;;  %v6651_v54 = vld [vmem:[#allocation11 + $0x160] ss:$16 sps:$4 sm:$0xff]   ;;  %v6652_v55 = vld [vmem:[#allocation11 + $0x184] ss:$16 sps:$4 sm:$0xff]   ;;  %v6656_v56 = vld [vmem:[#allocation11 + $0x18c] ss:$16 sps:$4 sm:$0xff]  }
  0x7c   :  { %v6654_v57 = vld [vmem:[#allocation11 + $0x188] ss:$16 sps:$4 sm:$0xff]   ;;  %v6657_v58 = vld [vmem:[#allocation11 + $0x180] ss:$16 sps:$4 sm:$0xff]   ;;  %v6658_v59 = vld [vmem:[#allocation11 + $0x1a4] ss:$16 sps:$4 sm:$0xff]  }
  0x7d   :  { %685 = vmatpush1.bf16.msra.mxu1 %v6609_v25  ;;  %v6662_v60 = vld [vmem:[#allocation11 + $0x1ac] ss:$16 sps:$4 sm:$0xff]   ;;  %v6660_v61 = vld [vmem:[#allocation11 + $0x1a8] ss:$16 sps:$4 sm:$0xff]   ;;  %v6663_v62 = vld [vmem:[#allocation11 + $0x1a0] ss:$16 sps:$4 sm:$0xff]  }
  0x7e   :  { %724 = vmatpush1.bf16.msra.mxu0 %v6600_v23  ;;  %686 = vmatprep.subr.bf16.mxu1 %v6610_v26  ;;  %v6664_v63 = vld [vmem:[#allocation11 + $0x1c4] ss:$16 sps:$4 sm:$0xff]   ;;  %v6668_v0 = vld [vmem:[#allocation11 + $0x1cc] ss:$16 sps:$4 sm:$0xff]   ;;  %v6666_v1 = vld [vmem:[#allocation11 + $0x1c8] ss:$16 sps:$4 sm:$0xff]  }
  0x7f   :  { %725 = vmatprep.subr.bf16.mxu0 %v6608_v24  ;;  %v6669_v2 = vld [vmem:[#allocation11 + $0x1c0] ss:$16 sps:$4 sm:$0xff]   ;;  %v6670_v3 = vld [vmem:[#allocation11 + $0x1e4] ss:$16 sps:$4 sm:$0xff]   ;;  %v6674_v4 = vld [vmem:[#allocation11 + $0x1ec] ss:$16 sps:$4 sm:$0xff]  }
  0x80   :  { %v6672_v5 = vld [vmem:[#allocation11 + $0x1e8] ss:$16 sps:$4 sm:$0xff]   ;;  %v6675_v6 = vld [vmem:[#allocation11 + $0x1e0] ss:$16 sps:$4 sm:$0xff]   ;;  %v7186_v8 = vshrl.u32 %v186_v7, 7 }
  0x81   :  { %687 = vmatpush1.bf16.msra.mxu1 %v6615_v29  ;;  %v184_v10 = vld [vmem:[#allocation12] ss:$8 sm:$0x3] }
  0x82   :  { %726 = vmatpush1.bf16.msra.mxu0 %v6606_v27  ;;  %688 = vmatprep.subr.bf16.mxu1 %v6616_v31  ;;  %v7189_v9 = vsub.s32 0, %v7186_v8  ;;  %v7192_v11 = vsub.s32 1, %v7186_v8 }
  0x83   :  { %727 = vmatprep.subr.bf16.mxu0 %v6614_v28 }
  0x84   :  { %v189_v12 = vrot.slane %v184_v10, %v7189_v9  ;;  %v193_v13 = vrot.slane %v184_v10, %v7192_v11 }
  0x85   :  { %689 = vmatpush1.bf16.msra.mxu1 %v6621_v33  ;;  %v334_v33 = vld [vmem:[#allocation12 + $0x1] ss:$8 sm:$0xf] }
  0x86   :  { %728 = vmatpush1.bf16.msra.mxu0 %v6612_v30  ;;  %690 = vmatprep.subr.bf16.mxu1 %v6622_v34  ;;  %v7200_v34 = vsub.s32 3, %v7186_v8 }
  0x87   :  { %729 = vmatprep.subr.bf16.mxu0 %v6620_v32  ;;  %v7197_v32 = vsub.s32 2, %v7186_v8 }
  0x89   :  { %691 = vmatpush1.bf16.msra.mxu1 %v6627_v38  ;;  %v351_v38 = vrot.slane %v334_v33, %v7200_v34 }
  0x8a   :  { %730 = vmatpush1.bf16.msra.mxu0 %v6618_v35  ;;  %692 = vmatprep.subr.bf16.mxu1 %v6628_v39  ;;  %v339_v35 = vrot.slane %v334_v33, %v7189_v9 }
  0x8b   :  { %731 = vmatprep.subr.bf16.mxu0 %v6626_v36  ;;  %v347_v36 = vrot.slane %v334_v33, %v7197_v32 }
  0x8d   :  { %693 = vmatpush1.bf16.msra.mxu1 %v6633_v42 }
  0x8e   :  { %732 = vmatpush1.bf16.msra.mxu0 %v6624_v37  ;;  %694 = vmatprep.subr.bf16.mxu1 %v6634_v43  ;;  %v343_v37 = vrot.slane %v334_v33, %v7192_v11 }
  0x8f   :  { %733 = vmatprep.subr.bf16.mxu0 %v6632_v40 }
  0x91   :  { %695 = vmatpush1.bf16.msra.mxu1 %v6639_v46 }
  0x92   :  { %734 = vmatpush1.bf16.msra.mxu0 %v6630_v41  ;;  %696 = vmatprep.subr.bf16.mxu1 %v6640_v47 }
  0x93   :  { %735 = vmatprep.subr.bf16.mxu0 %v6638_v44 }
  0x95   :  { %697 = vmatpush1.bf16.msra.mxu1 %v6645_v50 }
  0x96   :  { %736 = vmatpush1.bf16.msra.mxu0 %v6636_v45  ;;  %698 = vmatprep.subr.bf16.mxu1 %v6646_v51 }
  0x97   :  { %737 = vmatprep.subr.bf16.mxu0 %v6644_v48 }
  0x99   :  { %699 = vmatpush1.bf16.msra.mxu1 %v6651_v54 }
  0x9a   :  { %738 = vmatpush1.bf16.msra.mxu0 %v6642_v49  ;;  %700 = vmatprep.subr.bf16.mxu1 %v6652_v55 }
  0x9b   :  { %739 = vmatprep.subr.bf16.mxu0 %v6650_v52 }
  0x9d   :  { %701 = vmatpush1.bf16.msra.mxu1 %v6657_v58 }
  0x9e   :  { %740 = vmatpush1.bf16.msra.mxu0 %v6648_v53  ;;  %702 = vmatprep.subr.bf16.mxu1 %v6658_v59 }
  0x9f   :  { %741 = vmatprep.subr.bf16.mxu0 %v6656_v56 }
  0xa1   :  { %703 = vmatpush1.bf16.msra.mxu1 %v6663_v62 }
  0xa2   :  { %742 = vmatpush1.bf16.msra.mxu0 %v6654_v57  ;;  %704 = vmatprep.subr.bf16.mxu1 %v6664_v63 }
  0xa3   :  { %743 = vmatprep.subr.bf16.mxu0 %v6662_v60 }
  0xa5   :  { %705 = vmatpush1.bf16.msra.mxu1 %v6669_v2 }
  0xa6   :  { %744 = vmatpush1.bf16.msra.mxu0 %v6660_v61  ;;  %706 = vmatprep.subr.bf16.mxu1 %v6670_v3 }
  0xa7   :  { %745 = vmatprep.subr.bf16.mxu0 %v6668_v0 }
  0xa9   :  { %707 = vmatpush1.bf16.msra.mxu1 %v6675_v6 }
  0xaa   :  { %746 = vmatpush1.bf16.msra.mxu0 %v6666_v1 }
  0xab   :  { %747 = vmatprep.subr.bf16.mxu0 %v6674_v4 }
  0xae   :  { %748 = vmatpush1.bf16.msra.mxu0 %v6672_v5 }
 0x144   :  { %v246_v14 = vpop.f32.mrb[0].mxu0 }
 0x145   :  { %v247_v15 = vadd.f32 %v246_v14, %v189_v12  ;;  %v248_v16 = vpop.f32.mrb[1].mxu0 }
 0x146   :  { %v249_v17 = vadd.f32 %v248_v16, %v193_v13  ;;  %v250_v18 = vpop.f32.mrb[2].mxu0 }
 0x147   :  { %v6166_v19 = vmul.f32 -1.442695, %v247_v15  ;;  %v251_v20 = vpop.f32.mrb[3].mxu0 }
 0x148   :  { %v6167_v21 = vmul.f32 -1.442695, %v249_v17 }
 0x149   :  { %6676 = vpow2.f32 %v6166_v19 }
 0x14a   :  { %6678 = vpow2.f32 %v6167_v21 }
 0x153   :  { %v6677_v22 = vpop.eup %6676 }
 0x154   :  { %v6679_v23 = vpop.eup %6678  ;;  %v259_v24 = vadd.f32 1.0, %v6677_v22 }
 0x155   :  { %v260_v25 = vadd.f32 1.0, %v6679_v23 }
 0x156   :  { %6680 = vrcp.f32 %v259_v24 }
 0x157   :  { %6682 = vrcp.f32 %v260_v25 }
 0x160   :  { %v6681_v26 = vpop.eup %6680 }
 0x161   :  { %v6683_v27 = vpop.eup %6682  ;;  %v265_v28 = vmul.f32 %v6681_v26, %v247_v15 }
 0x162   :  { %v266_v29 = vmul.f32 %v6683_v27, %v249_v17 }
 0x163   :  { %v331_v31 = vpack.c.bf16 %v265_v28, %v265_v28 }
 0x164   :  { %v332_v30 = vpack.c.bf16 %v266_v29, %v266_v29 }
 0x166   :  { %708 = vmatprep.mubr.bf16.mxu1 %v332_v30  ;;  %749 = vmatprep.mubr.bf16.mxu0 %v332_v30 }
 0x167   :  { %709 = vmatmul.mubr.bf16.vlgmr.msra.gmra.mrb[0].mxu1 %v331_v31  ;;  %750 = vmatmul.mubr.bf16.vlgmr.msra.gmra.mrb[4].mxu0 %v331_v31 }
 0x23a   :  { %v710_v39 = vpop.f32.mrb[0].mxu1  ;;  %v751_v40 = vpop.f32.mrb[4].mxu0 }
 0x23b   :  { %v711_v41 = vadd.f32 %v710_v39, %v339_v35  ;;  %v752_v42 = vadd.f32 %v751_v40, %v347_v36  ;;  %v712_v43 = vpop.f32.mrb[1].mxu1  ;;  %v753_v44 = vpop.f32.mrb[5].mxu0 }
 0x23c   :  { %v713_v45 = vadd.f32 %v712_v43, %v343_v37  ;;  %v754_v46 = vadd.f32 %v753_v44, %v351_v38  ;;  %v714_v47 = vpop.f32.mrb[2].mxu1  ;;  %v755_v48 = vpop.f32.mrb[6].mxu0 }
 0x23d   :  { %v6232_v49 = vmul.f32 -1.442695, %v711_v41  ;;  %v6234_v50 = vmul.f32 -1.442695, %v752_v42  ;;  %v715_v51 = vpop.f32.mrb[3].mxu1  ;;  %v756_v52 = vpop.f32.mrb[7].mxu0 }
 0x23e   :  { %v6233_v53 = vmul.f32 -1.442695, %v713_v45  ;;  %v6235_v54 = vmul.f32 -1.442695, %v754_v46 }
 0x23f   :  { %6684 = vpow2.f32 %v6232_v49 }
 0x240   :  { %6686 = vpow2.f32 %v6234_v50 }
 0x241   :  { %6688 = vpow2.f32 %v6233_v53 }
 0x242   :  { %6690 = vpow2.f32 %v6235_v54 }
 0x249   :  { %v6685_v55 = vpop.eup %6684 }
 0x24a   :  { %v6687_v56 = vpop.eup %6686  ;;  %v770_v57 = vadd.f32 1.0, %v6685_v55 }
 0x24b   :  { %v6689_v58 = vpop.eup %6688  ;;  %v772_v59 = vadd.f32 1.0, %v6687_v56 }
 0x24c   :  { %v6691_v60 = vpop.eup %6690  ;;  %6692 = vrcp.f32 %v770_v57  ;;  %v771_v61 = vadd.f32 1.0, %v6689_v58 }
 0x24d   :  { %6694 = vrcp.f32 %v772_v59  ;;  %v773_v62 = vadd.f32 1.0, %v6691_v60 }
 0x24e   :  { %6696 = vrcp.f32 %v771_v61 }
 0x24f   :  { %6698 = vrcp.f32 %v773_v62 }
 0x256   :  { %v6693_v63 = vpop.eup %6692 }
 0x257   :  { %v6695_v0 = vpop.eup %6694  ;;  %v7206_v1 = vmul.f32 %v6693_v63, %v711_v41 }
 0x258   :  { %v6697_v2 = vpop.eup %6696  ;;  %v7208_v3 = vmul.f32 %v6695_v0, %v752_v42 }
 0x259   :  { %v6699_v4 = vpop.eup %6698  ;;  %v783_v5 = vmul.f32 %v6697_v2, %v713_v45 }
 0x25a   :  { %v7210_v6 = vmul.f32 %v6699_v4, %v754_v46 }
 0x25b   :  { %6992 = dma.done.wait [#allocation5], 32768 }
 0x25c   :  { %6993 = vsyncadd [#allocation5], 4294934528  ;;  %v7212_v10 = vpack.c.bf16 %v783_v5, %v783_v5  ;;  %v791_v12 = vld [vmem:[#allocation2 + $0x8] sm:$0xff]  ;;  %v793_v13 = vld [vmem:[#allocation2 + $0x18] sm:$0xff] }
 0x25d   :  { %v790_v14 = vld [vmem:[#allocation2] sm:$0xff]  ;;  %1095 = vmatprep.subr.bf16.mxu1 %v791_v12  ;;  %1177 = vmatprep.subr.bf16.mxu0 %v793_v13  ;;  %v792_v15 = vld [vmem:[#allocation2 + $0x10] sm:$0xff]  ;;  %v799_v16 = vld [vmem:[#allocation2 + $0x48] sm:$0xff] }
 0x25e   :  { %1127 = vmatprep.mubr.bf16.mxu1 %v7212_v10  ;;  %1209 = vmatprep.mubr.bf16.mxu0 %v7212_v10  ;;  %v801_v17 = vld [vmem:[#allocation2 + $0x58] sm:$0xff]  ;;  %v798_v18 = vld [vmem:[#allocation2 + $0x40] sm:$0xff]  ;;  %v800_v19 = vld [vmem:[#allocation2 + $0x50] sm:$0xff] }
 0x25f   :  { %1096 = vmatpush1.bf16.msra.mxu1 %v790_v14  ;;  %1178 = vmatpush1.bf16.msra.mxu0 %v792_v15  ;;  %v807_v20 = vld [vmem:[#allocation2 + $0x88] sm:$0xff]  ;;  %v809_v21 = vld [vmem:[#allocation2 + $0x98] sm:$0xff]  ;;  %v806_v22 = vld [vmem:[#allocation2 + $0x80] sm:$0xff] }
 0x260   :  { %1097 = vmatprep.subr.bf16.mxu1 %v799_v16  ;;  %1179 = vmatprep.subr.bf16.mxu0 %v801_v17  ;;  %v808_v23 = vld [vmem:[#allocation2 + $0x90] sm:$0xff]  ;;  %v815_v24 = vld [vmem:[#allocation2 + $0xc8] sm:$0xff]  ;;  %v817_v25 = vld [vmem:[#allocation2 + $0xd8] sm:$0xff] }
 0x261   :  { %v814_v26 = vld [vmem:[#allocation2 + $0xc0] sm:$0xff]  ;;  %v816_v27 = vld [vmem:[#allocation2 + $0xd0] sm:$0xff]  ;;  %v823_v28 = vld [vmem:[#allocation2 + $0x108] sm:$0xff] }
 0x262   :  { %v825_v29 = vld [vmem:[#allocation2 + $0x118] sm:$0xff]  ;;  %v822_v30 = vld [vmem:[#allocation2 + $0x100] sm:$0xff]  ;;  %v824_v31 = vld [vmem:[#allocation2 + $0x110] sm:$0xff] }
 0x263   :  { %1098 = vmatpush1.bf16.msra.mxu1 %v798_v18  ;;  %1180 = vmatpush1.bf16.msra.mxu0 %v800_v19  ;;  %v831_v33 = vld [vmem:[#allocation2 + $0x148] sm:$0xff]  ;;  %v833_v35 = vld [vmem:[#allocation2 + $0x158] sm:$0xff]  ;;  %v830_v36 = vld [vmem:[#allocation2 + $0x140] sm:$0xff] }
 0x264   :  { %1099 = vmatprep.subr.bf16.mxu1 %v807_v20  ;;  %1181 = vmatprep.subr.bf16.mxu0 %v809_v21  ;;  %v832_v37 = vld [vmem:[#allocation2 + $0x150] sm:$0xff]  ;;  %v839_v38 = vld [vmem:[#allocation2 + $0x188] sm:$0xff]  ;;  %v841_v39 = vld [vmem:[#allocation2 + $0x198] sm:$0xff] }
 0x265   :  { %v838_v40 = vld [vmem:[#allocation2 + $0x180] sm:$0xff]  ;;  %v840_v41 = vld [vmem:[#allocation2 + $0x190] sm:$0xff]  ;;  %v847_v42 = vld [vmem:[#allocation2 + $0x1c8] sm:$0xff] }
 0x266   :  { %v849_v43 = vld [vmem:[#allocation2 + $0x1d8] sm:$0xff]  ;;  %v846_v44 = vld [vmem:[#allocation2 + $0x1c0] sm:$0xff]  ;;  %v848_v45 = vld [vmem:[#allocation2 + $0x1d0] sm:$0xff] }
 0x267   :  { %1100 = vmatpush1.bf16.msra.mxu1 %v806_v22  ;;  %1182 = vmatpush1.bf16.msra.mxu0 %v808_v23  ;;  %v855_v46 = vld [vmem:[#allocation2 + $0x208] sm:$0xff]  ;;  %v857_v47 = vld [vmem:[#allocation2 + $0x218] sm:$0xff]  ;;  %v854_v48 = vld [vmem:[#allocation2 + $0x200] sm:$0xff] }
 0x268   :  { %1101 = vmatprep.subr.bf16.mxu1 %v815_v24  ;;  %1183 = vmatprep.subr.bf16.mxu0 %v817_v25  ;;  %v856_v49 = vld [vmem:[#allocation2 + $0x210] sm:$0xff]  ;;  %v863_v50 = vld [vmem:[#allocation2 + $0x248] sm:$0xff]  ;;  %v865_v51 = vld [vmem:[#allocation2 + $0x258] sm:$0xff]  ;;  %v7218_v24 = vpack.c.bf16 %v7206_v1, %v7206_v1 }
 0x269   :  { %v862_v52 = vld [vmem:[#allocation2 + $0x240] sm:$0xff]  ;;  %v864_v53 = vld [vmem:[#allocation2 + $0x250] sm:$0xff]  ;;  %v871_v54 = vld [vmem:[#allocation2 + $0x288] sm:$0xff] }
 0x26a   :  { %v873_v55 = vld [vmem:[#allocation2 + $0x298] sm:$0xff]  ;;  %v870_v56 = vld [vmem:[#allocation2 + $0x280] sm:$0xff]  ;;  %v872_v57 = vld [vmem:[#allocation2 + $0x290] sm:$0xff] }
 0x26b   :  { %1102 = vmatpush1.bf16.msra.mxu1 %v814_v26  ;;  %1184 = vmatpush1.bf16.msra.mxu0 %v816_v27  ;;  %v879_v58 = vld [vmem:[#allocation2 + $0x2c8] sm:$0xff]  ;;  %v881_v59 = vld [vmem:[#allocation2 + $0x2d8] sm:$0xff]  ;;  %v878_v60 = vld [vmem:[#allocation2 + $0x2c0] sm:$0xff] }
 0x26c   :  { %1103 = vmatprep.subr.bf16.mxu1 %v823_v28  ;;  %1185 = vmatprep.subr.bf16.mxu0 %v825_v29  ;;  %v880_v61 = vld [vmem:[#allocation2 + $0x2d0] sm:$0xff]  ;;  %v887_v62 = vld [vmem:[#allocation2 + $0x308] sm:$0xff]  ;;  %v889_v63 = vld [vmem:[#allocation2 + $0x318] sm:$0xff]  ;;  %v7222_v29 = vpack.c.bf16 %v7210_v6, %v7210_v6 }
 0x26d   :  { %v886_v0 = vld [vmem:[#allocation2 + $0x300] sm:$0xff]  ;;  %v888_v2 = vld [vmem:[#allocation2 + $0x310] sm:$0xff]  ;;  %v895_v4 = vld [vmem:[#allocation2 + $0x348] sm:$0xff] }
 0x26e   :  { %v897_v5 = vld [vmem:[#allocation2 + $0x358] sm:$0xff]  ;;  %v894_v12 = vld [vmem:[#allocation2 + $0x340] sm:$0xff]  ;;  %v896_v13 = vld [vmem:[#allocation2 + $0x350] sm:$0xff] }
 0x26f   :  { %1104 = vmatpush1.bf16.msra.mxu1 %v822_v30  ;;  %1186 = vmatpush1.bf16.msra.mxu0 %v824_v31  ;;  %v903_v14 = vld [vmem:[#allocation2 + $0x388] sm:$0xff]  ;;  %v905_v15 = vld [vmem:[#allocation2 + $0x398] sm:$0xff]  ;;  %v902_v16 = vld [vmem:[#allocation2 + $0x380] sm:$0xff] }
 0x270   :  { %1105 = vmatprep.subr.bf16.mxu1 %v831_v33  ;;  %1187 = vmatprep.subr.bf16.mxu0 %v833_v35  ;;  %v904_v17 = vld [vmem:[#allocation2 + $0x390] sm:$0xff]  ;;  %v911_v18 = vld [vmem:[#allocation2 + $0x3c8] sm:$0xff]  ;;  %v913_v19 = vld [vmem:[#allocation2 + $0x3d8] sm:$0xff] }
 0x271   :  { %v910_v20 = vld [vmem:[#allocation2 + $0x3c0] sm:$0xff]  ;;  %v912_v21 = vld [vmem:[#allocation2 + $0x3d0] sm:$0xff]  ;;  %v919_v22 = vld [vmem:[#allocation2 + $0x408] sm:$0xff] }
 0x272   :  { %v921_v23 = vld [vmem:[#allocation2 + $0x418] sm:$0xff]  ;;  %v918_v25 = vld [vmem:[#allocation2 + $0x400] sm:$0xff]  ;;  %v920_v26 = vld [vmem:[#allocation2 + $0x410] sm:$0xff] }
 0x273   :  { %1106 = vmatpush1.bf16.msra.mxu1 %v830_v36  ;;  %1188 = vmatpush1.bf16.msra.mxu0 %v832_v37  ;;  %v927_v27 = vld [vmem:[#allocation2 + $0x448] sm:$0xff]  ;;  %v929_v28 = vld [vmem:[#allocation2 + $0x458] sm:$0xff]  ;;  %v926_v1 = vld [vmem:[#allocation2 + $0x440] sm:$0xff] }
 0x274   :  { %1107 = vmatprep.subr.bf16.mxu1 %v839_v38  ;;  %1189 = vmatprep.subr.bf16.mxu0 %v841_v39  ;;  %v928_v30 = vld [vmem:[#allocation2 + $0x450] sm:$0xff]  ;;  %v935_v31 = vld [vmem:[#allocation2 + $0x488] sm:$0xff]  ;;  %v937_v33 = vld [vmem:[#allocation2 + $0x498] sm:$0xff] }
 0x275   :  { %v934_v6 = vld [vmem:[#allocation2 + $0x480] sm:$0xff]  ;;  %v936_v35 = vld [vmem:[#allocation2 + $0x490] sm:$0xff]  ;;  %v943_v36 = vld [vmem:[#allocation2 + $0x4c8] sm:$0xff] }
 0x276   :  { %v945_v37 = vld [vmem:[#allocation2 + $0x4d8] sm:$0xff]  ;;  %v942_v38 = vld [vmem:[#allocation2 + $0x4c0] sm:$0xff]  ;;  %v944_v39 = vld [vmem:[#allocation2 + $0x4d0] sm:$0xff] }
 0x277   :  { %1108 = vmatpush1.bf16.msra.mxu1 %v838_v40  ;;  %1190 = vmatpush1.bf16.msra.mxu0 %v840_v41  ;;  %v951_v40 = vld [vmem:[#allocation2 + $0x508] sm:$0xff]  ;;  %v953_v41 = vld [vmem:[#allocation2 + $0x518] sm:$0xff] }
 0x278   :  { %1109 = vmatprep.subr.bf16.mxu1 %v847_v42  ;;  %1191 = vmatprep.subr.bf16.mxu0 %v849_v43  ;;  %v950_v42 = vld [vmem:[#allocation2 + $0x500] sm:$0xff]  ;;  %v952_v43 = vld [vmem:[#allocation2 + $0x510] sm:$0xff] }
 0x27b   :  { %1110 = vmatpush1.bf16.msra.mxu1 %v846_v44  ;;  %1192 = vmatpush1.bf16.msra.mxu0 %v848_v45  ;;  %v959_v44 = vld [vmem:[#allocation2 + $0x548] sm:$0xff]  ;;  %v961_v45 = vld [vmem:[#allocation2 + $0x558] sm:$0xff] }
 0x27c   :  { %1111 = vmatprep.subr.bf16.mxu1 %v855_v46  ;;  %1193 = vmatprep.subr.bf16.mxu0 %v857_v47  ;;  %v958_v46 = vld [vmem:[#allocation2 + $0x540] sm:$0xff]  ;;  %v960_v47 = vld [vmem:[#allocation2 + $0x550] sm:$0xff] }
 0x27f   :  { %1112 = vmatpush1.bf16.msra.mxu1 %v854_v48  ;;  %1194 = vmatpush1.bf16.msra.mxu0 %v856_v49  ;;  %v967_v48 = vld [vmem:[#allocation2 + $0x588] sm:$0xff]  ;;  %v969_v49 = vld [vmem:[#allocation2 + $0x598] sm:$0xff] }
 0x280   :  { %1113 = vmatprep.subr.bf16.mxu1 %v863_v50  ;;  %1195 = vmatprep.subr.bf16.mxu0 %v865_v51  ;;  %v966_v50 = vld [vmem:[#allocation2 + $0x580] sm:$0xff]  ;;  %v968_v51 = vld [vmem:[#allocation2 + $0x590] sm:$0xff] }
 0x283   :  { %1114 = vmatpush1.bf16.msra.mxu1 %v862_v52  ;;  %1196 = vmatpush1.bf16.msra.mxu0 %v864_v53  ;;  %v975_v52 = vld [vmem:[#allocation2 + $0x5c8] sm:$0xff]  ;;  %v977_v53 = vld [vmem:[#allocation2 + $0x5d8] sm:$0xff] }
 0x284   :  { %1115 = vmatprep.subr.bf16.mxu1 %v871_v54  ;;  %1197 = vmatprep.subr.bf16.mxu0 %v873_v55  ;;  %v974_v54 = vld [vmem:[#allocation2 + $0x5c0] sm:$0xff]  ;;  %v976_v55 = vld [vmem:[#allocation2 + $0x5d0] sm:$0xff] }
 0x287   :  { %1116 = vmatpush1.bf16.msra.mxu1 %v870_v56  ;;  %1198 = vmatpush1.bf16.msra.mxu0 %v872_v57  ;;  %v983_v56 = vld [vmem:[#allocation2 + $0x608] sm:$0xff]  ;;  %v985_v57 = vld [vmem:[#allocation2 + $0x618] sm:$0xff] }
 0x288   :  { %1117 = vmatprep.subr.bf16.mxu1 %v879_v58  ;;  %1199 = vmatprep.subr.bf16.mxu0 %v881_v59  ;;  %v982_v58 = vld [vmem:[#allocation2 + $0x600] sm:$0xff]  ;;  %v984_v59 = vld [vmem:[#allocation2 + $0x610] sm:$0xff] }
 0x28b   :  { %1118 = vmatpush1.bf16.msra.mxu1 %v878_v60  ;;  %1200 = vmatpush1.bf16.msra.mxu0 %v880_v61  ;;  %v991_v60 = vld [vmem:[#allocation2 + $0x648] sm:$0xff]  ;;  %v993_v61 = vld [vmem:[#allocation2 + $0x658] sm:$0xff] }
 0x28c   :  { %1119 = vmatprep.subr.bf16.mxu1 %v887_v62  ;;  %1201 = vmatprep.subr.bf16.mxu0 %v889_v63  ;;  %v990_v62 = vld [vmem:[#allocation2 + $0x640] sm:$0xff]  ;;  %v992_v63 = vld [vmem:[#allocation2 + $0x650] sm:$0xff] }
 0x28f   :  { %1120 = vmatpush1.bf16.msra.mxu1 %v886_v0  ;;  %1202 = vmatpush1.bf16.msra.mxu0 %v888_v2  ;;  %v999_v0 = vld [vmem:[#allocation2 + $0x688] sm:$0xff]  ;;  %v1001_v2 = vld [vmem:[#allocation2 + $0x698] sm:$0xff] }
 0x290   :  { %1121 = vmatprep.subr.bf16.mxu1 %v895_v4  ;;  %1203 = vmatprep.subr.bf16.mxu0 %v897_v5  ;;  %v998_v4 = vld [vmem:[#allocation2 + $0x680] sm:$0xff]  ;;  %v1000_v5 = vld [vmem:[#allocation2 + $0x690] sm:$0xff] }
 0x293   :  { %1122 = vmatpush1.bf16.msra.mxu1 %v894_v12  ;;  %1204 = vmatpush1.bf16.msra.mxu0 %v896_v13  ;;  %v1007_v12 = vld [vmem:[#allocation2 + $0x6c8] sm:$0xff]  ;;  %v1009_v13 = vld [vmem:[#allocation2 + $0x6d8] sm:$0xff] }
 0x294   :  { %1123 = vmatprep.subr.bf16.mxu1 %v903_v14  ;;  %1205 = vmatprep.subr.bf16.mxu0 %v905_v15  ;;  %v1006_v14 = vld [vmem:[#allocation2 + $0x6c0] sm:$0xff]  ;;  %v1008_v15 = vld [vmem:[#allocation2 + $0x6d0] sm:$0xff] }
 0x297   :  { %1124 = vmatpush1.bf16.msra.mxu1 %v902_v16  ;;  %1206 = vmatpush1.bf16.msra.mxu0 %v904_v17  ;;  %v1015_v16 = vld [vmem:[#allocation2 + $0x708] sm:$0xff]  ;;  %v1017_v17 = vld [vmem:[#allocation2 + $0x718] sm:$0xff] }
 0x298   :  { %1125 = vmatprep.subr.bf16.mxu1 %v911_v18  ;;  %1207 = vmatprep.subr.bf16.mxu0 %v913_v19  ;;  %v1014_v18 = vld [vmem:[#allocation2 + $0x700] sm:$0xff]  ;;  %v1016_v19 = vld [vmem:[#allocation2 + $0x710] sm:$0xff] }
 0x29b   :  { %1126 = vmatpush1.bf16.msra.mxu1 %v910_v20  ;;  %1208 = vmatpush1.bf16.msra.mxu0 %v912_v21  ;;  %v1023_v20 = vld [vmem:[#allocation2 + $0x748] sm:$0xff]  ;;  %v1025_v21 = vld [vmem:[#allocation2 + $0x758] sm:$0xff] }
 0x29c   :  { %1136 = vmatprep.subr.bf16.mxu1 %v919_v22  ;;  %1218 = vmatprep.subr.bf16.mxu0 %v921_v23  ;;  %v1022_v22 = vld [vmem:[#allocation2 + $0x740] sm:$0xff]  ;;  %v1024_v23 = vld [vmem:[#allocation2 + $0x750] sm:$0xff] }
 0x29e   :  { %1128 = vmatmul.mubr.bf16.vlgmr.msra.gmra.mrb[4].mxu1 %v7218_v24  ;;  %1210 = vmatmul.mubr.bf16.vlgmr.msra.gmra.mrb[8].mxu0 %v7218_v24 }
 0x29f   :  { %1137 = vmatpush1.bf16.msra.mxu1 %v918_v25  ;;  %1219 = vmatpush1.bf16.msra.mxu0 %v920_v26  ;;  %v1031_v25 = vld [vmem:[#allocation2 + $0x788] sm:$0xff]  ;;  %v1033_v26 = vld [vmem:[#allocation2 + $0x798] sm:$0xff] }
 0x2a0   :  { %1138 = vmatprep.subr.bf16.mxu1 %v927_v27  ;;  %1220 = vmatprep.subr.bf16.mxu0 %v929_v28  ;;  %v1030_v27 = vld [vmem:[#allocation2 + $0x780] sm:$0xff]  ;;  %v1032_v28 = vld [vmem:[#allocation2 + $0x790] sm:$0xff] }
 0x2a1   :  { %1168 = vmatprep.mubr.bf16.mxu1 %v7222_v29  ;;  %1250 = vmatprep.mubr.bf16.mxu0 %v7222_v29 }
 0x2a3   :  { %1139 = vmatpush1.bf16.msra.mxu1 %v926_v1  ;;  %1221 = vmatpush1.bf16.msra.mxu0 %v928_v30  ;;  %v1039_v1 = vld [vmem:[#allocation2 + $0x7c8] sm:$0xff]  ;;  %v1041_v30 = vld [vmem:[#allocation2 + $0x7d8] sm:$0xff] }
 0x2a4   :  { %1140 = vmatprep.subr.bf16.mxu1 %v935_v31  ;;  %1222 = vmatprep.subr.bf16.mxu0 %v937_v33  ;;  %v1038_v31 = vld [vmem:[#allocation2 + $0x7c0] sm:$0xff]  ;;  %v1040_v33 = vld [vmem:[#allocation2 + $0x7d0] sm:$0xff] }
 0x2a7   :  { %1141 = vmatpush1.bf16.msra.mxu1 %v934_v6  ;;  %1223 = vmatpush1.bf16.msra.mxu0 %v936_v35  ;;  %v795_v6 = vld [vmem:[#allocation2 + $0x28] sm:$0xff]  ;;  %v797_v35 = vld [vmem:[#allocation2 + $0x38] sm:$0xff] }
 0x2a8   :  { %1142 = vmatprep.subr.bf16.mxu1 %v943_v36  ;;  %1224 = vmatprep.subr.bf16.mxu0 %v945_v37  ;;  %v7230_v36 = vpack.c.bf16 %v7208_v3, %v7208_v3  ;;  %v794_v37 = vld [vmem:[#allocation2 + $0x20] sm:$0xff]  ;;  %v811_v3 = vld [vmem:[#allocation2 + $0xa8] sm:$0xff] }
 0x2ab   :  { %1143 = vmatpush1.bf16.msra.mxu1 %v942_v38  ;;  %1225 = vmatpush1.bf16.msra.mxu0 %v944_v39  ;;  %v796_v38 = vld [vmem:[#allocation2 + $0x30] sm:$0xff]  ;;  %v803_v39 = vld [vmem:[#allocation2 + $0x68] sm:$0xff] }
 0x2ac   :  { %1144 = vmatprep.subr.bf16.mxu1 %v951_v40  ;;  %1226 = vmatprep.subr.bf16.mxu0 %v953_v41  ;;  %v805_v40 = vld [vmem:[#allocation2 + $0x78] sm:$0xff]  ;;  %v802_v41 = vld [vmem:[#allocation2 + $0x60] sm:$0xff] }
 0x2af   :  { %1145 = vmatpush1.bf16.msra.mxu1 %v950_v42  ;;  %1227 = vmatpush1.bf16.msra.mxu0 %v952_v43  ;;  %v804_v42 = vld [vmem:[#allocation2 + $0x70] sm:$0xff]  ;;  %v813_v43 = vld [vmem:[#allocation2 + $0xb8] sm:$0xff] }
 0x2b0   :  { %1146 = vmatprep.subr.bf16.mxu1 %v959_v44  ;;  %1228 = vmatprep.subr.bf16.mxu0 %v961_v45  ;;  %v810_v44 = vld [vmem:[#allocation2 + $0xa0] sm:$0xff]  ;;  %v812_v45 = vld [vmem:[#allocation2 + $0xb0] sm:$0xff] }
 0x2b3   :  { %1147 = vmatpush1.bf16.msra.mxu1 %v958_v46  ;;  %1229 = vmatpush1.bf16.msra.mxu0 %v960_v47  ;;  %v819_v46 = vld [vmem:[#allocation2 + $0xe8] sm:$0xff]  ;;  %v821_v47 = vld [vmem:[#allocation2 + $0xf8] sm:$0xff] }
 0x2b4   :  { %1148 = vmatprep.subr.bf16.mxu1 %v967_v48  ;;  %1230 = vmatprep.subr.bf16.mxu0 %v969_v49  ;;  %v818_v48 = vld [vmem:[#allocation2 + $0xe0] sm:$0xff]  ;;  %v820_v49 = vld [vmem:[#allocation2 + $0xf0] sm:$0xff] }
 0x2b7   :  { %1149 = vmatpush1.bf16.msra.mxu1 %v966_v50  ;;  %1231 = vmatpush1.bf16.msra.mxu0 %v968_v51  ;;  %v827_v50 = vld [vmem:[#allocation2 + $0x128] sm:$0xff]  ;;  %v829_v51 = vld [vmem:[#allocation2 + $0x138] sm:$0xff] }
 0x2b8   :  { %1150 = vmatprep.subr.bf16.mxu1 %v975_v52  ;;  %1232 = vmatprep.subr.bf16.mxu0 %v977_v53  ;;  %v828_v52 = vld [vmem:[#allocation2 + $0x130] sm:$0xff]  ;;  %v835_v53 = vld [vmem:[#allocation2 + $0x168] sm:$0xff] }
 0x2bb   :  { %1151 = vmatpush1.bf16.msra.mxu1 %v974_v54  ;;  %1233 = vmatpush1.bf16.msra.mxu0 %v976_v55  ;;  %v837_v54 = vld [vmem:[#allocation2 + $0x178] sm:$0xff]  ;;  %v834_v55 = vld [vmem:[#allocation2 + $0x160] sm:$0xff] }
 0x2bc   :  { %1152 = vmatprep.subr.bf16.mxu1 %v983_v56  ;;  %1234 = vmatprep.subr.bf16.mxu0 %v985_v57  ;;  %v836_v56 = vld [vmem:[#allocation2 + $0x170] sm:$0xff]  ;;  %v843_v57 = vld [vmem:[#allocation2 + $0x1a8] sm:$0xff] }
 0x2bf   :  { %1153 = vmatpush1.bf16.msra.mxu1 %v982_v58  ;;  %1235 = vmatpush1.bf16.msra.mxu0 %v984_v59  ;;  %v845_v58 = vld [vmem:[#allocation2 + $0x1b8] sm:$0xff]  ;;  %v842_v59 = vld [vmem:[#allocation2 + $0x1a0] sm:$0xff] }
 0x2c0   :  { %1154 = vmatprep.subr.bf16.mxu1 %v991_v60  ;;  %1236 = vmatprep.subr.bf16.mxu0 %v993_v61  ;;  %v844_v60 = vld [vmem:[#allocation2 + $0x1b0] sm:$0xff]  ;;  %v851_v61 = vld [vmem:[#allocation2 + $0x1e8] sm:$0xff] }
 0x2c3   :  { %1155 = vmatpush1.bf16.msra.mxu1 %v990_v62  ;;  %1237 = vmatpush1.bf16.msra.mxu0 %v992_v63  ;;  %v853_v62 = vld [vmem:[#allocation2 + $0x1f8] sm:$0xff]  ;;  %v850_v63 = vld [vmem:[#allocation2 + $0x1e0] sm:$0xff] }
 0x2c4   :  { %1156 = vmatprep.subr.bf16.mxu1 %v999_v0  ;;  %1238 = vmatprep.subr.bf16.mxu0 %v1001_v2  ;;  %v852_v0 = vld [vmem:[#allocation2 + $0x1f0] sm:$0xff]  ;;  %v859_v2 = vld [vmem:[#allocation2 + $0x228] sm:$0xff] }
 0x2c7   :  { %1157 = vmatpush1.bf16.msra.mxu1 %v998_v4  ;;  %1239 = vmatpush1.bf16.msra.mxu0 %v1000_v5  ;;  %v861_v4 = vld [vmem:[#allocation2 + $0x238] sm:$0xff]  ;;  %v858_v5 = vld [vmem:[#allocation2 + $0x220] sm:$0xff] }
 0x2c8   :  { %1158 = vmatprep.subr.bf16.mxu1 %v1007_v12  ;;  %1240 = vmatprep.subr.bf16.mxu0 %v1009_v13  ;;  %v860_v12 = vld [vmem:[#allocation2 + $0x230] sm:$0xff]  ;;  %v867_v13 = vld [vmem:[#allocation2 + $0x268] sm:$0xff] }
 0x2cb   :  { %1159 = vmatpush1.bf16.msra.mxu1 %v1006_v14  ;;  %1241 = vmatpush1.bf16.msra.mxu0 %v1008_v15  ;;  %v869_v14 = vld [vmem:[#allocation2 + $0x278] sm:$0xff]  ;;  %v866_v15 = vld [vmem:[#allocation2 + $0x260] sm:$0xff] }
 0x2cc   :  { %1160 = vmatprep.subr.bf16.mxu1 %v1015_v16  ;;  %1242 = vmatprep.subr.bf16.mxu0 %v1017_v17  ;;  %v868_v16 = vld [vmem:[#allocation2 + $0x270] sm:$0xff]  ;;  %v875_v17 = vld [vmem:[#allocation2 + $0x2a8] sm:$0xff] }
 0x2cf   :  { %1161 = vmatpush1.bf16.msra.mxu1 %v1014_v18  ;;  %1243 = vmatpush1.bf16.msra.mxu0 %v1016_v19  ;;  %v877_v18 = vld [vmem:[#allocation2 + $0x2b8] sm:$0xff]  ;;  %v874_v19 = vld [vmem:[#allocation2 + $0x2a0] sm:$0xff] }
 0x2d0   :  { %1162 = vmatprep.subr.bf16.mxu1 %v1023_v20  ;;  %1244 = vmatprep.subr.bf16.mxu0 %v1025_v21  ;;  %v876_v20 = vld [vmem:[#allocation2 + $0x2b0] sm:$0xff]  ;;  %v883_v21 = vld [vmem:[#allocation2 + $0x2e8] sm:$0xff] }
 0x2d3   :  { %1163 = vmatpush1.bf16.msra.mxu1 %v1022_v22  ;;  %1245 = vmatpush1.bf16.msra.mxu0 %v1024_v23  ;;  %v885_v22 = vld [vmem:[#allocation2 + $0x2f8] sm:$0xff]  ;;  %v882_v23 = vld [vmem:[#allocation2 + $0x2e0] sm:$0xff] }
 0x2d4   :  { %1164 = vmatprep.subr.bf16.mxu1 %v1031_v25  ;;  %1246 = vmatprep.subr.bf16.mxu0 %v1033_v26  ;;  %v884_v25 = vld [vmem:[#allocation2 + $0x2f0] sm:$0xff]  ;;  %v891_v26 = vld [vmem:[#allocation2 + $0x328] sm:$0xff] }
 0x2d7   :  { %1165 = vmatpush1.bf16.msra.mxu1 %v1030_v27  ;;  %1247 = vmatpush1.bf16.msra.mxu0 %v1032_v28  ;;  %v893_v27 = vld [vmem:[#allocation2 + $0x338] sm:$0xff]  ;;  %v890_v28 = vld [vmem:[#allocation2 + $0x320] sm:$0xff] }
 0x2d8   :  { %1166 = vmatprep.subr.bf16.mxu1 %v1039_v1  ;;  %1248 = vmatprep.subr.bf16.mxu0 %v1041_v30  ;;  %v892_v1 = vld [vmem:[#allocation2 + $0x330] sm:$0xff]  ;;  %v899_v30 = vld [vmem:[#allocation2 + $0x368] sm:$0xff] }
 0x2db   :  { %1167 = vmatpush1.bf16.msra.mxu1 %v1038_v31  ;;  %1249 = vmatpush1.bf16.msra.mxu0 %v1040_v33  ;;  %v901_v31 = vld [vmem:[#allocation2 + $0x378] sm:$0xff]  ;;  %v898_v33 = vld [vmem:[#allocation2 + $0x360] sm:$0xff] }
 0x2dc   :  { %1259 = vmatprep.subr.bf16.mxu1 %v795_v6  ;;  %1341 = vmatprep.subr.bf16.mxu0 %v797_v35  ;;  %v900_v6 = vld [vmem:[#allocation2 + $0x370] sm:$0xff]  ;;  %v907_v35 = vld [vmem:[#allocation2 + $0x3a8] sm:$0xff] }
 0x2de   :  { %1169 = vmatmul.mubr.bf16.vlgmr.msra.gmra.mrb[4].mxu1 %v7230_v36  ;;  %1251 = vmatmul.mubr.bf16.vlgmr.msra.gmra.mrb[8].mxu0 %v7230_v36 }
 0x2df   :  { %1260 = vmatpush1.bf16.msra.mxu1 %v794_v37  ;;  %1342 = vmatpush1.bf16.msra.mxu0 %v796_v38  ;;  %v909_v37 = vld [vmem:[#allocation2 + $0x3b8] sm:$0xff]  ;;  %v906_v38 = vld [vmem:[#allocation2 + $0x3a0] sm:$0xff] }
 0x2e0   :  { %1261 = vmatprep.subr.bf16.mxu1 %v803_v39  ;;  %1343 = vmatprep.subr.bf16.mxu0 %v805_v40  ;;  %v908_v39 = vld [vmem:[#allocation2 + $0x3b0] sm:$0xff]  ;;  %v915_v40 = vld [vmem:[#allocation2 + $0x3e8] sm:$0xff] }
 0x2e1   :  { %1291 = vmatprep.mubr.bf16.mxu1 %v7212_v10  ;;  %1373 = vmatprep.mubr.bf16.mxu0 %v7212_v10  ;;  %v826_v10 = vld [vmem:[#allocation2 + $0x120] sm:$0xff] }
 0x2e3   :  { %1262 = vmatpush1.bf16.msra.mxu1 %v802_v41  ;;  %1344 = vmatpush1.bf16.msra.mxu0 %v804_v42  ;;  %v917_v41 = vld [vmem:[#allocation2 + $0x3f8] sm:$0xff]  ;;  %v914_v42 = vld [vmem:[#allocation2 + $0x3e0] sm:$0xff] }
 0x2e4   :  { %1263 = vmatprep.subr.bf16.mxu1 %v811_v3  ;;  %1345 = vmatprep.subr.bf16.mxu0 %v813_v43  ;;  %v916_v3 = vld [vmem:[#allocation2 + $0x3f0] sm:$0xff]  ;;  %v923_v43 = vld [vmem:[#allocation2 + $0x428] sm:$0xff] }
 0x2e7   :  { %1264 = vmatpush1.bf16.msra.mxu1 %v810_v44  ;;  %1346 = vmatpush1.bf16.msra.mxu0 %v812_v45  ;;  %v925_v44 = vld [vmem:[#allocation2 + $0x438] sm:$0xff]  ;;  %v922_v45 = vld [vmem:[#allocation2 + $0x420] sm:$0xff] }
 0x2e8   :  { %1265 = vmatprep.subr.bf16.mxu1 %v819_v46  ;;  %1347 = vmatprep.subr.bf16.mxu0 %v821_v47  ;;  %v924_v46 = vld [vmem:[#allocation2 + $0x430] sm:$0xff]  ;;  %v931_v47 = vld [vmem:[#allocation2 + $0x468] sm:$0xff] }
 0x2eb   :  { %1266 = vmatpush1.bf16.msra.mxu1 %v818_v48  ;;  %1348 = vmatpush1.bf16.msra.mxu0 %v820_v49  ;;  %v933_v48 = vld [vmem:[#allocation2 + $0x478] sm:$0xff]  ;;  %v930_v49 = vld [vmem:[#allocation2 + $0x460] sm:$0xff] }
 0x2ec   :  { %1267 = vmatprep.subr.bf16.mxu1 %v827_v50  ;;  %1349 = vmatprep.subr.bf16.mxu0 %v829_v51  ;;  %v932_v50 = vld [vmem:[#allocation2 + $0x470] sm:$0xff]  ;;  %v939_v51 = vld [vmem:[#allocation2 + $0x4a8] sm:$0xff] }
 0x2ef   :  { %1268 = vmatpush1.bf16.msra.mxu1 %v826_v10  ;;  %1350 = vmatpush1.bf16.msra.mxu0 %v828_v52  ;;  %v941_v10 = vld [vmem:[#allocation2 + $0x4b8] sm:$0xff]  ;;  %v938_v52 = vld [vmem:[#allocation2 + $0x4a0] sm:$0xff] }
 0x2f0   :  { %1269 = vmatprep.subr.bf16.mxu1 %v835_v53  ;;  %1351 = vmatprep.subr.bf16.mxu0 %v837_v54  ;;  %v940_v53 = vld [vmem:[#allocation2 + $0x4b0] sm:$0xff]  ;;  %v947_v54 = vld [vmem:[#allocation2 + $0x4e8] sm:$0xff] }
 0x2f3   :  { %1270 = vmatpush1.bf16.msra.mxu1 %v834_v55  ;;  %1352 = vmatpush1.bf16.msra.mxu0 %v836_v56  ;;  %v946_v55 = vld [vmem:[#allocation2 + $0x4e0] sm:$0xff]  ;;  %v948_v56 = vld [vmem:[#allocation2 + $0x4f0] sm:$0xff] }
 0x2f4   :  { %1271 = vmatprep.subr.bf16.mxu1 %v843_v57  ;;  %1353 = vmatprep.subr.bf16.mxu0 %v845_v58  ;;  %v955_v57 = vld [vmem:[#allocation2 + $0x528] sm:$0xff]  ;;  %v957_v58 = vld [vmem:[#allocation2 + $0x538] sm:$0xff] }
 0x2f7   :  { %1272 = vmatpush1.bf16.msra.mxu1 %v842_v59  ;;  %1354 = vmatpush1.bf16.msra.mxu0 %v844_v60  ;;  %v956_v59 = vld [vmem:[#allocation2 + $0x530] sm:$0xff]  ;;  %v963_v60 = vld [vmem:[#allocation2 + $0x568] sm:$0xff] }
 0x2f8   :  { %1273 = vmatprep.subr.bf16.mxu1 %v851_v61  ;;  %1355 = vmatprep.subr.bf16.mxu0 %v853_v62  ;;  %v965_v61 = vld [vmem:[#allocation2 + $0x578] sm:$0xff]  ;;  %v962_v62 = vld [vmem:[#allocation2 + $0x560] sm:$0xff] }
 0x2fb   :  { %1274 = vmatpush1.bf16.msra.mxu1 %v850_v63  ;;  %1356 = vmatpush1.bf16.msra.mxu0 %v852_v0  ;;  %v964_v63 = vld [vmem:[#allocation2 + $0x570] sm:$0xff]  ;;  %v971_v0 = vld [vmem:[#allocation2 + $0x5a8] sm:$0xff] }
 0x2fc   :  { %1275 = vmatprep.subr.bf16.mxu1 %v859_v2  ;;  %1357 = vmatprep.subr.bf16.mxu0 %v861_v4  ;;  %v973_v2 = vld [vmem:[#allocation2 + $0x5b8] sm:$0xff]  ;;  %v970_v4 = vld [vmem:[#allocation2 + $0x5a0] sm:$0xff] }
 0x2ff   :  { %1276 = vmatpush1.bf16.msra.mxu1 %v858_v5  ;;  %1358 = vmatpush1.bf16.msra.mxu0 %v860_v12  ;;  %v972_v5 = vld [vmem:[#allocation2 + $0x5b0] sm:$0xff]  ;;  %v979_v12 = vld [vmem:[#allocation2 + $0x5e8] sm:$0xff] }
 0x300   :  { %1277 = vmatprep.subr.bf16.mxu1 %v867_v13  ;;  %1359 = vmatprep.subr.bf16.mxu0 %v869_v14  ;;  %v981_v13 = vld [vmem:[#allocation2 + $0x5f8] sm:$0xff]  ;;  %v978_v14 = vld [vmem:[#allocation2 + $0x5e0] sm:$0xff] }
 0x303   :  { %1278 = vmatpush1.bf16.msra.mxu1 %v866_v15  ;;  %1360 = vmatpush1.bf16.msra.mxu0 %v868_v16  ;;  %v980_v15 = vld [vmem:[#allocation2 + $0x5f0] sm:$0xff]  ;;  %v987_v16 = vld [vmem:[#allocation2 + $0x628] sm:$0xff] }
 0x304   :  { %1279 = vmatprep.subr.bf16.mxu1 %v875_v17  ;;  %1361 = vmatprep.subr.bf16.mxu0 %v877_v18  ;;  %v989_v17 = vld [vmem:[#allocation2 + $0x638] sm:$0xff]  ;;  %v986_v18 = vld [vmem:[#allocation2 + $0x620] sm:$0xff] }
 0x307   :  { %1280 = vmatpush1.bf16.msra.mxu1 %v874_v19  ;;  %1362 = vmatpush1.bf16.msra.mxu0 %v876_v20  ;;  %v988_v19 = vld [vmem:[#allocation2 + $0x630] sm:$0xff]  ;;  %v995_v20 = vld [vmem:[#allocation2 + $0x668] sm:$0xff] }
 0x308   :  { %1281 = vmatprep.subr.bf16.mxu1 %v883_v21  ;;  %1363 = vmatprep.subr.bf16.mxu0 %v885_v22  ;;  %v997_v21 = vld [vmem:[#allocation2 + $0x678] sm:$0xff]  ;;  %v994_v22 = vld [vmem:[#allocation2 + $0x660] sm:$0xff] }
 0x30b   :  { %1282 = vmatpush1.bf16.msra.mxu1 %v882_v23  ;;  %1364 = vmatpush1.bf16.msra.mxu0 %v884_v25  ;;  %v996_v23 = vld [vmem:[#allocation2 + $0x670] sm:$0xff]  ;;  %v1003_v25 = vld [vmem:[#allocation2 + $0x6a8] sm:$0xff] }
 0x30c   :  { %1283 = vmatprep.subr.bf16.mxu1 %v891_v26  ;;  %1365 = vmatprep.subr.bf16.mxu0 %v893_v27  ;;  %v1005_v26 = vld [vmem:[#allocation2 + $0x6b8] sm:$0xff]  ;;  %v1002_v27 = vld [vmem:[#allocation2 + $0x6a0] sm:$0xff] }
 0x30f   :  { %1284 = vmatpush1.bf16.msra.mxu1 %v890_v28  ;;  %1366 = vmatpush1.bf16.msra.mxu0 %v892_v1  ;;  %v1004_v28 = vld [vmem:[#allocation2 + $0x6b0] sm:$0xff]  ;;  %v1011_v1 = vld [vmem:[#allocation2 + $0x6e8] sm:$0xff] }
 0x310   :  { %1285 = vmatprep.subr.bf16.mxu1 %v899_v30  ;;  %1367 = vmatprep.subr.bf16.mxu0 %v901_v31  ;;  %v1013_v30 = vld [vmem:[#allocation2 + $0x6f8] sm:$0xff]  ;;  %v1010_v31 = vld [vmem:[#allocation2 + $0x6e0] sm:$0xff] }
 0x313   :  { %1286 = vmatpush1.bf16.msra.mxu1 %v898_v33  ;;  %1368 = vmatpush1.bf16.msra.mxu0 %v900_v6  ;;  %v1012_v33 = vld [vmem:[#allocation2 + $0x6f0] sm:$0xff]  ;;  %v1019_v6 = vld [vmem:[#allocation2 + $0x728] sm:$0xff] }
 0x314   :  { %1287 = vmatprep.subr.bf16.mxu1 %v907_v35  ;;  %1369 = vmatprep.subr.bf16.mxu0 %v909_v37  ;;  %v1021_v35 = vld [vmem:[#allocation2 + $0x738] sm:$0xff]  ;;  %v1018_v37 = vld [vmem:[#allocation2 + $0x720] sm:$0xff] }
 0x317   :  { %1288 = vmatpush1.bf16.msra.mxu1 %v906_v38  ;;  %1370 = vmatpush1.bf16.msra.mxu0 %v908_v39  ;;  %v1020_v38 = vld [vmem:[#allocation2 + $0x730] sm:$0xff]  ;;  %v1027_v39 = vld [vmem:[#allocation2 + $0x768] sm:$0xff] }
 0x318   :  { %1289 = vmatprep.subr.bf16.mxu1 %v915_v40  ;;  %1371 = vmatprep.subr.bf16.mxu0 %v917_v41  ;;  %v1029_v40 = vld [vmem:[#allocation2 + $0x778] sm:$0xff]  ;;  %v1026_v41 = vld [vmem:[#allocation2 + $0x760] sm:$0xff] }
 0x31b   :  { %1290 = vmatpush1.bf16.msra.mxu1 %v914_v42  ;;  %1372 = vmatpush1.bf16.msra.mxu0 %v916_v3  ;;  %v1028_v42 = vld [vmem:[#allocation2 + $0x770] sm:$0xff]  ;;  %v1035_v3 = vld [vmem:[#allocation2 + $0x7a8] sm:$0xff] }
 0x31c   :  { %1300 = vmatprep.subr.bf16.mxu1 %v923_v43  ;;  %1382 = vmatprep.subr.bf16.mxu0 %v925_v44  ;;  %v1037_v43 = vld [vmem:[#allocation2 + $0x7b8] sm:$0xff]  ;;  %v1034_v44 = vld [vmem:[#allocation2 + $0x7a0] sm:$0xff] }
 0x31e   :  { %1292 = vmatmul.mubr.bf16.vlgmr.msra.gmra.mrb[8].mxu1 %v7218_v24  ;;  %1374 = vmatmul.mubr.bf16.vlgmr.msra.gmra.mrb[12].mxu0 %v7218_v24  ;;  %v949_v24 = vld [vmem:[#allocation2 + $0x4f8] sm:$0xff] }
 0x31f   :  { %1301 = vmatpush1.bf16.msra.mxu1 %v922_v45  ;;  %1383 = vmatpush1.bf16.msra.mxu0 %v924_v46  ;;  %v1036_v45 = vld [vmem:[#allocation2 + $0x7b0] sm:$0xff]  ;;  %v1043_v46 = vld [vmem:[#allocation2 + $0x7e8] sm:$0xff] }
 0x320   :  { %1302 = vmatprep.subr.bf16.mxu1 %v931_v47  ;;  %1384 = vmatprep.subr.bf16.mxu0 %v933_v48  ;;  %v1045_v47 = vld [vmem:[#allocation2 + $0x7f8] sm:$0xff]  ;;  %v1042_v48 = vld [vmem:[#allocation2 + $0x7e0] sm:$0xff] }
 0x321   :  { %1332 = vmatprep.mubr.bf16.mxu1 %v7222_v29  ;;  %1414 = vmatprep.mubr.bf16.mxu0 %v7222_v29  ;;  %v954_v29 = vld [vmem:[#allocation2 + $0x520] sm:$0xff] }
 0x323   :  { %1303 = vmatpush1.bf16.msra.mxu1 %v930_v49  ;;  %1385 = vmatpush1.bf16.msra.mxu0 %v932_v50  ;;  %v1044_v49 = vld [vmem:[#allocation2 + $0x7f0] sm:$0xff] }
 0x324   :  { %1304 = vmatprep.subr.bf16.mxu1 %v939_v51  ;;  %1386 = vmatprep.subr.bf16.mxu0 %v941_v10  ;;  %v1051_v50 = vld [vmem:[#allocation12 + $0x2] ss:$8 sm:$0xf] }
 0x325   :  { %v1052_v51 = vld [vmem:[#allocation12 + $0x2] ss:$8 sm:$0xf0] }
 0x326   :  { %v1053_v10 = vor.u32 %v1052_v51, %v1051_v50 }
 0x327   :  { %1305 = vmatpush1.bf16.msra.mxu1 %v938_v52  ;;  %1387 = vmatpush1.bf16.msra.mxu0 %v940_v53 }
 0x328   :  { %1306 = vmatprep.subr.bf16.mxu1 %v947_v54  ;;  %1388 = vmatprep.subr.bf16.mxu0 %v949_v24  ;;  %v1058_v52 = vrot.slane %v1053_v10, %v7189_v9  ;;  %v1066_v53 = vrot.slane %v1053_v10, %v7197_v32  ;;  %v1062_v54 = vrot.slane %v1053_v10, %v7192_v11 }
 0x329   :  { %v1070_v24 = vrot.slane %v1053_v10, %v7200_v34 }
 0x32b   :  { %1307 = vmatpush1.bf16.msra.mxu1 %v946_v55  ;;  %1389 = vmatpush1.bf16.msra.mxu0 %v948_v56 }
 0x32c   :  { %1308 = vmatprep.subr.bf16.mxu1 %v955_v57  ;;  %1390 = vmatprep.subr.bf16.mxu0 %v957_v58 }
 0x32f   :  { %1309 = vmatpush1.bf16.msra.mxu1 %v954_v29  ;;  %1391 = vmatpush1.bf16.msra.mxu0 %v956_v59 }
 0x330   :  { %1310 = vmatprep.subr.bf16.mxu1 %v963_v60  ;;  %1392 = vmatprep.subr.bf16.mxu0 %v965_v61 }
 0x333   :  { %1311 = vmatpush1.bf16.msra.mxu1 %v962_v62  ;;  %1393 = vmatpush1.bf16.msra.mxu0 %v964_v63 }
 0x334   :  { %1312 = vmatprep.subr.bf16.mxu1 %v971_v0  ;;  %1394 = vmatprep.subr.bf16.mxu0 %v973_v2 }
 0x337   :  { %1313 = vmatpush1.bf16.msra.mxu1 %v970_v4  ;;  %1395 = vmatpush1.bf16.msra.mxu0 %v972_v5 }
 0x338   :  { %1314 = vmatprep.subr.bf16.mxu1 %v979_v12  ;;  %1396 = vmatprep.subr.bf16.mxu0 %v981_v13 }
 0x33b   :  { %1315 = vmatpush1.bf16.msra.mxu1 %v978_v14  ;;  %1397 = vmatpush1.bf16.msra.mxu0 %v980_v15 }
 0x33c   :  { %1316 = vmatprep.subr.bf16.mxu1 %v987_v16  ;;  %1398 = vmatprep.subr.bf16.mxu0 %v989_v17 }
 0x33f   :  { %1317 = vmatpush1.bf16.msra.mxu1 %v986_v18  ;;  %1399 = vmatpush1.bf16.msra.mxu0 %v988_v19 }
 0x340   :  { %1318 = vmatprep.subr.bf16.mxu1 %v995_v20  ;;  %1400 = vmatprep.subr.bf16.mxu0 %v997_v21 }
 0x343   :  { %1319 = vmatpush1.bf16.msra.mxu1 %v994_v22  ;;  %1401 = vmatpush1.bf16.msra.mxu0 %v996_v23 }
 0x344   :  { %1320 = vmatprep.subr.bf16.mxu1 %v1003_v25  ;;  %1402 = vmatprep.subr.bf16.mxu0 %v1005_v26 }
 0x347   :  { %1321 = vmatpush1.bf16.msra.mxu1 %v1002_v27  ;;  %1403 = vmatpush1.bf16.msra.mxu0 %v1004_v28 }
 0x348   :  { %1322 = vmatprep.subr.bf16.mxu1 %v1011_v1  ;;  %1404 = vmatprep.subr.bf16.mxu0 %v1013_v30  ;;  %v7253_v30 = vsub.s32 4, %v7186_v8 }
 0x34b   :  { %1323 = vmatpush1.bf16.msra.mxu1 %v1010_v31  ;;  %1405 = vmatpush1.bf16.msra.mxu0 %v1012_v33  ;;  %v7256_v31 = vsub.s32 6, %v7186_v8  ;;  %v7259_v33 = vsub.s32 5, %v7186_v8 }
 0x34c   :  { %1324 = vmatprep.subr.bf16.mxu1 %v1019_v6  ;;  %1406 = vmatprep.subr.bf16.mxu0 %v1021_v35  ;;  %v7262_v6 = vsub.s32 7, %v7186_v8  ;;  %v1074_v35 = vrot.slane %v1053_v10, %v7253_v30 }
 0x34f   :  { %1325 = vmatpush1.bf16.msra.mxu1 %v1018_v37  ;;  %1407 = vmatpush1.bf16.msra.mxu0 %v1020_v38  ;;  %v1082_v37 = vrot.slane %v1053_v10, %v7256_v31  ;;  %v1078_v38 = vrot.slane %v1053_v10, %v7259_v33 }
 0x350   :  { %1326 = vmatprep.subr.bf16.mxu1 %v1027_v39  ;;  %1408 = vmatprep.subr.bf16.mxu0 %v1029_v40  ;;  %v1086_v39 = vrot.slane %v1053_v10, %v7262_v6 }
 0x353   :  { %1327 = vmatpush1.bf16.msra.mxu1 %v1026_v41  ;;  %1409 = vmatpush1.bf16.msra.mxu0 %v1028_v42 }
 0x354   :  { %1328 = vmatprep.subr.bf16.mxu1 %v1035_v3  ;;  %1410 = vmatprep.subr.bf16.mxu0 %v1037_v43 }
 0x357   :  { %1329 = vmatpush1.bf16.msra.mxu1 %v1034_v44  ;;  %1411 = vmatpush1.bf16.msra.mxu0 %v1036_v45 }
 0x358   :  { %1330 = vmatprep.subr.bf16.mxu1 %v1043_v46  ;;  %1412 = vmatprep.subr.bf16.mxu0 %v1045_v47 }
 0x35b   :  { %1331 = vmatpush1.bf16.msra.mxu1 %v1042_v48  ;;  %1413 = vmatpush1.bf16.msra.mxu0 %v1044_v49 }
 0x35e   :  { %1333 = vmatmul.mubr.bf16.vlgmr.msra.gmra.mrb[8].mxu1 %v7230_v36  ;;  %1415 = vmatmul.mubr.bf16.vlgmr.msra.gmra.mrb[12].mxu0 %v7230_v36 }
 0x3b1   :  { %v1170_v55 = vpop.f32.mrb[4].mxu1  ;;  %v1252_v56 = vpop.f32.mrb[8].mxu0 }
 0x3b2   :  { %v6357_v57 = vadd.f32 %v1170_v55, %v1058_v52  ;;  %v6359_v58 = vadd.f32 %v1252_v56, %v1066_v53  ;;  %v1172_v29 = vpop.f32.mrb[5].mxu1  ;;  %v1254_v59 = vpop.f32.mrb[9].mxu0 }
 0x3b3   :  { %v6358_v60 = vadd.f32 %v1172_v29, %v1062_v54  ;;  %v6360_v61 = vadd.f32 %v1254_v59, %v1070_v24  ;;  %v1174_v36 = vpop.f32.mrb[6].mxu1  ;;  %v1256_v62 = vpop.f32.mrb[10].mxu0 }
 0x3b4   :  { %v6236_v63 = vmul.f32 -1.442695, %v6357_v57  ;;  %v6238_v0 = vmul.f32 -1.442695, %v6359_v58  ;;  %v1175_v2 = vpop.f32.mrb[7].mxu1  ;;  %v1257_v4 = vpop.f32.mrb[11].mxu0 }
 0x3b5   :  { %v6237_v5 = vmul.f32 -1.442695, %v6358_v60  ;;  %v6239_v12 = vmul.f32 -1.442695, %v6360_v61 }
 0x3b6   :  { %6700 = vpow2.f32 %v6236_v63 }
 0x3b7   :  { %6702 = vpow2.f32 %v6238_v0 }
 0x3b8   :  { %6704 = vpow2.f32 %v6237_v5 }
 0x3b9   :  { %6706 = vpow2.f32 %v6239_v12 }
 0x3c0   :  { %v6701_v13 = vpop.eup %6700 }
 0x3c1   :  { %v6703_v14 = vpop.eup %6702  ;;  %v1447_v15 = vadd.f32 1.0, %v6701_v13 }
 0x3c2   :  { %v6705_v16 = vpop.eup %6704  ;;  %v1449_v17 = vadd.f32 1.0, %v6703_v14 }
 0x3c3   :  { %v6707_v18 = vpop.eup %6706  ;;  %6708 = vrcp.f32 %v1447_v15  ;;  %v1448_v19 = vadd.f32 1.0, %v6705_v16 }
 0x3c4   :  { %6710 = vrcp.f32 %v1449_v17  ;;  %v1450_v20 = vadd.f32 1.0, %v6707_v18 }
 0x3c5   :  { %6712 = vrcp.f32 %v1448_v19 }
 0x3c6   :  { %6714 = vrcp.f32 %v1450_v20 }
 0x3cd   :  { %v6709_v21 = vpop.eup %6708 }
 0x3ce   :  { %v6711_v22 = vpop.eup %6710  ;;  %v7246_v23 = vmul.f32 %v6709_v21, %v6357_v57 }
 0x3cf   :  { %v6713_v25 = vpop.eup %6712  ;;  %v7248_v26 = vmul.f32 %v6711_v22, %v6359_v58 }
 0x3d0   :  { %v6715_v27 = vpop.eup %6714  ;;  %v1472_v28 = vmul.f32 %v6713_v25, %v6358_v60 }
 0x3d1   :  { %v7250_v1 = vmul.f32 %v6715_v27, %v6360_v61 }
 0x431   :  { %v1334_v40 = vpop.f32.mrb[8].mxu1  ;;  %v1416_v41 = vpop.f32.mrb[12].mxu0 }
 0x432   :  { %v6361_v42 = vadd.f32 %v1334_v40, %v1074_v35  ;;  %v6363_v3 = vadd.f32 %v1416_v41, %v1082_v37  ;;  %v1336_v43 = vpop.f32.mrb[9].mxu1  ;;  %v1418_v44 = vpop.f32.mrb[13].mxu0 }
 0x433   :  { %v6362_v45 = vadd.f32 %v1336_v43, %v1078_v38  ;;  %v6364_v46 = vadd.f32 %v1418_v44, %v1086_v39  ;;  %v1338_v47 = vpop.f32.mrb[10].mxu1  ;;  %v1420_v48 = vpop.f32.mrb[14].mxu0 }
 0x434   :  { %v6240_v8 = vmul.f32 -1.442695, %v6361_v42  ;;  %v6242_v49 = vmul.f32 -1.442695, %v6363_v3  ;;  %v1339_v50 = vpop.f32.mrb[11].mxu1  ;;  %v1421_v51 = vpop.f32.mrb[15].mxu0 }
 0x435   :  { %v6241_v52 = vmul.f32 -1.442695, %v6362_v45  ;;  %v6243_v53 = vmul.f32 -1.442695, %v6364_v46 }
 0x436   :  { %6716 = vpow2.f32 %v6240_v8 }
 0x437   :  { %6718 = vpow2.f32 %v6242_v49 }
 0x438   :  { %6720 = vpow2.f32 %v6241_v52 }
 0x439   :  { %6722 = vpow2.f32 %v6243_v53 }
 0x440   :  { %v6717_v10 = vpop.eup %6716 }
 0x441   :  { %v6719_v54 = vpop.eup %6718  ;;  %v1451_v24 = vadd.f32 1.0, %v6717_v10 }
 0x442   :  { %v6721_v55 = vpop.eup %6720  ;;  %v1453_v56 = vadd.f32 1.0, %v6719_v54 }
 0x443   :  { %v6723_v57 = vpop.eup %6722  ;;  %6724 = vrcp.f32 %v1451_v24  ;;  %v1452_v58 = vadd.f32 1.0, %v6721_v55 }
 0x444   :  { %6726 = vrcp.f32 %v1453_v56  ;;  %v1454_v29 = vadd.f32 1.0, %v6723_v57 }
 0x445   :  { %6728 = vrcp.f32 %v1452_v58 }
 0x446   :  { %6730 = vrcp.f32 %v1454_v29 }
 0x44d   :  { %v6725_v59 = vpop.eup %6724 }
 0x44e   :  { %v6727_v60 = vpop.eup %6726  ;;  %v7268_v61 = vmul.f32 %v6725_v59, %v6361_v42 }
 0x44f   :  { %v6729_v36 = vpop.eup %6728  ;;  %v7270_v62 = vmul.f32 %v6727_v60, %v6363_v3 }
 0x450   :  { %v6731_v63 = vpop.eup %6730  ;;  %v7272_v0 = vmul.f32 %v6729_v36, %v6362_v45 }
 0x451   :  { %v7274_v2 = vmul.f32 %v6731_v63, %v6364_v46 }
 0x452   :  { %6994 = dma.done.wait [#allocation5 + $0x1], 65536 }
 0x453   :  { %6995 = vsyncadd [#allocation5 + $0x1], 4294901760  ;;  %v7276_v4 = vpack.c.bf16 %v1472_v28, %v1472_v28  ;;  %1500 = sst [smem:[#allocation22]] %s7013_s24  ;;  %s7027_s9 = smov [#allocation3 + $0x1000]  }
 0x454   :  { %1502 = sst [smem:[#allocation22 + $0x1]] %s7013_s24  ;;  %s1496_s23 = sshll.u32 %s7027_s9, 4  ;;  %s1497_s23 = int_to_ptr.vmem [resolvable:$true] %s1496_s23 }
 0x455   :  { %2116 = vmatprep.mubr.bf16.mxu1 %v7276_v4  ;;  %2280 = vmatprep.mubr.bf16.mxu0 %v7276_v4  ;;  %1504 = sst [smem:[#allocation22 + $0x2]] %s7014_s4  ;;  %s7028_s25 = smov [#allocation5 + $0x2]  }
 0x456   :  { %1506 = sst [smem:[#allocation22 + $0x3]] %s7010_s21  ;;  %s7029_s30 = smov [#allocation21]  }
 0x457   :  { %1508 = sst [smem:[#allocation22 + $0x4]] %s7015_s26 }
 0x458   :  { %1510 = sst [smem:[#allocation22 + $0x5]] %s7016_s27 }
 0x459   :  { %1512 = sst [smem:[#allocation22 + $0x6]] %s7017_s28 }
 0x45a   :  { %1514 = sst [smem:[#allocation22 + $0x7]] %s7010_s21 }
 0x45b   :  { %1516 = sst [smem:[#allocation22 + $0x8]] %s7018_s29 }
 0x45c   :  { %1518 = dma.general %s7785_s7, 65536, %s1497_s23, %s7028_s25, %s7029_s30, [#allocation22], %s7144_s16, 0  }
 0x45d   :  { %v1520_v5 = vld [vmem:[#allocation3 + $0x8] sm:$0xff]  ;;  %v1522_v12 = vld [vmem:[#allocation3 + $0x18] sm:$0xff]  ;;  %v1519_v13 = vld [vmem:[#allocation3] sm:$0xff] }
 0x45e   :  { %2084 = vmatprep.subr.bf16.mxu1 %v1520_v5  ;;  %2248 = vmatprep.subr.bf16.mxu0 %v1522_v12  ;;  %v1521_v14 = vld [vmem:[#allocation3 + $0x10] sm:$0xff]  ;;  %v1528_v15 = vld [vmem:[#allocation3 + $0x48] sm:$0xff]  ;;  %v1530_v16 = vld [vmem:[#allocation3 + $0x58] sm:$0xff] }
 0x45f   :  { %2085 = vmatpush1.bf16.msra.mxu1 %v1519_v13  ;;  %2249 = vmatpush1.bf16.msra.mxu0 %v1521_v14  ;;  %v1527_v17 = vld [vmem:[#allocation3 + $0x40] sm:$0xff]  ;;  %v1529_v18 = vld [vmem:[#allocation3 + $0x50] sm:$0xff]  ;;  %v1536_v19 = vld [vmem:[#allocation3 + $0x88] sm:$0xff] }
 0x460   :  { %2086 = vmatprep.subr.bf16.mxu1 %v1528_v15  ;;  %2250 = vmatprep.subr.bf16.mxu0 %v1530_v16  ;;  %v1538_v20 = vld [vmem:[#allocation3 + $0x98] sm:$0xff]  ;;  %v1535_v21 = vld [vmem:[#allocation3 + $0x80] sm:$0xff]  ;;  %v1537_v22 = vld [vmem:[#allocation3 + $0x90] sm:$0xff] }
 0x461   :  { %v1544_v25 = vld [vmem:[#allocation3 + $0xc8] sm:$0xff]  ;;  %v1546_v27 = vld [vmem:[#allocation3 + $0xd8] sm:$0xff]  ;;  %v1543_v28 = vld [vmem:[#allocation3 + $0xc0] sm:$0xff] }
 0x462   :  { %v1545_v35 = vld [vmem:[#allocation3 + $0xd0] sm:$0xff]  ;;  %v1552_v37 = vld [vmem:[#allocation3 + $0x108] sm:$0xff]  ;;  %v1554_v38 = vld [vmem:[#allocation3 + $0x118] sm:$0xff] }
 0x463   :  { %2087 = vmatpush1.bf16.msra.mxu1 %v1527_v17  ;;  %2251 = vmatpush1.bf16.msra.mxu0 %v1529_v18  ;;  %v1551_v39 = vld [vmem:[#allocation3 + $0x100] sm:$0xff]  ;;  %v1553_v40 = vld [vmem:[#allocation3 + $0x110] sm:$0xff]  ;;  %v1560_v41 = vld [vmem:[#allocation3 + $0x148] sm:$0xff] }
 0x464   :  { %2088 = vmatprep.subr.bf16.mxu1 %v1536_v19  ;;  %2252 = vmatprep.subr.bf16.mxu0 %v1538_v20  ;;  %v1562_v42 = vld [vmem:[#allocation3 + $0x158] sm:$0xff]  ;;  %v1559_v3 = vld [vmem:[#allocation3 + $0x140] sm:$0xff]  ;;  %v1561_v43 = vld [vmem:[#allocation3 + $0x150] sm:$0xff] }
 0x465   :  { %v1568_v44 = vld [vmem:[#allocation3 + $0x188] sm:$0xff]  ;;  %v1570_v45 = vld [vmem:[#allocation3 + $0x198] sm:$0xff]  ;;  %v1567_v46 = vld [vmem:[#allocation3 + $0x180] sm:$0xff] }
 0x466   :  { %v1569_v47 = vld [vmem:[#allocation3 + $0x190] sm:$0xff]  ;;  %v1576_v48 = vld [vmem:[#allocation3 + $0x1c8] sm:$0xff]  ;;  %v1578_v8 = vld [vmem:[#allocation3 + $0x1d8] sm:$0xff] }
 0x467   :  { %2089 = vmatpush1.bf16.msra.mxu1 %v1535_v21  ;;  %2253 = vmatpush1.bf16.msra.mxu0 %v1537_v22  ;;  %v1575_v49 = vld [vmem:[#allocation3 + $0x1c0] sm:$0xff]  ;;  %v1577_v50 = vld [vmem:[#allocation3 + $0x1d0] sm:$0xff]  ;;  %v1584_v51 = vld [vmem:[#allocation3 + $0x208] sm:$0xff] }
 0x468   :  { %2090 = vmatprep.subr.bf16.mxu1 %v1544_v25  ;;  %2254 = vmatprep.subr.bf16.mxu0 %v1546_v27  ;;  %v1586_v52 = vld [vmem:[#allocation3 + $0x218] sm:$0xff]  ;;  %v1583_v53 = vld [vmem:[#allocation3 + $0x200] sm:$0xff]  ;;  %v1585_v10 = vld [vmem:[#allocation3 + $0x210] sm:$0xff] }
 0x469   :  { %v1592_v54 = vld [vmem:[#allocation3 + $0x248] sm:$0xff]  ;;  %v1594_v24 = vld [vmem:[#allocation3 + $0x258] sm:$0xff]  ;;  %v1591_v55 = vld [vmem:[#allocation3 + $0x240] sm:$0xff] }
 0x46a   :  { %v1593_v56 = vld [vmem:[#allocation3 + $0x250] sm:$0xff]  ;;  %v1600_v57 = vld [vmem:[#allocation3 + $0x288] sm:$0xff]  ;;  %v1602_v58 = vld [vmem:[#allocation3 + $0x298] sm:$0xff] }
 0x46b   :  { %2091 = vmatpush1.bf16.msra.mxu1 %v1543_v28  ;;  %2255 = vmatpush1.bf16.msra.mxu0 %v1545_v35  ;;  %v1599_v29 = vld [vmem:[#allocation3 + $0x280] sm:$0xff]  ;;  %v1601_v59 = vld [vmem:[#allocation3 + $0x290] sm:$0xff]  ;;  %v1608_v60 = vld [vmem:[#allocation3 + $0x2c8] sm:$0xff] }
 0x46c   :  { %2092 = vmatprep.subr.bf16.mxu1 %v1552_v37  ;;  %2256 = vmatprep.subr.bf16.mxu0 %v1554_v38  ;;  %v1610_v36 = vld [vmem:[#allocation3 + $0x2d8] sm:$0xff]  ;;  %v1607_v63 = vld [vmem:[#allocation3 + $0x2c0] sm:$0xff]  ;;  %v1609_v5 = vld [vmem:[#allocation3 + $0x2d0] sm:$0xff] }
 0x46d   :  { %v1616_v12 = vld [vmem:[#allocation3 + $0x308] sm:$0xff]  ;;  %v1618_v13 = vld [vmem:[#allocation3 + $0x318] sm:$0xff]  ;;  %v1615_v14 = vld [vmem:[#allocation3 + $0x300] sm:$0xff] }
 0x46e   :  { %v1617_v15 = vld [vmem:[#allocation3 + $0x310] sm:$0xff]  ;;  %v1624_v16 = vld [vmem:[#allocation3 + $0x348] sm:$0xff]  ;;  %v1626_v17 = vld [vmem:[#allocation3 + $0x358] sm:$0xff] }
 0x46f   :  { %2093 = vmatpush1.bf16.msra.mxu1 %v1551_v39  ;;  %2257 = vmatpush1.bf16.msra.mxu0 %v1553_v40  ;;  %v1623_v18 = vld [vmem:[#allocation3 + $0x340] sm:$0xff]  ;;  %v1625_v19 = vld [vmem:[#allocation3 + $0x350] sm:$0xff]  ;;  %v1632_v20 = vld [vmem:[#allocation3 + $0x388] sm:$0xff]  ;;  %v7295_v40 = vpack.c.bf16 %v7246_v23, %v7246_v23 }
 0x470   :  { %2094 = vmatprep.subr.bf16.mxu1 %v1560_v41  ;;  %2258 = vmatprep.subr.bf16.mxu0 %v1562_v42  ;;  %v1634_v21 = vld [vmem:[#allocation3 + $0x398] sm:$0xff]  ;;  %v1631_v22 = vld [vmem:[#allocation3 + $0x380] sm:$0xff]  ;;  %v1633_v25 = vld [vmem:[#allocation3 + $0x390] sm:$0xff] }
 0x471   :  { %v1640_v27 = vld [vmem:[#allocation3 + $0x3c8] sm:$0xff]  ;;  %v1642_v28 = vld [vmem:[#allocation3 + $0x3d8] sm:$0xff]  ;;  %v1639_v35 = vld [vmem:[#allocation3 + $0x3c0] sm:$0xff] }
 0x472   :  { %v1641_v37 = vld [vmem:[#allocation3 + $0x3d0] sm:$0xff]  ;;  %v1648_v38 = vld [vmem:[#allocation3 + $0x408] sm:$0xff]  ;;  %v1650_v39 = vld [vmem:[#allocation3 + $0x418] sm:$0xff] }
 0x473   :  { %2095 = vmatpush1.bf16.msra.mxu1 %v1559_v3  ;;  %2259 = vmatpush1.bf16.msra.mxu0 %v1561_v43  ;;  %v1647_v41 = vld [vmem:[#allocation3 + $0x400] sm:$0xff]  ;;  %v1649_v42 = vld [vmem:[#allocation3 + $0x410] sm:$0xff]  ;;  %v1656_v3 = vld [vmem:[#allocation3 + $0x448] sm:$0xff] }
 0x474   :  { %2096 = vmatprep.subr.bf16.mxu1 %v1568_v44  ;;  %2260 = vmatprep.subr.bf16.mxu0 %v1570_v45  ;;  %v1658_v43 = vld [vmem:[#allocation3 + $0x458] sm:$0xff]  ;;  %v7299_v44 = vpack.c.bf16 %v7250_v1, %v7250_v1  ;;  %v1655_v23 = vld [vmem:[#allocation3 + $0x440] sm:$0xff]  ;;  %v1657_v45 = vld [vmem:[#allocation3 + $0x450] sm:$0xff] }
 0x475   :  { %v1663_v1 = vld [vmem:[#allocation3 + $0x480] sm:$0xff] }
 0x477   :  { %2097 = vmatpush1.bf16.msra.mxu1 %v1567_v46  ;;  %2261 = vmatpush1.bf16.msra.mxu0 %v1569_v47  ;;  %v1664_v46 = vld [vmem:[#allocation3 + $0x488] sm:$0xff]  ;;  %v1666_v47 = vld [vmem:[#allocation3 + $0x498] sm:$0xff] }
 0x478   :  { %2098 = vmatprep.subr.bf16.mxu1 %v1576_v48  ;;  %2262 = vmatprep.subr.bf16.mxu0 %v1578_v8  ;;  %v1665_v48 = vld [vmem:[#allocation3 + $0x490] sm:$0xff]  ;;  %v1672_v8 = vld [vmem:[#allocation3 + $0x4c8] sm:$0xff] }
 0x47b   :  { %2099 = vmatpush1.bf16.msra.mxu1 %v1575_v49  ;;  %2263 = vmatpush1.bf16.msra.mxu0 %v1577_v50  ;;  %v1674_v49 = vld [vmem:[#allocation3 + $0x4d8] sm:$0xff]  ;;  %v1671_v50 = vld [vmem:[#allocation3 + $0x4c0] sm:$0xff] }
 0x47c   :  { %2100 = vmatprep.subr.bf16.mxu1 %v1584_v51  ;;  %2264 = vmatprep.subr.bf16.mxu0 %v1586_v52  ;;  %v1673_v51 = vld [vmem:[#allocation3 + $0x4d0] sm:$0xff]  ;;  %v1680_v52 = vld [vmem:[#allocation3 + $0x508] sm:$0xff] }
 0x47f   :  { %2101 = vmatpush1.bf16.msra.mxu1 %v1583_v53  ;;  %2265 = vmatpush1.bf16.msra.mxu0 %v1585_v10  ;;  %v1682_v53 = vld [vmem:[#allocation3 + $0x518] sm:$0xff]  ;;  %v1679_v10 = vld [vmem:[#allocation3 + $0x500] sm:$0xff] }
 0x480   :  { %2102 = vmatprep.subr.bf16.mxu1 %v1592_v54  ;;  %2266 = vmatprep.subr.bf16.mxu0 %v1594_v24  ;;  %v1681_v54 = vld [vmem:[#allocation3 + $0x510] sm:$0xff]  ;;  %v1688_v24 = vld [vmem:[#allocation3 + $0x548] sm:$0xff] }
 0x483   :  { %2103 = vmatpush1.bf16.msra.mxu1 %v1591_v55  ;;  %2267 = vmatpush1.bf16.msra.mxu0 %v1593_v56  ;;  %v1690_v55 = vld [vmem:[#allocation3 + $0x558] sm:$0xff]  ;;  %v1687_v56 = vld [vmem:[#allocation3 + $0x540] sm:$0xff] }
 0x484   :  { %2104 = vmatprep.subr.bf16.mxu1 %v1600_v57  ;;  %2268 = vmatprep.subr.bf16.mxu0 %v1602_v58  ;;  %v1689_v57 = vld [vmem:[#allocation3 + $0x550] sm:$0xff]  ;;  %v1696_v58 = vld [vmem:[#allocation3 + $0x588] sm:$0xff] }
 0x487   :  { %2105 = vmatpush1.bf16.msra.mxu1 %v1599_v29  ;;  %2269 = vmatpush1.bf16.msra.mxu0 %v1601_v59  ;;  %v1698_v29 = vld [vmem:[#allocation3 + $0x598] sm:$0xff]  ;;  %v1695_v59 = vld [vmem:[#allocation3 + $0x580] sm:$0xff] }
 0x488   :  { %2106 = vmatprep.subr.bf16.mxu1 %v1608_v60  ;;  %2270 = vmatprep.subr.bf16.mxu0 %v1610_v36  ;;  %v1697_v60 = vld [vmem:[#allocation3 + $0x590] sm:$0xff]  ;;  %v1704_v36 = vld [vmem:[#allocation3 + $0x5c8] sm:$0xff] }
 0x48b   :  { %2107 = vmatpush1.bf16.msra.mxu1 %v1607_v63  ;;  %2271 = vmatpush1.bf16.msra.mxu0 %v1609_v5  ;;  %v1706_v63 = vld [vmem:[#allocation3 + $0x5d8] sm:$0xff]  ;;  %v1703_v5 = vld [vmem:[#allocation3 + $0x5c0] sm:$0xff] }
 0x48c   :  { %2108 = vmatprep.subr.bf16.mxu1 %v1616_v12  ;;  %2272 = vmatprep.subr.bf16.mxu0 %v1618_v13  ;;  %v1705_v12 = vld [vmem:[#allocation3 + $0x5d0] sm:$0xff]  ;;  %v1712_v13 = vld [vmem:[#allocation3 + $0x608] sm:$0xff] }
 0x48f   :  { %2109 = vmatpush1.bf16.msra.mxu1 %v1615_v14  ;;  %2273 = vmatpush1.bf16.msra.mxu0 %v1617_v15  ;;  %v1714_v14 = vld [vmem:[#allocation3 + $0x618] sm:$0xff]  ;;  %v1711_v15 = vld [vmem:[#allocation3 + $0x600] sm:$0xff] }
 0x490   :  { %2110 = vmatprep.subr.bf16.mxu1 %v1624_v16  ;;  %2274 = vmatprep.subr.bf16.mxu0 %v1626_v17  ;;  %v1713_v16 = vld [vmem:[#allocation3 + $0x610] sm:$0xff]  ;;  %v1720_v17 = vld [vmem:[#allocation3 + $0x648] sm:$0xff] }
 0x493   :  { %2111 = vmatpush1.bf16.msra.mxu1 %v1623_v18  ;;  %2275 = vmatpush1.bf16.msra.mxu0 %v1625_v19  ;;  %v1722_v18 = vld [vmem:[#allocation3 + $0x658] sm:$0xff]  ;;  %v1719_v19 = vld [vmem:[#allocation3 + $0x640] sm:$0xff] }
 0x494   :  { %2112 = vmatprep.subr.bf16.mxu1 %v1632_v20  ;;  %2276 = vmatprep.subr.bf16.mxu0 %v1634_v21  ;;  %v1721_v20 = vld [vmem:[#allocation3 + $0x650] sm:$0xff]  ;;  %v1728_v21 = vld [vmem:[#allocation3 + $0x688] sm:$0xff] }
 0x497   :  { %2113 = vmatpush1.bf16.msra.mxu1 %v1631_v22  ;;  %2277 = vmatpush1.bf16.msra.mxu0 %v1633_v25  ;;  %v1730_v22 = vld [vmem:[#allocation3 + $0x698] sm:$0xff]  ;;  %v1727_v25 = vld [vmem:[#allocation3 + $0x680] sm:$0xff] }
 0x498   :  { %2114 = vmatprep.subr.bf16.mxu1 %v1640_v27  ;;  %2278 = vmatprep.subr.bf16.mxu0 %v1642_v28  ;;  %v1729_v27 = vld [vmem:[#allocation3 + $0x690] sm:$0xff]  ;;  %v1736_v28 = vld [vmem:[#allocation3 + $0x6c8] sm:$0xff] }
 0x49b   :  { %2115 = vmatpush1.bf16.msra.mxu1 %v1639_v35  ;;  %2279 = vmatpush1.bf16.msra.mxu0 %v1641_v37  ;;  %v1738_v35 = vld [vmem:[#allocation3 + $0x6d8] sm:$0xff]  ;;  %v1735_v37 = vld [vmem:[#allocation3 + $0x6c0] sm:$0xff] }
 0x49c   :  { %2125 = vmatprep.subr.bf16.mxu1 %v1648_v38  ;;  %2289 = vmatprep.subr.bf16.mxu0 %v1650_v39  ;;  %v1737_v38 = vld [vmem:[#allocation3 + $0x6d0] sm:$0xff]  ;;  %v1744_v39 = vld [vmem:[#allocation3 + $0x708] sm:$0xff] }
 0x49e   :  { %2117 = vmatmul.mubr.bf16.vlgmr.msra.gmra.mrb[12].mxu1 %v7295_v40  ;;  %2281 = vmatmul.mubr.bf16.vlgmr.msra.gmra.mrb[16].mxu0 %v7295_v40 }
 0x49f   :  { %2126 = vmatpush1.bf16.msra.mxu1 %v1647_v41  ;;  %2290 = vmatpush1.bf16.msra.mxu0 %v1649_v42  ;;  %v1746_v41 = vld [vmem:[#allocation3 + $0x718] sm:$0xff]  ;;  %v1743_v42 = vld [vmem:[#allocation3 + $0x700] sm:$0xff] }
 0x4a0   :  { %2127 = vmatprep.subr.bf16.mxu1 %v1656_v3  ;;  %2291 = vmatprep.subr.bf16.mxu0 %v1658_v43  ;;  %v1745_v3 = vld [vmem:[#allocation3 + $0x710] sm:$0xff]  ;;  %v1752_v43 = vld [vmem:[#allocation3 + $0x748] sm:$0xff] }
 0x4a1   :  { %2157 = vmatprep.mubr.bf16.mxu1 %v7299_v44  ;;  %2321 = vmatprep.mubr.bf16.mxu0 %v7299_v44 }
 0x4a3   :  { %2128 = vmatpush1.bf16.msra.mxu1 %v1655_v23  ;;  %2292 = vmatpush1.bf16.msra.mxu0 %v1657_v45  ;;  %v1754_v23 = vld [vmem:[#allocation3 + $0x758] sm:$0xff]  ;;  %v1751_v45 = vld [vmem:[#allocation3 + $0x740] sm:$0xff] }
 0x4a4   :  { %2129 = vmatprep.subr.bf16.mxu1 %v1664_v46  ;;  %2293 = vmatprep.subr.bf16.mxu0 %v1666_v47  ;;  %v1753_v46 = vld [vmem:[#allocation3 + $0x750] sm:$0xff]  ;;  %v1760_v47 = vld [vmem:[#allocation3 + $0x788] sm:$0xff] }
 0x4a7   :  { %2130 = vmatpush1.bf16.msra.mxu1 %v1663_v1  ;;  %2294 = vmatpush1.bf16.msra.mxu0 %v1665_v48  ;;  %v1762_v1 = vld [vmem:[#allocation3 + $0x798] sm:$0xff]  ;;  %v1759_v48 = vld [vmem:[#allocation3 + $0x780] sm:$0xff] }
 0x4a8   :  { %2131 = vmatprep.subr.bf16.mxu1 %v1672_v8  ;;  %2295 = vmatprep.subr.bf16.mxu0 %v1674_v49  ;;  %v1761_v8 = vld [vmem:[#allocation3 + $0x790] sm:$0xff]  ;;  %v1768_v49 = vld [vmem:[#allocation3 + $0x7c8] sm:$0xff] }
 0x4ab   :  { %2132 = vmatpush1.bf16.msra.mxu1 %v1671_v50  ;;  %2296 = vmatpush1.bf16.msra.mxu0 %v1673_v51  ;;  %v1770_v50 = vld [vmem:[#allocation3 + $0x7d8] sm:$0xff]  ;;  %v1767_v51 = vld [vmem:[#allocation3 + $0x7c0] sm:$0xff] }
 0x4ac   :  { %2133 = vmatprep.subr.bf16.mxu1 %v1680_v52  ;;  %2297 = vmatprep.subr.bf16.mxu0 %v1682_v53  ;;  %v1769_v52 = vld [vmem:[#allocation3 + $0x7d0] sm:$0xff]  ;;  %v1776_v53 = vld [vmem:[#allocation3 + $0x808] sm:$0xff] }
 0x4af   :  { %2134 = vmatpush1.bf16.msra.mxu1 %v1679_v10  ;;  %2298 = vmatpush1.bf16.msra.mxu0 %v1681_v54  ;;  %v1778_v10 = vld [vmem:[#allocation3 + $0x818] sm:$0xff]  ;;  %v7307_v54 = vpack.c.bf16 %v7248_v26, %v7248_v26  ;;  %v1783_v26 = vld [vmem:[#allocation3 + $0x840] sm:$0xff] }
 0x4b0   :  { %2135 = vmatprep.subr.bf16.mxu1 %v1688_v24  ;;  %2299 = vmatprep.subr.bf16.mxu0 %v1690_v55  ;;  %v1775_v24 = vld [vmem:[#allocation3 + $0x800] sm:$0xff]  ;;  %v1777_v55 = vld [vmem:[#allocation3 + $0x810] sm:$0xff] }
 0x4b3   :  { %2136 = vmatpush1.bf16.msra.mxu1 %v1687_v56  ;;  %2300 = vmatpush1.bf16.msra.mxu0 %v1689_v57  ;;  %v1784_v56 = vld [vmem:[#allocation3 + $0x848] sm:$0xff]  ;;  %v1786_v57 = vld [vmem:[#allocation3 + $0x858] sm:$0xff] }
 0x4b4   :  { %2137 = vmatprep.subr.bf16.mxu1 %v1696_v58  ;;  %2301 = vmatprep.subr.bf16.mxu0 %v1698_v29  ;;  %v7311_v58 = vpack.c.bf16 %v7272_v0, %v7272_v0  ;;  %v1785_v29 = vld [vmem:[#allocation3 + $0x850] sm:$0xff]  ;;  %v1791_v0 = vld [vmem:[#allocation3 + $0x880] sm:$0xff] }
 0x4b7   :  { %2138 = vmatpush1.bf16.msra.mxu1 %v1695_v59  ;;  %2302 = vmatpush1.bf16.msra.mxu0 %v1697_v60  ;;  %v1792_v59 = vld [vmem:[#allocation3 + $0x888] sm:$0xff]  ;;  %v1794_v60 = vld [vmem:[#allocation3 + $0x898] sm:$0xff] }
 0x4b8   :  { %2139 = vmatprep.subr.bf16.mxu1 %v1704_v36  ;;  %2303 = vmatprep.subr.bf16.mxu0 %v1706_v63  ;;  %v1793_v36 = vld [vmem:[#allocation3 + $0x890] sm:$0xff]  ;;  %v1800_v63 = vld [vmem:[#allocation3 + $0x8c8] sm:$0xff] }
 0x4bb   :  { %2140 = vmatpush1.bf16.msra.mxu1 %v1703_v5  ;;  %2304 = vmatpush1.bf16.msra.mxu0 %v1705_v12  ;;  %v1802_v5 = vld [vmem:[#allocation3 + $0x8d8] sm:$0xff]  ;;  %v1799_v12 = vld [vmem:[#allocation3 + $0x8c0] sm:$0xff] }
 0x4bc   :  { %2141 = vmatprep.subr.bf16.mxu1 %v1712_v13  ;;  %2305 = vmatprep.subr.bf16.mxu0 %v1714_v14  ;;  %v1801_v13 = vld [vmem:[#allocation3 + $0x8d0] sm:$0xff]  ;;  %v1808_v14 = vld [vmem:[#allocation3 + $0x908] sm:$0xff] }
 0x4bf   :  { %2142 = vmatpush1.bf16.msra.mxu1 %v1711_v15  ;;  %2306 = vmatpush1.bf16.msra.mxu0 %v1713_v16  ;;  %v1810_v15 = vld [vmem:[#allocation3 + $0x918] sm:$0xff]  ;;  %v1807_v16 = vld [vmem:[#allocation3 + $0x900] sm:$0xff] }
 0x4c0   :  { %2143 = vmatprep.subr.bf16.mxu1 %v1720_v17  ;;  %2307 = vmatprep.subr.bf16.mxu0 %v1722_v18  ;;  %v1809_v17 = vld [vmem:[#allocation3 + $0x910] sm:$0xff]  ;;  %v1816_v18 = vld [vmem:[#allocation3 + $0x948] sm:$0xff] }
 0x4c3   :  { %2144 = vmatpush1.bf16.msra.mxu1 %v1719_v19  ;;  %2308 = vmatpush1.bf16.msra.mxu0 %v1721_v20  ;;  %v1818_v19 = vld [vmem:[#allocation3 + $0x958] sm:$0xff]  ;;  %v1815_v20 = vld [vmem:[#allocation3 + $0x940] sm:$0xff] }
 0x4c4   :  { %2145 = vmatprep.subr.bf16.mxu1 %v1728_v21  ;;  %2309 = vmatprep.subr.bf16.mxu0 %v1730_v22  ;;  %v1817_v21 = vld [vmem:[#allocation3 + $0x950] sm:$0xff]  ;;  %v1824_v22 = vld [vmem:[#allocation3 + $0x988] sm:$0xff] }
 0x4c7   :  { %2146 = vmatpush1.bf16.msra.mxu1 %v1727_v25  ;;  %2310 = vmatpush1.bf16.msra.mxu0 %v1729_v27  ;;  %v1826_v25 = vld [vmem:[#allocation3 + $0x998] sm:$0xff]  ;;  %v1823_v27 = vld [vmem:[#allocation3 + $0x980] sm:$0xff] }
 0x4c8   :  { %2147 = vmatprep.subr.bf16.mxu1 %v1736_v28  ;;  %2311 = vmatprep.subr.bf16.mxu0 %v1738_v35  ;;  %v1825_v28 = vld [vmem:[#allocation3 + $0x990] sm:$0xff]  ;;  %v1832_v35 = vld [vmem:[#allocation3 + $0x9c8] sm:$0xff] }
 0x4cb   :  { %2148 = vmatpush1.bf16.msra.mxu1 %v1735_v37  ;;  %2312 = vmatpush1.bf16.msra.mxu0 %v1737_v38  ;;  %v1834_v37 = vld [vmem:[#allocation3 + $0x9d8] sm:$0xff]  ;;  %v1831_v38 = vld [vmem:[#allocation3 + $0x9c0] sm:$0xff] }
 0x4cc   :  { %2149 = vmatprep.subr.bf16.mxu1 %v1744_v39  ;;  %2313 = vmatprep.subr.bf16.mxu0 %v1746_v41  ;;  %v1833_v39 = vld [vmem:[#allocation3 + $0x9d0] sm:$0xff]  ;;  %v1840_v41 = vld [vmem:[#allocation3 + $0xa08] sm:$0xff] }
 0x4cf   :  { %2150 = vmatpush1.bf16.msra.mxu1 %v1743_v42  ;;  %2314 = vmatpush1.bf16.msra.mxu0 %v1745_v3  ;;  %v1842_v42 = vld [vmem:[#allocation3 + $0xa18] sm:$0xff]  ;;  %v1839_v3 = vld [vmem:[#allocation3 + $0xa00] sm:$0xff] }
 0x4d0   :  { %2151 = vmatprep.subr.bf16.mxu1 %v1752_v43  ;;  %2315 = vmatprep.subr.bf16.mxu0 %v1754_v23  ;;  %v1841_v43 = vld [vmem:[#allocation3 + $0xa10] sm:$0xff]  ;;  %v1848_v23 = vld [vmem:[#allocation3 + $0xa48] sm:$0xff] }
 0x4d3   :  { %2152 = vmatpush1.bf16.msra.mxu1 %v1751_v45  ;;  %2316 = vmatpush1.bf16.msra.mxu0 %v1753_v46  ;;  %v1850_v45 = vld [vmem:[#allocation3 + $0xa58] sm:$0xff]  ;;  %v1847_v46 = vld [vmem:[#allocation3 + $0xa40] sm:$0xff] }
 0x4d4   :  { %2153 = vmatprep.subr.bf16.mxu1 %v1760_v47  ;;  %2317 = vmatprep.subr.bf16.mxu0 %v1762_v1  ;;  %v1849_v47 = vld [vmem:[#allocation3 + $0xa50] sm:$0xff]  ;;  %v1856_v1 = vld [vmem:[#allocation3 + $0xa88] sm:$0xff] }
 0x4d7   :  { %2154 = vmatpush1.bf16.msra.mxu1 %v1759_v48  ;;  %2318 = vmatpush1.bf16.msra.mxu0 %v1761_v8  ;;  %v1858_v48 = vld [vmem:[#allocation3 + $0xa98] sm:$0xff]  ;;  %v1855_v8 = vld [vmem:[#allocation3 + $0xa80] sm:$0xff] }
 0x4d8   :  { %2155 = vmatprep.subr.bf16.mxu1 %v1768_v49  ;;  %2319 = vmatprep.subr.bf16.mxu0 %v1770_v50  ;;  %v1857_v49 = vld [vmem:[#allocation3 + $0xa90] sm:$0xff]  ;;  %v1864_v50 = vld [vmem:[#allocation3 + $0xac8] sm:$0xff] }
 0x4db   :  { %2156 = vmatpush1.bf16.msra.mxu1 %v1767_v51  ;;  %2320 = vmatpush1.bf16.msra.mxu0 %v1769_v52  ;;  %v1866_v51 = vld [vmem:[#allocation3 + $0xad8] sm:$0xff]  ;;  %v1863_v52 = vld [vmem:[#allocation3 + $0xac0] sm:$0xff] }
 0x4dc   :  { %2166 = vmatprep.subr.bf16.mxu1 %v1776_v53  ;;  %2330 = vmatprep.subr.bf16.mxu0 %v1778_v10  ;;  %v1865_v53 = vld [vmem:[#allocation3 + $0xad0] sm:$0xff]  ;;  %v1872_v10 = vld [vmem:[#allocation3 + $0xb08] sm:$0xff] }
 0x4de   :  { %2158 = vmatmul.mubr.bf16.vlgmr.msra.gmra.mrb[12].mxu1 %v7307_v54  ;;  %2322 = vmatmul.mubr.bf16.vlgmr.msra.gmra.mrb[16].mxu0 %v7307_v54 }
 0x4df   :  { %2167 = vmatpush1.bf16.msra.mxu1 %v1775_v24  ;;  %2331 = vmatpush1.bf16.msra.mxu0 %v1777_v55  ;;  %v1874_v24 = vld [vmem:[#allocation3 + $0xb18] sm:$0xff]  ;;  %v1871_v55 = vld [vmem:[#allocation3 + $0xb00] sm:$0xff] }
 0x4e0   :  { %2168 = vmatprep.subr.bf16.mxu1 %v1784_v56  ;;  %2332 = vmatprep.subr.bf16.mxu0 %v1786_v57  ;;  %v1873_v56 = vld [vmem:[#allocation3 + $0xb10] sm:$0xff]  ;;  %v1880_v57 = vld [vmem:[#allocation3 + $0xb48] sm:$0xff] }
 0x4e1   :  { %2198 = vmatprep.mubr.bf16.mxu1 %v7311_v58  ;;  %2362 = vmatprep.mubr.bf16.mxu0 %v7311_v58 }
 0x4e3   :  { %2169 = vmatpush1.bf16.msra.mxu1 %v1783_v26  ;;  %2333 = vmatpush1.bf16.msra.mxu0 %v1785_v29  ;;  %v1882_v26 = vld [vmem:[#allocation3 + $0xb58] sm:$0xff]  ;;  %v1879_v29 = vld [vmem:[#allocation3 + $0xb40] sm:$0xff] }
 0x4e4   :  { %2170 = vmatprep.subr.bf16.mxu1 %v1792_v59  ;;  %2334 = vmatprep.subr.bf16.mxu0 %v1794_v60  ;;  %v1881_v59 = vld [vmem:[#allocation3 + $0xb50] sm:$0xff]  ;;  %v1888_v60 = vld [vmem:[#allocation3 + $0xb88] sm:$0xff] }
 0x4e7   :  { %2171 = vmatpush1.bf16.msra.mxu1 %v1791_v0  ;;  %2335 = vmatpush1.bf16.msra.mxu0 %v1793_v36  ;;  %v1890_v0 = vld [vmem:[#allocation3 + $0xb98] sm:$0xff]  ;;  %v1887_v36 = vld [vmem:[#allocation3 + $0xb80] sm:$0xff] }
 0x4e8   :  { %2172 = vmatprep.subr.bf16.mxu1 %v1800_v63  ;;  %2336 = vmatprep.subr.bf16.mxu0 %v1802_v5  ;;  %v1889_v63 = vld [vmem:[#allocation3 + $0xb90] sm:$0xff]  ;;  %v1896_v5 = vld [vmem:[#allocation3 + $0xbc8] sm:$0xff] }
 0x4eb   :  { %2173 = vmatpush1.bf16.msra.mxu1 %v1799_v12  ;;  %2337 = vmatpush1.bf16.msra.mxu0 %v1801_v13  ;;  %v1898_v12 = vld [vmem:[#allocation3 + $0xbd8] sm:$0xff]  ;;  %v1895_v13 = vld [vmem:[#allocation3 + $0xbc0] sm:$0xff] }
 0x4ec   :  { %2174 = vmatprep.subr.bf16.mxu1 %v1808_v14  ;;  %2338 = vmatprep.subr.bf16.mxu0 %v1810_v15  ;;  %v1897_v14 = vld [vmem:[#allocation3 + $0xbd0] sm:$0xff]  ;;  %v1904_v15 = vld [vmem:[#allocation3 + $0xc08] sm:$0xff] }
 0x4ef   :  { %2175 = vmatpush1.bf16.msra.mxu1 %v1807_v16  ;;  %2339 = vmatpush1.bf16.msra.mxu0 %v1809_v17  ;;  %v1906_v16 = vld [vmem:[#allocation3 + $0xc18] sm:$0xff]  ;;  %v7319_v17 = vpack.c.bf16 %v7268_v61, %v7268_v61  ;;  %v1911_v61 = vld [vmem:[#allocation3 + $0xc40] sm:$0xff] }
 0x4f0   :  { %2176 = vmatprep.subr.bf16.mxu1 %v1816_v18  ;;  %2340 = vmatprep.subr.bf16.mxu0 %v1818_v19  ;;  %v1903_v18 = vld [vmem:[#allocation3 + $0xc00] sm:$0xff]  ;;  %v1905_v19 = vld [vmem:[#allocation3 + $0xc10] sm:$0xff] }
 0x4f3   :  { %2177 = vmatpush1.bf16.msra.mxu1 %v1815_v20  ;;  %2341 = vmatpush1.bf16.msra.mxu0 %v1817_v21  ;;  %v1912_v20 = vld [vmem:[#allocation3 + $0xc48] sm:$0xff]  ;;  %v1914_v21 = vld [vmem:[#allocation3 + $0xc58] sm:$0xff] }
 0x4f4   :  { %2178 = vmatprep.subr.bf16.mxu1 %v1824_v22  ;;  %2342 = vmatprep.subr.bf16.mxu0 %v1826_v25  ;;  %v7323_v22 = vpack.c.bf16 %v7274_v2, %v7274_v2  ;;  %v1913_v25 = vld [vmem:[#allocation3 + $0xc50] sm:$0xff]  ;;  %v1919_v2 = vld [vmem:[#allocation3 + $0xc80] sm:$0xff] }
 0x4f7   :  { %2179 = vmatpush1.bf16.msra.mxu1 %v1823_v27  ;;  %2343 = vmatpush1.bf16.msra.mxu0 %v1825_v28  ;;  %v1920_v27 = vld [vmem:[#allocation3 + $0xc88] sm:$0xff]  ;;  %v1922_v28 = vld [vmem:[#allocation3 + $0xc98] sm:$0xff] }
 0x4f8   :  { %2180 = vmatprep.subr.bf16.mxu1 %v1832_v35  ;;  %2344 = vmatprep.subr.bf16.mxu0 %v1834_v37  ;;  %v1921_v35 = vld [vmem:[#allocation3 + $0xc90] sm:$0xff]  ;;  %v1928_v37 = vld [vmem:[#allocation3 + $0xcc8] sm:$0xff] }
 0x4fb   :  { %2181 = vmatpush1.bf16.msra.mxu1 %v1831_v38  ;;  %2345 = vmatpush1.bf16.msra.mxu0 %v1833_v39  ;;  %v1930_v38 = vld [vmem:[#allocation3 + $0xcd8] sm:$0xff]  ;;  %v1927_v39 = vld [vmem:[#allocation3 + $0xcc0] sm:$0xff] }
 0x4fc   :  { %2182 = vmatprep.subr.bf16.mxu1 %v1840_v41  ;;  %2346 = vmatprep.subr.bf16.mxu0 %v1842_v42  ;;  %v1929_v41 = vld [vmem:[#allocation3 + $0xcd0] sm:$0xff]  ;;  %v1936_v42 = vld [vmem:[#allocation3 + $0xd08] sm:$0xff] }
 0x4ff   :  { %2183 = vmatpush1.bf16.msra.mxu1 %v1839_v3  ;;  %2347 = vmatpush1.bf16.msra.mxu0 %v1841_v43  ;;  %v1938_v3 = vld [vmem:[#allocation3 + $0xd18] sm:$0xff]  ;;  %v1935_v43 = vld [vmem:[#allocation3 + $0xd00] sm:$0xff] }
 0x500   :  { %2184 = vmatprep.subr.bf16.mxu1 %v1848_v23  ;;  %2348 = vmatprep.subr.bf16.mxu0 %v1850_v45  ;;  %v1937_v23 = vld [vmem:[#allocation3 + $0xd10] sm:$0xff]  ;;  %v1944_v45 = vld [vmem:[#allocation3 + $0xd48] sm:$0xff] }
 0x503   :  { %2185 = vmatpush1.bf16.msra.mxu1 %v1847_v46  ;;  %2349 = vmatpush1.bf16.msra.mxu0 %v1849_v47  ;;  %v1946_v46 = vld [vmem:[#allocation3 + $0xd58] sm:$0xff]  ;;  %v1943_v47 = vld [vmem:[#allocation3 + $0xd40] sm:$0xff] }
 0x504   :  { %2186 = vmatprep.subr.bf16.mxu1 %v1856_v1  ;;  %2350 = vmatprep.subr.bf16.mxu0 %v1858_v48  ;;  %v1945_v1 = vld [vmem:[#allocation3 + $0xd50] sm:$0xff]  ;;  %v1952_v48 = vld [vmem:[#allocation3 + $0xd88] sm:$0xff] }
 0x507   :  { %2187 = vmatpush1.bf16.msra.mxu1 %v1855_v8  ;;  %2351 = vmatpush1.bf16.msra.mxu0 %v1857_v49  ;;  %v1954_v8 = vld [vmem:[#allocation3 + $0xd98] sm:$0xff]  ;;  %v1951_v49 = vld [vmem:[#allocation3 + $0xd80] sm:$0xff] }
 0x508   :  { %2188 = vmatprep.subr.bf16.mxu1 %v1864_v50  ;;  %2352 = vmatprep.subr.bf16.mxu0 %v1866_v51  ;;  %v1953_v50 = vld [vmem:[#allocation3 + $0xd90] sm:$0xff]  ;;  %v1960_v51 = vld [vmem:[#allocation3 + $0xdc8] sm:$0xff] }
 0x50b   :  { %2189 = vmatpush1.bf16.msra.mxu1 %v1863_v52  ;;  %2353 = vmatpush1.bf16.msra.mxu0 %v1865_v53  ;;  %v1962_v52 = vld [vmem:[#allocation3 + $0xdd8] sm:$0xff]  ;;  %v1959_v53 = vld [vmem:[#allocation3 + $0xdc0] sm:$0xff] }
 0x50c   :  { %2190 = vmatprep.subr.bf16.mxu1 %v1872_v10  ;;  %2354 = vmatprep.subr.bf16.mxu0 %v1874_v24  ;;  %v1961_v10 = vld [vmem:[#allocation3 + $0xdd0] sm:$0xff]  ;;  %v1968_v24 = vld [vmem:[#allocation3 + $0xe08] sm:$0xff] }
 0x50f   :  { %2191 = vmatpush1.bf16.msra.mxu1 %v1871_v55  ;;  %2355 = vmatpush1.bf16.msra.mxu0 %v1873_v56  ;;  %v1970_v55 = vld [vmem:[#allocation3 + $0xe18] sm:$0xff]  ;;  %v1967_v56 = vld [vmem:[#allocation3 + $0xe00] sm:$0xff] }
 0x510   :  { %2192 = vmatprep.subr.bf16.mxu1 %v1880_v57  ;;  %2356 = vmatprep.subr.bf16.mxu0 %v1882_v26  ;;  %v1969_v57 = vld [vmem:[#allocation3 + $0xe10] sm:$0xff]  ;;  %v1976_v26 = vld [vmem:[#allocation3 + $0xe48] sm:$0xff] }
 0x513   :  { %2193 = vmatpush1.bf16.msra.mxu1 %v1879_v29  ;;  %2357 = vmatpush1.bf16.msra.mxu0 %v1881_v59  ;;  %v1978_v29 = vld [vmem:[#allocation3 + $0xe58] sm:$0xff]  ;;  %v1975_v59 = vld [vmem:[#allocation3 + $0xe40] sm:$0xff] }
 0x514   :  { %2194 = vmatprep.subr.bf16.mxu1 %v1888_v60  ;;  %2358 = vmatprep.subr.bf16.mxu0 %v1890_v0  ;;  %v1977_v60 = vld [vmem:[#allocation3 + $0xe50] sm:$0xff]  ;;  %v1984_v0 = vld [vmem:[#allocation3 + $0xe88] sm:$0xff] }
 0x517   :  { %2195 = vmatpush1.bf16.msra.mxu1 %v1887_v36  ;;  %2359 = vmatpush1.bf16.msra.mxu0 %v1889_v63  ;;  %v1986_v36 = vld [vmem:[#allocation3 + $0xe98] sm:$0xff]  ;;  %v1983_v63 = vld [vmem:[#allocation3 + $0xe80] sm:$0xff] }
 0x518   :  { %2196 = vmatprep.subr.bf16.mxu1 %v1896_v5  ;;  %2360 = vmatprep.subr.bf16.mxu0 %v1898_v12  ;;  %v1985_v5 = vld [vmem:[#allocation3 + $0xe90] sm:$0xff]  ;;  %v1992_v12 = vld [vmem:[#allocation3 + $0xec8] sm:$0xff] }
 0x51b   :  { %2197 = vmatpush1.bf16.msra.mxu1 %v1895_v13  ;;  %2361 = vmatpush1.bf16.msra.mxu0 %v1897_v14  ;;  %v1994_v13 = vld [vmem:[#allocation3 + $0xed8] sm:$0xff]  ;;  %v1991_v14 = vld [vmem:[#allocation3 + $0xec0] sm:$0xff] }
 0x51c   :  { %2207 = vmatprep.subr.bf16.mxu1 %v1904_v15  ;;  %2371 = vmatprep.subr.bf16.mxu0 %v1906_v16  ;;  %v1993_v15 = vld [vmem:[#allocation3 + $0xed0] sm:$0xff]  ;;  %v2000_v16 = vld [vmem:[#allocation3 + $0xf08] sm:$0xff] }
 0x51e   :  { %2199 = vmatmul.mubr.bf16.vlgmr.msra.gmra.mrb[12].mxu1 %v7319_v17  ;;  %2363 = vmatmul.mubr.bf16.vlgmr.msra.gmra.mrb[16].mxu0 %v7319_v17 }
 0x51f   :  { %2208 = vmatpush1.bf16.msra.mxu1 %v1903_v18  ;;  %2372 = vmatpush1.bf16.msra.mxu0 %v1905_v19  ;;  %v2002_v18 = vld [vmem:[#allocation3 + $0xf18] sm:$0xff]  ;;  %v1999_v19 = vld [vmem:[#allocation3 + $0xf00] sm:$0xff] }
 0x520   :  { %2209 = vmatprep.subr.bf16.mxu1 %v1912_v20  ;;  %2373 = vmatprep.subr.bf16.mxu0 %v1914_v21  ;;  %v2001_v20 = vld [vmem:[#allocation3 + $0xf10] sm:$0xff]  ;;  %v2008_v21 = vld [vmem:[#allocation3 + $0xf48] sm:$0xff] }
 0x521   :  { %2239 = vmatprep.mubr.bf16.mxu1 %v7323_v22  ;;  %2403 = vmatprep.mubr.bf16.mxu0 %v7323_v22 }
 0x523   :  { %2210 = vmatpush1.bf16.msra.mxu1 %v1911_v61  ;;  %2374 = vmatpush1.bf16.msra.mxu0 %v1913_v25  ;;  %v2010_v61 = vld [vmem:[#allocation3 + $0xf58] sm:$0xff]  ;;  %v2007_v25 = vld [vmem:[#allocation3 + $0xf40] sm:$0xff] }
 0x524   :  { %2211 = vmatprep.subr.bf16.mxu1 %v1920_v27  ;;  %2375 = vmatprep.subr.bf16.mxu0 %v1922_v28  ;;  %v2009_v27 = vld [vmem:[#allocation3 + $0xf50] sm:$0xff]  ;;  %v2016_v28 = vld [vmem:[#allocation3 + $0xf88] sm:$0xff] }
 0x527   :  { %2212 = vmatpush1.bf16.msra.mxu1 %v1919_v2  ;;  %2376 = vmatpush1.bf16.msra.mxu0 %v1921_v35  ;;  %v2018_v2 = vld [vmem:[#allocation3 + $0xf98] sm:$0xff]  ;;  %v2015_v35 = vld [vmem:[#allocation3 + $0xf80] sm:$0xff] }
 0x528   :  { %2213 = vmatprep.subr.bf16.mxu1 %v1928_v37  ;;  %2377 = vmatprep.subr.bf16.mxu0 %v1930_v38  ;;  %v2017_v37 = vld [vmem:[#allocation3 + $0xf90] sm:$0xff]  ;;  %v2024_v38 = vld [vmem:[#allocation3 + $0xfc8] sm:$0xff] }
 0x52b   :  { %2214 = vmatpush1.bf16.msra.mxu1 %v1927_v39  ;;  %2378 = vmatpush1.bf16.msra.mxu0 %v1929_v41  ;;  %v2026_v39 = vld [vmem:[#allocation3 + $0xfd8] sm:$0xff]  ;;  %v2023_v41 = vld [vmem:[#allocation3 + $0xfc0] sm:$0xff] }
 0x52c   :  { %2215 = vmatprep.subr.bf16.mxu1 %v1936_v42  ;;  %2379 = vmatprep.subr.bf16.mxu0 %v1938_v3  ;;  %v2025_v42 = vld [vmem:[#allocation3 + $0xfd0] sm:$0xff]  ;;  %v1524_v3 = vld [vmem:[#allocation3 + $0x28] sm:$0xff] }
 0x52f   :  { %2216 = vmatpush1.bf16.msra.mxu1 %v1935_v43  ;;  %2380 = vmatpush1.bf16.msra.mxu0 %v1937_v23  ;;  %v1526_v43 = vld [vmem:[#allocation3 + $0x38] sm:$0xff]  ;;  %v7331_v23 = vpack.c.bf16 %v7270_v62, %v7270_v62  ;;  %v1540_v62 = vld [vmem:[#allocation3 + $0xa8] sm:$0xff] }
 0x530   :  { %2217 = vmatprep.subr.bf16.mxu1 %v1944_v45  ;;  %2381 = vmatprep.subr.bf16.mxu0 %v1946_v46  ;;  %v1523_v45 = vld [vmem:[#allocation3 + $0x20] sm:$0xff]  ;;  %v1525_v46 = vld [vmem:[#allocation3 + $0x30] sm:$0xff] }
 0x533   :  { %2218 = vmatpush1.bf16.msra.mxu1 %v1943_v47  ;;  %2382 = vmatpush1.bf16.msra.mxu0 %v1945_v1  ;;  %v1532_v47 = vld [vmem:[#allocation3 + $0x68] sm:$0xff]  ;;  %v1534_v1 = vld [vmem:[#allocation3 + $0x78] sm:$0xff] }
 0x534   :  { %2219 = vmatprep.subr.bf16.mxu1 %v1952_v48  ;;  %2383 = vmatprep.subr.bf16.mxu0 %v1954_v8  ;;  %v1531_v48 = vld [vmem:[#allocation3 + $0x60] sm:$0xff]  ;;  %v1533_v8 = vld [vmem:[#allocation3 + $0x70] sm:$0xff] }
 0x537   :  { %2220 = vmatpush1.bf16.msra.mxu1 %v1951_v49  ;;  %2384 = vmatpush1.bf16.msra.mxu0 %v1953_v50  ;;  %v1542_v49 = vld [vmem:[#allocation3 + $0xb8] sm:$0xff]  ;;  %v1539_v50 = vld [vmem:[#allocation3 + $0xa0] sm:$0xff] }
 0x538   :  { %2221 = vmatprep.subr.bf16.mxu1 %v1960_v51  ;;  %2385 = vmatprep.subr.bf16.mxu0 %v1962_v52  ;;  %v1541_v51 = vld [vmem:[#allocation3 + $0xb0] sm:$0xff]  ;;  %v1548_v52 = vld [vmem:[#allocation3 + $0xe8] sm:$0xff] }
 0x53b   :  { %2222 = vmatpush1.bf16.msra.mxu1 %v1959_v53  ;;  %2386 = vmatpush1.bf16.msra.mxu0 %v1961_v10  ;;  %v1550_v53 = vld [vmem:[#allocation3 + $0xf8] sm:$0xff]  ;;  %v1547_v10 = vld [vmem:[#allocation3 + $0xe0] sm:$0xff] }
 0x53c   :  { %2223 = vmatprep.subr.bf16.mxu1 %v1968_v24  ;;  %2387 = vmatprep.subr.bf16.mxu0 %v1970_v55  ;;  %v1549_v24 = vld [vmem:[#allocation3 + $0xf0] sm:$0xff]  ;;  %v1556_v55 = vld [vmem:[#allocation3 + $0x128] sm:$0xff] }
 0x53f   :  { %2224 = vmatpush1.bf16.msra.mxu1 %v1967_v56  ;;  %2388 = vmatpush1.bf16.msra.mxu0 %v1969_v57  ;;  %v1558_v56 = vld [vmem:[#allocation3 + $0x138] sm:$0xff]  ;;  %v1557_v57 = vld [vmem:[#allocation3 + $0x130] sm:$0xff] }
 0x540   :  { %2225 = vmatprep.subr.bf16.mxu1 %v1976_v26  ;;  %2389 = vmatprep.subr.bf16.mxu0 %v1978_v29  ;;  %v1564_v26 = vld [vmem:[#allocation3 + $0x168] sm:$0xff]  ;;  %v1566_v29 = vld [vmem:[#allocation3 + $0x178] sm:$0xff] }
 0x543   :  { %2226 = vmatpush1.bf16.msra.mxu1 %v1975_v59  ;;  %2390 = vmatpush1.bf16.msra.mxu0 %v1977_v60  ;;  %v1563_v59 = vld [vmem:[#allocation3 + $0x160] sm:$0xff]  ;;  %v1565_v60 = vld [vmem:[#allocation3 + $0x170] sm:$0xff] }
 0x544   :  { %2227 = vmatprep.subr.bf16.mxu1 %v1984_v0  ;;  %2391 = vmatprep.subr.bf16.mxu0 %v1986_v36  ;;  %v1572_v0 = vld [vmem:[#allocation3 + $0x1a8] sm:$0xff]  ;;  %v1574_v36 = vld [vmem:[#allocation3 + $0x1b8] sm:$0xff] }
 0x547   :  { %2228 = vmatpush1.bf16.msra.mxu1 %v1983_v63  ;;  %2392 = vmatpush1.bf16.msra.mxu0 %v1985_v5  ;;  %v1571_v63 = vld [vmem:[#allocation3 + $0x1a0] sm:$0xff]  ;;  %v1573_v5 = vld [vmem:[#allocation3 + $0x1b0] sm:$0xff] }
 0x548   :  { %2229 = vmatprep.subr.bf16.mxu1 %v1992_v12  ;;  %2393 = vmatprep.subr.bf16.mxu0 %v1994_v13  ;;  %v1580_v12 = vld [vmem:[#allocation3 + $0x1e8] sm:$0xff]  ;;  %v1582_v13 = vld [vmem:[#allocation3 + $0x1f8] sm:$0xff] }
 0x54b   :  { %2230 = vmatpush1.bf16.msra.mxu1 %v1991_v14  ;;  %2394 = vmatpush1.bf16.msra.mxu0 %v1993_v15  ;;  %v1579_v14 = vld [vmem:[#allocation3 + $0x1e0] sm:$0xff]  ;;  %v1581_v15 = vld [vmem:[#allocation3 + $0x1f0] sm:$0xff] }
 0x54c   :  { %2231 = vmatprep.subr.bf16.mxu1 %v2000_v16  ;;  %2395 = vmatprep.subr.bf16.mxu0 %v2002_v18  ;;  %v1588_v16 = vld [vmem:[#allocation3 + $0x228] sm:$0xff]  ;;  %v1590_v18 = vld [vmem:[#allocation3 + $0x238] sm:$0xff] }
 0x54f   :  { %2232 = vmatpush1.bf16.msra.mxu1 %v1999_v19  ;;  %2396 = vmatpush1.bf16.msra.mxu0 %v2001_v20  ;;  %v1587_v19 = vld [vmem:[#allocation3 + $0x220] sm:$0xff]  ;;  %v1589_v20 = vld [vmem:[#allocation3 + $0x230] sm:$0xff] }
 0x550   :  { %2233 = vmatprep.subr.bf16.mxu1 %v2008_v21  ;;  %2397 = vmatprep.subr.bf16.mxu0 %v2010_v61  ;;  %v1596_v21 = vld [vmem:[#allocation3 + $0x268] sm:$0xff]  ;;  %v1598_v61 = vld [vmem:[#allocation3 + $0x278] sm:$0xff] }
 0x553   :  { %2234 = vmatpush1.bf16.msra.mxu1 %v2007_v25  ;;  %2398 = vmatpush1.bf16.msra.mxu0 %v2009_v27  ;;  %v1595_v25 = vld [vmem:[#allocation3 + $0x260] sm:$0xff]  ;;  %v1597_v27 = vld [vmem:[#allocation3 + $0x270] sm:$0xff] }
 0x554   :  { %2235 = vmatprep.subr.bf16.mxu1 %v2016_v28  ;;  %2399 = vmatprep.subr.bf16.mxu0 %v2018_v2  ;;  %v1604_v28 = vld [vmem:[#allocation3 + $0x2a8] sm:$0xff]  ;;  %v1606_v2 = vld [vmem:[#allocation3 + $0x2b8] sm:$0xff] }
 0x557   :  { %2236 = vmatpush1.bf16.msra.mxu1 %v2015_v35  ;;  %2400 = vmatpush1.bf16.msra.mxu0 %v2017_v37  ;;  %v1603_v35 = vld [vmem:[#allocation3 + $0x2a0] sm:$0xff]  ;;  %v1605_v37 = vld [vmem:[#allocation3 + $0x2b0] sm:$0xff] }
 0x558   :  { %2237 = vmatprep.subr.bf16.mxu1 %v2024_v38  ;;  %2401 = vmatprep.subr.bf16.mxu0 %v2026_v39  ;;  %v1612_v38 = vld [vmem:[#allocation3 + $0x2e8] sm:$0xff]  ;;  %v1614_v39 = vld [vmem:[#allocation3 + $0x2f8] sm:$0xff] }
 0x55b   :  { %2238 = vmatpush1.bf16.msra.mxu1 %v2023_v41  ;;  %2402 = vmatpush1.bf16.msra.mxu0 %v2025_v42  ;;  %v1611_v41 = vld [vmem:[#allocation3 + $0x2e0] sm:$0xff]  ;;  %v1613_v42 = vld [vmem:[#allocation3 + $0x2f0] sm:$0xff] }
 0x55c   :  { %2412 = vmatprep.subr.bf16.mxu1 %v1524_v3  ;;  %2576 = vmatprep.subr.bf16.mxu0 %v1526_v43  ;;  %v1620_v3 = vld [vmem:[#allocation3 + $0x328] sm:$0xff]  ;;  %v1622_v43 = vld [vmem:[#allocation3 + $0x338] sm:$0xff] }
 0x55e   :  { %2240 = vmatmul.mubr.bf16.vlgmr.msra.gmra.mrb[12].mxu1 %v7331_v23  ;;  %2404 = vmatmul.mubr.bf16.vlgmr.msra.gmra.mrb[16].mxu0 %v7331_v23 }
 0x55f   :  { %2413 = vmatpush1.bf16.msra.mxu1 %v1523_v45  ;;  %2577 = vmatpush1.bf16.msra.mxu0 %v1525_v46  ;;  %v1619_v45 = vld [vmem:[#allocation3 + $0x320] sm:$0xff]  ;;  %v1621_v46 = vld [vmem:[#allocation3 + $0x330] sm:$0xff] }
 0x560   :  { %2414 = vmatprep.subr.bf16.mxu1 %v1532_v47  ;;  %2578 = vmatprep.subr.bf16.mxu0 %v1534_v1  ;;  %v1628_v47 = vld [vmem:[#allocation3 + $0x368] sm:$0xff]  ;;  %v1630_v1 = vld [vmem:[#allocation3 + $0x378] sm:$0xff] }
 0x561   :  { %2444 = vmatprep.mubr.bf16.mxu1 %v7276_v4  ;;  %2608 = vmatprep.mubr.bf16.mxu0 %v7276_v4  ;;  %v1555_v4 = vld [vmem:[#allocation3 + $0x120] sm:$0xff] }
 0x563   :  { %2415 = vmatpush1.bf16.msra.mxu1 %v1531_v48  ;;  %2579 = vmatpush1.bf16.msra.mxu0 %v1533_v8  ;;  %v1627_v48 = vld [vmem:[#allocation3 + $0x360] sm:$0xff]  ;;  %v1629_v8 = vld [vmem:[#allocation3 + $0x370] sm:$0xff] }
 0x564   :  { %2416 = vmatprep.subr.bf16.mxu1 %v1540_v62  ;;  %2580 = vmatprep.subr.bf16.mxu0 %v1542_v49  ;;  %v1636_v62 = vld [vmem:[#allocation3 + $0x3a8] sm:$0xff]  ;;  %v1638_v49 = vld [vmem:[#allocation3 + $0x3b8] sm:$0xff] }
 0x567   :  { %2417 = vmatpush1.bf16.msra.mxu1 %v1539_v50  ;;  %2581 = vmatpush1.bf16.msra.mxu0 %v1541_v51  ;;  %v1635_v50 = vld [vmem:[#allocation3 + $0x3a0] sm:$0xff]  ;;  %v1637_v51 = vld [vmem:[#allocation3 + $0x3b0] sm:$0xff] }
 0x568   :  { %2418 = vmatprep.subr.bf16.mxu1 %v1548_v52  ;;  %2582 = vmatprep.subr.bf16.mxu0 %v1550_v53  ;;  %v1644_v52 = vld [vmem:[#allocation3 + $0x3e8] sm:$0xff]  ;;  %v1646_v53 = vld [vmem:[#allocation3 + $0x3f8] sm:$0xff] }
 0x56b   :  { %2419 = vmatpush1.bf16.msra.mxu1 %v1547_v10  ;;  %2583 = vmatpush1.bf16.msra.mxu0 %v1549_v24  ;;  %v1643_v10 = vld [vmem:[#allocation3 + $0x3e0] sm:$0xff]  ;;  %v1645_v24 = vld [vmem:[#allocation3 + $0x3f0] sm:$0xff] }
 0x56c   :  { %2420 = vmatprep.subr.bf16.mxu1 %v1556_v55  ;;  %2584 = vmatprep.subr.bf16.mxu0 %v1558_v56  ;;  %v1652_v55 = vld [vmem:[#allocation3 + $0x428] sm:$0xff]  ;;  %v1654_v56 = vld [vmem:[#allocation3 + $0x438] sm:$0xff] }
 0x56f   :  { %2421 = vmatpush1.bf16.msra.mxu1 %v1555_v4  ;;  %2585 = vmatpush1.bf16.msra.mxu0 %v1557_v57  ;;  %v1651_v4 = vld [vmem:[#allocation3 + $0x420] sm:$0xff]  ;;  %v1653_v57 = vld [vmem:[#allocation3 + $0x430] sm:$0xff] }
 0x570   :  { %2422 = vmatprep.subr.bf16.mxu1 %v1564_v26  ;;  %2586 = vmatprep.subr.bf16.mxu0 %v1566_v29  ;;  %v1660_v26 = vld [vmem:[#allocation3 + $0x468] sm:$0xff]  ;;  %v1662_v29 = vld [vmem:[#allocation3 + $0x478] sm:$0xff] }
 0x573   :  { %2423 = vmatpush1.bf16.msra.mxu1 %v1563_v59  ;;  %2587 = vmatpush1.bf16.msra.mxu0 %v1565_v60  ;;  %v1659_v59 = vld [vmem:[#allocation3 + $0x460] sm:$0xff]  ;;  %v1661_v60 = vld [vmem:[#allocation3 + $0x470] sm:$0xff] }
 0x574   :  { %2424 = vmatprep.subr.bf16.mxu1 %v1572_v0  ;;  %2588 = vmatprep.subr.bf16.mxu0 %v1574_v36  ;;  %v1668_v0 = vld [vmem:[#allocation3 + $0x4a8] sm:$0xff]  ;;  %v1670_v36 = vld [vmem:[#allocation3 + $0x4b8] sm:$0xff] }
 0x577   :  { %2425 = vmatpush1.bf16.msra.mxu1 %v1571_v63  ;;  %2589 = vmatpush1.bf16.msra.mxu0 %v1573_v5  ;;  %v1667_v63 = vld [vmem:[#allocation3 + $0x4a0] sm:$0xff]  ;;  %v1669_v5 = vld [vmem:[#allocation3 + $0x4b0] sm:$0xff] }
 0x578   :  { %2426 = vmatprep.subr.bf16.mxu1 %v1580_v12  ;;  %2590 = vmatprep.subr.bf16.mxu0 %v1582_v13  ;;  %v1676_v12 = vld [vmem:[#allocation3 + $0x4e8] sm:$0xff]  ;;  %v1675_v13 = vld [vmem:[#allocation3 + $0x4e0] sm:$0xff] }
 0x57b   :  { %2427 = vmatpush1.bf16.msra.mxu1 %v1579_v14  ;;  %2591 = vmatpush1.bf16.msra.mxu0 %v1581_v15  ;;  %v1677_v14 = vld [vmem:[#allocation3 + $0x4f0] sm:$0xff]  ;;  %v1684_v15 = vld [vmem:[#allocation3 + $0x528] sm:$0xff] }
 0x57c   :  { %2428 = vmatprep.subr.bf16.mxu1 %v1588_v16  ;;  %2592 = vmatprep.subr.bf16.mxu0 %v1590_v18  ;;  %v1686_v16 = vld [vmem:[#allocation3 + $0x538] sm:$0xff]  ;;  %v1685_v18 = vld [vmem:[#allocation3 + $0x530] sm:$0xff] }
 0x57f   :  { %2429 = vmatpush1.bf16.msra.mxu1 %v1587_v19  ;;  %2593 = vmatpush1.bf16.msra.mxu0 %v1589_v20  ;;  %v1692_v19 = vld [vmem:[#allocation3 + $0x568] sm:$0xff]  ;;  %v1694_v20 = vld [vmem:[#allocation3 + $0x578] sm:$0xff] }
 0x580   :  { %2430 = vmatprep.subr.bf16.mxu1 %v1596_v21  ;;  %2594 = vmatprep.subr.bf16.mxu0 %v1598_v61  ;;  %v1691_v21 = vld [vmem:[#allocation3 + $0x560] sm:$0xff]  ;;  %v1693_v61 = vld [vmem:[#allocation3 + $0x570] sm:$0xff] }
 0x583   :  { %2431 = vmatpush1.bf16.msra.mxu1 %v1595_v25  ;;  %2595 = vmatpush1.bf16.msra.mxu0 %v1597_v27  ;;  %v1700_v25 = vld [vmem:[#allocation3 + $0x5a8] sm:$0xff]  ;;  %v1702_v27 = vld [vmem:[#allocation3 + $0x5b8] sm:$0xff] }
 0x584   :  { %2432 = vmatprep.subr.bf16.mxu1 %v1604_v28  ;;  %2596 = vmatprep.subr.bf16.mxu0 %v1606_v2  ;;  %v1699_v28 = vld [vmem:[#allocation3 + $0x5a0] sm:$0xff]  ;;  %v1701_v2 = vld [vmem:[#allocation3 + $0x5b0] sm:$0xff] }
 0x587   :  { %2433 = vmatpush1.bf16.msra.mxu1 %v1603_v35  ;;  %2597 = vmatpush1.bf16.msra.mxu0 %v1605_v37  ;;  %v1708_v35 = vld [vmem:[#allocation3 + $0x5e8] sm:$0xff]  ;;  %v1710_v37 = vld [vmem:[#allocation3 + $0x5f8] sm:$0xff] }
 0x588   :  { %2434 = vmatprep.subr.bf16.mxu1 %v1612_v38  ;;  %2598 = vmatprep.subr.bf16.mxu0 %v1614_v39  ;;  %v1707_v38 = vld [vmem:[#allocation3 + $0x5e0] sm:$0xff]  ;;  %v1709_v39 = vld [vmem:[#allocation3 + $0x5f0] sm:$0xff] }
 0x58b   :  { %2435 = vmatpush1.bf16.msra.mxu1 %v1611_v41  ;;  %2599 = vmatpush1.bf16.msra.mxu0 %v1613_v42  ;;  %v1716_v41 = vld [vmem:[#allocation3 + $0x628] sm:$0xff]  ;;  %v1718_v42 = vld [vmem:[#allocation3 + $0x638] sm:$0xff] }
 0x58c   :  { %2436 = vmatprep.subr.bf16.mxu1 %v1620_v3  ;;  %2600 = vmatprep.subr.bf16.mxu0 %v1622_v43  ;;  %v1715_v3 = vld [vmem:[#allocation3 + $0x620] sm:$0xff]  ;;  %v1717_v43 = vld [vmem:[#allocation3 + $0x630] sm:$0xff] }
 0x58f   :  { %2437 = vmatpush1.bf16.msra.mxu1 %v1619_v45  ;;  %2601 = vmatpush1.bf16.msra.mxu0 %v1621_v46  ;;  %v1724_v45 = vld [vmem:[#allocation3 + $0x668] sm:$0xff]  ;;  %v1726_v46 = vld [vmem:[#allocation3 + $0x678] sm:$0xff] }
 0x590   :  { %2438 = vmatprep.subr.bf16.mxu1 %v1628_v47  ;;  %2602 = vmatprep.subr.bf16.mxu0 %v1630_v1  ;;  %v1723_v47 = vld [vmem:[#allocation3 + $0x660] sm:$0xff]  ;;  %v1725_v1 = vld [vmem:[#allocation3 + $0x670] sm:$0xff] }
 0x593   :  { %2439 = vmatpush1.bf16.msra.mxu1 %v1627_v48  ;;  %2603 = vmatpush1.bf16.msra.mxu0 %v1629_v8  ;;  %v1732_v48 = vld [vmem:[#allocation3 + $0x6a8] sm:$0xff]  ;;  %v1734_v8 = vld [vmem:[#allocation3 + $0x6b8] sm:$0xff] }
 0x594   :  { %2440 = vmatprep.subr.bf16.mxu1 %v1636_v62  ;;  %2604 = vmatprep.subr.bf16.mxu0 %v1638_v49  ;;  %v1731_v62 = vld [vmem:[#allocation3 + $0x6a0] sm:$0xff]  ;;  %v1733_v49 = vld [vmem:[#allocation3 + $0x6b0] sm:$0xff] }
 0x597   :  { %2441 = vmatpush1.bf16.msra.mxu1 %v1635_v50  ;;  %2605 = vmatpush1.bf16.msra.mxu0 %v1637_v51  ;;  %v1740_v50 = vld [vmem:[#allocation3 + $0x6e8] sm:$0xff]  ;;  %v1742_v51 = vld [vmem:[#allocation3 + $0x6f8] sm:$0xff] }
 0x598   :  { %2442 = vmatprep.subr.bf16.mxu1 %v1644_v52  ;;  %2606 = vmatprep.subr.bf16.mxu0 %v1646_v53  ;;  %v1739_v52 = vld [vmem:[#allocation3 + $0x6e0] sm:$0xff]  ;;  %v1741_v53 = vld [vmem:[#allocation3 + $0x6f0] sm:$0xff] }
 0x59b   :  { %2443 = vmatpush1.bf16.msra.mxu1 %v1643_v10  ;;  %2607 = vmatpush1.bf16.msra.mxu0 %v1645_v24  ;;  %v1748_v10 = vld [vmem:[#allocation3 + $0x728] sm:$0xff]  ;;  %v1750_v24 = vld [vmem:[#allocation3 + $0x738] sm:$0xff] }
 0x59c   :  { %2453 = vmatprep.subr.bf16.mxu1 %v1652_v55  ;;  %2617 = vmatprep.subr.bf16.mxu0 %v1654_v56  ;;  %v1747_v55 = vld [vmem:[#allocation3 + $0x720] sm:$0xff]  ;;  %v1749_v56 = vld [vmem:[#allocation3 + $0x730] sm:$0xff] }
 0x59e   :  { %2445 = vmatmul.mubr.bf16.vlgmr.msra.gmra.mrb[16].mxu1 %v7295_v40  ;;  %2609 = vmatmul.mubr.bf16.vlgmr.msra.gmra.mrb[20].mxu0 %v7295_v40  ;;  %v1678_v40 = vld [vmem:[#allocation3 + $0x4f8] sm:$0xff] }
 0x59f   :  { %2454 = vmatpush1.bf16.msra.mxu1 %v1651_v4  ;;  %2618 = vmatpush1.bf16.msra.mxu0 %v1653_v57  ;;  %v1756_v4 = vld [vmem:[#allocation3 + $0x768] sm:$0xff]  ;;  %v1758_v57 = vld [vmem:[#allocation3 + $0x778] sm:$0xff] }
 0x5a0   :  { %2455 = vmatprep.subr.bf16.mxu1 %v1660_v26  ;;  %2619 = vmatprep.subr.bf16.mxu0 %v1662_v29  ;;  %v1755_v26 = vld [vmem:[#allocation3 + $0x760] sm:$0xff]  ;;  %v1757_v29 = vld [vmem:[#allocation3 + $0x770] sm:$0xff] }
 0x5a1   :  { %2485 = vmatprep.mubr.bf16.mxu1 %v7299_v44  ;;  %2649 = vmatprep.mubr.bf16.mxu0 %v7299_v44  ;;  %v1683_v44 = vld [vmem:[#allocation3 + $0x520] sm:$0xff] }
 0x5a3   :  { %2456 = vmatpush1.bf16.msra.mxu1 %v1659_v59  ;;  %2620 = vmatpush1.bf16.msra.mxu0 %v1661_v60  ;;  %v1764_v59 = vld [vmem:[#allocation3 + $0x7a8] sm:$0xff]  ;;  %v1766_v60 = vld [vmem:[#allocation3 + $0x7b8] sm:$0xff] }
 0x5a4   :  { %2457 = vmatprep.subr.bf16.mxu1 %v1668_v0  ;;  %2621 = vmatprep.subr.bf16.mxu0 %v1670_v36  ;;  %v1763_v0 = vld [vmem:[#allocation3 + $0x7a0] sm:$0xff]  ;;  %v1765_v36 = vld [vmem:[#allocation3 + $0x7b0] sm:$0xff] }
 0x5a7   :  { %2458 = vmatpush1.bf16.msra.mxu1 %v1667_v63  ;;  %2622 = vmatpush1.bf16.msra.mxu0 %v1669_v5  ;;  %v1772_v63 = vld [vmem:[#allocation3 + $0x7e8] sm:$0xff]  ;;  %v1774_v5 = vld [vmem:[#allocation3 + $0x7f8] sm:$0xff] }
 0x5a8   :  { %2459 = vmatprep.subr.bf16.mxu1 %v1676_v12  ;;  %2623 = vmatprep.subr.bf16.mxu0 %v1678_v40  ;;  %v1771_v12 = vld [vmem:[#allocation3 + $0x7e0] sm:$0xff]  ;;  %v1773_v40 = vld [vmem:[#allocation3 + $0x7f0] sm:$0xff] }
 0x5ab   :  { %2460 = vmatpush1.bf16.msra.mxu1 %v1675_v13  ;;  %2624 = vmatpush1.bf16.msra.mxu0 %v1677_v14  ;;  %v1780_v13 = vld [vmem:[#allocation3 + $0x828] sm:$0xff]  ;;  %v1782_v14 = vld [vmem:[#allocation3 + $0x838] sm:$0xff] }
 0x5ac   :  { %2461 = vmatprep.subr.bf16.mxu1 %v1684_v15  ;;  %2625 = vmatprep.subr.bf16.mxu0 %v1686_v16  ;;  %v1779_v15 = vld [vmem:[#allocation3 + $0x820] sm:$0xff]  ;;  %v1781_v16 = vld [vmem:[#allocation3 + $0x830] sm:$0xff] }
 0x5af   :  { %2462 = vmatpush1.bf16.msra.mxu1 %v1683_v44  ;;  %2626 = vmatpush1.bf16.msra.mxu0 %v1685_v18  ;;  %v1788_v44 = vld [vmem:[#allocation3 + $0x868] sm:$0xff]  ;;  %v1790_v18 = vld [vmem:[#allocation3 + $0x878] sm:$0xff] }
 0x5b0   :  { %2463 = vmatprep.subr.bf16.mxu1 %v1692_v19  ;;  %2627 = vmatprep.subr.bf16.mxu0 %v1694_v20  ;;  %v1787_v19 = vld [vmem:[#allocation3 + $0x860] sm:$0xff]  ;;  %v1789_v20 = vld [vmem:[#allocation3 + $0x870] sm:$0xff] }
 0x5b3   :  { %2464 = vmatpush1.bf16.msra.mxu1 %v1691_v21  ;;  %2628 = vmatpush1.bf16.msra.mxu0 %v1693_v61  ;;  %v1796_v21 = vld [vmem:[#allocation3 + $0x8a8] sm:$0xff]  ;;  %v1798_v61 = vld [vmem:[#allocation3 + $0x8b8] sm:$0xff] }
 0x5b4   :  { %2465 = vmatprep.subr.bf16.mxu1 %v1700_v25  ;;  %2629 = vmatprep.subr.bf16.mxu0 %v1702_v27  ;;  %v1795_v25 = vld [vmem:[#allocation3 + $0x8a0] sm:$0xff]  ;;  %v1797_v27 = vld [vmem:[#allocation3 + $0x8b0] sm:$0xff] }
 0x5b7   :  { %2466 = vmatpush1.bf16.msra.mxu1 %v1699_v28  ;;  %2630 = vmatpush1.bf16.msra.mxu0 %v1701_v2  ;;  %v1804_v28 = vld [vmem:[#allocation3 + $0x8e8] sm:$0xff]  ;;  %v1803_v2 = vld [vmem:[#allocation3 + $0x8e0] sm:$0xff] }
 0x5b8   :  { %2467 = vmatprep.subr.bf16.mxu1 %v1708_v35  ;;  %2631 = vmatprep.subr.bf16.mxu0 %v1710_v37  ;;  %v1805_v35 = vld [vmem:[#allocation3 + $0x8f0] sm:$0xff]  ;;  %v1812_v37 = vld [vmem:[#allocation3 + $0x928] sm:$0xff] }
 0x5bb   :  { %2468 = vmatpush1.bf16.msra.mxu1 %v1707_v38  ;;  %2632 = vmatpush1.bf16.msra.mxu0 %v1709_v39  ;;  %v1814_v38 = vld [vmem:[#allocation3 + $0x938] sm:$0xff]  ;;  %v1813_v39 = vld [vmem:[#allocation3 + $0x930] sm:$0xff] }
 0x5bc   :  { %2469 = vmatprep.subr.bf16.mxu1 %v1716_v41  ;;  %2633 = vmatprep.subr.bf16.mxu0 %v1718_v42  ;;  %v1820_v41 = vld [vmem:[#allocation3 + $0x968] sm:$0xff]  ;;  %v1822_v42 = vld [vmem:[#allocation3 + $0x978] sm:$0xff] }
 0x5bf   :  { %2470 = vmatpush1.bf16.msra.mxu1 %v1715_v3  ;;  %2634 = vmatpush1.bf16.msra.mxu0 %v1717_v43  ;;  %v1819_v3 = vld [vmem:[#allocation3 + $0x960] sm:$0xff]  ;;  %v1821_v43 = vld [vmem:[#allocation3 + $0x970] sm:$0xff] }
 0x5c0   :  { %2471 = vmatprep.subr.bf16.mxu1 %v1724_v45  ;;  %2635 = vmatprep.subr.bf16.mxu0 %v1726_v46  ;;  %v1828_v45 = vld [vmem:[#allocation3 + $0x9a8] sm:$0xff]  ;;  %v1830_v46 = vld [vmem:[#allocation3 + $0x9b8] sm:$0xff] }
 0x5c3   :  { %2472 = vmatpush1.bf16.msra.mxu1 %v1723_v47  ;;  %2636 = vmatpush1.bf16.msra.mxu0 %v1725_v1  ;;  %v1827_v47 = vld [vmem:[#allocation3 + $0x9a0] sm:$0xff]  ;;  %v1829_v1 = vld [vmem:[#allocation3 + $0x9b0] sm:$0xff] }
 0x5c4   :  { %2473 = vmatprep.subr.bf16.mxu1 %v1732_v48  ;;  %2637 = vmatprep.subr.bf16.mxu0 %v1734_v8  ;;  %v1836_v48 = vld [vmem:[#allocation3 + $0x9e8] sm:$0xff]  ;;  %v1838_v8 = vld [vmem:[#allocation3 + $0x9f8] sm:$0xff] }
 0x5c7   :  { %2474 = vmatpush1.bf16.msra.mxu1 %v1731_v62  ;;  %2638 = vmatpush1.bf16.msra.mxu0 %v1733_v49  ;;  %v1835_v62 = vld [vmem:[#allocation3 + $0x9e0] sm:$0xff]  ;;  %v1837_v49 = vld [vmem:[#allocation3 + $0x9f0] sm:$0xff] }
 0x5c8   :  { %2475 = vmatprep.subr.bf16.mxu1 %v1740_v50  ;;  %2639 = vmatprep.subr.bf16.mxu0 %v1742_v51  ;;  %v1844_v50 = vld [vmem:[#allocation3 + $0xa28] sm:$0xff]  ;;  %v1846_v51 = vld [vmem:[#allocation3 + $0xa38] sm:$0xff] }
 0x5cb   :  { %2476 = vmatpush1.bf16.msra.mxu1 %v1739_v52  ;;  %2640 = vmatpush1.bf16.msra.mxu0 %v1741_v53  ;;  %v1843_v52 = vld [vmem:[#allocation3 + $0xa20] sm:$0xff]  ;;  %v1845_v53 = vld [vmem:[#allocation3 + $0xa30] sm:$0xff] }
 0x5cc   :  { %2477 = vmatprep.subr.bf16.mxu1 %v1748_v10  ;;  %2641 = vmatprep.subr.bf16.mxu0 %v1750_v24  ;;  %v1852_v10 = vld [vmem:[#allocation3 + $0xa68] sm:$0xff]  ;;  %v1854_v24 = vld [vmem:[#allocation3 + $0xa78] sm:$0xff] }
 0x5cf   :  { %2478 = vmatpush1.bf16.msra.mxu1 %v1747_v55  ;;  %2642 = vmatpush1.bf16.msra.mxu0 %v1749_v56  ;;  %v1851_v55 = vld [vmem:[#allocation3 + $0xa60] sm:$0xff]  ;;  %v1853_v56 = vld [vmem:[#allocation3 + $0xa70] sm:$0xff] }
 0x5d0   :  { %2479 = vmatprep.subr.bf16.mxu1 %v1756_v4  ;;  %2643 = vmatprep.subr.bf16.mxu0 %v1758_v57  ;;  %v1860_v4 = vld [vmem:[#allocation3 + $0xaa8] sm:$0xff]  ;;  %v1862_v57 = vld [vmem:[#allocation3 + $0xab8] sm:$0xff] }
 0x5d3   :  { %2480 = vmatpush1.bf16.msra.mxu1 %v1755_v26  ;;  %2644 = vmatpush1.bf16.msra.mxu0 %v1757_v29  ;;  %v1859_v26 = vld [vmem:[#allocation3 + $0xaa0] sm:$0xff]  ;;  %v1861_v29 = vld [vmem:[#allocation3 + $0xab0] sm:$0xff] }
 0x5d4   :  { %2481 = vmatprep.subr.bf16.mxu1 %v1764_v59  ;;  %2645 = vmatprep.subr.bf16.mxu0 %v1766_v60  ;;  %v1868_v59 = vld [vmem:[#allocation3 + $0xae8] sm:$0xff]  ;;  %v1870_v60 = vld [vmem:[#allocation3 + $0xaf8] sm:$0xff] }
 0x5d7   :  { %2482 = vmatpush1.bf16.msra.mxu1 %v1763_v0  ;;  %2646 = vmatpush1.bf16.msra.mxu0 %v1765_v36  ;;  %v1867_v0 = vld [vmem:[#allocation3 + $0xae0] sm:$0xff]  ;;  %v1869_v36 = vld [vmem:[#allocation3 + $0xaf0] sm:$0xff] }
 0x5d8   :  { %2483 = vmatprep.subr.bf16.mxu1 %v1772_v63  ;;  %2647 = vmatprep.subr.bf16.mxu0 %v1774_v5  ;;  %v1876_v63 = vld [vmem:[#allocation3 + $0xb28] sm:$0xff]  ;;  %v1878_v5 = vld [vmem:[#allocation3 + $0xb38] sm:$0xff] }
 0x5db   :  { %2484 = vmatpush1.bf16.msra.mxu1 %v1771_v12  ;;  %2648 = vmatpush1.bf16.msra.mxu0 %v1773_v40  ;;  %v1875_v12 = vld [vmem:[#allocation3 + $0xb20] sm:$0xff]  ;;  %v1877_v40 = vld [vmem:[#allocation3 + $0xb30] sm:$0xff] }
 0x5dc   :  { %2494 = vmatprep.subr.bf16.mxu1 %v1780_v13  ;;  %2658 = vmatprep.subr.bf16.mxu0 %v1782_v14  ;;  %v1884_v13 = vld [vmem:[#allocation3 + $0xb68] sm:$0xff]  ;;  %v1886_v14 = vld [vmem:[#allocation3 + $0xb78] sm:$0xff] }
 0x5de   :  { %2486 = vmatmul.mubr.bf16.vlgmr.msra.gmra.mrb[16].mxu1 %v7307_v54  ;;  %2650 = vmatmul.mubr.bf16.vlgmr.msra.gmra.mrb[20].mxu0 %v7307_v54  ;;  %v1806_v54 = vld [vmem:[#allocation3 + $0x8f8] sm:$0xff] }
 0x5df   :  { %2495 = vmatpush1.bf16.msra.mxu1 %v1779_v15  ;;  %2659 = vmatpush1.bf16.msra.mxu0 %v1781_v16  ;;  %v1883_v15 = vld [vmem:[#allocation3 + $0xb60] sm:$0xff]  ;;  %v1885_v16 = vld [vmem:[#allocation3 + $0xb70] sm:$0xff] }
 0x5e0   :  { %2496 = vmatprep.subr.bf16.mxu1 %v1788_v44  ;;  %2660 = vmatprep.subr.bf16.mxu0 %v1790_v18  ;;  %v1892_v44 = vld [vmem:[#allocation3 + $0xba8] sm:$0xff]  ;;  %v1894_v18 = vld [vmem:[#allocation3 + $0xbb8] sm:$0xff] }
 0x5e1   :  { %2526 = vmatprep.mubr.bf16.mxu1 %v7311_v58  ;;  %2690 = vmatprep.mubr.bf16.mxu0 %v7311_v58  ;;  %v1811_v58 = vld [vmem:[#allocation3 + $0x920] sm:$0xff] }
 0x5e3   :  { %2497 = vmatpush1.bf16.msra.mxu1 %v1787_v19  ;;  %2661 = vmatpush1.bf16.msra.mxu0 %v1789_v20  ;;  %v1891_v19 = vld [vmem:[#allocation3 + $0xba0] sm:$0xff]  ;;  %v1893_v20 = vld [vmem:[#allocation3 + $0xbb0] sm:$0xff] }
 0x5e4   :  { %2498 = vmatprep.subr.bf16.mxu1 %v1796_v21  ;;  %2662 = vmatprep.subr.bf16.mxu0 %v1798_v61  ;;  %v1900_v21 = vld [vmem:[#allocation3 + $0xbe8] sm:$0xff]  ;;  %v1902_v61 = vld [vmem:[#allocation3 + $0xbf8] sm:$0xff] }
 0x5e7   :  { %2499 = vmatpush1.bf16.msra.mxu1 %v1795_v25  ;;  %2663 = vmatpush1.bf16.msra.mxu0 %v1797_v27  ;;  %v1899_v25 = vld [vmem:[#allocation3 + $0xbe0] sm:$0xff]  ;;  %v1901_v27 = vld [vmem:[#allocation3 + $0xbf0] sm:$0xff] }
 0x5e8   :  { %2500 = vmatprep.subr.bf16.mxu1 %v1804_v28  ;;  %2664 = vmatprep.subr.bf16.mxu0 %v1806_v54  ;;  %v1908_v28 = vld [vmem:[#allocation3 + $0xc28] sm:$0xff]  ;;  %v1910_v54 = vld [vmem:[#allocation3 + $0xc38] sm:$0xff] }
 0x5eb   :  { %2501 = vmatpush1.bf16.msra.mxu1 %v1803_v2  ;;  %2665 = vmatpush1.bf16.msra.mxu0 %v1805_v35  ;;  %v1907_v2 = vld [vmem:[#allocation3 + $0xc20] sm:$0xff]  ;;  %v1909_v35 = vld [vmem:[#allocation3 + $0xc30] sm:$0xff] }
 0x5ec   :  { %2502 = vmatprep.subr.bf16.mxu1 %v1812_v37  ;;  %2666 = vmatprep.subr.bf16.mxu0 %v1814_v38  ;;  %v1916_v37 = vld [vmem:[#allocation3 + $0xc68] sm:$0xff]  ;;  %v1918_v38 = vld [vmem:[#allocation3 + $0xc78] sm:$0xff] }
 0x5ef   :  { %2503 = vmatpush1.bf16.msra.mxu1 %v1811_v58  ;;  %2667 = vmatpush1.bf16.msra.mxu0 %v1813_v39  ;;  %v1915_v58 = vld [vmem:[#allocation3 + $0xc60] sm:$0xff]  ;;  %v1917_v39 = vld [vmem:[#allocation3 + $0xc70] sm:$0xff] }
 0x5f0   :  { %2504 = vmatprep.subr.bf16.mxu1 %v1820_v41  ;;  %2668 = vmatprep.subr.bf16.mxu0 %v1822_v42  ;;  %v1924_v41 = vld [vmem:[#allocation3 + $0xca8] sm:$0xff]  ;;  %v1926_v42 = vld [vmem:[#allocation3 + $0xcb8] sm:$0xff] }
 0x5f3   :  { %2505 = vmatpush1.bf16.msra.mxu1 %v1819_v3  ;;  %2669 = vmatpush1.bf16.msra.mxu0 %v1821_v43  ;;  %v1923_v3 = vld [vmem:[#allocation3 + $0xca0] sm:$0xff]  ;;  %v1925_v43 = vld [vmem:[#allocation3 + $0xcb0] sm:$0xff] }
 0x5f4   :  { %2506 = vmatprep.subr.bf16.mxu1 %v1828_v45  ;;  %2670 = vmatprep.subr.bf16.mxu0 %v1830_v46  ;;  %v1932_v45 = vld [vmem:[#allocation3 + $0xce8] sm:$0xff] }
 0x5f5   :  { %v2040_v46 = vld [vmem:[#allocation12 + $0x3] ss:$8 sm:$0xf] }
 0x5f7   :  { %2507 = vmatpush1.bf16.msra.mxu1 %v1827_v47  ;;  %2671 = vmatpush1.bf16.msra.mxu0 %v1829_v1  ;;  %v2041_v47 = vld [vmem:[#allocation12 + $0x3] ss:$8 sm:$0xf0] }
 0x5f8   :  { %2508 = vmatprep.subr.bf16.mxu1 %v1836_v48  ;;  %2672 = vmatprep.subr.bf16.mxu0 %v1838_v8  ;;  %v1931_v1 = vld [vmem:[#allocation3 + $0xce0] sm:$0xff]  ;;  %v1933_v48 = vld [vmem:[#allocation3 + $0xcf0] sm:$0xff]  ;;  %v1940_v8 = vld [vmem:[#allocation3 + $0xd28] sm:$0xff] }
 0x5fb   :  { %2509 = vmatpush1.bf16.msra.mxu1 %v1835_v62  ;;  %2673 = vmatpush1.bf16.msra.mxu0 %v1837_v49  ;;  %v1942_v62 = vld [vmem:[#allocation3 + $0xd38] sm:$0xff]  ;;  %v7349_v49 = vor.u32 %v2041_v47, %v2040_v46 }
 0x5fc   :  { %2510 = vmatprep.subr.bf16.mxu1 %v1844_v50  ;;  %2674 = vmatprep.subr.bf16.mxu0 %v1846_v51  ;;  %v1941_v50 = vld [vmem:[#allocation3 + $0xd30] sm:$0xff]  ;;  %v1948_v51 = vld [vmem:[#allocation3 + $0xd68] sm:$0xff] }
 0x5ff   :  { %2511 = vmatpush1.bf16.msra.mxu1 %v1843_v52  ;;  %2675 = vmatpush1.bf16.msra.mxu0 %v1845_v53  ;;  %v1950_v52 = vld [vmem:[#allocation3 + $0xd78] sm:$0xff]  ;;  %v2047_v53 = vrot.slane %v7349_v49, %v7189_v9 }
 0x600   :  { %2512 = vmatprep.subr.bf16.mxu1 %v1852_v10  ;;  %2676 = vmatprep.subr.bf16.mxu0 %v1854_v24  ;;  %v2055_v10 = vrot.slane %v7349_v49, %v7197_v32  ;;  %v2051_v24 = vrot.slane %v7349_v49, %v7192_v11 }
 0x603   :  { %2513 = vmatpush1.bf16.msra.mxu1 %v1851_v55  ;;  %2677 = vmatpush1.bf16.msra.mxu0 %v1853_v56  ;;  %v2059_v55 = vrot.slane %v7349_v49, %v7200_v34  ;;  %v1947_v56 = vld [vmem:[#allocation3 + $0xd60] sm:$0xff] }
 0x604   :  { %2514 = vmatprep.subr.bf16.mxu1 %v1860_v4  ;;  %2678 = vmatprep.subr.bf16.mxu0 %v1862_v57  ;;  %v1949_v4 = vld [vmem:[#allocation3 + $0xd70] sm:$0xff] }
 0x607   :  { %2515 = vmatpush1.bf16.msra.mxu1 %v1859_v26  ;;  %2679 = vmatpush1.bf16.msra.mxu0 %v1861_v29  ;;  %v1956_v29 = vld [vmem:[#allocation3 + $0xda8] sm:$0xff] }
 0x608   :  { %2516 = vmatprep.subr.bf16.mxu1 %v1868_v59  ;;  %2680 = vmatprep.subr.bf16.mxu0 %v1870_v60  ;;  %v1958_v59 = vld [vmem:[#allocation3 + $0xdb8] sm:$0xff] }
 0x60b   :  { %2517 = vmatpush1.bf16.msra.mxu1 %v1867_v0  ;;  %2681 = vmatpush1.bf16.msra.mxu0 %v1869_v36 }
 0x60c   :  { %2518 = vmatprep.subr.bf16.mxu1 %v1876_v63  ;;  %2682 = vmatprep.subr.bf16.mxu0 %v1878_v5 }
 0x60f   :  { %2519 = vmatpush1.bf16.msra.mxu1 %v1875_v12  ;;  %2683 = vmatpush1.bf16.msra.mxu0 %v1877_v40 }
 0x610   :  { %2520 = vmatprep.subr.bf16.mxu1 %v1884_v13  ;;  %2684 = vmatprep.subr.bf16.mxu0 %v1886_v14  ;;  %v1955_v14 = vld [vmem:[#allocation3 + $0xda0] sm:$0xff] }
 0x613   :  { %2521 = vmatpush1.bf16.msra.mxu1 %v1883_v15  ;;  %2685 = vmatpush1.bf16.msra.mxu0 %v1885_v16  ;;  %v1957_v15 = vld [vmem:[#allocation3 + $0xdb0] sm:$0xff] }
 0x614   :  { %2522 = vmatprep.subr.bf16.mxu1 %v1892_v44  ;;  %2686 = vmatprep.subr.bf16.mxu0 %v1894_v18 }
 0x617   :  { %2523 = vmatpush1.bf16.msra.mxu1 %v1891_v19  ;;  %2687 = vmatpush1.bf16.msra.mxu0 %v1893_v20 }
 0x618   :  { %2524 = vmatprep.subr.bf16.mxu1 %v1900_v21  ;;  %2688 = vmatprep.subr.bf16.mxu0 %v1902_v61  ;;  %v1964_v61 = vld [vmem:[#allocation3 + $0xde8] sm:$0xff] }
 0x61b   :  { %2525 = vmatpush1.bf16.msra.mxu1 %v1899_v25  ;;  %2689 = vmatpush1.bf16.msra.mxu0 %v1901_v27  ;;  %v1966_v25 = vld [vmem:[#allocation3 + $0xdf8] sm:$0xff]  ;;  %v1963_v27 = vld [vmem:[#allocation3 + $0xde0] sm:$0xff] }
 0x61c   :  { %2535 = vmatprep.subr.bf16.mxu1 %v1908_v28  ;;  %2699 = vmatprep.subr.bf16.mxu0 %v1910_v54  ;;  %v1965_v28 = vld [vmem:[#allocation3 + $0xdf0] sm:$0xff]  ;;  %v1972_v54 = vld [vmem:[#allocation3 + $0xe28] sm:$0xff] }
 0x61e   :  { %2527 = vmatmul.mubr.bf16.vlgmr.msra.gmra.mrb[16].mxu1 %v7319_v17  ;;  %2691 = vmatmul.mubr.bf16.vlgmr.msra.gmra.mrb[20].mxu0 %v7319_v17  ;;  %v1934_v17 = vld [vmem:[#allocation3 + $0xcf8] sm:$0xff] }
 0x61f   :  { %2536 = vmatpush1.bf16.msra.mxu1 %v1907_v2  ;;  %2700 = vmatpush1.bf16.msra.mxu0 %v1909_v35  ;;  %v1974_v2 = vld [vmem:[#allocation3 + $0xe38] sm:$0xff]  ;;  %v1971_v35 = vld [vmem:[#allocation3 + $0xe20] sm:$0xff] }
 0x620   :  { %2537 = vmatprep.subr.bf16.mxu1 %v1916_v37  ;;  %2701 = vmatprep.subr.bf16.mxu0 %v1918_v38  ;;  %v1973_v37 = vld [vmem:[#allocation3 + $0xe30] sm:$0xff]  ;;  %v1980_v38 = vld [vmem:[#allocation3 + $0xe68] sm:$0xff] }
 0x621   :  { %2567 = vmatprep.mubr.bf16.mxu1 %v7323_v22  ;;  %2731 = vmatprep.mubr.bf16.mxu0 %v7323_v22  ;;  %v1939_v22 = vld [vmem:[#allocation3 + $0xd20] sm:$0xff] }
 0x623   :  { %2538 = vmatpush1.bf16.msra.mxu1 %v1915_v58  ;;  %2702 = vmatpush1.bf16.msra.mxu0 %v1917_v39  ;;  %v1982_v58 = vld [vmem:[#allocation3 + $0xe78] sm:$0xff] }
 0x624   :  { %2539 = vmatprep.subr.bf16.mxu1 %v1924_v41  ;;  %2703 = vmatprep.subr.bf16.mxu0 %v1926_v42  ;;  %v1979_v41 = vld [vmem:[#allocation3 + $0xe60] sm:$0xff]  ;;  %v1981_v42 = vld [vmem:[#allocation3 + $0xe70] sm:$0xff] }
 0x627   :  { %2540 = vmatpush1.bf16.msra.mxu1 %v1923_v3  ;;  %2704 = vmatpush1.bf16.msra.mxu0 %v1925_v43 }
 0x628   :  { %2541 = vmatprep.subr.bf16.mxu1 %v1932_v45  ;;  %2705 = vmatprep.subr.bf16.mxu0 %v1934_v17  ;;  %v1988_v45 = vld [vmem:[#allocation3 + $0xea8] sm:$0xff]  ;;  %v1990_v17 = vld [vmem:[#allocation3 + $0xeb8] sm:$0xff] }
 0x62b   :  { %2542 = vmatpush1.bf16.msra.mxu1 %v1931_v1  ;;  %2706 = vmatpush1.bf16.msra.mxu0 %v1933_v48 }
 0x62c   :  { %2543 = vmatprep.subr.bf16.mxu1 %v1940_v8  ;;  %2707 = vmatprep.subr.bf16.mxu0 %v1942_v62  ;;  %v1987_v62 = vld [vmem:[#allocation3 + $0xea0] sm:$0xff] }
 0x62f   :  { %2544 = vmatpush1.bf16.msra.mxu1 %v1939_v22  ;;  %2708 = vmatpush1.bf16.msra.mxu0 %v1941_v50  ;;  %v1989_v22 = vld [vmem:[#allocation3 + $0xeb0] sm:$0xff]  ;;  %v1996_v50 = vld [vmem:[#allocation3 + $0xee8] sm:$0xff] }
 0x630   :  { %2545 = vmatprep.subr.bf16.mxu1 %v1948_v51  ;;  %2709 = vmatprep.subr.bf16.mxu0 %v1950_v52  ;;  %v1998_v51 = vld [vmem:[#allocation3 + $0xef8] sm:$0xff]  ;;  %v1995_v52 = vld [vmem:[#allocation3 + $0xee0] sm:$0xff] }
 0x631   :  { %v2241_v57 = vpop.f32.mrb[12].mxu1  ;;  %v2405_v26 = vpop.f32.mrb[16].mxu0 }
 0x632   :  { %v7359_v60 = vadd.f32 %v2241_v57, %v2047_v53  ;;  %v7361_v0 = vadd.f32 %v2405_v26, %v2055_v10  ;;  %v2243_v36 = vpop.f32.mrb[13].mxu1  ;;  %v2407_v63 = vpop.f32.mrb[17].mxu0  ;;  %v1997_v53 = vld [vmem:[#allocation3 + $0xef0] sm:$0xff]  ;;  %v2004_v10 = vld [vmem:[#allocation3 + $0xf28] sm:$0xff]  ;;  %v2014_v26 = vld [vmem:[#allocation3 + $0xf78] sm:$0xff] }
 0x633   :  { %v7363_v5 = vadd.f32 %v2243_v36, %v2051_v24  ;;  %v7365_v12 = vadd.f32 %v2407_v63, %v2059_v55  ;;  %v2245_v40 = vpop.f32.mrb[14].mxu1  ;;  %v2409_v13 = vpop.f32.mrb[18].mxu0  ;;  %2546 = vmatpush1.bf16.msra.mxu1 %v1947_v56  ;;  %2710 = vmatpush1.bf16.msra.mxu0 %v1949_v4  ;;  %v2006_v24 = vld [vmem:[#allocation3 + $0xf38] sm:$0xff]  ;;  %v2003_v55 = vld [vmem:[#allocation3 + $0xf20] sm:$0xff]  ;;  %v2005_v56 = vld [vmem:[#allocation3 + $0xf30] sm:$0xff] }
 0x634   :  { %v6246_v16 = vmul.f32 -1.442695, %v7359_v60  ;;  %v6248_v44 = vmul.f32 -1.442695, %v7361_v0  ;;  %v2246_v18 = vpop.f32.mrb[15].mxu1  ;;  %v2410_v19 = vpop.f32.mrb[19].mxu0  ;;  %2547 = vmatprep.subr.bf16.mxu1 %v1956_v29  ;;  %2711 = vmatprep.subr.bf16.mxu0 %v1958_v59 }
 0x635   :  { %v6247_v20 = vmul.f32 -1.442695, %v7363_v5  ;;  %v6249_v21 = vmul.f32 -1.442695, %v7365_v12  ;;  %v2012_v57 = vld [vmem:[#allocation3 + $0xf68] sm:$0xff]  ;;  %v2021_v18 = vld [vmem:[#allocation3 + $0xfb0] sm:$0xff] }
 0x636   :  { %6732 = vpow2.f32 %v6246_v16  ;;  %v2028_v19 = vld [vmem:[#allocation3 + $0xfe8] sm:$0xff] }
 0x637   :  { %6734 = vpow2.f32 %v6248_v44  ;;  %2548 = vmatpush1.bf16.msra.mxu1 %v1955_v14  ;;  %2712 = vmatpush1.bf16.msra.mxu0 %v1957_v15  ;;  %v2011_v14 = vld [vmem:[#allocation3 + $0xf60] sm:$0xff]  ;;  %v2013_v15 = vld [vmem:[#allocation3 + $0xf70] sm:$0xff]  ;;  %v2020_v44 = vld [vmem:[#allocation3 + $0xfa8] sm:$0xff] }
 0x638   :  { %6736 = vpow2.f32 %v6247_v20  ;;  %2549 = vmatprep.subr.bf16.mxu1 %v1964_v61  ;;  %2713 = vmatprep.subr.bf16.mxu0 %v1966_v25  ;;  %v2030_v20 = vld [vmem:[#allocation3 + $0xff8] sm:$0xff]  ;;  %v2071_v61 = vrot.slane %v7349_v49, %v7256_v31  ;;  %v2067_v25 = vrot.slane %v7349_v49, %v7259_v33 }
 0x639   :  { %6738 = vpow2.f32 %v6249_v21  ;;  %v2029_v21 = vld [vmem:[#allocation3 + $0xff0] sm:$0xff] }
 0x63b   :  { %2550 = vmatpush1.bf16.msra.mxu1 %v1963_v27  ;;  %2714 = vmatpush1.bf16.msra.mxu0 %v1965_v28  ;;  %v2075_v27 = vrot.slane %v7349_v49, %v7262_v6 }
 0x63c   :  { %2551 = vmatprep.subr.bf16.mxu1 %v1972_v54  ;;  %2715 = vmatprep.subr.bf16.mxu0 %v1974_v2 }
 0x63f   :  { %2552 = vmatpush1.bf16.msra.mxu1 %v1971_v35  ;;  %2716 = vmatpush1.bf16.msra.mxu0 %v1973_v37 }
 0x640   :  { %v6733_v39 = vpop.eup %6732  ;;  %2553 = vmatprep.subr.bf16.mxu1 %v1980_v38  ;;  %2717 = vmatprep.subr.bf16.mxu0 %v1982_v58 }
 0x641   :  { %v6735_v3 = vpop.eup %6734  ;;  %v2764_v43 = vadd.f32 1.0, %v6733_v39 }
 0x642   :  { %v6737_v46 = vpop.eup %6736  ;;  %v2766_v47 = vadd.f32 1.0, %v6735_v3 }
 0x643   :  { %v6739_v1 = vpop.eup %6738  ;;  %6740 = vrcp.f32 %v2764_v43  ;;  %v2765_v48 = vadd.f32 1.0, %v6737_v46  ;;  %2554 = vmatpush1.bf16.msra.mxu1 %v1979_v41  ;;  %2718 = vmatpush1.bf16.msra.mxu0 %v1981_v42 }
 0x644   :  { %6742 = vrcp.f32 %v2766_v47  ;;  %v2767_v8 = vadd.f32 1.0, %v6739_v1  ;;  %2555 = vmatprep.subr.bf16.mxu1 %v1988_v45  ;;  %2719 = vmatprep.subr.bf16.mxu0 %v1990_v17 }
 0x645   :  { %6744 = vrcp.f32 %v2765_v48 }
 0x646   :  { %6746 = vrcp.f32 %v2767_v8 }
 0x647   :  { %2556 = vmatpush1.bf16.msra.mxu1 %v1987_v62  ;;  %2720 = vmatpush1.bf16.msra.mxu0 %v1989_v22 }
 0x648   :  { %2557 = vmatprep.subr.bf16.mxu1 %v1996_v50  ;;  %2721 = vmatprep.subr.bf16.mxu0 %v1998_v51 }
 0x64b   :  { %2558 = vmatpush1.bf16.msra.mxu1 %v1995_v52  ;;  %2722 = vmatpush1.bf16.msra.mxu0 %v1997_v53 }
 0x64c   :  { %2559 = vmatprep.subr.bf16.mxu1 %v2004_v10  ;;  %2723 = vmatprep.subr.bf16.mxu0 %v2006_v24 }
 0x64d   :  { %v6741_v4 = vpop.eup %6740 }
 0x64e   :  { %v6743_v29 = vpop.eup %6742  ;;  %v7372_v59 = vmul.f32 %v6741_v4, %v7359_v60  ;;  %v2022_v60 = vld [vmem:[#allocation3 + $0xfb8] sm:$0xff] }
 0x64f   :  { %v6745_v36 = vpop.eup %6744  ;;  %v7375_v63 = vmul.f32 %v6743_v29, %v7361_v0  ;;  %2560 = vmatpush1.bf16.msra.mxu1 %v2003_v55  ;;  %2724 = vmatpush1.bf16.msra.mxu0 %v2005_v56  ;;  %v2019_v0 = vld [vmem:[#allocation3 + $0xfa0] sm:$0xff] }
 0x650   :  { %v6747_v40 = vpop.eup %6746  ;;  %v7378_v13 = vmul.f32 %v6745_v36, %v7363_v5  ;;  %2561 = vmatprep.subr.bf16.mxu1 %v2012_v57  ;;  %2725 = vmatprep.subr.bf16.mxu0 %v2014_v26  ;;  %v2027_v5 = vld [vmem:[#allocation3 + $0xfe0] sm:$0xff] }
 0x651   :  { %v7381_v16 = vmul.f32 %v6747_v40, %v7365_v12  ;;  %v2063_v12 = vrot.slane %v7349_v49, %v7253_v30 }
 0x653   :  { %2562 = vmatpush1.bf16.msra.mxu1 %v2011_v14  ;;  %2726 = vmatpush1.bf16.msra.mxu0 %v2013_v15 }
 0x654   :  { %2563 = vmatprep.subr.bf16.mxu1 %v2020_v44  ;;  %2727 = vmatprep.subr.bf16.mxu0 %v2022_v60 }
 0x657   :  { %2564 = vmatpush1.bf16.msra.mxu1 %v2019_v0  ;;  %2728 = vmatpush1.bf16.msra.mxu0 %v2021_v18 }
 0x658   :  { %2565 = vmatprep.subr.bf16.mxu1 %v2028_v19  ;;  %2729 = vmatprep.subr.bf16.mxu0 %v2030_v20 }
 0x65b   :  { %2566 = vmatpush1.bf16.msra.mxu1 %v2027_v5  ;;  %2730 = vmatpush1.bf16.msra.mxu0 %v2029_v21 }
 0x65e   :  { %2568 = vmatmul.mubr.bf16.vlgmr.msra.gmra.mrb[16].mxu1 %v7331_v23  ;;  %2732 = vmatmul.mubr.bf16.vlgmr.msra.gmra.mrb[20].mxu0 %v7331_v23 }
 0x731   :  { %v2569_v28 = vpop.f32.mrb[16].mxu1  ;;  %v2733_v54 = vpop.f32.mrb[20].mxu0 }
 0x732   :  { %v6369_v2 = vadd.f32 %v2569_v28, %v2063_v12  ;;  %v6371_v35 = vadd.f32 %v2733_v54, %v2071_v61  ;;  %v2571_v37 = vpop.f32.mrb[17].mxu1  ;;  %v2735_v38 = vpop.f32.mrb[21].mxu0 }
 0x733   :  { %v6370_v58 = vadd.f32 %v2571_v37, %v2067_v25  ;;  %v6372_v23 = vadd.f32 %v2735_v38, %v2075_v27  ;;  %v2573_v39 = vpop.f32.mrb[18].mxu1  ;;  %v2737_v41 = vpop.f32.mrb[22].mxu0 }
 0x734   :  { %v6250_v42 = vmul.f32 -1.442695, %v6369_v2  ;;  %v6252_v3 = vmul.f32 -1.442695, %v6371_v35  ;;  %v2574_v43 = vpop.f32.mrb[19].mxu1  ;;  %v2738_v45 = vpop.f32.mrb[23].mxu0 }
 0x735   :  { %v6251_v17 = vmul.f32 -1.442695, %v6370_v58  ;;  %v6253_v46 = vmul.f32 -1.442695, %v6372_v23 }
 0x736   :  { %6748 = vpow2.f32 %v6250_v42 }
 0x737   :  { %6750 = vpow2.f32 %v6252_v3 }
 0x738   :  { %6752 = vpow2.f32 %v6251_v17 }
 0x739   :  { %6754 = vpow2.f32 %v6253_v46 }
 0x740   :  { %v6749_v49 = vpop.eup %6748 }
 0x741   :  { %v6751_v47 = vpop.eup %6750  ;;  %v2768_v1 = vadd.f32 1.0, %v6749_v49 }
 0x742   :  { %v6753_v48 = vpop.eup %6752  ;;  %v2770_v8 = vadd.f32 1.0, %v6751_v47 }
 0x743   :  { %v6755_v62 = vpop.eup %6754  ;;  %6756 = vrcp.f32 %v2768_v1  ;;  %v2769_v22 = vadd.f32 1.0, %v6753_v48 }
 0x744   :  { %6758 = vrcp.f32 %v2770_v8  ;;  %v2771_v50 = vadd.f32 1.0, %v6755_v62 }
 0x745   :  { %6760 = vrcp.f32 %v2769_v22 }
 0x746   :  { %6762 = vrcp.f32 %v2771_v50 }
 0x74d   :  { %v6757_v51 = vpop.eup %6756 }
 0x74e   :  { %v6759_v52 = vpop.eup %6758  ;;  %v7393_v53 = vmul.f32 %v6757_v51, %v6369_v2 }
 0x74f   :  { %v6761_v10 = vpop.eup %6760  ;;  %v7395_v24 = vmul.f32 %v6759_v52, %v6371_v35 }
 0x750   :  { %v6763_v55 = vpop.eup %6762  ;;  %v7397_v56 = vmul.f32 %v6761_v10, %v6370_v58 }
 0x751   :  { %v7399_v4 = vmul.f32 %v6763_v55, %v6372_v23 }
 0x752   :  { %6996 = dma.done.wait [#allocation5 + $0x2], 65536 }
 0x753   :  { %6997 = vsyncadd [#allocation5 + $0x2], 4294901760  ;;  %v7403_v57 = vpack.c.bf16 %v7378_v13, %v7378_v13  ;;  %2814 = sst [smem:[#allocation24]] %s7013_s24  ;;  %s7030_s7 = smov [#allocation5 + $0x3]  }
 0x754   :  { %2816 = sst [smem:[#allocation24 + $0x1]] %s7013_s24  ;;  %s7031_s24 = smov [#allocation23]  }
 0x755   :  { %3430 = vmatprep.mubr.bf16.mxu1 %v7403_v57  ;;  %3594 = vmatprep.mubr.bf16.mxu0 %v7403_v57  ;;  %2818 = sst [smem:[#allocation24 + $0x2]] %s7014_s4 }
 0x756   :  { %2820 = sst [smem:[#allocation24 + $0x3]] %s7010_s21 }
 0x757   :  { %2822 = sst [smem:[#allocation24 + $0x4]] %s7015_s26 }
 0x758   :  { %2824 = sst [smem:[#allocation24 + $0x5]] %s7016_s27 }
 0x759   :  { %2826 = sst [smem:[#allocation24 + $0x6]] %s7017_s28 }
 0x75a   :  { %2828 = sst [smem:[#allocation24 + $0x7]] %s7010_s21 }
 0x75b   :  { %2830 = sst [smem:[#allocation24 + $0x8]] %s7018_s29 }
 0x75c   :  { %2832 = dma.general %s7786_s8, 65536, %s124_s1, %s7030_s7, %s7031_s24, [#allocation24], %s7144_s16, 0  }
 0x75d   :  { %v2834_v26 = vld [vmem:[#allocation3 + $0x1008] sm:$0xff]  ;;  %v2836_v29 = vld [vmem:[#allocation3 + $0x1018] sm:$0xff]  ;;  %v2833_v36 = vld [vmem:[#allocation3 + $0x1000] sm:$0xff] }
 0x75e   :  { %3398 = vmatprep.subr.bf16.mxu1 %v2834_v26  ;;  %3562 = vmatprep.subr.bf16.mxu0 %v2836_v29  ;;  %v2835_v40 = vld [vmem:[#allocation3 + $0x1010] sm:$0xff]  ;;  %v2842_v13 = vld [vmem:[#allocation3 + $0x1048] sm:$0xff]  ;;  %v2844_v14 = vld [vmem:[#allocation3 + $0x1058] sm:$0xff] }
 0x75f   :  { %3399 = vmatpush1.bf16.msra.mxu1 %v2833_v36  ;;  %3563 = vmatpush1.bf16.msra.mxu0 %v2835_v40  ;;  %v2841_v15 = vld [vmem:[#allocation3 + $0x1040] sm:$0xff]  ;;  %v2843_v44 = vld [vmem:[#allocation3 + $0x1050] sm:$0xff]  ;;  %v2850_v60 = vld [vmem:[#allocation3 + $0x1088] sm:$0xff] }
 0x760   :  { %3400 = vmatprep.subr.bf16.mxu1 %v2842_v13  ;;  %3564 = vmatprep.subr.bf16.mxu0 %v2844_v14  ;;  %v2852_v0 = vld [vmem:[#allocation3 + $0x1098] sm:$0xff]  ;;  %v2849_v18 = vld [vmem:[#allocation3 + $0x1080] sm:$0xff]  ;;  %v2851_v19 = vld [vmem:[#allocation3 + $0x1090] sm:$0xff] }
 0x761   :  { %v2858_v20 = vld [vmem:[#allocation3 + $0x10c8] sm:$0xff]  ;;  %v2860_v5 = vld [vmem:[#allocation3 + $0x10d8] sm:$0xff]  ;;  %v2857_v21 = vld [vmem:[#allocation3 + $0x10c0] sm:$0xff] }
 0x762   :  { %v2859_v12 = vld [vmem:[#allocation3 + $0x10d0] sm:$0xff]  ;;  %v2866_v61 = vld [vmem:[#allocation3 + $0x1108] sm:$0xff]  ;;  %v2868_v25 = vld [vmem:[#allocation3 + $0x1118] sm:$0xff] }
 0x763   :  { %3401 = vmatpush1.bf16.msra.mxu1 %v2841_v15  ;;  %3565 = vmatpush1.bf16.msra.mxu0 %v2843_v44  ;;  %v2865_v27 = vld [vmem:[#allocation3 + $0x1100] sm:$0xff]  ;;  %v2867_v28 = vld [vmem:[#allocation3 + $0x1110] sm:$0xff]  ;;  %v2874_v54 = vld [vmem:[#allocation3 + $0x1148] sm:$0xff] }
 0x764   :  { %3402 = vmatprep.subr.bf16.mxu1 %v2850_v60  ;;  %3566 = vmatprep.subr.bf16.mxu0 %v2852_v0  ;;  %v2876_v2 = vld [vmem:[#allocation3 + $0x1158] sm:$0xff]  ;;  %v2873_v35 = vld [vmem:[#allocation3 + $0x1140] sm:$0xff]  ;;  %v2875_v37 = vld [vmem:[#allocation3 + $0x1150] sm:$0xff] }
 0x765   :  { %v2882_v38 = vld [vmem:[#allocation3 + $0x1188] sm:$0xff]  ;;  %v2884_v58 = vld [vmem:[#allocation3 + $0x1198] sm:$0xff]  ;;  %v2881_v23 = vld [vmem:[#allocation3 + $0x1180] sm:$0xff] }
 0x766   :  { %v2883_v39 = vld [vmem:[#allocation3 + $0x1190] sm:$0xff]  ;;  %v2890_v41 = vld [vmem:[#allocation3 + $0x11c8] sm:$0xff]  ;;  %v2892_v42 = vld [vmem:[#allocation3 + $0x11d8] sm:$0xff] }
 0x767   :  { %3403 = vmatpush1.bf16.msra.mxu1 %v2849_v18  ;;  %3567 = vmatpush1.bf16.msra.mxu0 %v2851_v19  ;;  %v2889_v3 = vld [vmem:[#allocation3 + $0x11c0] sm:$0xff]  ;;  %v2891_v43 = vld [vmem:[#allocation3 + $0x11d0] sm:$0xff]  ;;  %v2898_v45 = vld [vmem:[#allocation3 + $0x1208] sm:$0xff] }
 0x768   :  { %3404 = vmatprep.subr.bf16.mxu1 %v2858_v20  ;;  %3568 = vmatprep.subr.bf16.mxu0 %v2860_v5  ;;  %v2900_v17 = vld [vmem:[#allocation3 + $0x1218] sm:$0xff]  ;;  %v2897_v46 = vld [vmem:[#allocation3 + $0x1200] sm:$0xff]  ;;  %v2899_v49 = vld [vmem:[#allocation3 + $0x1210] sm:$0xff] }
 0x769   :  { %v2906_v47 = vld [vmem:[#allocation3 + $0x1248] sm:$0xff]  ;;  %v2908_v1 = vld [vmem:[#allocation3 + $0x1258] sm:$0xff]  ;;  %v2905_v48 = vld [vmem:[#allocation3 + $0x1240] sm:$0xff] }
 0x76a   :  { %v2907_v8 = vld [vmem:[#allocation3 + $0x1250] sm:$0xff]  ;;  %v2914_v62 = vld [vmem:[#allocation3 + $0x1288] sm:$0xff]  ;;  %v2916_v22 = vld [vmem:[#allocation3 + $0x1298] sm:$0xff] }
 0x76b   :  { %3405 = vmatpush1.bf16.msra.mxu1 %v2857_v21  ;;  %3569 = vmatpush1.bf16.msra.mxu0 %v2859_v12  ;;  %v2913_v50 = vld [vmem:[#allocation3 + $0x1280] sm:$0xff]  ;;  %v2915_v51 = vld [vmem:[#allocation3 + $0x1290] sm:$0xff]  ;;  %v2922_v52 = vld [vmem:[#allocation3 + $0x12c8] sm:$0xff] }
 0x76c   :  { %3406 = vmatprep.subr.bf16.mxu1 %v2866_v61  ;;  %3570 = vmatprep.subr.bf16.mxu0 %v2868_v25  ;;  %v2924_v10 = vld [vmem:[#allocation3 + $0x12d8] sm:$0xff]  ;;  %v2921_v55 = vld [vmem:[#allocation3 + $0x12c0] sm:$0xff]  ;;  %v2923_v26 = vld [vmem:[#allocation3 + $0x12d0] sm:$0xff] }
 0x76d   :  { %v2930_v29 = vld [vmem:[#allocation3 + $0x1308] sm:$0xff]  ;;  %v2932_v36 = vld [vmem:[#allocation3 + $0x1318] sm:$0xff]  ;;  %v2929_v40 = vld [vmem:[#allocation3 + $0x1300] sm:$0xff] }
 0x76e   :  { %v2931_v13 = vld [vmem:[#allocation3 + $0x1310] sm:$0xff]  ;;  %v2938_v14 = vld [vmem:[#allocation3 + $0x1348] sm:$0xff]  ;;  %v2940_v15 = vld [vmem:[#allocation3 + $0x1358] sm:$0xff] }
 0x76f   :  { %3407 = vmatpush1.bf16.msra.mxu1 %v2865_v27  ;;  %3571 = vmatpush1.bf16.msra.mxu0 %v2867_v28  ;;  %v2937_v44 = vld [vmem:[#allocation3 + $0x1340] sm:$0xff]  ;;  %v2939_v60 = vld [vmem:[#allocation3 + $0x1350] sm:$0xff]  ;;  %v2946_v0 = vld [vmem:[#allocation3 + $0x1388] sm:$0xff]  ;;  %v7424_v28 = vpack.c.bf16 %v7372_v59, %v7372_v59 }
 0x770   :  { %3408 = vmatprep.subr.bf16.mxu1 %v2874_v54  ;;  %3572 = vmatprep.subr.bf16.mxu0 %v2876_v2  ;;  %v2948_v18 = vld [vmem:[#allocation3 + $0x1398] sm:$0xff]  ;;  %v2945_v19 = vld [vmem:[#allocation3 + $0x1380] sm:$0xff]  ;;  %v2947_v20 = vld [vmem:[#allocation3 + $0x1390] sm:$0xff] }
 0x771   :  { %v2954_v5 = vld [vmem:[#allocation3 + $0x13c8] sm:$0xff]  ;;  %v2956_v21 = vld [vmem:[#allocation3 + $0x13d8] sm:$0xff]  ;;  %v2953_v12 = vld [vmem:[#allocation3 + $0x13c0] sm:$0xff] }
 0x772   :  { %v2955_v61 = vld [vmem:[#allocation3 + $0x13d0] sm:$0xff]  ;;  %v2962_v25 = vld [vmem:[#allocation3 + $0x1408] sm:$0xff]  ;;  %v2964_v27 = vld [vmem:[#allocation3 + $0x1418] sm:$0xff] }
 0x773   :  { %3409 = vmatpush1.bf16.msra.mxu1 %v2873_v35  ;;  %3573 = vmatpush1.bf16.msra.mxu0 %v2875_v37  ;;  %v2961_v54 = vld [vmem:[#allocation3 + $0x1400] sm:$0xff]  ;;  %v2963_v2 = vld [vmem:[#allocation3 + $0x1410] sm:$0xff]  ;;  %v2970_v35 = vld [vmem:[#allocation3 + $0x1448] sm:$0xff] }
 0x774   :  { %3410 = vmatprep.subr.bf16.mxu1 %v2882_v38  ;;  %3574 = vmatprep.subr.bf16.mxu0 %v2884_v58  ;;  %v2972_v37 = vld [vmem:[#allocation3 + $0x1458] sm:$0xff]  ;;  %v7428_v38 = vpack.c.bf16 %v7381_v16, %v7381_v16  ;;  %v2969_v59 = vld [vmem:[#allocation3 + $0x1440] sm:$0xff]  ;;  %v2971_v58 = vld [vmem:[#allocation3 + $0x1450] sm:$0xff] }
 0x775   :  { %v2977_v16 = vld [vmem:[#allocation3 + $0x1480] sm:$0xff] }
 0x777   :  { %3411 = vmatpush1.bf16.msra.mxu1 %v2881_v23  ;;  %3575 = vmatpush1.bf16.msra.mxu0 %v2883_v39  ;;  %v2978_v23 = vld [vmem:[#allocation3 + $0x1488] sm:$0xff]  ;;  %v2980_v39 = vld [vmem:[#allocation3 + $0x1498] sm:$0xff] }
 0x778   :  { %3412 = vmatprep.subr.bf16.mxu1 %v2890_v41  ;;  %3576 = vmatprep.subr.bf16.mxu0 %v2892_v42  ;;  %v2979_v41 = vld [vmem:[#allocation3 + $0x1490] sm:$0xff]  ;;  %v2986_v42 = vld [vmem:[#allocation3 + $0x14c8] sm:$0xff] }
 0x77b   :  { %3413 = vmatpush1.bf16.msra.mxu1 %v2889_v3  ;;  %3577 = vmatpush1.bf16.msra.mxu0 %v2891_v43  ;;  %v2988_v3 = vld [vmem:[#allocation3 + $0x14d8] sm:$0xff]  ;;  %v2985_v43 = vld [vmem:[#allocation3 + $0x14c0] sm:$0xff] }
 0x77c   :  { %3414 = vmatprep.subr.bf16.mxu1 %v2898_v45  ;;  %3578 = vmatprep.subr.bf16.mxu0 %v2900_v17  ;;  %v2987_v45 = vld [vmem:[#allocation3 + $0x14d0] sm:$0xff]  ;;  %v2994_v17 = vld [vmem:[#allocation3 + $0x1508] sm:$0xff] }
 0x77f   :  { %3415 = vmatpush1.bf16.msra.mxu1 %v2897_v46  ;;  %3579 = vmatpush1.bf16.msra.mxu0 %v2899_v49  ;;  %v2996_v46 = vld [vmem:[#allocation3 + $0x1518] sm:$0xff]  ;;  %v2993_v49 = vld [vmem:[#allocation3 + $0x1500] sm:$0xff] }
 0x780   :  { %3416 = vmatprep.subr.bf16.mxu1 %v2906_v47  ;;  %3580 = vmatprep.subr.bf16.mxu0 %v2908_v1  ;;  %v2995_v47 = vld [vmem:[#allocation3 + $0x1510] sm:$0xff]  ;;  %v3002_v1 = vld [vmem:[#allocation3 + $0x1548] sm:$0xff] }
 0x783   :  { %3417 = vmatpush1.bf16.msra.mxu1 %v2905_v48  ;;  %3581 = vmatpush1.bf16.msra.mxu0 %v2907_v8  ;;  %v3004_v48 = vld [vmem:[#allocation3 + $0x1558] sm:$0xff]  ;;  %v3001_v8 = vld [vmem:[#allocation3 + $0x1540] sm:$0xff] }
 0x784   :  { %3418 = vmatprep.subr.bf16.mxu1 %v2914_v62  ;;  %3582 = vmatprep.subr.bf16.mxu0 %v2916_v22  ;;  %v3003_v62 = vld [vmem:[#allocation3 + $0x1550] sm:$0xff]  ;;  %v3010_v22 = vld [vmem:[#allocation3 + $0x1588] sm:$0xff] }
 0x787   :  { %3419 = vmatpush1.bf16.msra.mxu1 %v2913_v50  ;;  %3583 = vmatpush1.bf16.msra.mxu0 %v2915_v51  ;;  %v3012_v50 = vld [vmem:[#allocation3 + $0x1598] sm:$0xff]  ;;  %v3009_v51 = vld [vmem:[#allocation3 + $0x1580] sm:$0xff] }
 0x788   :  { %3420 = vmatprep.subr.bf16.mxu1 %v2922_v52  ;;  %3584 = vmatprep.subr.bf16.mxu0 %v2924_v10  ;;  %v3011_v52 = vld [vmem:[#allocation3 + $0x1590] sm:$0xff]  ;;  %v3018_v10 = vld [vmem:[#allocation3 + $0x15c8] sm:$0xff] }
 0x78b   :  { %3421 = vmatpush1.bf16.msra.mxu1 %v2921_v55  ;;  %3585 = vmatpush1.bf16.msra.mxu0 %v2923_v26  ;;  %v3020_v55 = vld [vmem:[#allocation3 + $0x15d8] sm:$0xff]  ;;  %v3017_v26 = vld [vmem:[#allocation3 + $0x15c0] sm:$0xff] }
 0x78c   :  { %3422 = vmatprep.subr.bf16.mxu1 %v2930_v29  ;;  %3586 = vmatprep.subr.bf16.mxu0 %v2932_v36  ;;  %v3019_v29 = vld [vmem:[#allocation3 + $0x15d0] sm:$0xff]  ;;  %v3026_v36 = vld [vmem:[#allocation3 + $0x1608] sm:$0xff] }
 0x78f   :  { %3423 = vmatpush1.bf16.msra.mxu1 %v2929_v40  ;;  %3587 = vmatpush1.bf16.msra.mxu0 %v2931_v13  ;;  %v3028_v40 = vld [vmem:[#allocation3 + $0x1618] sm:$0xff]  ;;  %v3025_v13 = vld [vmem:[#allocation3 + $0x1600] sm:$0xff] }
 0x790   :  { %3424 = vmatprep.subr.bf16.mxu1 %v2938_v14  ;;  %3588 = vmatprep.subr.bf16.mxu0 %v2940_v15  ;;  %v3027_v14 = vld [vmem:[#allocation3 + $0x1610] sm:$0xff]  ;;  %v3034_v15 = vld [vmem:[#allocation3 + $0x1648] sm:$0xff] }
 0x793   :  { %3425 = vmatpush1.bf16.msra.mxu1 %v2937_v44  ;;  %3589 = vmatpush1.bf16.msra.mxu0 %v2939_v60  ;;  %v3036_v44 = vld [vmem:[#allocation3 + $0x1658] sm:$0xff]  ;;  %v3033_v60 = vld [vmem:[#allocation3 + $0x1640] sm:$0xff] }
 0x794   :  { %3426 = vmatprep.subr.bf16.mxu1 %v2946_v0  ;;  %3590 = vmatprep.subr.bf16.mxu0 %v2948_v18  ;;  %v3035_v0 = vld [vmem:[#allocation3 + $0x1650] sm:$0xff]  ;;  %v3042_v18 = vld [vmem:[#allocation3 + $0x1688] sm:$0xff] }
 0x797   :  { %3427 = vmatpush1.bf16.msra.mxu1 %v2945_v19  ;;  %3591 = vmatpush1.bf16.msra.mxu0 %v2947_v20  ;;  %v3044_v19 = vld [vmem:[#allocation3 + $0x1698] sm:$0xff]  ;;  %v3041_v20 = vld [vmem:[#allocation3 + $0x1680] sm:$0xff] }
 0x798   :  { %3428 = vmatprep.subr.bf16.mxu1 %v2954_v5  ;;  %3592 = vmatprep.subr.bf16.mxu0 %v2956_v21  ;;  %v3043_v5 = vld [vmem:[#allocation3 + $0x1690] sm:$0xff]  ;;  %v3050_v21 = vld [vmem:[#allocation3 + $0x16c8] sm:$0xff] }
 0x79b   :  { %3429 = vmatpush1.bf16.msra.mxu1 %v2953_v12  ;;  %3593 = vmatpush1.bf16.msra.mxu0 %v2955_v61  ;;  %v3052_v12 = vld [vmem:[#allocation3 + $0x16d8] sm:$0xff]  ;;  %v3049_v61 = vld [vmem:[#allocation3 + $0x16c0] sm:$0xff] }
 0x79c   :  { %3439 = vmatprep.subr.bf16.mxu1 %v2962_v25  ;;  %3603 = vmatprep.subr.bf16.mxu0 %v2964_v27  ;;  %v3051_v25 = vld [vmem:[#allocation3 + $0x16d0] sm:$0xff]  ;;  %v3058_v27 = vld [vmem:[#allocation3 + $0x1708] sm:$0xff] }
 0x79e   :  { %3431 = vmatmul.mubr.bf16.vlgmr.msra.gmra.mrb[20].mxu1 %v7424_v28  ;;  %3595 = vmatmul.mubr.bf16.vlgmr.msra.gmra.mrb[24].mxu0 %v7424_v28 }
 0x79f   :  { %3440 = vmatpush1.bf16.msra.mxu1 %v2961_v54  ;;  %3604 = vmatpush1.bf16.msra.mxu0 %v2963_v2  ;;  %v3060_v54 = vld [vmem:[#allocation3 + $0x1718] sm:$0xff]  ;;  %v3057_v2 = vld [vmem:[#allocation3 + $0x1700] sm:$0xff] }
 0x7a0   :  { %3441 = vmatprep.subr.bf16.mxu1 %v2970_v35  ;;  %3605 = vmatprep.subr.bf16.mxu0 %v2972_v37  ;;  %v3059_v35 = vld [vmem:[#allocation3 + $0x1710] sm:$0xff]  ;;  %v3066_v37 = vld [vmem:[#allocation3 + $0x1748] sm:$0xff] }
 0x7a1   :  { %3471 = vmatprep.mubr.bf16.mxu1 %v7428_v38  ;;  %3635 = vmatprep.mubr.bf16.mxu0 %v7428_v38 }
 0x7a3   :  { %3442 = vmatpush1.bf16.msra.mxu1 %v2969_v59  ;;  %3606 = vmatpush1.bf16.msra.mxu0 %v2971_v58  ;;  %v3068_v59 = vld [vmem:[#allocation3 + $0x1758] sm:$0xff]  ;;  %v3065_v58 = vld [vmem:[#allocation3 + $0x1740] sm:$0xff] }
 0x7a4   :  { %3443 = vmatprep.subr.bf16.mxu1 %v2978_v23  ;;  %3607 = vmatprep.subr.bf16.mxu0 %v2980_v39  ;;  %v3067_v23 = vld [vmem:[#allocation3 + $0x1750] sm:$0xff]  ;;  %v3074_v39 = vld [vmem:[#allocation3 + $0x1788] sm:$0xff] }
 0x7a7   :  { %3444 = vmatpush1.bf16.msra.mxu1 %v2977_v16  ;;  %3608 = vmatpush1.bf16.msra.mxu0 %v2979_v41  ;;  %v3076_v16 = vld [vmem:[#allocation3 + $0x1798] sm:$0xff]  ;;  %v3073_v41 = vld [vmem:[#allocation3 + $0x1780] sm:$0xff] }
 0x7a8   :  { %3445 = vmatprep.subr.bf16.mxu1 %v2986_v42  ;;  %3609 = vmatprep.subr.bf16.mxu0 %v2988_v3  ;;  %v3075_v42 = vld [vmem:[#allocation3 + $0x1790] sm:$0xff]  ;;  %v3082_v3 = vld [vmem:[#allocation3 + $0x17c8] sm:$0xff] }
 0x7ab   :  { %3446 = vmatpush1.bf16.msra.mxu1 %v2985_v43  ;;  %3610 = vmatpush1.bf16.msra.mxu0 %v2987_v45  ;;  %v3084_v43 = vld [vmem:[#allocation3 + $0x17d8] sm:$0xff]  ;;  %v3081_v45 = vld [vmem:[#allocation3 + $0x17c0] sm:$0xff] }
 0x7ac   :  { %3447 = vmatprep.subr.bf16.mxu1 %v2994_v17  ;;  %3611 = vmatprep.subr.bf16.mxu0 %v2996_v46  ;;  %v3083_v17 = vld [vmem:[#allocation3 + $0x17d0] sm:$0xff]  ;;  %v3090_v46 = vld [vmem:[#allocation3 + $0x1808] sm:$0xff] }
 0x7af   :  { %3448 = vmatpush1.bf16.msra.mxu1 %v2993_v49  ;;  %3612 = vmatpush1.bf16.msra.mxu0 %v2995_v47  ;;  %v3092_v49 = vld [vmem:[#allocation3 + $0x1818] sm:$0xff]  ;;  %v7436_v47 = vpack.c.bf16 %v7375_v63, %v7375_v63  ;;  %v3097_v63 = vld [vmem:[#allocation3 + $0x1840] sm:$0xff] }
 0x7b0   :  { %3449 = vmatprep.subr.bf16.mxu1 %v3002_v1  ;;  %3613 = vmatprep.subr.bf16.mxu0 %v3004_v48  ;;  %v3089_v1 = vld [vmem:[#allocation3 + $0x1800] sm:$0xff]  ;;  %v3091_v48 = vld [vmem:[#allocation3 + $0x1810] sm:$0xff] }
 0x7b3   :  { %3450 = vmatpush1.bf16.msra.mxu1 %v3001_v8  ;;  %3614 = vmatpush1.bf16.msra.mxu0 %v3003_v62  ;;  %v3098_v8 = vld [vmem:[#allocation3 + $0x1848] sm:$0xff]  ;;  %v3100_v62 = vld [vmem:[#allocation3 + $0x1858] sm:$0xff] }
 0x7b4   :  { %3451 = vmatprep.subr.bf16.mxu1 %v3010_v22  ;;  %3615 = vmatprep.subr.bf16.mxu0 %v3012_v50  ;;  %v7440_v22 = vpack.c.bf16 %v7397_v56, %v7397_v56  ;;  %v3099_v50 = vld [vmem:[#allocation3 + $0x1850] sm:$0xff]  ;;  %v3105_v56 = vld [vmem:[#allocation3 + $0x1880] sm:$0xff] }
 0x7b7   :  { %3452 = vmatpush1.bf16.msra.mxu1 %v3009_v51  ;;  %3616 = vmatpush1.bf16.msra.mxu0 %v3011_v52  ;;  %v3106_v51 = vld [vmem:[#allocation3 + $0x1888] sm:$0xff]  ;;  %v3108_v52 = vld [vmem:[#allocation3 + $0x1898] sm:$0xff] }
 0x7b8   :  { %3453 = vmatprep.subr.bf16.mxu1 %v3018_v10  ;;  %3617 = vmatprep.subr.bf16.mxu0 %v3020_v55  ;;  %v3107_v10 = vld [vmem:[#allocation3 + $0x1890] sm:$0xff]  ;;  %v3114_v55 = vld [vmem:[#allocation3 + $0x18c8] sm:$0xff] }
 0x7bb   :  { %3454 = vmatpush1.bf16.msra.mxu1 %v3017_v26  ;;  %3618 = vmatpush1.bf16.msra.mxu0 %v3019_v29  ;;  %v3116_v26 = vld [vmem:[#allocation3 + $0x18d8] sm:$0xff]  ;;  %v3113_v29 = vld [vmem:[#allocation3 + $0x18c0] sm:$0xff] }
 0x7bc   :  { %3455 = vmatprep.subr.bf16.mxu1 %v3026_v36  ;;  %3619 = vmatprep.subr.bf16.mxu0 %v3028_v40  ;;  %v3115_v36 = vld [vmem:[#allocation3 + $0x18d0] sm:$0xff]  ;;  %v3122_v40 = vld [vmem:[#allocation3 + $0x1908] sm:$0xff] }
 0x7bf   :  { %3456 = vmatpush1.bf16.msra.mxu1 %v3025_v13  ;;  %3620 = vmatpush1.bf16.msra.mxu0 %v3027_v14  ;;  %v3124_v13 = vld [vmem:[#allocation3 + $0x1918] sm:$0xff]  ;;  %v3121_v14 = vld [vmem:[#allocation3 + $0x1900] sm:$0xff] }
 0x7c0   :  { %3457 = vmatprep.subr.bf16.mxu1 %v3034_v15  ;;  %3621 = vmatprep.subr.bf16.mxu0 %v3036_v44  ;;  %v3123_v15 = vld [vmem:[#allocation3 + $0x1910] sm:$0xff]  ;;  %v3130_v44 = vld [vmem:[#allocation3 + $0x1948] sm:$0xff] }
 0x7c3   :  { %3458 = vmatpush1.bf16.msra.mxu1 %v3033_v60  ;;  %3622 = vmatpush1.bf16.msra.mxu0 %v3035_v0  ;;  %v3132_v60 = vld [vmem:[#allocation3 + $0x1958] sm:$0xff]  ;;  %v3129_v0 = vld [vmem:[#allocation3 + $0x1940] sm:$0xff] }
 0x7c4   :  { %3459 = vmatprep.subr.bf16.mxu1 %v3042_v18  ;;  %3623 = vmatprep.subr.bf16.mxu0 %v3044_v19  ;;  %v3131_v18 = vld [vmem:[#allocation3 + $0x1950] sm:$0xff]  ;;  %v3138_v19 = vld [vmem:[#allocation3 + $0x1988] sm:$0xff] }
 0x7c7   :  { %3460 = vmatpush1.bf16.msra.mxu1 %v3041_v20  ;;  %3624 = vmatpush1.bf16.msra.mxu0 %v3043_v5  ;;  %v3140_v20 = vld [vmem:[#allocation3 + $0x1998] sm:$0xff]  ;;  %v3137_v5 = vld [vmem:[#allocation3 + $0x1980] sm:$0xff] }
 0x7c8   :  { %3461 = vmatprep.subr.bf16.mxu1 %v3050_v21  ;;  %3625 = vmatprep.subr.bf16.mxu0 %v3052_v12  ;;  %v3139_v21 = vld [vmem:[#allocation3 + $0x1990] sm:$0xff]  ;;  %v3146_v12 = vld [vmem:[#allocation3 + $0x19c8] sm:$0xff] }
 0x7cb   :  { %3462 = vmatpush1.bf16.msra.mxu1 %v3049_v61  ;;  %3626 = vmatpush1.bf16.msra.mxu0 %v3051_v25  ;;  %v3148_v61 = vld [vmem:[#allocation3 + $0x19d8] sm:$0xff]  ;;  %v3145_v25 = vld [vmem:[#allocation3 + $0x19c0] sm:$0xff] }
 0x7cc   :  { %3463 = vmatprep.subr.bf16.mxu1 %v3058_v27  ;;  %3627 = vmatprep.subr.bf16.mxu0 %v3060_v54  ;;  %v3147_v27 = vld [vmem:[#allocation3 + $0x19d0] sm:$0xff]  ;;  %v3154_v54 = vld [vmem:[#allocation3 + $0x1a08] sm:$0xff] }
 0x7cf   :  { %3464 = vmatpush1.bf16.msra.mxu1 %v3057_v2  ;;  %3628 = vmatpush1.bf16.msra.mxu0 %v3059_v35  ;;  %v3156_v2 = vld [vmem:[#allocation3 + $0x1a18] sm:$0xff]  ;;  %v3153_v35 = vld [vmem:[#allocation3 + $0x1a00] sm:$0xff] }
 0x7d0   :  { %3465 = vmatprep.subr.bf16.mxu1 %v3066_v37  ;;  %3629 = vmatprep.subr.bf16.mxu0 %v3068_v59  ;;  %v3155_v37 = vld [vmem:[#allocation3 + $0x1a10] sm:$0xff]  ;;  %v3162_v59 = vld [vmem:[#allocation3 + $0x1a48] sm:$0xff] }
 0x7d3   :  { %3466 = vmatpush1.bf16.msra.mxu1 %v3065_v58  ;;  %3630 = vmatpush1.bf16.msra.mxu0 %v3067_v23  ;;  %v3164_v58 = vld [vmem:[#allocation3 + $0x1a58] sm:$0xff]  ;;  %v3161_v23 = vld [vmem:[#allocation3 + $0x1a40] sm:$0xff] }
 0x7d4   :  { %3467 = vmatprep.subr.bf16.mxu1 %v3074_v39  ;;  %3631 = vmatprep.subr.bf16.mxu0 %v3076_v16  ;;  %v3163_v39 = vld [vmem:[#allocation3 + $0x1a50] sm:$0xff]  ;;  %v3170_v16 = vld [vmem:[#allocation3 + $0x1a88] sm:$0xff] }
 0x7d7   :  { %3468 = vmatpush1.bf16.msra.mxu1 %v3073_v41  ;;  %3632 = vmatpush1.bf16.msra.mxu0 %v3075_v42  ;;  %v3172_v41 = vld [vmem:[#allocation3 + $0x1a98] sm:$0xff]  ;;  %v3169_v42 = vld [vmem:[#allocation3 + $0x1a80] sm:$0xff] }
 0x7d8   :  { %3469 = vmatprep.subr.bf16.mxu1 %v3082_v3  ;;  %3633 = vmatprep.subr.bf16.mxu0 %v3084_v43  ;;  %v3171_v3 = vld [vmem:[#allocation3 + $0x1a90] sm:$0xff]  ;;  %v3178_v43 = vld [vmem:[#allocation3 + $0x1ac8] sm:$0xff] }
 0x7db   :  { %3470 = vmatpush1.bf16.msra.mxu1 %v3081_v45  ;;  %3634 = vmatpush1.bf16.msra.mxu0 %v3083_v17  ;;  %v3180_v45 = vld [vmem:[#allocation3 + $0x1ad8] sm:$0xff]  ;;  %v3177_v17 = vld [vmem:[#allocation3 + $0x1ac0] sm:$0xff] }
 0x7dc   :  { %3480 = vmatprep.subr.bf16.mxu1 %v3090_v46  ;;  %3644 = vmatprep.subr.bf16.mxu0 %v3092_v49  ;;  %v3179_v46 = vld [vmem:[#allocation3 + $0x1ad0] sm:$0xff]  ;;  %v3186_v49 = vld [vmem:[#allocation3 + $0x1b08] sm:$0xff] }
 0x7de   :  { %3472 = vmatmul.mubr.bf16.vlgmr.msra.gmra.mrb[20].mxu1 %v7436_v47  ;;  %3636 = vmatmul.mubr.bf16.vlgmr.msra.gmra.mrb[24].mxu0 %v7436_v47 }
 0x7df   :  { %3481 = vmatpush1.bf16.msra.mxu1 %v3089_v1  ;;  %3645 = vmatpush1.bf16.msra.mxu0 %v3091_v48  ;;  %v3188_v1 = vld [vmem:[#allocation3 + $0x1b18] sm:$0xff]  ;;  %v3185_v48 = vld [vmem:[#allocation3 + $0x1b00] sm:$0xff] }
 0x7e0   :  { %3482 = vmatprep.subr.bf16.mxu1 %v3098_v8  ;;  %3646 = vmatprep.subr.bf16.mxu0 %v3100_v62  ;;  %v3187_v8 = vld [vmem:[#allocation3 + $0x1b10] sm:$0xff]  ;;  %v3194_v62 = vld [vmem:[#allocation3 + $0x1b48] sm:$0xff] }
 0x7e1   :  { %3512 = vmatprep.mubr.bf16.mxu1 %v7440_v22  ;;  %3676 = vmatprep.mubr.bf16.mxu0 %v7440_v22 }
 0x7e3   :  { %3483 = vmatpush1.bf16.msra.mxu1 %v3097_v63  ;;  %3647 = vmatpush1.bf16.msra.mxu0 %v3099_v50  ;;  %v3196_v63 = vld [vmem:[#allocation3 + $0x1b58] sm:$0xff]  ;;  %v3193_v50 = vld [vmem:[#allocation3 + $0x1b40] sm:$0xff] }
 0x7e4   :  { %3484 = vmatprep.subr.bf16.mxu1 %v3106_v51  ;;  %3648 = vmatprep.subr.bf16.mxu0 %v3108_v52  ;;  %v3195_v51 = vld [vmem:[#allocation3 + $0x1b50] sm:$0xff]  ;;  %v3202_v52 = vld [vmem:[#allocation3 + $0x1b88] sm:$0xff] }
 0x7e7   :  { %3485 = vmatpush1.bf16.msra.mxu1 %v3105_v56  ;;  %3649 = vmatpush1.bf16.msra.mxu0 %v3107_v10  ;;  %v3204_v56 = vld [vmem:[#allocation3 + $0x1b98] sm:$0xff]  ;;  %v3201_v10 = vld [vmem:[#allocation3 + $0x1b80] sm:$0xff] }
 0x7e8   :  { %3486 = vmatprep.subr.bf16.mxu1 %v3114_v55  ;;  %3650 = vmatprep.subr.bf16.mxu0 %v3116_v26  ;;  %v3203_v55 = vld [vmem:[#allocation3 + $0x1b90] sm:$0xff]  ;;  %v3210_v26 = vld [vmem:[#allocation3 + $0x1bc8] sm:$0xff] }
 0x7eb   :  { %3487 = vmatpush1.bf16.msra.mxu1 %v3113_v29  ;;  %3651 = vmatpush1.bf16.msra.mxu0 %v3115_v36  ;;  %v3212_v29 = vld [vmem:[#allocation3 + $0x1bd8] sm:$0xff]  ;;  %v3209_v36 = vld [vmem:[#allocation3 + $0x1bc0] sm:$0xff] }
 0x7ec   :  { %3488 = vmatprep.subr.bf16.mxu1 %v3122_v40  ;;  %3652 = vmatprep.subr.bf16.mxu0 %v3124_v13  ;;  %v3211_v40 = vld [vmem:[#allocation3 + $0x1bd0] sm:$0xff]  ;;  %v3218_v13 = vld [vmem:[#allocation3 + $0x1c08] sm:$0xff] }
 0x7ef   :  { %3489 = vmatpush1.bf16.msra.mxu1 %v3121_v14  ;;  %3653 = vmatpush1.bf16.msra.mxu0 %v3123_v15  ;;  %v3220_v14 = vld [vmem:[#allocation3 + $0x1c18] sm:$0xff]  ;;  %v7448_v15 = vpack.c.bf16 %v7393_v53, %v7393_v53  ;;  %v3225_v53 = vld [vmem:[#allocation3 + $0x1c40] sm:$0xff] }
 0x7f0   :  { %3490 = vmatprep.subr.bf16.mxu1 %v3130_v44  ;;  %3654 = vmatprep.subr.bf16.mxu0 %v3132_v60  ;;  %v3217_v44 = vld [vmem:[#allocation3 + $0x1c00] sm:$0xff]  ;;  %v3219_v60 = vld [vmem:[#allocation3 + $0x1c10] sm:$0xff] }
 0x7f3   :  { %3491 = vmatpush1.bf16.msra.mxu1 %v3129_v0  ;;  %3655 = vmatpush1.bf16.msra.mxu0 %v3131_v18  ;;  %v3226_v0 = vld [vmem:[#allocation3 + $0x1c48] sm:$0xff]  ;;  %v3228_v18 = vld [vmem:[#allocation3 + $0x1c58] sm:$0xff] }
 0x7f4   :  { %3492 = vmatprep.subr.bf16.mxu1 %v3138_v19  ;;  %3656 = vmatprep.subr.bf16.mxu0 %v3140_v20  ;;  %v7452_v19 = vpack.c.bf16 %v7399_v4, %v7399_v4  ;;  %v3227_v20 = vld [vmem:[#allocation3 + $0x1c50] sm:$0xff]  ;;  %v3233_v4 = vld [vmem:[#allocation3 + $0x1c80] sm:$0xff] }
 0x7f7   :  { %3493 = vmatpush1.bf16.msra.mxu1 %v3137_v5  ;;  %3657 = vmatpush1.bf16.msra.mxu0 %v3139_v21  ;;  %v3234_v5 = vld [vmem:[#allocation3 + $0x1c88] sm:$0xff]  ;;  %v3236_v21 = vld [vmem:[#allocation3 + $0x1c98] sm:$0xff] }
 0x7f8   :  { %3494 = vmatprep.subr.bf16.mxu1 %v3146_v12  ;;  %3658 = vmatprep.subr.bf16.mxu0 %v3148_v61  ;;  %v3235_v12 = vld [vmem:[#allocation3 + $0x1c90] sm:$0xff]  ;;  %v3242_v61 = vld [vmem:[#allocation3 + $0x1cc8] sm:$0xff] }
 0x7fb   :  { %3495 = vmatpush1.bf16.msra.mxu1 %v3145_v25  ;;  %3659 = vmatpush1.bf16.msra.mxu0 %v3147_v27  ;;  %v3244_v25 = vld [vmem:[#allocation3 + $0x1cd8] sm:$0xff]  ;;  %v3241_v27 = vld [vmem:[#allocation3 + $0x1cc0] sm:$0xff] }
 0x7fc   :  { %3496 = vmatprep.subr.bf16.mxu1 %v3154_v54  ;;  %3660 = vmatprep.subr.bf16.mxu0 %v3156_v2  ;;  %v3243_v54 = vld [vmem:[#allocation3 + $0x1cd0] sm:$0xff]  ;;  %v3250_v2 = vld [vmem:[#allocation3 + $0x1d08] sm:$0xff] }
 0x7ff   :  { %3497 = vmatpush1.bf16.msra.mxu1 %v3153_v35  ;;  %3661 = vmatpush1.bf16.msra.mxu0 %v3155_v37  ;;  %v3252_v35 = vld [vmem:[#allocation3 + $0x1d18] sm:$0xff]  ;;  %v3249_v37 = vld [vmem:[#allocation3 + $0x1d00] sm:$0xff] }
 0x800   :  { %3498 = vmatprep.subr.bf16.mxu1 %v3162_v59  ;;  %3662 = vmatprep.subr.bf16.mxu0 %v3164_v58  ;;  %v3251_v59 = vld [vmem:[#allocation3 + $0x1d10] sm:$0xff]  ;;  %v3258_v58 = vld [vmem:[#allocation3 + $0x1d48] sm:$0xff] }
 0x803   :  { %3499 = vmatpush1.bf16.msra.mxu1 %v3161_v23  ;;  %3663 = vmatpush1.bf16.msra.mxu0 %v3163_v39  ;;  %v3260_v23 = vld [vmem:[#allocation3 + $0x1d58] sm:$0xff]  ;;  %v3257_v39 = vld [vmem:[#allocation3 + $0x1d40] sm:$0xff] }
 0x804   :  { %3500 = vmatprep.subr.bf16.mxu1 %v3170_v16  ;;  %3664 = vmatprep.subr.bf16.mxu0 %v3172_v41  ;;  %v3259_v16 = vld [vmem:[#allocation3 + $0x1d50] sm:$0xff]  ;;  %v3266_v41 = vld [vmem:[#allocation3 + $0x1d88] sm:$0xff] }
 0x807   :  { %3501 = vmatpush1.bf16.msra.mxu1 %v3169_v42  ;;  %3665 = vmatpush1.bf16.msra.mxu0 %v3171_v3  ;;  %v3268_v42 = vld [vmem:[#allocation3 + $0x1d98] sm:$0xff]  ;;  %v3265_v3 = vld [vmem:[#allocation3 + $0x1d80] sm:$0xff] }
 0x808   :  { %3502 = vmatprep.subr.bf16.mxu1 %v3178_v43  ;;  %3666 = vmatprep.subr.bf16.mxu0 %v3180_v45  ;;  %v3267_v43 = vld [vmem:[#allocation3 + $0x1d90] sm:$0xff]  ;;  %v3274_v45 = vld [vmem:[#allocation3 + $0x1dc8] sm:$0xff] }
 0x80b   :  { %3503 = vmatpush1.bf16.msra.mxu1 %v3177_v17  ;;  %3667 = vmatpush1.bf16.msra.mxu0 %v3179_v46  ;;  %v3276_v17 = vld [vmem:[#allocation3 + $0x1dd8] sm:$0xff]  ;;  %v3273_v46 = vld [vmem:[#allocation3 + $0x1dc0] sm:$0xff] }
 0x80c   :  { %3504 = vmatprep.subr.bf16.mxu1 %v3186_v49  ;;  %3668 = vmatprep.subr.bf16.mxu0 %v3188_v1  ;;  %v3275_v49 = vld [vmem:[#allocation3 + $0x1dd0] sm:$0xff]  ;;  %v3282_v1 = vld [vmem:[#allocation3 + $0x1e08] sm:$0xff] }
 0x80f   :  { %3505 = vmatpush1.bf16.msra.mxu1 %v3185_v48  ;;  %3669 = vmatpush1.bf16.msra.mxu0 %v3187_v8  ;;  %v3284_v48 = vld [vmem:[#allocation3 + $0x1e18] sm:$0xff]  ;;  %v3281_v8 = vld [vmem:[#allocation3 + $0x1e00] sm:$0xff] }
 0x810   :  { %3506 = vmatprep.subr.bf16.mxu1 %v3194_v62  ;;  %3670 = vmatprep.subr.bf16.mxu0 %v3196_v63  ;;  %v3283_v62 = vld [vmem:[#allocation3 + $0x1e10] sm:$0xff]  ;;  %v3290_v63 = vld [vmem:[#allocation3 + $0x1e48] sm:$0xff] }
 0x813   :  { %3507 = vmatpush1.bf16.msra.mxu1 %v3193_v50  ;;  %3671 = vmatpush1.bf16.msra.mxu0 %v3195_v51  ;;  %v3292_v50 = vld [vmem:[#allocation3 + $0x1e58] sm:$0xff]  ;;  %v3289_v51 = vld [vmem:[#allocation3 + $0x1e40] sm:$0xff] }
 0x814   :  { %3508 = vmatprep.subr.bf16.mxu1 %v3202_v52  ;;  %3672 = vmatprep.subr.bf16.mxu0 %v3204_v56  ;;  %v3291_v52 = vld [vmem:[#allocation3 + $0x1e50] sm:$0xff]  ;;  %v3298_v56 = vld [vmem:[#allocation3 + $0x1e88] sm:$0xff] }
 0x817   :  { %3509 = vmatpush1.bf16.msra.mxu1 %v3201_v10  ;;  %3673 = vmatpush1.bf16.msra.mxu0 %v3203_v55  ;;  %v3300_v10 = vld [vmem:[#allocation3 + $0x1e98] sm:$0xff]  ;;  %v3297_v55 = vld [vmem:[#allocation3 + $0x1e80] sm:$0xff] }
 0x818   :  { %3510 = vmatprep.subr.bf16.mxu1 %v3210_v26  ;;  %3674 = vmatprep.subr.bf16.mxu0 %v3212_v29  ;;  %v3299_v26 = vld [vmem:[#allocation3 + $0x1e90] sm:$0xff]  ;;  %v3306_v29 = vld [vmem:[#allocation3 + $0x1ec8] sm:$0xff] }
 0x81b   :  { %3511 = vmatpush1.bf16.msra.mxu1 %v3209_v36  ;;  %3675 = vmatpush1.bf16.msra.mxu0 %v3211_v40  ;;  %v3308_v36 = vld [vmem:[#allocation3 + $0x1ed8] sm:$0xff]  ;;  %v3305_v40 = vld [vmem:[#allocation3 + $0x1ec0] sm:$0xff] }
 0x81c   :  { %3521 = vmatprep.subr.bf16.mxu1 %v3218_v13  ;;  %3685 = vmatprep.subr.bf16.mxu0 %v3220_v14  ;;  %v3307_v13 = vld [vmem:[#allocation3 + $0x1ed0] sm:$0xff]  ;;  %v3314_v14 = vld [vmem:[#allocation3 + $0x1f08] sm:$0xff] }
 0x81e   :  { %3513 = vmatmul.mubr.bf16.vlgmr.msra.gmra.mrb[20].mxu1 %v7448_v15  ;;  %3677 = vmatmul.mubr.bf16.vlgmr.msra.gmra.mrb[24].mxu0 %v7448_v15 }
 0x81f   :  { %3522 = vmatpush1.bf16.msra.mxu1 %v3217_v44  ;;  %3686 = vmatpush1.bf16.msra.mxu0 %v3219_v60  ;;  %v3316_v44 = vld [vmem:[#allocation3 + $0x1f18] sm:$0xff]  ;;  %v3313_v60 = vld [vmem:[#allocation3 + $0x1f00] sm:$0xff] }
 0x820   :  { %3523 = vmatprep.subr.bf16.mxu1 %v3226_v0  ;;  %3687 = vmatprep.subr.bf16.mxu0 %v3228_v18  ;;  %v3315_v0 = vld [vmem:[#allocation3 + $0x1f10] sm:$0xff]  ;;  %v3322_v18 = vld [vmem:[#allocation3 + $0x1f48] sm:$0xff] }
 0x821   :  { %3553 = vmatprep.mubr.bf16.mxu1 %v7452_v19  ;;  %3717 = vmatprep.mubr.bf16.mxu0 %v7452_v19 }
 0x823   :  { %3524 = vmatpush1.bf16.msra.mxu1 %v3225_v53  ;;  %3688 = vmatpush1.bf16.msra.mxu0 %v3227_v20  ;;  %v3324_v53 = vld [vmem:[#allocation3 + $0x1f58] sm:$0xff]  ;;  %v3321_v20 = vld [vmem:[#allocation3 + $0x1f40] sm:$0xff] }
 0x824   :  { %3525 = vmatprep.subr.bf16.mxu1 %v3234_v5  ;;  %3689 = vmatprep.subr.bf16.mxu0 %v3236_v21  ;;  %v3323_v5 = vld [vmem:[#allocation3 + $0x1f50] sm:$0xff]  ;;  %v3330_v21 = vld [vmem:[#allocation3 + $0x1f88] sm:$0xff] }
 0x827   :  { %3526 = vmatpush1.bf16.msra.mxu1 %v3233_v4  ;;  %3690 = vmatpush1.bf16.msra.mxu0 %v3235_v12  ;;  %v3332_v4 = vld [vmem:[#allocation3 + $0x1f98] sm:$0xff]  ;;  %v3329_v12 = vld [vmem:[#allocation3 + $0x1f80] sm:$0xff] }
 0x828   :  { %3527 = vmatprep.subr.bf16.mxu1 %v3242_v61  ;;  %3691 = vmatprep.subr.bf16.mxu0 %v3244_v25  ;;  %v3331_v61 = vld [vmem:[#allocation3 + $0x1f90] sm:$0xff]  ;;  %v3338_v25 = vld [vmem:[#allocation3 + $0x1fc8] sm:$0xff] }
 0x82b   :  { %3528 = vmatpush1.bf16.msra.mxu1 %v3241_v27  ;;  %3692 = vmatpush1.bf16.msra.mxu0 %v3243_v54  ;;  %v3340_v27 = vld [vmem:[#allocation3 + $0x1fd8] sm:$0xff]  ;;  %v3337_v54 = vld [vmem:[#allocation3 + $0x1fc0] sm:$0xff] }
 0x82c   :  { %3529 = vmatprep.subr.bf16.mxu1 %v3250_v2  ;;  %3693 = vmatprep.subr.bf16.mxu0 %v3252_v35  ;;  %v3339_v2 = vld [vmem:[#allocation3 + $0x1fd0] sm:$0xff]  ;;  %v2838_v35 = vld [vmem:[#allocation3 + $0x1028] sm:$0xff] }
 0x82f   :  { %3530 = vmatpush1.bf16.msra.mxu1 %v3249_v37  ;;  %3694 = vmatpush1.bf16.msra.mxu0 %v3251_v59  ;;  %v2840_v37 = vld [vmem:[#allocation3 + $0x1038] sm:$0xff]  ;;  %v7460_v59 = vpack.c.bf16 %v7395_v24, %v7395_v24  ;;  %v2854_v24 = vld [vmem:[#allocation3 + $0x10a8] sm:$0xff] }
 0x830   :  { %3531 = vmatprep.subr.bf16.mxu1 %v3258_v58  ;;  %3695 = vmatprep.subr.bf16.mxu0 %v3260_v23  ;;  %v2837_v58 = vld [vmem:[#allocation3 + $0x1020] sm:$0xff]  ;;  %v2839_v23 = vld [vmem:[#allocation3 + $0x1030] sm:$0xff] }
 0x833   :  { %3532 = vmatpush1.bf16.msra.mxu1 %v3257_v39  ;;  %3696 = vmatpush1.bf16.msra.mxu0 %v3259_v16  ;;  %v2846_v39 = vld [vmem:[#allocation3 + $0x1068] sm:$0xff]  ;;  %v2848_v16 = vld [vmem:[#allocation3 + $0x1078] sm:$0xff] }
 0x834   :  { %3533 = vmatprep.subr.bf16.mxu1 %v3266_v41  ;;  %3697 = vmatprep.subr.bf16.mxu0 %v3268_v42  ;;  %v2845_v41 = vld [vmem:[#allocation3 + $0x1060] sm:$0xff]  ;;  %v2847_v42 = vld [vmem:[#allocation3 + $0x1070] sm:$0xff] }
 0x837   :  { %3534 = vmatpush1.bf16.msra.mxu1 %v3265_v3  ;;  %3698 = vmatpush1.bf16.msra.mxu0 %v3267_v43  ;;  %v2856_v3 = vld [vmem:[#allocation3 + $0x10b8] sm:$0xff]  ;;  %v2853_v43 = vld [vmem:[#allocation3 + $0x10a0] sm:$0xff] }
 0x838   :  { %3535 = vmatprep.subr.bf16.mxu1 %v3274_v45  ;;  %3699 = vmatprep.subr.bf16.mxu0 %v3276_v17  ;;  %v2855_v45 = vld [vmem:[#allocation3 + $0x10b0] sm:$0xff]  ;;  %v2862_v17 = vld [vmem:[#allocation3 + $0x10e8] sm:$0xff] }
 0x83b   :  { %3536 = vmatpush1.bf16.msra.mxu1 %v3273_v46  ;;  %3700 = vmatpush1.bf16.msra.mxu0 %v3275_v49  ;;  %v2864_v46 = vld [vmem:[#allocation3 + $0x10f8] sm:$0xff]  ;;  %v2861_v49 = vld [vmem:[#allocation3 + $0x10e0] sm:$0xff] }
 0x83c   :  { %3537 = vmatprep.subr.bf16.mxu1 %v3282_v1  ;;  %3701 = vmatprep.subr.bf16.mxu0 %v3284_v48  ;;  %v2863_v1 = vld [vmem:[#allocation3 + $0x10f0] sm:$0xff]  ;;  %v2870_v48 = vld [vmem:[#allocation3 + $0x1128] sm:$0xff] }
 0x83f   :  { %3538 = vmatpush1.bf16.msra.mxu1 %v3281_v8  ;;  %3702 = vmatpush1.bf16.msra.mxu0 %v3283_v62  ;;  %v2872_v8 = vld [vmem:[#allocation3 + $0x1138] sm:$0xff]  ;;  %v2871_v62 = vld [vmem:[#allocation3 + $0x1130] sm:$0xff] }
 0x840   :  { %3539 = vmatprep.subr.bf16.mxu1 %v3290_v63  ;;  %3703 = vmatprep.subr.bf16.mxu0 %v3292_v50  ;;  %v2878_v63 = vld [vmem:[#allocation3 + $0x1168] sm:$0xff]  ;;  %v2880_v50 = vld [vmem:[#allocation3 + $0x1178] sm:$0xff] }
 0x843   :  { %3540 = vmatpush1.bf16.msra.mxu1 %v3289_v51  ;;  %3704 = vmatpush1.bf16.msra.mxu0 %v3291_v52  ;;  %v2877_v51 = vld [vmem:[#allocation3 + $0x1160] sm:$0xff]  ;;  %v2879_v52 = vld [vmem:[#allocation3 + $0x1170] sm:$0xff] }
 0x844   :  { %3541 = vmatprep.subr.bf16.mxu1 %v3298_v56  ;;  %3705 = vmatprep.subr.bf16.mxu0 %v3300_v10  ;;  %v2886_v56 = vld [vmem:[#allocation3 + $0x11a8] sm:$0xff]  ;;  %v2888_v10 = vld [vmem:[#allocation3 + $0x11b8] sm:$0xff] }
 0x847   :  { %3542 = vmatpush1.bf16.msra.mxu1 %v3297_v55  ;;  %3706 = vmatpush1.bf16.msra.mxu0 %v3299_v26  ;;  %v2885_v55 = vld [vmem:[#allocation3 + $0x11a0] sm:$0xff]  ;;  %v2887_v26 = vld [vmem:[#allocation3 + $0x11b0] sm:$0xff] }
 0x848   :  { %3543 = vmatprep.subr.bf16.mxu1 %v3306_v29  ;;  %3707 = vmatprep.subr.bf16.mxu0 %v3308_v36  ;;  %v2894_v29 = vld [vmem:[#allocation3 + $0x11e8] sm:$0xff]  ;;  %v2896_v36 = vld [vmem:[#allocation3 + $0x11f8] sm:$0xff] }
 0x84b   :  { %3544 = vmatpush1.bf16.msra.mxu1 %v3305_v40  ;;  %3708 = vmatpush1.bf16.msra.mxu0 %v3307_v13  ;;  %v2893_v40 = vld [vmem:[#allocation3 + $0x11e0] sm:$0xff]  ;;  %v2895_v13 = vld [vmem:[#allocation3 + $0x11f0] sm:$0xff] }
 0x84c   :  { %3545 = vmatprep.subr.bf16.mxu1 %v3314_v14  ;;  %3709 = vmatprep.subr.bf16.mxu0 %v3316_v44  ;;  %v2902_v14 = vld [vmem:[#allocation3 + $0x1228] sm:$0xff]  ;;  %v2904_v44 = vld [vmem:[#allocation3 + $0x1238] sm:$0xff] }
 0x84f   :  { %3546 = vmatpush1.bf16.msra.mxu1 %v3313_v60  ;;  %3710 = vmatpush1.bf16.msra.mxu0 %v3315_v0  ;;  %v2901_v60 = vld [vmem:[#allocation3 + $0x1220] sm:$0xff]  ;;  %v2903_v0 = vld [vmem:[#allocation3 + $0x1230] sm:$0xff] }
 0x850   :  { %3547 = vmatprep.subr.bf16.mxu1 %v3322_v18  ;;  %3711 = vmatprep.subr.bf16.mxu0 %v3324_v53  ;;  %v2910_v18 = vld [vmem:[#allocation3 + $0x1268] sm:$0xff]  ;;  %v2912_v53 = vld [vmem:[#allocation3 + $0x1278] sm:$0xff] }
 0x853   :  { %3548 = vmatpush1.bf16.msra.mxu1 %v3321_v20  ;;  %3712 = vmatpush1.bf16.msra.mxu0 %v3323_v5  ;;  %v2909_v20 = vld [vmem:[#allocation3 + $0x1260] sm:$0xff]  ;;  %v2911_v5 = vld [vmem:[#allocation3 + $0x1270] sm:$0xff] }
 0x854   :  { %3549 = vmatprep.subr.bf16.mxu1 %v3330_v21  ;;  %3713 = vmatprep.subr.bf16.mxu0 %v3332_v4  ;;  %v2918_v21 = vld [vmem:[#allocation3 + $0x12a8] sm:$0xff]  ;;  %v2920_v4 = vld [vmem:[#allocation3 + $0x12b8] sm:$0xff] }
 0x857   :  { %3550 = vmatpush1.bf16.msra.mxu1 %v3329_v12  ;;  %3714 = vmatpush1.bf16.msra.mxu0 %v3331_v61  ;;  %v2917_v12 = vld [vmem:[#allocation3 + $0x12a0] sm:$0xff]  ;;  %v2919_v61 = vld [vmem:[#allocation3 + $0x12b0] sm:$0xff] }
 0x858   :  { %3551 = vmatprep.subr.bf16.mxu1 %v3338_v25  ;;  %3715 = vmatprep.subr.bf16.mxu0 %v3340_v27  ;;  %v2926_v25 = vld [vmem:[#allocation3 + $0x12e8] sm:$0xff]  ;;  %v2928_v27 = vld [vmem:[#allocation3 + $0x12f8] sm:$0xff] }
 0x85b   :  { %3552 = vmatpush1.bf16.msra.mxu1 %v3337_v54  ;;  %3716 = vmatpush1.bf16.msra.mxu0 %v3339_v2  ;;  %v2925_v54 = vld [vmem:[#allocation3 + $0x12e0] sm:$0xff]  ;;  %v2927_v2 = vld [vmem:[#allocation3 + $0x12f0] sm:$0xff] }
 0x85c   :  { %3726 = vmatprep.subr.bf16.mxu1 %v2838_v35  ;;  %3890 = vmatprep.subr.bf16.mxu0 %v2840_v37  ;;  %v2934_v35 = vld [vmem:[#allocation3 + $0x1328] sm:$0xff]  ;;  %v2936_v37 = vld [vmem:[#allocation3 + $0x1338] sm:$0xff] }
 0x85e   :  { %3554 = vmatmul.mubr.bf16.vlgmr.msra.gmra.mrb[20].mxu1 %v7460_v59  ;;  %3718 = vmatmul.mubr.bf16.vlgmr.msra.gmra.mrb[24].mxu0 %v7460_v59 }
 0x85f   :  { %3727 = vmatpush1.bf16.msra.mxu1 %v2837_v58  ;;  %3891 = vmatpush1.bf16.msra.mxu0 %v2839_v23  ;;  %v2933_v58 = vld [vmem:[#allocation3 + $0x1320] sm:$0xff]  ;;  %v2935_v23 = vld [vmem:[#allocation3 + $0x1330] sm:$0xff] }
 0x860   :  { %3728 = vmatprep.subr.bf16.mxu1 %v2846_v39  ;;  %3892 = vmatprep.subr.bf16.mxu0 %v2848_v16  ;;  %v2942_v39 = vld [vmem:[#allocation3 + $0x1368] sm:$0xff]  ;;  %v2944_v16 = vld [vmem:[#allocation3 + $0x1378] sm:$0xff] }
 0x861   :  { %3758 = vmatprep.mubr.bf16.mxu1 %v7403_v57  ;;  %3922 = vmatprep.mubr.bf16.mxu0 %v7403_v57  ;;  %v2869_v57 = vld [vmem:[#allocation3 + $0x1120] sm:$0xff] }
 0x863   :  { %3729 = vmatpush1.bf16.msra.mxu1 %v2845_v41  ;;  %3893 = vmatpush1.bf16.msra.mxu0 %v2847_v42  ;;  %v2941_v41 = vld [vmem:[#allocation3 + $0x1360] sm:$0xff]  ;;  %v2943_v42 = vld [vmem:[#allocation3 + $0x1370] sm:$0xff] }
 0x864   :  { %3730 = vmatprep.subr.bf16.mxu1 %v2854_v24  ;;  %3894 = vmatprep.subr.bf16.mxu0 %v2856_v3  ;;  %v2950_v24 = vld [vmem:[#allocation3 + $0x13a8] sm:$0xff]  ;;  %v2952_v3 = vld [vmem:[#allocation3 + $0x13b8] sm:$0xff] }
 0x867   :  { %3731 = vmatpush1.bf16.msra.mxu1 %v2853_v43  ;;  %3895 = vmatpush1.bf16.msra.mxu0 %v2855_v45  ;;  %v2949_v43 = vld [vmem:[#allocation3 + $0x13a0] sm:$0xff]  ;;  %v2951_v45 = vld [vmem:[#allocation3 + $0x13b0] sm:$0xff] }
 0x868   :  { %3732 = vmatprep.subr.bf16.mxu1 %v2862_v17  ;;  %3896 = vmatprep.subr.bf16.mxu0 %v2864_v46  ;;  %v2958_v17 = vld [vmem:[#allocation3 + $0x13e8] sm:$0xff]  ;;  %v2960_v46 = vld [vmem:[#allocation3 + $0x13f8] sm:$0xff] }
 0x86b   :  { %3733 = vmatpush1.bf16.msra.mxu1 %v2861_v49  ;;  %3897 = vmatpush1.bf16.msra.mxu0 %v2863_v1  ;;  %v2957_v49 = vld [vmem:[#allocation3 + $0x13e0] sm:$0xff]  ;;  %v2959_v1 = vld [vmem:[#allocation3 + $0x13f0] sm:$0xff] }
 0x86c   :  { %3734 = vmatprep.subr.bf16.mxu1 %v2870_v48  ;;  %3898 = vmatprep.subr.bf16.mxu0 %v2872_v8  ;;  %v2966_v48 = vld [vmem:[#allocation3 + $0x1428] sm:$0xff]  ;;  %v2968_v8 = vld [vmem:[#allocation3 + $0x1438] sm:$0xff] }
 0x86f   :  { %3735 = vmatpush1.bf16.msra.mxu1 %v2869_v57  ;;  %3899 = vmatpush1.bf16.msra.mxu0 %v2871_v62  ;;  %v2965_v57 = vld [vmem:[#allocation3 + $0x1420] sm:$0xff]  ;;  %v2967_v62 = vld [vmem:[#allocation3 + $0x1430] sm:$0xff] }
 0x870   :  { %3736 = vmatprep.subr.bf16.mxu1 %v2878_v63  ;;  %3900 = vmatprep.subr.bf16.mxu0 %v2880_v50  ;;  %v2974_v63 = vld [vmem:[#allocation3 + $0x1468] sm:$0xff]  ;;  %v2976_v50 = vld [vmem:[#allocation3 + $0x1478] sm:$0xff] }
 0x873   :  { %3737 = vmatpush1.bf16.msra.mxu1 %v2877_v51  ;;  %3901 = vmatpush1.bf16.msra.mxu0 %v2879_v52  ;;  %v2973_v51 = vld [vmem:[#allocation3 + $0x1460] sm:$0xff]  ;;  %v2975_v52 = vld [vmem:[#allocation3 + $0x1470] sm:$0xff] }
 0x874   :  { %3738 = vmatprep.subr.bf16.mxu1 %v2886_v56  ;;  %3902 = vmatprep.subr.bf16.mxu0 %v2888_v10  ;;  %v2982_v56 = vld [vmem:[#allocation3 + $0x14a8] sm:$0xff]  ;;  %v2984_v10 = vld [vmem:[#allocation3 + $0x14b8] sm:$0xff] }
 0x877   :  { %3739 = vmatpush1.bf16.msra.mxu1 %v2885_v55  ;;  %3903 = vmatpush1.bf16.msra.mxu0 %v2887_v26  ;;  %v2981_v55 = vld [vmem:[#allocation3 + $0x14a0] sm:$0xff]  ;;  %v2983_v26 = vld [vmem:[#allocation3 + $0x14b0] sm:$0xff] }
 0x878   :  { %3740 = vmatprep.subr.bf16.mxu1 %v2894_v29  ;;  %3904 = vmatprep.subr.bf16.mxu0 %v2896_v36  ;;  %v2990_v29 = vld [vmem:[#allocation3 + $0x14e8] sm:$0xff]  ;;  %v2989_v36 = vld [vmem:[#allocation3 + $0x14e0] sm:$0xff] }
 0x87b   :  { %3741 = vmatpush1.bf16.msra.mxu1 %v2893_v40  ;;  %3905 = vmatpush1.bf16.msra.mxu0 %v2895_v13  ;;  %v2991_v40 = vld [vmem:[#allocation3 + $0x14f0] sm:$0xff]  ;;  %v2998_v13 = vld [vmem:[#allocation3 + $0x1528] sm:$0xff] }
 0x87c   :  { %3742 = vmatprep.subr.bf16.mxu1 %v2902_v14  ;;  %3906 = vmatprep.subr.bf16.mxu0 %v2904_v44  ;;  %v3000_v14 = vld [vmem:[#allocation3 + $0x1538] sm:$0xff]  ;;  %v2999_v44 = vld [vmem:[#allocation3 + $0x1530] sm:$0xff] }
 0x87f   :  { %3743 = vmatpush1.bf16.msra.mxu1 %v2901_v60  ;;  %3907 = vmatpush1.bf16.msra.mxu0 %v2903_v0  ;;  %v3006_v60 = vld [vmem:[#allocation3 + $0x1568] sm:$0xff]  ;;  %v3008_v0 = vld [vmem:[#allocation3 + $0x1578] sm:$0xff] }
 0x880   :  { %3744 = vmatprep.subr.bf16.mxu1 %v2910_v18  ;;  %3908 = vmatprep.subr.bf16.mxu0 %v2912_v53  ;;  %v3005_v18 = vld [vmem:[#allocation3 + $0x1560] sm:$0xff]  ;;  %v3007_v53 = vld [vmem:[#allocation3 + $0x1570] sm:$0xff] }
 0x883   :  { %3745 = vmatpush1.bf16.msra.mxu1 %v2909_v20  ;;  %3909 = vmatpush1.bf16.msra.mxu0 %v2911_v5  ;;  %v3014_v20 = vld [vmem:[#allocation3 + $0x15a8] sm:$0xff]  ;;  %v3016_v5 = vld [vmem:[#allocation3 + $0x15b8] sm:$0xff] }
 0x884   :  { %3746 = vmatprep.subr.bf16.mxu1 %v2918_v21  ;;  %3910 = vmatprep.subr.bf16.mxu0 %v2920_v4  ;;  %v3013_v21 = vld [vmem:[#allocation3 + $0x15a0] sm:$0xff]  ;;  %v3015_v4 = vld [vmem:[#allocation3 + $0x15b0] sm:$0xff] }
 0x887   :  { %3747 = vmatpush1.bf16.msra.mxu1 %v2917_v12  ;;  %3911 = vmatpush1.bf16.msra.mxu0 %v2919_v61  ;;  %v3022_v12 = vld [vmem:[#allocation3 + $0x15e8] sm:$0xff]  ;;  %v3024_v61 = vld [vmem:[#allocation3 + $0x15f8] sm:$0xff] }
 0x888   :  { %3748 = vmatprep.subr.bf16.mxu1 %v2926_v25  ;;  %3912 = vmatprep.subr.bf16.mxu0 %v2928_v27  ;;  %v3021_v25 = vld [vmem:[#allocation3 + $0x15e0] sm:$0xff]  ;;  %v3023_v27 = vld [vmem:[#allocation3 + $0x15f0] sm:$0xff] }
 0x88b   :  { %3749 = vmatpush1.bf16.msra.mxu1 %v2925_v54  ;;  %3913 = vmatpush1.bf16.msra.mxu0 %v2927_v2  ;;  %v3030_v54 = vld [vmem:[#allocation3 + $0x1628] sm:$0xff]  ;;  %v3032_v2 = vld [vmem:[#allocation3 + $0x1638] sm:$0xff] }
 0x88c   :  { %3750 = vmatprep.subr.bf16.mxu1 %v2934_v35  ;;  %3914 = vmatprep.subr.bf16.mxu0 %v2936_v37  ;;  %v3029_v35 = vld [vmem:[#allocation3 + $0x1620] sm:$0xff]  ;;  %v3031_v37 = vld [vmem:[#allocation3 + $0x1630] sm:$0xff] }
 0x88f   :  { %3751 = vmatpush1.bf16.msra.mxu1 %v2933_v58  ;;  %3915 = vmatpush1.bf16.msra.mxu0 %v2935_v23  ;;  %v3038_v58 = vld [vmem:[#allocation3 + $0x1668] sm:$0xff]  ;;  %v3040_v23 = vld [vmem:[#allocation3 + $0x1678] sm:$0xff] }
 0x890   :  { %3752 = vmatprep.subr.bf16.mxu1 %v2942_v39  ;;  %3916 = vmatprep.subr.bf16.mxu0 %v2944_v16  ;;  %v3037_v39 = vld [vmem:[#allocation3 + $0x1660] sm:$0xff]  ;;  %v3039_v16 = vld [vmem:[#allocation3 + $0x1670] sm:$0xff] }
 0x893   :  { %3753 = vmatpush1.bf16.msra.mxu1 %v2941_v41  ;;  %3917 = vmatpush1.bf16.msra.mxu0 %v2943_v42  ;;  %v3046_v41 = vld [vmem:[#allocation3 + $0x16a8] sm:$0xff]  ;;  %v3048_v42 = vld [vmem:[#allocation3 + $0x16b8] sm:$0xff] }
 0x894   :  { %3754 = vmatprep.subr.bf16.mxu1 %v2950_v24  ;;  %3918 = vmatprep.subr.bf16.mxu0 %v2952_v3  ;;  %v3045_v24 = vld [vmem:[#allocation3 + $0x16a0] sm:$0xff]  ;;  %v3047_v3 = vld [vmem:[#allocation3 + $0x16b0] sm:$0xff] }
 0x897   :  { %3755 = vmatpush1.bf16.msra.mxu1 %v2949_v43  ;;  %3919 = vmatpush1.bf16.msra.mxu0 %v2951_v45  ;;  %v3054_v43 = vld [vmem:[#allocation3 + $0x16e8] sm:$0xff]  ;;  %v3056_v45 = vld [vmem:[#allocation3 + $0x16f8] sm:$0xff] }
 0x898   :  { %3756 = vmatprep.subr.bf16.mxu1 %v2958_v17  ;;  %3920 = vmatprep.subr.bf16.mxu0 %v2960_v46  ;;  %v3053_v17 = vld [vmem:[#allocation3 + $0x16e0] sm:$0xff]  ;;  %v3055_v46 = vld [vmem:[#allocation3 + $0x16f0] sm:$0xff] }
 0x89b   :  { %3757 = vmatpush1.bf16.msra.mxu1 %v2957_v49  ;;  %3921 = vmatpush1.bf16.msra.mxu0 %v2959_v1  ;;  %v3062_v49 = vld [vmem:[#allocation3 + $0x1728] sm:$0xff]  ;;  %v3064_v1 = vld [vmem:[#allocation3 + $0x1738] sm:$0xff] }
 0x89c   :  { %3767 = vmatprep.subr.bf16.mxu1 %v2966_v48  ;;  %3931 = vmatprep.subr.bf16.mxu0 %v2968_v8  ;;  %v3061_v48 = vld [vmem:[#allocation3 + $0x1720] sm:$0xff]  ;;  %v3063_v8 = vld [vmem:[#allocation3 + $0x1730] sm:$0xff] }
 0x89e   :  { %3759 = vmatmul.mubr.bf16.vlgmr.msra.gmra.mrb[24].mxu1 %v7424_v28  ;;  %3923 = vmatmul.mubr.bf16.vlgmr.msra.gmra.mrb[28].mxu0 %v7424_v28  ;;  %v2992_v28 = vld [vmem:[#allocation3 + $0x14f8] sm:$0xff] }
 0x89f   :  { %3768 = vmatpush1.bf16.msra.mxu1 %v2965_v57  ;;  %3932 = vmatpush1.bf16.msra.mxu0 %v2967_v62  ;;  %v3070_v57 = vld [vmem:[#allocation3 + $0x1768] sm:$0xff]  ;;  %v3072_v62 = vld [vmem:[#allocation3 + $0x1778] sm:$0xff] }
 0x8a0   :  { %3769 = vmatprep.subr.bf16.mxu1 %v2974_v63  ;;  %3933 = vmatprep.subr.bf16.mxu0 %v2976_v50  ;;  %v3069_v63 = vld [vmem:[#allocation3 + $0x1760] sm:$0xff]  ;;  %v3071_v50 = vld [vmem:[#allocation3 + $0x1770] sm:$0xff] }
 0x8a1   :  { %3799 = vmatprep.mubr.bf16.mxu1 %v7428_v38  ;;  %3963 = vmatprep.mubr.bf16.mxu0 %v7428_v38  ;;  %v2997_v38 = vld [vmem:[#allocation3 + $0x1520] sm:$0xff] }
 0x8a3   :  { %3770 = vmatpush1.bf16.msra.mxu1 %v2973_v51  ;;  %3934 = vmatpush1.bf16.msra.mxu0 %v2975_v52  ;;  %v3078_v51 = vld [vmem:[#allocation3 + $0x17a8] sm:$0xff]  ;;  %v3080_v52 = vld [vmem:[#allocation3 + $0x17b8] sm:$0xff] }
 0x8a4   :  { %3771 = vmatprep.subr.bf16.mxu1 %v2982_v56  ;;  %3935 = vmatprep.subr.bf16.mxu0 %v2984_v10  ;;  %v3077_v56 = vld [vmem:[#allocation3 + $0x17a0] sm:$0xff]  ;;  %v3079_v10 = vld [vmem:[#allocation3 + $0x17b0] sm:$0xff] }
 0x8a7   :  { %3772 = vmatpush1.bf16.msra.mxu1 %v2981_v55  ;;  %3936 = vmatpush1.bf16.msra.mxu0 %v2983_v26  ;;  %v3086_v55 = vld [vmem:[#allocation3 + $0x17e8] sm:$0xff]  ;;  %v3088_v26 = vld [vmem:[#allocation3 + $0x17f8] sm:$0xff] }
 0x8a8   :  { %3773 = vmatprep.subr.bf16.mxu1 %v2990_v29  ;;  %3937 = vmatprep.subr.bf16.mxu0 %v2992_v28  ;;  %v3085_v29 = vld [vmem:[#allocation3 + $0x17e0] sm:$0xff]  ;;  %v3087_v28 = vld [vmem:[#allocation3 + $0x17f0] sm:$0xff] }
 0x8ab   :  { %3774 = vmatpush1.bf16.msra.mxu1 %v2989_v36  ;;  %3938 = vmatpush1.bf16.msra.mxu0 %v2991_v40  ;;  %v3094_v36 = vld [vmem:[#allocation3 + $0x1828] sm:$0xff]  ;;  %v3096_v40 = vld [vmem:[#allocation3 + $0x1838] sm:$0xff] }
 0x8ac   :  { %3775 = vmatprep.subr.bf16.mxu1 %v2998_v13  ;;  %3939 = vmatprep.subr.bf16.mxu0 %v3000_v14  ;;  %v3093_v13 = vld [vmem:[#allocation3 + $0x1820] sm:$0xff]  ;;  %v3095_v14 = vld [vmem:[#allocation3 + $0x1830] sm:$0xff] }
 0x8af   :  { %3776 = vmatpush1.bf16.msra.mxu1 %v2997_v38  ;;  %3940 = vmatpush1.bf16.msra.mxu0 %v2999_v44  ;;  %v3102_v38 = vld [vmem:[#allocation3 + $0x1868] sm:$0xff]  ;;  %v3104_v44 = vld [vmem:[#allocation3 + $0x1878] sm:$0xff] }
 0x8b0   :  { %3777 = vmatprep.subr.bf16.mxu1 %v3006_v60  ;;  %3941 = vmatprep.subr.bf16.mxu0 %v3008_v0  ;;  %v3101_v60 = vld [vmem:[#allocation3 + $0x1860] sm:$0xff]  ;;  %v3103_v0 = vld [vmem:[#allocation3 + $0x1870] sm:$0xff] }
 0x8b3   :  { %3778 = vmatpush1.bf16.msra.mxu1 %v3005_v18  ;;  %3942 = vmatpush1.bf16.msra.mxu0 %v3007_v53  ;;  %v3110_v18 = vld [vmem:[#allocation3 + $0x18a8] sm:$0xff]  ;;  %v3112_v53 = vld [vmem:[#allocation3 + $0x18b8] sm:$0xff] }
 0x8b4   :  { %3779 = vmatprep.subr.bf16.mxu1 %v3014_v20  ;;  %3943 = vmatprep.subr.bf16.mxu0 %v3016_v5  ;;  %v3109_v20 = vld [vmem:[#allocation3 + $0x18a0] sm:$0xff]  ;;  %v3111_v5 = vld [vmem:[#allocation3 + $0x18b0] sm:$0xff] }
 0x8b7   :  { %3780 = vmatpush1.bf16.msra.mxu1 %v3013_v21  ;;  %3944 = vmatpush1.bf16.msra.mxu0 %v3015_v4  ;;  %v3118_v21 = vld [vmem:[#allocation3 + $0x18e8] sm:$0xff]  ;;  %v3117_v4 = vld [vmem:[#allocation3 + $0x18e0] sm:$0xff] }
 0x8b8   :  { %3781 = vmatprep.subr.bf16.mxu1 %v3022_v12  ;;  %3945 = vmatprep.subr.bf16.mxu0 %v3024_v61  ;;  %v3119_v12 = vld [vmem:[#allocation3 + $0x18f0] sm:$0xff]  ;;  %v3126_v61 = vld [vmem:[#allocation3 + $0x1928] sm:$0xff] }
 0x8bb   :  { %3782 = vmatpush1.bf16.msra.mxu1 %v3021_v25  ;;  %3946 = vmatpush1.bf16.msra.mxu0 %v3023_v27  ;;  %v3128_v25 = vld [vmem:[#allocation3 + $0x1938] sm:$0xff]  ;;  %v3127_v27 = vld [vmem:[#allocation3 + $0x1930] sm:$0xff] }
 0x8bc   :  { %3783 = vmatprep.subr.bf16.mxu1 %v3030_v54  ;;  %3947 = vmatprep.subr.bf16.mxu0 %v3032_v2  ;;  %v3134_v54 = vld [vmem:[#allocation3 + $0x1968] sm:$0xff]  ;;  %v3136_v2 = vld [vmem:[#allocation3 + $0x1978] sm:$0xff] }
 0x8bf   :  { %3784 = vmatpush1.bf16.msra.mxu1 %v3029_v35  ;;  %3948 = vmatpush1.bf16.msra.mxu0 %v3031_v37  ;;  %v3133_v35 = vld [vmem:[#allocation3 + $0x1960] sm:$0xff]  ;;  %v3135_v37 = vld [vmem:[#allocation3 + $0x1970] sm:$0xff] }
 0x8c0   :  { %3785 = vmatprep.subr.bf16.mxu1 %v3038_v58  ;;  %3949 = vmatprep.subr.bf16.mxu0 %v3040_v23  ;;  %v3142_v58 = vld [vmem:[#allocation3 + $0x19a8] sm:$0xff]  ;;  %v3144_v23 = vld [vmem:[#allocation3 + $0x19b8] sm:$0xff] }
 0x8c3   :  { %3786 = vmatpush1.bf16.msra.mxu1 %v3037_v39  ;;  %3950 = vmatpush1.bf16.msra.mxu0 %v3039_v16  ;;  %v3141_v39 = vld [vmem:[#allocation3 + $0x19a0] sm:$0xff]  ;;  %v3143_v16 = vld [vmem:[#allocation3 + $0x19b0] sm:$0xff] }
 0x8c4   :  { %3787 = vmatprep.subr.bf16.mxu1 %v3046_v41  ;;  %3951 = vmatprep.subr.bf16.mxu0 %v3048_v42  ;;  %v3150_v41 = vld [vmem:[#allocation3 + $0x19e8] sm:$0xff]  ;;  %v3152_v42 = vld [vmem:[#allocation3 + $0x19f8] sm:$0xff] }
 0x8c7   :  { %3788 = vmatpush1.bf16.msra.mxu1 %v3045_v24  ;;  %3952 = vmatpush1.bf16.msra.mxu0 %v3047_v3  ;;  %v3149_v24 = vld [vmem:[#allocation3 + $0x19e0] sm:$0xff]  ;;  %v3151_v3 = vld [vmem:[#allocation3 + $0x19f0] sm:$0xff] }
 0x8c8   :  { %3789 = vmatprep.subr.bf16.mxu1 %v3054_v43  ;;  %3953 = vmatprep.subr.bf16.mxu0 %v3056_v45  ;;  %v3158_v43 = vld [vmem:[#allocation3 + $0x1a28] sm:$0xff]  ;;  %v3160_v45 = vld [vmem:[#allocation3 + $0x1a38] sm:$0xff] }
 0x8cb   :  { %3790 = vmatpush1.bf16.msra.mxu1 %v3053_v17  ;;  %3954 = vmatpush1.bf16.msra.mxu0 %v3055_v46  ;;  %v3157_v17 = vld [vmem:[#allocation3 + $0x1a20] sm:$0xff]  ;;  %v3159_v46 = vld [vmem:[#allocation3 + $0x1a30] sm:$0xff] }
 0x8cc   :  { %3791 = vmatprep.subr.bf16.mxu1 %v3062_v49  ;;  %3955 = vmatprep.subr.bf16.mxu0 %v3064_v1  ;;  %v3166_v49 = vld [vmem:[#allocation3 + $0x1a68] sm:$0xff]  ;;  %v3168_v1 = vld [vmem:[#allocation3 + $0x1a78] sm:$0xff] }
 0x8cf   :  { %3792 = vmatpush1.bf16.msra.mxu1 %v3061_v48  ;;  %3956 = vmatpush1.bf16.msra.mxu0 %v3063_v8  ;;  %v3165_v48 = vld [vmem:[#allocation3 + $0x1a60] sm:$0xff]  ;;  %v3167_v8 = vld [vmem:[#allocation3 + $0x1a70] sm:$0xff] }
 0x8d0   :  { %3793 = vmatprep.subr.bf16.mxu1 %v3070_v57  ;;  %3957 = vmatprep.subr.bf16.mxu0 %v3072_v62  ;;  %v3174_v57 = vld [vmem:[#allocation3 + $0x1aa8] sm:$0xff]  ;;  %v3176_v62 = vld [vmem:[#allocation3 + $0x1ab8] sm:$0xff] }
 0x8d3   :  { %3794 = vmatpush1.bf16.msra.mxu1 %v3069_v63  ;;  %3958 = vmatpush1.bf16.msra.mxu0 %v3071_v50  ;;  %v3173_v63 = vld [vmem:[#allocation3 + $0x1aa0] sm:$0xff]  ;;  %v3175_v50 = vld [vmem:[#allocation3 + $0x1ab0] sm:$0xff] }
 0x8d4   :  { %3795 = vmatprep.subr.bf16.mxu1 %v3078_v51  ;;  %3959 = vmatprep.subr.bf16.mxu0 %v3080_v52  ;;  %v3182_v51 = vld [vmem:[#allocation3 + $0x1ae8] sm:$0xff]  ;;  %v3184_v52 = vld [vmem:[#allocation3 + $0x1af8] sm:$0xff] }
 0x8d7   :  { %3796 = vmatpush1.bf16.msra.mxu1 %v3077_v56  ;;  %3960 = vmatpush1.bf16.msra.mxu0 %v3079_v10  ;;  %v3181_v56 = vld [vmem:[#allocation3 + $0x1ae0] sm:$0xff]  ;;  %v3183_v10 = vld [vmem:[#allocation3 + $0x1af0] sm:$0xff] }
 0x8d8   :  { %3797 = vmatprep.subr.bf16.mxu1 %v3086_v55  ;;  %3961 = vmatprep.subr.bf16.mxu0 %v3088_v26  ;;  %v3190_v55 = vld [vmem:[#allocation3 + $0x1b28] sm:$0xff]  ;;  %v3192_v26 = vld [vmem:[#allocation3 + $0x1b38] sm:$0xff] }
 0x8db   :  { %3798 = vmatpush1.bf16.msra.mxu1 %v3085_v29  ;;  %3962 = vmatpush1.bf16.msra.mxu0 %v3087_v28  ;;  %v3189_v29 = vld [vmem:[#allocation3 + $0x1b20] sm:$0xff]  ;;  %v3191_v28 = vld [vmem:[#allocation3 + $0x1b30] sm:$0xff] }
 0x8dc   :  { %3808 = vmatprep.subr.bf16.mxu1 %v3094_v36  ;;  %3972 = vmatprep.subr.bf16.mxu0 %v3096_v40  ;;  %v3198_v36 = vld [vmem:[#allocation3 + $0x1b68] sm:$0xff]  ;;  %v3200_v40 = vld [vmem:[#allocation3 + $0x1b78] sm:$0xff] }
 0x8de   :  { %3800 = vmatmul.mubr.bf16.vlgmr.msra.gmra.mrb[24].mxu1 %v7436_v47  ;;  %3964 = vmatmul.mubr.bf16.vlgmr.msra.gmra.mrb[28].mxu0 %v7436_v47  ;;  %v3120_v47 = vld [vmem:[#allocation3 + $0x18f8] sm:$0xff] }
 0x8df   :  { %3809 = vmatpush1.bf16.msra.mxu1 %v3093_v13  ;;  %3973 = vmatpush1.bf16.msra.mxu0 %v3095_v14  ;;  %v3197_v13 = vld [vmem:[#allocation3 + $0x1b60] sm:$0xff]  ;;  %v3199_v14 = vld [vmem:[#allocation3 + $0x1b70] sm:$0xff] }
 0x8e0   :  { %3810 = vmatprep.subr.bf16.mxu1 %v3102_v38  ;;  %3974 = vmatprep.subr.bf16.mxu0 %v3104_v44  ;;  %v3206_v38 = vld [vmem:[#allocation3 + $0x1ba8] sm:$0xff]  ;;  %v3208_v44 = vld [vmem:[#allocation3 + $0x1bb8] sm:$0xff] }
 0x8e1   :  { %3840 = vmatprep.mubr.bf16.mxu1 %v7440_v22  ;;  %4004 = vmatprep.mubr.bf16.mxu0 %v7440_v22  ;;  %v3125_v22 = vld [vmem:[#allocation3 + $0x1920] sm:$0xff] }
 0x8e3   :  { %3811 = vmatpush1.bf16.msra.mxu1 %v3101_v60  ;;  %3975 = vmatpush1.bf16.msra.mxu0 %v3103_v0  ;;  %v3205_v60 = vld [vmem:[#allocation3 + $0x1ba0] sm:$0xff]  ;;  %v3207_v0 = vld [vmem:[#allocation3 + $0x1bb0] sm:$0xff] }
 0x8e4   :  { %3812 = vmatprep.subr.bf16.mxu1 %v3110_v18  ;;  %3976 = vmatprep.subr.bf16.mxu0 %v3112_v53  ;;  %v3214_v18 = vld [vmem:[#allocation3 + $0x1be8] sm:$0xff]  ;;  %v3216_v53 = vld [vmem:[#allocation3 + $0x1bf8] sm:$0xff] }
 0x8e7   :  { %3813 = vmatpush1.bf16.msra.mxu1 %v3109_v20  ;;  %3977 = vmatpush1.bf16.msra.mxu0 %v3111_v5  ;;  %v3213_v20 = vld [vmem:[#allocation3 + $0x1be0] sm:$0xff]  ;;  %v3215_v5 = vld [vmem:[#allocation3 + $0x1bf0] sm:$0xff] }
 0x8e8   :  { %3814 = vmatprep.subr.bf16.mxu1 %v3118_v21  ;;  %3978 = vmatprep.subr.bf16.mxu0 %v3120_v47  ;;  %v3222_v21 = vld [vmem:[#allocation3 + $0x1c28] sm:$0xff]  ;;  %v3224_v47 = vld [vmem:[#allocation3 + $0x1c38] sm:$0xff] }
 0x8eb   :  { %3815 = vmatpush1.bf16.msra.mxu1 %v3117_v4  ;;  %3979 = vmatpush1.bf16.msra.mxu0 %v3119_v12  ;;  %v3221_v4 = vld [vmem:[#allocation3 + $0x1c20] sm:$0xff]  ;;  %v3223_v12 = vld [vmem:[#allocation3 + $0x1c30] sm:$0xff] }
 0x8ec   :  { %3816 = vmatprep.subr.bf16.mxu1 %v3126_v61  ;;  %3980 = vmatprep.subr.bf16.mxu0 %v3128_v25  ;;  %v3230_v61 = vld [vmem:[#allocation3 + $0x1c68] sm:$0xff]  ;;  %v3232_v25 = vld [vmem:[#allocation3 + $0x1c78] sm:$0xff] }
 0x8ef   :  { %3817 = vmatpush1.bf16.msra.mxu1 %v3125_v22  ;;  %3981 = vmatpush1.bf16.msra.mxu0 %v3127_v27  ;;  %v3229_v22 = vld [vmem:[#allocation3 + $0x1c60] sm:$0xff]  ;;  %v3231_v27 = vld [vmem:[#allocation3 + $0x1c70] sm:$0xff] }
 0x8f0   :  { %3818 = vmatprep.subr.bf16.mxu1 %v3134_v54  ;;  %3982 = vmatprep.subr.bf16.mxu0 %v3136_v2  ;;  %v3238_v54 = vld [vmem:[#allocation3 + $0x1ca8] sm:$0xff]  ;;  %v3240_v2 = vld [vmem:[#allocation3 + $0x1cb8] sm:$0xff] }
 0x8f3   :  { %3819 = vmatpush1.bf16.msra.mxu1 %v3133_v35  ;;  %3983 = vmatpush1.bf16.msra.mxu0 %v3135_v37  ;;  %v3237_v35 = vld [vmem:[#allocation3 + $0x1ca0] sm:$0xff]  ;;  %v3239_v37 = vld [vmem:[#allocation3 + $0x1cb0] sm:$0xff] }
 0x8f4   :  { %3820 = vmatprep.subr.bf16.mxu1 %v3142_v58  ;;  %3984 = vmatprep.subr.bf16.mxu0 %v3144_v23  ;;  %v3246_v58 = vld [vmem:[#allocation3 + $0x1ce8] sm:$0xff] }
 0x8f5   :  { %v3354_v23 = vld [vmem:[#allocation12 + $0x4] ss:$8 sm:$0xf] }
 0x8f7   :  { %3821 = vmatpush1.bf16.msra.mxu1 %v3141_v39  ;;  %3985 = vmatpush1.bf16.msra.mxu0 %v3143_v16  ;;  %v3355_v39 = vld [vmem:[#allocation12 + $0x4] ss:$8 sm:$0xf0] }
 0x8f8   :  { %3822 = vmatprep.subr.bf16.mxu1 %v3150_v41  ;;  %3986 = vmatprep.subr.bf16.mxu0 %v3152_v42  ;;  %v3245_v16 = vld [vmem:[#allocation3 + $0x1ce0] sm:$0xff]  ;;  %v3247_v41 = vld [vmem:[#allocation3 + $0x1cf0] sm:$0xff]  ;;  %v3254_v42 = vld [vmem:[#allocation3 + $0x1d28] sm:$0xff] }
 0x8fb   :  { %3823 = vmatpush1.bf16.msra.mxu1 %v3149_v24  ;;  %3987 = vmatpush1.bf16.msra.mxu0 %v3151_v3  ;;  %v3256_v24 = vld [vmem:[#allocation3 + $0x1d38] sm:$0xff]  ;;  %v7478_v3 = vor.u32 %v3355_v39, %v3354_v23 }
 0x8fc   :  { %3824 = vmatprep.subr.bf16.mxu1 %v3158_v43  ;;  %3988 = vmatprep.subr.bf16.mxu0 %v3160_v45  ;;  %v3255_v43 = vld [vmem:[#allocation3 + $0x1d30] sm:$0xff]  ;;  %v3262_v45 = vld [vmem:[#allocation3 + $0x1d68] sm:$0xff] }
 0x8ff   :  { %3825 = vmatpush1.bf16.msra.mxu1 %v3157_v17  ;;  %3989 = vmatpush1.bf16.msra.mxu0 %v3159_v46  ;;  %v3264_v17 = vld [vmem:[#allocation3 + $0x1d78] sm:$0xff]  ;;  %v3361_v46 = vrot.slane %v7478_v3, %v7189_v9 }
 0x900   :  { %3826 = vmatprep.subr.bf16.mxu1 %v3166_v49  ;;  %3990 = vmatprep.subr.bf16.mxu0 %v3168_v1  ;;  %v3369_v49 = vrot.slane %v7478_v3, %v7197_v32  ;;  %v3365_v1 = vrot.slane %v7478_v3, %v7192_v11 }
 0x903   :  { %3827 = vmatpush1.bf16.msra.mxu1 %v3165_v48  ;;  %3991 = vmatpush1.bf16.msra.mxu0 %v3167_v8  ;;  %v3373_v48 = vrot.slane %v7478_v3, %v7200_v34  ;;  %v3261_v8 = vld [vmem:[#allocation3 + $0x1d60] sm:$0xff] }
 0x904   :  { %3828 = vmatprep.subr.bf16.mxu1 %v3174_v57  ;;  %3992 = vmatprep.subr.bf16.mxu0 %v3176_v62  ;;  %v3263_v57 = vld [vmem:[#allocation3 + $0x1d70] sm:$0xff] }
 0x907   :  { %3829 = vmatpush1.bf16.msra.mxu1 %v3173_v63  ;;  %3993 = vmatpush1.bf16.msra.mxu0 %v3175_v50  ;;  %v3270_v50 = vld [vmem:[#allocation3 + $0x1da8] sm:$0xff] }
 0x908   :  { %3830 = vmatprep.subr.bf16.mxu1 %v3182_v51  ;;  %3994 = vmatprep.subr.bf16.mxu0 %v3184_v52  ;;  %v3272_v51 = vld [vmem:[#allocation3 + $0x1db8] sm:$0xff] }
 0x90b   :  { %3831 = vmatpush1.bf16.msra.mxu1 %v3181_v56  ;;  %3995 = vmatpush1.bf16.msra.mxu0 %v3183_v10 }
 0x90c   :  { %3832 = vmatprep.subr.bf16.mxu1 %v3190_v55  ;;  %3996 = vmatprep.subr.bf16.mxu0 %v3192_v26 }
 0x90f   :  { %3833 = vmatpush1.bf16.msra.mxu1 %v3189_v29  ;;  %3997 = vmatpush1.bf16.msra.mxu0 %v3191_v28 }
 0x910   :  { %3834 = vmatprep.subr.bf16.mxu1 %v3198_v36  ;;  %3998 = vmatprep.subr.bf16.mxu0 %v3200_v40  ;;  %v3269_v40 = vld [vmem:[#allocation3 + $0x1da0] sm:$0xff] }
 0x913   :  { %3835 = vmatpush1.bf16.msra.mxu1 %v3197_v13  ;;  %3999 = vmatpush1.bf16.msra.mxu0 %v3199_v14  ;;  %v3271_v13 = vld [vmem:[#allocation3 + $0x1db0] sm:$0xff] }
 0x914   :  { %3836 = vmatprep.subr.bf16.mxu1 %v3206_v38  ;;  %4000 = vmatprep.subr.bf16.mxu0 %v3208_v44 }
 0x917   :  { %3837 = vmatpush1.bf16.msra.mxu1 %v3205_v60  ;;  %4001 = vmatpush1.bf16.msra.mxu0 %v3207_v0 }
 0x918   :  { %3838 = vmatprep.subr.bf16.mxu1 %v3214_v18  ;;  %4002 = vmatprep.subr.bf16.mxu0 %v3216_v53  ;;  %v3278_v53 = vld [vmem:[#allocation3 + $0x1de8] sm:$0xff] }
 0x91b   :  { %3839 = vmatpush1.bf16.msra.mxu1 %v3213_v20  ;;  %4003 = vmatpush1.bf16.msra.mxu0 %v3215_v5  ;;  %v3280_v20 = vld [vmem:[#allocation3 + $0x1df8] sm:$0xff]  ;;  %v3277_v5 = vld [vmem:[#allocation3 + $0x1de0] sm:$0xff] }
 0x91c   :  { %3849 = vmatprep.subr.bf16.mxu1 %v3222_v21  ;;  %4013 = vmatprep.subr.bf16.mxu0 %v3224_v47  ;;  %v3279_v21 = vld [vmem:[#allocation3 + $0x1df0] sm:$0xff]  ;;  %v3286_v47 = vld [vmem:[#allocation3 + $0x1e28] sm:$0xff] }
 0x91e   :  { %3841 = vmatmul.mubr.bf16.vlgmr.msra.gmra.mrb[24].mxu1 %v7448_v15  ;;  %4005 = vmatmul.mubr.bf16.vlgmr.msra.gmra.mrb[28].mxu0 %v7448_v15  ;;  %v3248_v15 = vld [vmem:[#allocation3 + $0x1cf8] sm:$0xff] }
 0x91f   :  { %3850 = vmatpush1.bf16.msra.mxu1 %v3221_v4  ;;  %4014 = vmatpush1.bf16.msra.mxu0 %v3223_v12  ;;  %v3288_v4 = vld [vmem:[#allocation3 + $0x1e38] sm:$0xff]  ;;  %v3285_v12 = vld [vmem:[#allocation3 + $0x1e20] sm:$0xff] }
 0x920   :  { %3851 = vmatprep.subr.bf16.mxu1 %v3230_v61  ;;  %4015 = vmatprep.subr.bf16.mxu0 %v3232_v25  ;;  %v3287_v61 = vld [vmem:[#allocation3 + $0x1e30] sm:$0xff]  ;;  %v3294_v25 = vld [vmem:[#allocation3 + $0x1e68] sm:$0xff] }
 0x921   :  { %3881 = vmatprep.mubr.bf16.mxu1 %v7452_v19  ;;  %4045 = vmatprep.mubr.bf16.mxu0 %v7452_v19  ;;  %v3253_v19 = vld [vmem:[#allocation3 + $0x1d20] sm:$0xff] }
 0x923   :  { %3852 = vmatpush1.bf16.msra.mxu1 %v3229_v22  ;;  %4016 = vmatpush1.bf16.msra.mxu0 %v3231_v27  ;;  %v3296_v22 = vld [vmem:[#allocation3 + $0x1e78] sm:$0xff] }
 0x924   :  { %3853 = vmatprep.subr.bf16.mxu1 %v3238_v54  ;;  %4017 = vmatprep.subr.bf16.mxu0 %v3240_v2  ;;  %v3293_v54 = vld [vmem:[#allocation3 + $0x1e60] sm:$0xff]  ;;  %v3295_v2 = vld [vmem:[#allocation3 + $0x1e70] sm:$0xff] }
 0x927   :  { %3854 = vmatpush1.bf16.msra.mxu1 %v3237_v35  ;;  %4018 = vmatpush1.bf16.msra.mxu0 %v3239_v37 }
 0x928   :  { %3855 = vmatprep.subr.bf16.mxu1 %v3246_v58  ;;  %4019 = vmatprep.subr.bf16.mxu0 %v3248_v15  ;;  %v3302_v58 = vld [vmem:[#allocation3 + $0x1ea8] sm:$0xff]  ;;  %v3304_v15 = vld [vmem:[#allocation3 + $0x1eb8] sm:$0xff] }
 0x92b   :  { %3856 = vmatpush1.bf16.msra.mxu1 %v3245_v16  ;;  %4020 = vmatpush1.bf16.msra.mxu0 %v3247_v41 }
 0x92c   :  { %3857 = vmatprep.subr.bf16.mxu1 %v3254_v42  ;;  %4021 = vmatprep.subr.bf16.mxu0 %v3256_v24  ;;  %v3301_v24 = vld [vmem:[#allocation3 + $0x1ea0] sm:$0xff] }
 0x92f   :  { %3858 = vmatpush1.bf16.msra.mxu1 %v3253_v19  ;;  %4022 = vmatpush1.bf16.msra.mxu0 %v3255_v43  ;;  %v3303_v19 = vld [vmem:[#allocation3 + $0x1eb0] sm:$0xff]  ;;  %v3310_v43 = vld [vmem:[#allocation3 + $0x1ee8] sm:$0xff] }
 0x930   :  { %3859 = vmatprep.subr.bf16.mxu1 %v3262_v45  ;;  %4023 = vmatprep.subr.bf16.mxu0 %v3264_v17  ;;  %v3312_v45 = vld [vmem:[#allocation3 + $0x1ef8] sm:$0xff]  ;;  %v3309_v17 = vld [vmem:[#allocation3 + $0x1ee0] sm:$0xff] }
 0x931   :  { %v3555_v62 = vpop.f32.mrb[20].mxu1  ;;  %v3719_v63 = vpop.f32.mrb[24].mxu0 }
 0x932   :  { %v7488_v52 = vadd.f32 %v3555_v62, %v3361_v46  ;;  %v7490_v56 = vadd.f32 %v3719_v63, %v3369_v49  ;;  %v3557_v10 = vpop.f32.mrb[21].mxu1  ;;  %v3721_v55 = vpop.f32.mrb[25].mxu0  ;;  %v3311_v46 = vld [vmem:[#allocation3 + $0x1ef0] sm:$0xff]  ;;  %v3318_v49 = vld [vmem:[#allocation3 + $0x1f28] sm:$0xff]  ;;  %v3328_v63 = vld [vmem:[#allocation3 + $0x1f78] sm:$0xff] }
 0x933   :  { %v7492_v26 = vadd.f32 %v3557_v10, %v3365_v1  ;;  %v7494_v29 = vadd.f32 %v3721_v55, %v3373_v48  ;;  %v3559_v28 = vpop.f32.mrb[22].mxu1  ;;  %v3723_v36 = vpop.f32.mrb[26].mxu0  ;;  %3860 = vmatpush1.bf16.msra.mxu1 %v3261_v8  ;;  %4024 = vmatpush1.bf16.msra.mxu0 %v3263_v57  ;;  %v3320_v1 = vld [vmem:[#allocation3 + $0x1f38] sm:$0xff]  ;;  %v3317_v48 = vld [vmem:[#allocation3 + $0x1f20] sm:$0xff]  ;;  %v3319_v8 = vld [vmem:[#allocation3 + $0x1f30] sm:$0xff] }
 0x934   :  { %v6256_v14 = vmul.f32 -1.442695, %v7488_v52  ;;  %v6258_v38 = vmul.f32 -1.442695, %v7490_v56  ;;  %v3560_v44 = vpop.f32.mrb[23].mxu1  ;;  %v3724_v60 = vpop.f32.mrb[27].mxu0  ;;  %3861 = vmatprep.subr.bf16.mxu1 %v3270_v50  ;;  %4025 = vmatprep.subr.bf16.mxu0 %v3272_v51 }
 0x935   :  { %v6257_v0 = vmul.f32 -1.442695, %v7492_v26  ;;  %v6259_v18 = vmul.f32 -1.442695, %v7494_v29  ;;  %v3326_v62 = vld [vmem:[#allocation3 + $0x1f68] sm:$0xff]  ;;  %v3335_v44 = vld [vmem:[#allocation3 + $0x1fb0] sm:$0xff] }
 0x936   :  { %6764 = vpow2.f32 %v6256_v14  ;;  %v3342_v60 = vld [vmem:[#allocation3 + $0x1fe8] sm:$0xff] }
 0x937   :  { %6766 = vpow2.f32 %v6258_v38  ;;  %3862 = vmatpush1.bf16.msra.mxu1 %v3269_v40  ;;  %4026 = vmatpush1.bf16.msra.mxu0 %v3271_v13  ;;  %v3325_v40 = vld [vmem:[#allocation3 + $0x1f60] sm:$0xff]  ;;  %v3327_v13 = vld [vmem:[#allocation3 + $0x1f70] sm:$0xff]  ;;  %v3334_v38 = vld [vmem:[#allocation3 + $0x1fa8] sm:$0xff] }
 0x938   :  { %6768 = vpow2.f32 %v6257_v0  ;;  %3863 = vmatprep.subr.bf16.mxu1 %v3278_v53  ;;  %4027 = vmatprep.subr.bf16.mxu0 %v3280_v20  ;;  %v3344_v0 = vld [vmem:[#allocation3 + $0x1ff8] sm:$0xff]  ;;  %v3385_v53 = vrot.slane %v7478_v3, %v7256_v31  ;;  %v3381_v20 = vrot.slane %v7478_v3, %v7259_v33 }
 0x939   :  { %6770 = vpow2.f32 %v6259_v18  ;;  %v3343_v18 = vld [vmem:[#allocation3 + $0x1ff0] sm:$0xff] }
 0x93b   :  { %3864 = vmatpush1.bf16.msra.mxu1 %v3277_v5  ;;  %4028 = vmatpush1.bf16.msra.mxu0 %v3279_v21  ;;  %v3389_v5 = vrot.slane %v7478_v3, %v7262_v6 }
 0x93c   :  { %3865 = vmatprep.subr.bf16.mxu1 %v3286_v47  ;;  %4029 = vmatprep.subr.bf16.mxu0 %v3288_v4 }
 0x93f   :  { %3866 = vmatpush1.bf16.msra.mxu1 %v3285_v12  ;;  %4030 = vmatpush1.bf16.msra.mxu0 %v3287_v61 }
 0x940   :  { %v6765_v27 = vpop.eup %6764  ;;  %3867 = vmatprep.subr.bf16.mxu1 %v3294_v25  ;;  %4031 = vmatprep.subr.bf16.mxu0 %v3296_v22 }
 0x941   :  { %v6767_v35 = vpop.eup %6766  ;;  %v4078_v37 = vadd.f32 1.0, %v6765_v27 }
 0x942   :  { %v6769_v23 = vpop.eup %6768  ;;  %v4080_v39 = vadd.f32 1.0, %v6767_v35 }
 0x943   :  { %v6771_v16 = vpop.eup %6770  ;;  %6772 = vrcp.f32 %v4078_v37  ;;  %v4079_v41 = vadd.f32 1.0, %v6769_v23  ;;  %3868 = vmatpush1.bf16.msra.mxu1 %v3293_v54  ;;  %4032 = vmatpush1.bf16.msra.mxu0 %v3295_v2 }
 0x944   :  { %6774 = vrcp.f32 %v4080_v39  ;;  %v4081_v42 = vadd.f32 1.0, %v6771_v16  ;;  %3869 = vmatprep.subr.bf16.mxu1 %v3302_v58  ;;  %4033 = vmatprep.subr.bf16.mxu0 %v3304_v15 }
 0x945   :  { %6776 = vrcp.f32 %v4079_v41 }
 0x946   :  { %6778 = vrcp.f32 %v4081_v42 }
 0x947   :  { %3870 = vmatpush1.bf16.msra.mxu1 %v3301_v24  ;;  %4034 = vmatpush1.bf16.msra.mxu0 %v3303_v19 }
 0x948   :  { %3871 = vmatprep.subr.bf16.mxu1 %v3310_v43  ;;  %4035 = vmatprep.subr.bf16.mxu0 %v3312_v45 }
 0x94b   :  { %3872 = vmatpush1.bf16.msra.mxu1 %v3309_v17  ;;  %4036 = vmatpush1.bf16.msra.mxu0 %v3311_v46 }
 0x94c   :  { %3873 = vmatprep.subr.bf16.mxu1 %v3318_v49  ;;  %4037 = vmatprep.subr.bf16.mxu0 %v3320_v1 }
 0x94d   :  { %v6773_v57 = vpop.eup %6772 }
 0x94e   :  { %v6775_v50 = vpop.eup %6774  ;;  %v7501_v51 = vmul.f32 %v6773_v57, %v7488_v52  ;;  %v3336_v52 = vld [vmem:[#allocation3 + $0x1fb8] sm:$0xff] }
 0x94f   :  { %v6777_v10 = vpop.eup %6776  ;;  %v7504_v55 = vmul.f32 %v6775_v50, %v7490_v56  ;;  %3874 = vmatpush1.bf16.msra.mxu1 %v3317_v48  ;;  %4038 = vmatpush1.bf16.msra.mxu0 %v3319_v8  ;;  %v3333_v56 = vld [vmem:[#allocation3 + $0x1fa0] sm:$0xff] }
 0x950   :  { %v6779_v28 = vpop.eup %6778  ;;  %v7507_v36 = vmul.f32 %v6777_v10, %v7492_v26  ;;  %3875 = vmatprep.subr.bf16.mxu1 %v3326_v62  ;;  %4039 = vmatprep.subr.bf16.mxu0 %v3328_v63  ;;  %v3341_v26 = vld [vmem:[#allocation3 + $0x1fe0] sm:$0xff] }
 0x951   :  { %v7510_v14 = vmul.f32 %v6779_v28, %v7494_v29  ;;  %v3377_v29 = vrot.slane %v7478_v3, %v7253_v30 }
 0x953   :  { %3876 = vmatpush1.bf16.msra.mxu1 %v3325_v40  ;;  %4040 = vmatpush1.bf16.msra.mxu0 %v3327_v13 }
 0x954   :  { %3877 = vmatprep.subr.bf16.mxu1 %v3334_v38  ;;  %4041 = vmatprep.subr.bf16.mxu0 %v3336_v52 }
 0x957   :  { %3878 = vmatpush1.bf16.msra.mxu1 %v3333_v56  ;;  %4042 = vmatpush1.bf16.msra.mxu0 %v3335_v44 }
 0x958   :  { %3879 = vmatprep.subr.bf16.mxu1 %v3342_v60  ;;  %4043 = vmatprep.subr.bf16.mxu0 %v3344_v0 }
 0x95b   :  { %3880 = vmatpush1.bf16.msra.mxu1 %v3341_v26  ;;  %4044 = vmatpush1.bf16.msra.mxu0 %v3343_v18 }
 0x95e   :  { %3882 = vmatmul.mubr.bf16.vlgmr.msra.gmra.mrb[24].mxu1 %v7460_v59  ;;  %4046 = vmatmul.mubr.bf16.vlgmr.msra.gmra.mrb[28].mxu0 %v7460_v59 }
 0xa31   :  { %v3883_v21 = vpop.f32.mrb[24].mxu1  ;;  %v4047_v47 = vpop.f32.mrb[28].mxu0 }
 0xa32   :  { %v6377_v4 = vadd.f32 %v3883_v21, %v3377_v29  ;;  %v6379_v12 = vadd.f32 %v4047_v47, %v3385_v53  ;;  %v3885_v61 = vpop.f32.mrb[25].mxu1  ;;  %v4049_v25 = vpop.f32.mrb[29].mxu0 }
 0xa33   :  { %v6378_v22 = vadd.f32 %v3885_v61, %v3381_v20  ;;  %v6380_v59 = vadd.f32 %v4049_v25, %v3389_v5  ;;  %v3887_v27 = vpop.f32.mrb[26].mxu1  ;;  %v4051_v54 = vpop.f32.mrb[30].mxu0 }
 0xa34   :  { %v6260_v2 = vmul.f32 -1.442695, %v6377_v4  ;;  %v6262_v35 = vmul.f32 -1.442695, %v6379_v12  ;;  %v3888_v37 = vpop.f32.mrb[27].mxu1  ;;  %v4052_v58 = vpop.f32.mrb[31].mxu0 }
 0xa35   :  { %v6261_v15 = vmul.f32 -1.442695, %v6378_v22  ;;  %v6263_v23 = vmul.f32 -1.442695, %v6380_v59 }
 0xa36   :  { %6780 = vpow2.f32 %v6260_v2 }
 0xa37   :  { %6782 = vpow2.f32 %v6262_v35 }
 0xa38   :  { %6784 = vpow2.f32 %v6261_v15 }
 0xa39   :  { %6786 = vpow2.f32 %v6263_v23 }
 0xa40   :  { %v6781_v3 = vpop.eup %6780 }
 0xa41   :  { %v6783_v39 = vpop.eup %6782  ;;  %v4082_v16 = vadd.f32 1.0, %v6781_v3 }
 0xa42   :  { %v6785_v41 = vpop.eup %6784  ;;  %v4084_v42 = vadd.f32 1.0, %v6783_v39 }
 0xa43   :  { %v6787_v24 = vpop.eup %6786  ;;  %6788 = vrcp.f32 %v4082_v16  ;;  %v4083_v19 = vadd.f32 1.0, %v6785_v41 }
 0xa44   :  { %6790 = vrcp.f32 %v4084_v42  ;;  %v4085_v43 = vadd.f32 1.0, %v6787_v24 }
 0xa45   :  { %6792 = vrcp.f32 %v4083_v19 }
 0xa46   :  { %6794 = vrcp.f32 %v4085_v43 }
 0xa4d   :  { %v6789_v45 = vpop.eup %6788 }
 0xa4e   :  { %v6791_v17 = vpop.eup %6790  ;;  %v7522_v46 = vmul.f32 %v6789_v45, %v6377_v4 }
 0xa4f   :  { %v6793_v49 = vpop.eup %6792  ;;  %v7524_v1 = vmul.f32 %v6791_v17, %v6379_v12 }
 0xa50   :  { %v6795_v48 = vpop.eup %6794  ;;  %v7526_v8 = vmul.f32 %v6793_v49, %v6378_v22 }
 0xa51   :  { %v7528_v57 = vmul.f32 %v6795_v48, %v6380_v59 }
 0xa52   :  { %6998 = dma.done.wait [#allocation5 + $0x3], 65536 }
 0xa53   :  { %6999 = vsyncadd [#allocation5 + $0x3], 4294901760  ;;  %v7532_v62 = vpack.c.bf16 %v7507_v36, %v7507_v36  ;;  %v4113_v63 = vld [vmem:[#allocation3 + $0x8] sm:$0xff]  ;;  %v4115_v50 = vld [vmem:[#allocation3 + $0x18] sm:$0xff] }
 0xa54   :  { %v4112_v10 = vld [vmem:[#allocation3] sm:$0xff]  ;;  %4677 = vmatprep.subr.bf16.mxu1 %v4113_v63  ;;  %4841 = vmatprep.subr.bf16.mxu0 %v4115_v50  ;;  %v4114_v28 = vld [vmem:[#allocation3 + $0x10] sm:$0xff]  ;;  %v4121_v40 = vld [vmem:[#allocation3 + $0x48] sm:$0xff] }
 0xa55   :  { %4709 = vmatprep.mubr.bf16.mxu1 %v7532_v62  ;;  %4873 = vmatprep.mubr.bf16.mxu0 %v7532_v62  ;;  %v4123_v13 = vld [vmem:[#allocation3 + $0x58] sm:$0xff]  ;;  %v4120_v38 = vld [vmem:[#allocation3 + $0x40] sm:$0xff]  ;;  %v4122_v52 = vld [vmem:[#allocation3 + $0x50] sm:$0xff] }
 0xa56   :  { %4678 = vmatpush1.bf16.msra.mxu1 %v4112_v10  ;;  %4842 = vmatpush1.bf16.msra.mxu0 %v4114_v28  ;;  %v4129_v36 = vld [vmem:[#allocation3 + $0x88] sm:$0xff]  ;;  %v4131_v56 = vld [vmem:[#allocation3 + $0x98] sm:$0xff]  ;;  %v4128_v44 = vld [vmem:[#allocation3 + $0x80] sm:$0xff] }
 0xa57   :  { %4679 = vmatprep.subr.bf16.mxu1 %v4121_v40  ;;  %4843 = vmatprep.subr.bf16.mxu0 %v4123_v13  ;;  %v4130_v60 = vld [vmem:[#allocation3 + $0x90] sm:$0xff]  ;;  %v4137_v0 = vld [vmem:[#allocation3 + $0xc8] sm:$0xff]  ;;  %v4139_v26 = vld [vmem:[#allocation3 + $0xd8] sm:$0xff] }
 0xa58   :  { %v4136_v18 = vld [vmem:[#allocation3 + $0xc0] sm:$0xff]  ;;  %v4138_v29 = vld [vmem:[#allocation3 + $0xd0] sm:$0xff]  ;;  %v4145_v53 = vld [vmem:[#allocation3 + $0x108] sm:$0xff] }
 0xa59   :  { %v4147_v20 = vld [vmem:[#allocation3 + $0x118] sm:$0xff]  ;;  %v4144_v5 = vld [vmem:[#allocation3 + $0x100] sm:$0xff]  ;;  %v4146_v21 = vld [vmem:[#allocation3 + $0x110] sm:$0xff] }
 0xa5a   :  { %4680 = vmatpush1.bf16.msra.mxu1 %v4120_v38  ;;  %4844 = vmatpush1.bf16.msra.mxu0 %v4122_v52  ;;  %v4153_v47 = vld [vmem:[#allocation3 + $0x148] sm:$0xff]  ;;  %v4155_v4 = vld [vmem:[#allocation3 + $0x158] sm:$0xff]  ;;  %v4152_v12 = vld [vmem:[#allocation3 + $0x140] sm:$0xff] }
 0xa5b   :  { %4681 = vmatprep.subr.bf16.mxu1 %v4129_v36  ;;  %4845 = vmatprep.subr.bf16.mxu0 %v4131_v56  ;;  %v4154_v61 = vld [vmem:[#allocation3 + $0x150] sm:$0xff]  ;;  %v4161_v25 = vld [vmem:[#allocation3 + $0x188] sm:$0xff]  ;;  %v4163_v22 = vld [vmem:[#allocation3 + $0x198] sm:$0xff] }
 0xa5c   :  { %v4160_v59 = vld [vmem:[#allocation3 + $0x180] sm:$0xff]  ;;  %v4162_v27 = vld [vmem:[#allocation3 + $0x190] sm:$0xff]  ;;  %v4169_v54 = vld [vmem:[#allocation3 + $0x1c8] sm:$0xff] }
 0xa5d   :  { %v4171_v2 = vld [vmem:[#allocation3 + $0x1d8] sm:$0xff]  ;;  %v4168_v35 = vld [vmem:[#allocation3 + $0x1c0] sm:$0xff]  ;;  %v4170_v37 = vld [vmem:[#allocation3 + $0x1d0] sm:$0xff] }
 0xa5e   :  { %4682 = vmatpush1.bf16.msra.mxu1 %v4128_v44  ;;  %4846 = vmatpush1.bf16.msra.mxu0 %v4130_v60  ;;  %v4177_v58 = vld [vmem:[#allocation3 + $0x208] sm:$0xff]  ;;  %v4179_v15 = vld [vmem:[#allocation3 + $0x218] sm:$0xff]  ;;  %v4176_v23 = vld [vmem:[#allocation3 + $0x200] sm:$0xff] }
 0xa5f   :  { %4683 = vmatprep.subr.bf16.mxu1 %v4137_v0  ;;  %4847 = vmatprep.subr.bf16.mxu0 %v4139_v26  ;;  %v4178_v3 = vld [vmem:[#allocation3 + $0x210] sm:$0xff]  ;;  %v4185_v39 = vld [vmem:[#allocation3 + $0x248] sm:$0xff]  ;;  %v4187_v16 = vld [vmem:[#allocation3 + $0x258] sm:$0xff] }
 0xa60   :  { %v4184_v41 = vld [vmem:[#allocation3 + $0x240] sm:$0xff]  ;;  %v4186_v42 = vld [vmem:[#allocation3 + $0x250] sm:$0xff]  ;;  %v4193_v24 = vld [vmem:[#allocation3 + $0x288] sm:$0xff] }
 0xa61   :  { %v4195_v19 = vld [vmem:[#allocation3 + $0x298] sm:$0xff]  ;;  %v4192_v43 = vld [vmem:[#allocation3 + $0x280] sm:$0xff]  ;;  %v4194_v45 = vld [vmem:[#allocation3 + $0x290] sm:$0xff] }
 0xa62   :  { %4684 = vmatpush1.bf16.msra.mxu1 %v4136_v18  ;;  %4848 = vmatpush1.bf16.msra.mxu0 %v4138_v29  ;;  %v4201_v17 = vld [vmem:[#allocation3 + $0x2c8] sm:$0xff]  ;;  %v4203_v49 = vld [vmem:[#allocation3 + $0x2d8] sm:$0xff]  ;;  %v4200_v48 = vld [vmem:[#allocation3 + $0x2c0] sm:$0xff] }
 0xa63   :  { %4685 = vmatprep.subr.bf16.mxu1 %v4145_v53  ;;  %4849 = vmatprep.subr.bf16.mxu0 %v4147_v20  ;;  %v4202_v63 = vld [vmem:[#allocation3 + $0x2d0] sm:$0xff]  ;;  %v4209_v50 = vld [vmem:[#allocation3 + $0x308] sm:$0xff]  ;;  %v4211_v10 = vld [vmem:[#allocation3 + $0x318] sm:$0xff] }
 0xa64   :  { %v4208_v28 = vld [vmem:[#allocation3 + $0x300] sm:$0xff]  ;;  %v4210_v40 = vld [vmem:[#allocation3 + $0x310] sm:$0xff]  ;;  %v4217_v13 = vld [vmem:[#allocation3 + $0x348] sm:$0xff] }
 0xa65   :  { %v4219_v38 = vld [vmem:[#allocation3 + $0x358] sm:$0xff]  ;;  %v4216_v52 = vld [vmem:[#allocation3 + $0x340] sm:$0xff]  ;;  %v4218_v36 = vld [vmem:[#allocation3 + $0x350] sm:$0xff] }
 0xa66   :  { %4686 = vmatpush1.bf16.msra.mxu1 %v4144_v5  ;;  %4850 = vmatpush1.bf16.msra.mxu0 %v4146_v21  ;;  %v4225_v56 = vld [vmem:[#allocation3 + $0x388] sm:$0xff]  ;;  %v4227_v44 = vld [vmem:[#allocation3 + $0x398] sm:$0xff]  ;;  %v4224_v60 = vld [vmem:[#allocation3 + $0x380] sm:$0xff]  ;;  %v7538_v21 = vpack.c.bf16 %v7501_v51, %v7501_v51 }
 0xa67   :  { %4687 = vmatprep.subr.bf16.mxu1 %v4153_v47  ;;  %4851 = vmatprep.subr.bf16.mxu0 %v4155_v4  ;;  %v4226_v0 = vld [vmem:[#allocation3 + $0x390] sm:$0xff]  ;;  %v4233_v26 = vld [vmem:[#allocation3 + $0x3c8] sm:$0xff]  ;;  %v4235_v18 = vld [vmem:[#allocation3 + $0x3d8] sm:$0xff] }
 0xa68   :  { %v4232_v29 = vld [vmem:[#allocation3 + $0x3c0] sm:$0xff]  ;;  %v4234_v53 = vld [vmem:[#allocation3 + $0x3d0] sm:$0xff]  ;;  %v4241_v20 = vld [vmem:[#allocation3 + $0x408] sm:$0xff] }
 0xa69   :  { %v4243_v5 = vld [vmem:[#allocation3 + $0x418] sm:$0xff]  ;;  %v4240_v47 = vld [vmem:[#allocation3 + $0x400] sm:$0xff]  ;;  %v4242_v4 = vld [vmem:[#allocation3 + $0x410] sm:$0xff] }
 0xa6a   :  { %4688 = vmatpush1.bf16.msra.mxu1 %v4152_v12  ;;  %4852 = vmatpush1.bf16.msra.mxu0 %v4154_v61  ;;  %v4249_v12 = vld [vmem:[#allocation3 + $0x448] sm:$0xff]  ;;  %v4251_v61 = vld [vmem:[#allocation3 + $0x458] sm:$0xff]  ;;  %v4248_v51 = vld [vmem:[#allocation3 + $0x440] sm:$0xff] }
 0xa6b   :  { %4689 = vmatprep.subr.bf16.mxu1 %v4161_v25  ;;  %4853 = vmatprep.subr.bf16.mxu0 %v4163_v22  ;;  %v7542_v25 = vpack.c.bf16 %v7510_v14, %v7510_v14  ;;  %v4250_v22 = vld [vmem:[#allocation3 + $0x450] sm:$0xff]  ;;  %v4256_v14 = vld [vmem:[#allocation3 + $0x480] sm:$0xff] }
 0xa6e   :  { %4690 = vmatpush1.bf16.msra.mxu1 %v4160_v59  ;;  %4854 = vmatpush1.bf16.msra.mxu0 %v4162_v27  ;;  %v4257_v59 = vld [vmem:[#allocation3 + $0x488] sm:$0xff]  ;;  %v4259_v27 = vld [vmem:[#allocation3 + $0x498] sm:$0xff] }
 0xa6f   :  { %4691 = vmatprep.subr.bf16.mxu1 %v4169_v54  ;;  %4855 = vmatprep.subr.bf16.mxu0 %v4171_v2  ;;  %v4258_v54 = vld [vmem:[#allocation3 + $0x490] sm:$0xff]  ;;  %v4265_v2 = vld [vmem:[#allocation3 + $0x4c8] sm:$0xff] }
 0xa72   :  { %4692 = vmatpush1.bf16.msra.mxu1 %v4168_v35  ;;  %4856 = vmatpush1.bf16.msra.mxu0 %v4170_v37  ;;  %v4267_v35 = vld [vmem:[#allocation3 + $0x4d8] sm:$0xff]  ;;  %v4264_v37 = vld [vmem:[#allocation3 + $0x4c0] sm:$0xff] }
 0xa73   :  { %4693 = vmatprep.subr.bf16.mxu1 %v4177_v58  ;;  %4857 = vmatprep.subr.bf16.mxu0 %v4179_v15  ;;  %v4266_v58 = vld [vmem:[#allocation3 + $0x4d0] sm:$0xff]  ;;  %v4273_v15 = vld [vmem:[#allocation3 + $0x508] sm:$0xff] }
 0xa76   :  { %4694 = vmatpush1.bf16.msra.mxu1 %v4176_v23  ;;  %4858 = vmatpush1.bf16.msra.mxu0 %v4178_v3  ;;  %v4275_v23 = vld [vmem:[#allocation3 + $0x518] sm:$0xff]  ;;  %v4272_v3 = vld [vmem:[#allocation3 + $0x500] sm:$0xff] }
 0xa77   :  { %4695 = vmatprep.subr.bf16.mxu1 %v4185_v39  ;;  %4859 = vmatprep.subr.bf16.mxu0 %v4187_v16  ;;  %v4274_v39 = vld [vmem:[#allocation3 + $0x510] sm:$0xff]  ;;  %v4281_v16 = vld [vmem:[#allocation3 + $0x548] sm:$0xff] }
 0xa7a   :  { %4696 = vmatpush1.bf16.msra.mxu1 %v4184_v41  ;;  %4860 = vmatpush1.bf16.msra.mxu0 %v4186_v42  ;;  %v4283_v41 = vld [vmem:[#allocation3 + $0x558] sm:$0xff]  ;;  %v4280_v42 = vld [vmem:[#allocation3 + $0x540] sm:$0xff] }
 0xa7b   :  { %4697 = vmatprep.subr.bf16.mxu1 %v4193_v24  ;;  %4861 = vmatprep.subr.bf16.mxu0 %v4195_v19  ;;  %v4282_v24 = vld [vmem:[#allocation3 + $0x550] sm:$0xff]  ;;  %v4289_v19 = vld [vmem:[#allocation3 + $0x588] sm:$0xff] }
 0xa7e   :  { %4698 = vmatpush1.bf16.msra.mxu1 %v4192_v43  ;;  %4862 = vmatpush1.bf16.msra.mxu0 %v4194_v45  ;;  %v4291_v43 = vld [vmem:[#allocation3 + $0x598] sm:$0xff]  ;;  %v4288_v45 = vld [vmem:[#allocation3 + $0x580] sm:$0xff] }
 0xa7f   :  { %4699 = vmatprep.subr.bf16.mxu1 %v4201_v17  ;;  %4863 = vmatprep.subr.bf16.mxu0 %v4203_v49  ;;  %v4290_v17 = vld [vmem:[#allocation3 + $0x590] sm:$0xff]  ;;  %v4297_v49 = vld [vmem:[#allocation3 + $0x5c8] sm:$0xff] }
 0xa82   :  { %4700 = vmatpush1.bf16.msra.mxu1 %v4200_v48  ;;  %4864 = vmatpush1.bf16.msra.mxu0 %v4202_v63  ;;  %v4299_v48 = vld [vmem:[#allocation3 + $0x5d8] sm:$0xff]  ;;  %v4296_v63 = vld [vmem:[#allocation3 + $0x5c0] sm:$0xff] }
 0xa83   :  { %4701 = vmatprep.subr.bf16.mxu1 %v4209_v50  ;;  %4865 = vmatprep.subr.bf16.mxu0 %v4211_v10  ;;  %v4298_v50 = vld [vmem:[#allocation3 + $0x5d0] sm:$0xff]  ;;  %v4305_v10 = vld [vmem:[#allocation3 + $0x608] sm:$0xff] }
 0xa86   :  { %4702 = vmatpush1.bf16.msra.mxu1 %v4208_v28  ;;  %4866 = vmatpush1.bf16.msra.mxu0 %v4210_v40  ;;  %v4307_v28 = vld [vmem:[#allocation3 + $0x618] sm:$0xff]  ;;  %v4304_v40 = vld [vmem:[#allocation3 + $0x600] sm:$0xff] }
 0xa87   :  { %4703 = vmatprep.subr.bf16.mxu1 %v4217_v13  ;;  %4867 = vmatprep.subr.bf16.mxu0 %v4219_v38  ;;  %v4306_v13 = vld [vmem:[#allocation3 + $0x610] sm:$0xff]  ;;  %v4313_v38 = vld [vmem:[#allocation3 + $0x648] sm:$0xff] }
 0xa8a   :  { %4704 = vmatpush1.bf16.msra.mxu1 %v4216_v52  ;;  %4868 = vmatpush1.bf16.msra.mxu0 %v4218_v36  ;;  %v4315_v52 = vld [vmem:[#allocation3 + $0x658] sm:$0xff]  ;;  %v4312_v36 = vld [vmem:[#allocation3 + $0x640] sm:$0xff] }
 0xa8b   :  { %4705 = vmatprep.subr.bf16.mxu1 %v4225_v56  ;;  %4869 = vmatprep.subr.bf16.mxu0 %v4227_v44  ;;  %v4314_v56 = vld [vmem:[#allocation3 + $0x650] sm:$0xff]  ;;  %v4321_v44 = vld [vmem:[#allocation3 + $0x688] sm:$0xff] }
 0xa8e   :  { %4706 = vmatpush1.bf16.msra.mxu1 %v4224_v60  ;;  %4870 = vmatpush1.bf16.msra.mxu0 %v4226_v0  ;;  %v4323_v60 = vld [vmem:[#allocation3 + $0x698] sm:$0xff]  ;;  %v4320_v0 = vld [vmem:[#allocation3 + $0x680] sm:$0xff] }
 0xa8f   :  { %4707 = vmatprep.subr.bf16.mxu1 %v4233_v26  ;;  %4871 = vmatprep.subr.bf16.mxu0 %v4235_v18  ;;  %v4322_v26 = vld [vmem:[#allocation3 + $0x690] sm:$0xff]  ;;  %v4329_v18 = vld [vmem:[#allocation3 + $0x6c8] sm:$0xff] }
 0xa92   :  { %4708 = vmatpush1.bf16.msra.mxu1 %v4232_v29  ;;  %4872 = vmatpush1.bf16.msra.mxu0 %v4234_v53  ;;  %v4331_v29 = vld [vmem:[#allocation3 + $0x6d8] sm:$0xff]  ;;  %v4328_v53 = vld [vmem:[#allocation3 + $0x6c0] sm:$0xff] }
 0xa93   :  { %4718 = vmatprep.subr.bf16.mxu1 %v4241_v20  ;;  %4882 = vmatprep.subr.bf16.mxu0 %v4243_v5  ;;  %v4330_v20 = vld [vmem:[#allocation3 + $0x6d0] sm:$0xff]  ;;  %v4337_v5 = vld [vmem:[#allocation3 + $0x708] sm:$0xff] }
 0xa95   :  { %4710 = vmatmul.mubr.bf16.vlgmr.msra.gmra.mrb[28].mxu1 %v7538_v21  ;;  %4874 = vmatmul.mubr.bf16.vlgmr.msra.gmra.mrb[32].mxu0 %v7538_v21 }
 0xa96   :  { %4719 = vmatpush1.bf16.msra.mxu1 %v4240_v47  ;;  %4883 = vmatpush1.bf16.msra.mxu0 %v4242_v4  ;;  %v4339_v47 = vld [vmem:[#allocation3 + $0x718] sm:$0xff]  ;;  %v4336_v4 = vld [vmem:[#allocation3 + $0x700] sm:$0xff] }
 0xa97   :  { %4720 = vmatprep.subr.bf16.mxu1 %v4249_v12  ;;  %4884 = vmatprep.subr.bf16.mxu0 %v4251_v61  ;;  %v4338_v12 = vld [vmem:[#allocation3 + $0x710] sm:$0xff]  ;;  %v4345_v61 = vld [vmem:[#allocation3 + $0x748] sm:$0xff] }
 0xa98   :  { %4750 = vmatprep.mubr.bf16.mxu1 %v7542_v25  ;;  %4914 = vmatprep.mubr.bf16.mxu0 %v7542_v25 }
 0xa9a   :  { %4721 = vmatpush1.bf16.msra.mxu1 %v4248_v51  ;;  %4885 = vmatpush1.bf16.msra.mxu0 %v4250_v22  ;;  %v4347_v51 = vld [vmem:[#allocation3 + $0x758] sm:$0xff]  ;;  %v4344_v22 = vld [vmem:[#allocation3 + $0x740] sm:$0xff] }
 0xa9b   :  { %4722 = vmatprep.subr.bf16.mxu1 %v4257_v59  ;;  %4886 = vmatprep.subr.bf16.mxu0 %v4259_v27  ;;  %v4346_v59 = vld [vmem:[#allocation3 + $0x750] sm:$0xff]  ;;  %v4353_v27 = vld [vmem:[#allocation3 + $0x788] sm:$0xff] }
 0xa9e   :  { %4723 = vmatpush1.bf16.msra.mxu1 %v4256_v14  ;;  %4887 = vmatpush1.bf16.msra.mxu0 %v4258_v54  ;;  %v4355_v14 = vld [vmem:[#allocation3 + $0x798] sm:$0xff]  ;;  %v4352_v54 = vld [vmem:[#allocation3 + $0x780] sm:$0xff] }
 0xa9f   :  { %4724 = vmatprep.subr.bf16.mxu1 %v4265_v2  ;;  %4888 = vmatprep.subr.bf16.mxu0 %v4267_v35  ;;  %v4354_v2 = vld [vmem:[#allocation3 + $0x790] sm:$0xff]  ;;  %v4361_v35 = vld [vmem:[#allocation3 + $0x7c8] sm:$0xff] }
 0xaa2   :  { %4725 = vmatpush1.bf16.msra.mxu1 %v4264_v37  ;;  %4889 = vmatpush1.bf16.msra.mxu0 %v4266_v58  ;;  %v4363_v37 = vld [vmem:[#allocation3 + $0x7d8] sm:$0xff]  ;;  %v4360_v58 = vld [vmem:[#allocation3 + $0x7c0] sm:$0xff] }
 0xaa3   :  { %4726 = vmatprep.subr.bf16.mxu1 %v4273_v15  ;;  %4890 = vmatprep.subr.bf16.mxu0 %v4275_v23  ;;  %v4362_v15 = vld [vmem:[#allocation3 + $0x7d0] sm:$0xff]  ;;  %v4369_v23 = vld [vmem:[#allocation3 + $0x808] sm:$0xff] }
 0xaa6   :  { %4727 = vmatpush1.bf16.msra.mxu1 %v4272_v3  ;;  %4891 = vmatpush1.bf16.msra.mxu0 %v4274_v39  ;;  %v4371_v3 = vld [vmem:[#allocation3 + $0x818] sm:$0xff]  ;;  %v7550_v39 = vpack.c.bf16 %v7504_v55, %v7504_v55  ;;  %v4376_v55 = vld [vmem:[#allocation3 + $0x840] sm:$0xff] }
 0xaa7   :  { %4728 = vmatprep.subr.bf16.mxu1 %v4281_v16  ;;  %4892 = vmatprep.subr.bf16.mxu0 %v4283_v41  ;;  %v4368_v16 = vld [vmem:[#allocation3 + $0x800] sm:$0xff]  ;;  %v4370_v41 = vld [vmem:[#allocation3 + $0x810] sm:$0xff] }
 0xaaa   :  { %4729 = vmatpush1.bf16.msra.mxu1 %v4280_v42  ;;  %4893 = vmatpush1.bf16.msra.mxu0 %v4282_v24  ;;  %v4377_v42 = vld [vmem:[#allocation3 + $0x848] sm:$0xff]  ;;  %v4379_v24 = vld [vmem:[#allocation3 + $0x858] sm:$0xff] }
 0xaab   :  { %4730 = vmatprep.subr.bf16.mxu1 %v4289_v19  ;;  %4894 = vmatprep.subr.bf16.mxu0 %v4291_v43  ;;  %v7554_v19 = vpack.c.bf16 %v7526_v8, %v7526_v8  ;;  %v4378_v43 = vld [vmem:[#allocation3 + $0x850] sm:$0xff]  ;;  %v4384_v8 = vld [vmem:[#allocation3 + $0x880] sm:$0xff] }
 0xaae   :  { %4731 = vmatpush1.bf16.msra.mxu1 %v4288_v45  ;;  %4895 = vmatpush1.bf16.msra.mxu0 %v4290_v17  ;;  %v4385_v45 = vld [vmem:[#allocation3 + $0x888] sm:$0xff]  ;;  %v4387_v17 = vld [vmem:[#allocation3 + $0x898] sm:$0xff] }
 0xaaf   :  { %4732 = vmatprep.subr.bf16.mxu1 %v4297_v49  ;;  %4896 = vmatprep.subr.bf16.mxu0 %v4299_v48  ;;  %v4386_v49 = vld [vmem:[#allocation3 + $0x890] sm:$0xff]  ;;  %v4393_v48 = vld [vmem:[#allocation3 + $0x8c8] sm:$0xff] }
 0xab2   :  { %4733 = vmatpush1.bf16.msra.mxu1 %v4296_v63  ;;  %4897 = vmatpush1.bf16.msra.mxu0 %v4298_v50  ;;  %v4395_v63 = vld [vmem:[#allocation3 + $0x8d8] sm:$0xff]  ;;  %v4392_v50 = vld [vmem:[#allocation3 + $0x8c0] sm:$0xff] }
 0xab3   :  { %4734 = vmatprep.subr.bf16.mxu1 %v4305_v10  ;;  %4898 = vmatprep.subr.bf16.mxu0 %v4307_v28  ;;  %v4394_v10 = vld [vmem:[#allocation3 + $0x8d0] sm:$0xff]  ;;  %v4401_v28 = vld [vmem:[#allocation3 + $0x908] sm:$0xff] }
 0xab6   :  { %4735 = vmatpush1.bf16.msra.mxu1 %v4304_v40  ;;  %4899 = vmatpush1.bf16.msra.mxu0 %v4306_v13  ;;  %v4403_v40 = vld [vmem:[#allocation3 + $0x918] sm:$0xff]  ;;  %v4400_v13 = vld [vmem:[#allocation3 + $0x900] sm:$0xff] }
 0xab7   :  { %4736 = vmatprep.subr.bf16.mxu1 %v4313_v38  ;;  %4900 = vmatprep.subr.bf16.mxu0 %v4315_v52  ;;  %v4402_v38 = vld [vmem:[#allocation3 + $0x910] sm:$0xff]  ;;  %v4409_v52 = vld [vmem:[#allocation3 + $0x948] sm:$0xff] }
 0xaba   :  { %4737 = vmatpush1.bf16.msra.mxu1 %v4312_v36  ;;  %4901 = vmatpush1.bf16.msra.mxu0 %v4314_v56  ;;  %v4411_v36 = vld [vmem:[#allocation3 + $0x958] sm:$0xff]  ;;  %v4408_v56 = vld [vmem:[#allocation3 + $0x940] sm:$0xff] }
 0xabb   :  { %4738 = vmatprep.subr.bf16.mxu1 %v4321_v44  ;;  %4902 = vmatprep.subr.bf16.mxu0 %v4323_v60  ;;  %v4410_v44 = vld [vmem:[#allocation3 + $0x950] sm:$0xff]  ;;  %v4417_v60 = vld [vmem:[#allocation3 + $0x988] sm:$0xff] }
 0xabe   :  { %4739 = vmatpush1.bf16.msra.mxu1 %v4320_v0  ;;  %4903 = vmatpush1.bf16.msra.mxu0 %v4322_v26  ;;  %v4419_v0 = vld [vmem:[#allocation3 + $0x998] sm:$0xff]  ;;  %v4416_v26 = vld [vmem:[#allocation3 + $0x980] sm:$0xff] }
 0xabf   :  { %4740 = vmatprep.subr.bf16.mxu1 %v4329_v18  ;;  %4904 = vmatprep.subr.bf16.mxu0 %v4331_v29  ;;  %v4418_v18 = vld [vmem:[#allocation3 + $0x990] sm:$0xff]  ;;  %v4425_v29 = vld [vmem:[#allocation3 + $0x9c8] sm:$0xff] }
 0xac2   :  { %4741 = vmatpush1.bf16.msra.mxu1 %v4328_v53  ;;  %4905 = vmatpush1.bf16.msra.mxu0 %v4330_v20  ;;  %v4427_v53 = vld [vmem:[#allocation3 + $0x9d8] sm:$0xff]  ;;  %v4424_v20 = vld [vmem:[#allocation3 + $0x9c0] sm:$0xff] }
 0xac3   :  { %4742 = vmatprep.subr.bf16.mxu1 %v4337_v5  ;;  %4906 = vmatprep.subr.bf16.mxu0 %v4339_v47  ;;  %v4426_v5 = vld [vmem:[#allocation3 + $0x9d0] sm:$0xff]  ;;  %v4433_v47 = vld [vmem:[#allocation3 + $0xa08] sm:$0xff] }
 0xac6   :  { %4743 = vmatpush1.bf16.msra.mxu1 %v4336_v4  ;;  %4907 = vmatpush1.bf16.msra.mxu0 %v4338_v12  ;;  %v4435_v4 = vld [vmem:[#allocation3 + $0xa18] sm:$0xff]  ;;  %v4432_v12 = vld [vmem:[#allocation3 + $0xa00] sm:$0xff] }
 0xac7   :  { %4744 = vmatprep.subr.bf16.mxu1 %v4345_v61  ;;  %4908 = vmatprep.subr.bf16.mxu0 %v4347_v51  ;;  %v4434_v61 = vld [vmem:[#allocation3 + $0xa10] sm:$0xff]  ;;  %v4441_v51 = vld [vmem:[#allocation3 + $0xa48] sm:$0xff] }
 0xaca   :  { %4745 = vmatpush1.bf16.msra.mxu1 %v4344_v22  ;;  %4909 = vmatpush1.bf16.msra.mxu0 %v4346_v59  ;;  %v4443_v22 = vld [vmem:[#allocation3 + $0xa58] sm:$0xff]  ;;  %v4440_v59 = vld [vmem:[#allocation3 + $0xa40] sm:$0xff] }
 0xacb   :  { %4746 = vmatprep.subr.bf16.mxu1 %v4353_v27  ;;  %4910 = vmatprep.subr.bf16.mxu0 %v4355_v14  ;;  %v4442_v27 = vld [vmem:[#allocation3 + $0xa50] sm:$0xff]  ;;  %v4449_v14 = vld [vmem:[#allocation3 + $0xa88] sm:$0xff] }
 0xace   :  { %4747 = vmatpush1.bf16.msra.mxu1 %v4352_v54  ;;  %4911 = vmatpush1.bf16.msra.mxu0 %v4354_v2  ;;  %v4451_v54 = vld [vmem:[#allocation3 + $0xa98] sm:$0xff]  ;;  %v4448_v2 = vld [vmem:[#allocation3 + $0xa80] sm:$0xff] }
 0xacf   :  { %4748 = vmatprep.subr.bf16.mxu1 %v4361_v35  ;;  %4912 = vmatprep.subr.bf16.mxu0 %v4363_v37  ;;  %v4450_v35 = vld [vmem:[#allocation3 + $0xa90] sm:$0xff]  ;;  %v4457_v37 = vld [vmem:[#allocation3 + $0xac8] sm:$0xff] }
 0xad2   :  { %4749 = vmatpush1.bf16.msra.mxu1 %v4360_v58  ;;  %4913 = vmatpush1.bf16.msra.mxu0 %v4362_v15  ;;  %v4459_v58 = vld [vmem:[#allocation3 + $0xad8] sm:$0xff]  ;;  %v4456_v15 = vld [vmem:[#allocation3 + $0xac0] sm:$0xff] }
 0xad3   :  { %4759 = vmatprep.subr.bf16.mxu1 %v4369_v23  ;;  %4923 = vmatprep.subr.bf16.mxu0 %v4371_v3  ;;  %v4458_v23 = vld [vmem:[#allocation3 + $0xad0] sm:$0xff]  ;;  %v4465_v3 = vld [vmem:[#allocation3 + $0xb08] sm:$0xff] }
 0xad5   :  { %4751 = vmatmul.mubr.bf16.vlgmr.msra.gmra.mrb[28].mxu1 %v7550_v39  ;;  %4915 = vmatmul.mubr.bf16.vlgmr.msra.gmra.mrb[32].mxu0 %v7550_v39 }
 0xad6   :  { %4760 = vmatpush1.bf16.msra.mxu1 %v4368_v16  ;;  %4924 = vmatpush1.bf16.msra.mxu0 %v4370_v41  ;;  %v4467_v16 = vld [vmem:[#allocation3 + $0xb18] sm:$0xff]  ;;  %v4464_v41 = vld [vmem:[#allocation3 + $0xb00] sm:$0xff] }
 0xad7   :  { %4761 = vmatprep.subr.bf16.mxu1 %v4377_v42  ;;  %4925 = vmatprep.subr.bf16.mxu0 %v4379_v24  ;;  %v4466_v42 = vld [vmem:[#allocation3 + $0xb10] sm:$0xff]  ;;  %v4473_v24 = vld [vmem:[#allocation3 + $0xb48] sm:$0xff] }
 0xad8   :  { %4791 = vmatprep.mubr.bf16.mxu1 %v7554_v19  ;;  %4955 = vmatprep.mubr.bf16.mxu0 %v7554_v19 }
 0xada   :  { %4762 = vmatpush1.bf16.msra.mxu1 %v4376_v55  ;;  %4926 = vmatpush1.bf16.msra.mxu0 %v4378_v43  ;;  %v4475_v55 = vld [vmem:[#allocation3 + $0xb58] sm:$0xff]  ;;  %v4472_v43 = vld [vmem:[#allocation3 + $0xb40] sm:$0xff] }
 0xadb   :  { %4763 = vmatprep.subr.bf16.mxu1 %v4385_v45  ;;  %4927 = vmatprep.subr.bf16.mxu0 %v4387_v17  ;;  %v4474_v45 = vld [vmem:[#allocation3 + $0xb50] sm:$0xff]  ;;  %v4481_v17 = vld [vmem:[#allocation3 + $0xb88] sm:$0xff] }
 0xade   :  { %4764 = vmatpush1.bf16.msra.mxu1 %v4384_v8  ;;  %4928 = vmatpush1.bf16.msra.mxu0 %v4386_v49  ;;  %v4483_v8 = vld [vmem:[#allocation3 + $0xb98] sm:$0xff]  ;;  %v4480_v49 = vld [vmem:[#allocation3 + $0xb80] sm:$0xff] }
 0xadf   :  { %4765 = vmatprep.subr.bf16.mxu1 %v4393_v48  ;;  %4929 = vmatprep.subr.bf16.mxu0 %v4395_v63  ;;  %v4482_v48 = vld [vmem:[#allocation3 + $0xb90] sm:$0xff]  ;;  %v4489_v63 = vld [vmem:[#allocation3 + $0xbc8] sm:$0xff] }
 0xae2   :  { %4766 = vmatpush1.bf16.msra.mxu1 %v4392_v50  ;;  %4930 = vmatpush1.bf16.msra.mxu0 %v4394_v10  ;;  %v4491_v50 = vld [vmem:[#allocation3 + $0xbd8] sm:$0xff]  ;;  %v4488_v10 = vld [vmem:[#allocation3 + $0xbc0] sm:$0xff] }
 0xae3   :  { %4767 = vmatprep.subr.bf16.mxu1 %v4401_v28  ;;  %4931 = vmatprep.subr.bf16.mxu0 %v4403_v40  ;;  %v4490_v28 = vld [vmem:[#allocation3 + $0xbd0] sm:$0xff]  ;;  %v4497_v40 = vld [vmem:[#allocation3 + $0xc08] sm:$0xff] }
 0xae6   :  { %4768 = vmatpush1.bf16.msra.mxu1 %v4400_v13  ;;  %4932 = vmatpush1.bf16.msra.mxu0 %v4402_v38  ;;  %v4499_v13 = vld [vmem:[#allocation3 + $0xc18] sm:$0xff]  ;;  %v7562_v38 = vpack.c.bf16 %v7522_v46, %v7522_v46  ;;  %v4504_v46 = vld [vmem:[#allocation3 + $0xc40] sm:$0xff] }
 0xae7   :  { %4769 = vmatprep.subr.bf16.mxu1 %v4409_v52  ;;  %4933 = vmatprep.subr.bf16.mxu0 %v4411_v36  ;;  %v4496_v52 = vld [vmem:[#allocation3 + $0xc00] sm:$0xff]  ;;  %v4498_v36 = vld [vmem:[#allocation3 + $0xc10] sm:$0xff] }
 0xaea   :  { %4770 = vmatpush1.bf16.msra.mxu1 %v4408_v56  ;;  %4934 = vmatpush1.bf16.msra.mxu0 %v4410_v44  ;;  %v4505_v56 = vld [vmem:[#allocation3 + $0xc48] sm:$0xff]  ;;  %v4507_v44 = vld [vmem:[#allocation3 + $0xc58] sm:$0xff] }
 0xaeb   :  { %4771 = vmatprep.subr.bf16.mxu1 %v4417_v60  ;;  %4935 = vmatprep.subr.bf16.mxu0 %v4419_v0  ;;  %v7566_v60 = vpack.c.bf16 %v7528_v57, %v7528_v57  ;;  %v4506_v0 = vld [vmem:[#allocation3 + $0xc50] sm:$0xff]  ;;  %v4512_v57 = vld [vmem:[#allocation3 + $0xc80] sm:$0xff] }
 0xaee   :  { %4772 = vmatpush1.bf16.msra.mxu1 %v4416_v26  ;;  %4936 = vmatpush1.bf16.msra.mxu0 %v4418_v18  ;;  %v4513_v26 = vld [vmem:[#allocation3 + $0xc88] sm:$0xff]  ;;  %v4515_v18 = vld [vmem:[#allocation3 + $0xc98] sm:$0xff] }
 0xaef   :  { %4773 = vmatprep.subr.bf16.mxu1 %v4425_v29  ;;  %4937 = vmatprep.subr.bf16.mxu0 %v4427_v53  ;;  %v4514_v29 = vld [vmem:[#allocation3 + $0xc90] sm:$0xff]  ;;  %v4521_v53 = vld [vmem:[#allocation3 + $0xcc8] sm:$0xff] }
 0xaf2   :  { %4774 = vmatpush1.bf16.msra.mxu1 %v4424_v20  ;;  %4938 = vmatpush1.bf16.msra.mxu0 %v4426_v5  ;;  %v4523_v20 = vld [vmem:[#allocation3 + $0xcd8] sm:$0xff]  ;;  %v4520_v5 = vld [vmem:[#allocation3 + $0xcc0] sm:$0xff] }
 0xaf3   :  { %4775 = vmatprep.subr.bf16.mxu1 %v4433_v47  ;;  %4939 = vmatprep.subr.bf16.mxu0 %v4435_v4  ;;  %v4522_v47 = vld [vmem:[#allocation3 + $0xcd0] sm:$0xff]  ;;  %v4529_v4 = vld [vmem:[#allocation3 + $0xd08] sm:$0xff] }
 0xaf6   :  { %4776 = vmatpush1.bf16.msra.mxu1 %v4432_v12  ;;  %4940 = vmatpush1.bf16.msra.mxu0 %v4434_v61  ;;  %v4531_v12 = vld [vmem:[#allocation3 + $0xd18] sm:$0xff]  ;;  %v4528_v61 = vld [vmem:[#allocation3 + $0xd00] sm:$0xff] }
 0xaf7   :  { %4777 = vmatprep.subr.bf16.mxu1 %v4441_v51  ;;  %4941 = vmatprep.subr.bf16.mxu0 %v4443_v22  ;;  %v4530_v51 = vld [vmem:[#allocation3 + $0xd10] sm:$0xff]  ;;  %v4537_v22 = vld [vmem:[#allocation3 + $0xd48] sm:$0xff] }
 0xafa   :  { %4778 = vmatpush1.bf16.msra.mxu1 %v4440_v59  ;;  %4942 = vmatpush1.bf16.msra.mxu0 %v4442_v27  ;;  %v4539_v59 = vld [vmem:[#allocation3 + $0xd58] sm:$0xff]  ;;  %v4536_v27 = vld [vmem:[#allocation3 + $0xd40] sm:$0xff] }
 0xafb   :  { %4779 = vmatprep.subr.bf16.mxu1 %v4449_v14  ;;  %4943 = vmatprep.subr.bf16.mxu0 %v4451_v54  ;;  %v4538_v14 = vld [vmem:[#allocation3 + $0xd50] sm:$0xff]  ;;  %v4545_v54 = vld [vmem:[#allocation3 + $0xd88] sm:$0xff] }
 0xafe   :  { %4780 = vmatpush1.bf16.msra.mxu1 %v4448_v2  ;;  %4944 = vmatpush1.bf16.msra.mxu0 %v4450_v35  ;;  %v4547_v2 = vld [vmem:[#allocation3 + $0xd98] sm:$0xff]  ;;  %v4544_v35 = vld [vmem:[#allocation3 + $0xd80] sm:$0xff] }
 0xaff   :  { %4781 = vmatprep.subr.bf16.mxu1 %v4457_v37  ;;  %4945 = vmatprep.subr.bf16.mxu0 %v4459_v58  ;;  %v4546_v37 = vld [vmem:[#allocation3 + $0xd90] sm:$0xff]  ;;  %v4553_v58 = vld [vmem:[#allocation3 + $0xdc8] sm:$0xff] }
 0xb02   :  { %4782 = vmatpush1.bf16.msra.mxu1 %v4456_v15  ;;  %4946 = vmatpush1.bf16.msra.mxu0 %v4458_v23  ;;  %v4555_v15 = vld [vmem:[#allocation3 + $0xdd8] sm:$0xff]  ;;  %v4552_v23 = vld [vmem:[#allocation3 + $0xdc0] sm:$0xff] }
 0xb03   :  { %4783 = vmatprep.subr.bf16.mxu1 %v4465_v3  ;;  %4947 = vmatprep.subr.bf16.mxu0 %v4467_v16  ;;  %v4554_v3 = vld [vmem:[#allocation3 + $0xdd0] sm:$0xff]  ;;  %v4561_v16 = vld [vmem:[#allocation3 + $0xe08] sm:$0xff] }
 0xb06   :  { %4784 = vmatpush1.bf16.msra.mxu1 %v4464_v41  ;;  %4948 = vmatpush1.bf16.msra.mxu0 %v4466_v42  ;;  %v4563_v41 = vld [vmem:[#allocation3 + $0xe18] sm:$0xff]  ;;  %v4560_v42 = vld [vmem:[#allocation3 + $0xe00] sm:$0xff] }
 0xb07   :  { %4785 = vmatprep.subr.bf16.mxu1 %v4473_v24  ;;  %4949 = vmatprep.subr.bf16.mxu0 %v4475_v55  ;;  %v4562_v24 = vld [vmem:[#allocation3 + $0xe10] sm:$0xff]  ;;  %v4569_v55 = vld [vmem:[#allocation3 + $0xe48] sm:$0xff] }
 0xb0a   :  { %4786 = vmatpush1.bf16.msra.mxu1 %v4472_v43  ;;  %4950 = vmatpush1.bf16.msra.mxu0 %v4474_v45  ;;  %v4571_v43 = vld [vmem:[#allocation3 + $0xe58] sm:$0xff]  ;;  %v4568_v45 = vld [vmem:[#allocation3 + $0xe40] sm:$0xff] }
 0xb0b   :  { %4787 = vmatprep.subr.bf16.mxu1 %v4481_v17  ;;  %4951 = vmatprep.subr.bf16.mxu0 %v4483_v8  ;;  %v4570_v17 = vld [vmem:[#allocation3 + $0xe50] sm:$0xff]  ;;  %v4577_v8 = vld [vmem:[#allocation3 + $0xe88] sm:$0xff] }
 0xb0e   :  { %4788 = vmatpush1.bf16.msra.mxu1 %v4480_v49  ;;  %4952 = vmatpush1.bf16.msra.mxu0 %v4482_v48  ;;  %v4579_v49 = vld [vmem:[#allocation3 + $0xe98] sm:$0xff]  ;;  %v4576_v48 = vld [vmem:[#allocation3 + $0xe80] sm:$0xff] }
 0xb0f   :  { %4789 = vmatprep.subr.bf16.mxu1 %v4489_v63  ;;  %4953 = vmatprep.subr.bf16.mxu0 %v4491_v50  ;;  %v4578_v63 = vld [vmem:[#allocation3 + $0xe90] sm:$0xff]  ;;  %v4585_v50 = vld [vmem:[#allocation3 + $0xec8] sm:$0xff] }
 0xb12   :  { %4790 = vmatpush1.bf16.msra.mxu1 %v4488_v10  ;;  %4954 = vmatpush1.bf16.msra.mxu0 %v4490_v28  ;;  %v4587_v10 = vld [vmem:[#allocation3 + $0xed8] sm:$0xff]  ;;  %v4584_v28 = vld [vmem:[#allocation3 + $0xec0] sm:$0xff] }
 0xb13   :  { %4800 = vmatprep.subr.bf16.mxu1 %v4497_v40  ;;  %4964 = vmatprep.subr.bf16.mxu0 %v4499_v13  ;;  %v4586_v40 = vld [vmem:[#allocation3 + $0xed0] sm:$0xff]  ;;  %v4593_v13 = vld [vmem:[#allocation3 + $0xf08] sm:$0xff] }
 0xb15   :  { %4792 = vmatmul.mubr.bf16.vlgmr.msra.gmra.mrb[28].mxu1 %v7562_v38  ;;  %4956 = vmatmul.mubr.bf16.vlgmr.msra.gmra.mrb[32].mxu0 %v7562_v38 }
 0xb16   :  { %4801 = vmatpush1.bf16.msra.mxu1 %v4496_v52  ;;  %4965 = vmatpush1.bf16.msra.mxu0 %v4498_v36  ;;  %v4595_v52 = vld [vmem:[#allocation3 + $0xf18] sm:$0xff]  ;;  %v4592_v36 = vld [vmem:[#allocation3 + $0xf00] sm:$0xff] }
 0xb17   :  { %4802 = vmatprep.subr.bf16.mxu1 %v4505_v56  ;;  %4966 = vmatprep.subr.bf16.mxu0 %v4507_v44  ;;  %v4594_v56 = vld [vmem:[#allocation3 + $0xf10] sm:$0xff]  ;;  %v4601_v44 = vld [vmem:[#allocation3 + $0xf48] sm:$0xff] }
 0xb18   :  { %4832 = vmatprep.mubr.bf16.mxu1 %v7566_v60  ;;  %4996 = vmatprep.mubr.bf16.mxu0 %v7566_v60 }
 0xb1a   :  { %4803 = vmatpush1.bf16.msra.mxu1 %v4504_v46  ;;  %4967 = vmatpush1.bf16.msra.mxu0 %v4506_v0  ;;  %v4603_v46 = vld [vmem:[#allocation3 + $0xf58] sm:$0xff]  ;;  %v4600_v0 = vld [vmem:[#allocation3 + $0xf40] sm:$0xff] }
 0xb1b   :  { %4804 = vmatprep.subr.bf16.mxu1 %v4513_v26  ;;  %4968 = vmatprep.subr.bf16.mxu0 %v4515_v18  ;;  %v4602_v26 = vld [vmem:[#allocation3 + $0xf50] sm:$0xff]  ;;  %v4609_v18 = vld [vmem:[#allocation3 + $0xf88] sm:$0xff] }
 0xb1e   :  { %4805 = vmatpush1.bf16.msra.mxu1 %v4512_v57  ;;  %4969 = vmatpush1.bf16.msra.mxu0 %v4514_v29  ;;  %v4611_v57 = vld [vmem:[#allocation3 + $0xf98] sm:$0xff]  ;;  %v4608_v29 = vld [vmem:[#allocation3 + $0xf80] sm:$0xff] }
 0xb1f   :  { %4806 = vmatprep.subr.bf16.mxu1 %v4521_v53  ;;  %4970 = vmatprep.subr.bf16.mxu0 %v4523_v20  ;;  %v4610_v53 = vld [vmem:[#allocation3 + $0xf90] sm:$0xff]  ;;  %v4617_v20 = vld [vmem:[#allocation3 + $0xfc8] sm:$0xff] }
 0xb22   :  { %4807 = vmatpush1.bf16.msra.mxu1 %v4520_v5  ;;  %4971 = vmatpush1.bf16.msra.mxu0 %v4522_v47  ;;  %v4619_v5 = vld [vmem:[#allocation3 + $0xfd8] sm:$0xff]  ;;  %v4616_v47 = vld [vmem:[#allocation3 + $0xfc0] sm:$0xff] }
 0xb23   :  { %4808 = vmatprep.subr.bf16.mxu1 %v4529_v4  ;;  %4972 = vmatprep.subr.bf16.mxu0 %v4531_v12  ;;  %v4618_v4 = vld [vmem:[#allocation3 + $0xfd0] sm:$0xff]  ;;  %v4117_v12 = vld [vmem:[#allocation3 + $0x28] sm:$0xff] }
 0xb26   :  { %4809 = vmatpush1.bf16.msra.mxu1 %v4528_v61  ;;  %4973 = vmatpush1.bf16.msra.mxu0 %v4530_v51  ;;  %v4119_v61 = vld [vmem:[#allocation3 + $0x38] sm:$0xff]  ;;  %v7574_v51 = vpack.c.bf16 %v7524_v1, %v7524_v1  ;;  %v4133_v1 = vld [vmem:[#allocation3 + $0xa8] sm:$0xff] }
 0xb27   :  { %4810 = vmatprep.subr.bf16.mxu1 %v4537_v22  ;;  %4974 = vmatprep.subr.bf16.mxu0 %v4539_v59  ;;  %v4116_v22 = vld [vmem:[#allocation3 + $0x20] sm:$0xff]  ;;  %v4118_v59 = vld [vmem:[#allocation3 + $0x30] sm:$0xff] }
 0xb2a   :  { %4811 = vmatpush1.bf16.msra.mxu1 %v4536_v27  ;;  %4975 = vmatpush1.bf16.msra.mxu0 %v4538_v14  ;;  %v4125_v27 = vld [vmem:[#allocation3 + $0x68] sm:$0xff]  ;;  %v4127_v14 = vld [vmem:[#allocation3 + $0x78] sm:$0xff] }
 0xb2b   :  { %4812 = vmatprep.subr.bf16.mxu1 %v4545_v54  ;;  %4976 = vmatprep.subr.bf16.mxu0 %v4547_v2  ;;  %v4124_v54 = vld [vmem:[#allocation3 + $0x60] sm:$0xff]  ;;  %v4126_v2 = vld [vmem:[#allocation3 + $0x70] sm:$0xff] }
 0xb2e   :  { %4813 = vmatpush1.bf16.msra.mxu1 %v4544_v35  ;;  %4977 = vmatpush1.bf16.msra.mxu0 %v4546_v37  ;;  %v4135_v35 = vld [vmem:[#allocation3 + $0xb8] sm:$0xff]  ;;  %v4132_v37 = vld [vmem:[#allocation3 + $0xa0] sm:$0xff] }
 0xb2f   :  { %4814 = vmatprep.subr.bf16.mxu1 %v4553_v58  ;;  %4978 = vmatprep.subr.bf16.mxu0 %v4555_v15  ;;  %v4134_v58 = vld [vmem:[#allocation3 + $0xb0] sm:$0xff]  ;;  %v4141_v15 = vld [vmem:[#allocation3 + $0xe8] sm:$0xff] }
 0xb32   :  { %4815 = vmatpush1.bf16.msra.mxu1 %v4552_v23  ;;  %4979 = vmatpush1.bf16.msra.mxu0 %v4554_v3  ;;  %v4143_v23 = vld [vmem:[#allocation3 + $0xf8] sm:$0xff]  ;;  %v4140_v3 = vld [vmem:[#allocation3 + $0xe0] sm:$0xff] }
 0xb33   :  { %4816 = vmatprep.subr.bf16.mxu1 %v4561_v16  ;;  %4980 = vmatprep.subr.bf16.mxu0 %v4563_v41  ;;  %v4142_v16 = vld [vmem:[#allocation3 + $0xf0] sm:$0xff]  ;;  %v4149_v41 = vld [vmem:[#allocation3 + $0x128] sm:$0xff] }
 0xb36   :  { %4817 = vmatpush1.bf16.msra.mxu1 %v4560_v42  ;;  %4981 = vmatpush1.bf16.msra.mxu0 %v4562_v24  ;;  %v4151_v42 = vld [vmem:[#allocation3 + $0x138] sm:$0xff]  ;;  %v4150_v24 = vld [vmem:[#allocation3 + $0x130] sm:$0xff] }
 0xb37   :  { %4818 = vmatprep.subr.bf16.mxu1 %v4569_v55  ;;  %4982 = vmatprep.subr.bf16.mxu0 %v4571_v43  ;;  %v4157_v55 = vld [vmem:[#allocation3 + $0x168] sm:$0xff]  ;;  %v4159_v43 = vld [vmem:[#allocation3 + $0x178] sm:$0xff] }
 0xb3a   :  { %4819 = vmatpush1.bf16.msra.mxu1 %v4568_v45  ;;  %4983 = vmatpush1.bf16.msra.mxu0 %v4570_v17  ;;  %v4156_v45 = vld [vmem:[#allocation3 + $0x160] sm:$0xff]  ;;  %v4158_v17 = vld [vmem:[#allocation3 + $0x170] sm:$0xff] }
 0xb3b   :  { %4820 = vmatprep.subr.bf16.mxu1 %v4577_v8  ;;  %4984 = vmatprep.subr.bf16.mxu0 %v4579_v49  ;;  %v4165_v8 = vld [vmem:[#allocation3 + $0x1a8] sm:$0xff]  ;;  %v4167_v49 = vld [vmem:[#allocation3 + $0x1b8] sm:$0xff] }
 0xb3e   :  { %4821 = vmatpush1.bf16.msra.mxu1 %v4576_v48  ;;  %4985 = vmatpush1.bf16.msra.mxu0 %v4578_v63  ;;  %v4164_v48 = vld [vmem:[#allocation3 + $0x1a0] sm:$0xff]  ;;  %v4166_v63 = vld [vmem:[#allocation3 + $0x1b0] sm:$0xff] }
 0xb3f   :  { %4822 = vmatprep.subr.bf16.mxu1 %v4585_v50  ;;  %4986 = vmatprep.subr.bf16.mxu0 %v4587_v10  ;;  %v4173_v50 = vld [vmem:[#allocation3 + $0x1e8] sm:$0xff]  ;;  %v4175_v10 = vld [vmem:[#allocation3 + $0x1f8] sm:$0xff] }
 0xb42   :  { %4823 = vmatpush1.bf16.msra.mxu1 %v4584_v28  ;;  %4987 = vmatpush1.bf16.msra.mxu0 %v4586_v40  ;;  %v4172_v28 = vld [vmem:[#allocation3 + $0x1e0] sm:$0xff]  ;;  %v4174_v40 = vld [vmem:[#allocation3 + $0x1f0] sm:$0xff] }
 0xb43   :  { %4824 = vmatprep.subr.bf16.mxu1 %v4593_v13  ;;  %4988 = vmatprep.subr.bf16.mxu0 %v4595_v52  ;;  %v4181_v13 = vld [vmem:[#allocation3 + $0x228] sm:$0xff]  ;;  %v4183_v52 = vld [vmem:[#allocation3 + $0x238] sm:$0xff] }
 0xb46   :  { %4825 = vmatpush1.bf16.msra.mxu1 %v4592_v36  ;;  %4989 = vmatpush1.bf16.msra.mxu0 %v4594_v56  ;;  %v4180_v36 = vld [vmem:[#allocation3 + $0x220] sm:$0xff]  ;;  %v4182_v56 = vld [vmem:[#allocation3 + $0x230] sm:$0xff] }
 0xb47   :  { %4826 = vmatprep.subr.bf16.mxu1 %v4601_v44  ;;  %4990 = vmatprep.subr.bf16.mxu0 %v4603_v46  ;;  %v4189_v44 = vld [vmem:[#allocation3 + $0x268] sm:$0xff]  ;;  %v4191_v46 = vld [vmem:[#allocation3 + $0x278] sm:$0xff] }
 0xb4a   :  { %4827 = vmatpush1.bf16.msra.mxu1 %v4600_v0  ;;  %4991 = vmatpush1.bf16.msra.mxu0 %v4602_v26  ;;  %v4188_v0 = vld [vmem:[#allocation3 + $0x260] sm:$0xff]  ;;  %v4190_v26 = vld [vmem:[#allocation3 + $0x270] sm:$0xff] }
 0xb4b   :  { %4828 = vmatprep.subr.bf16.mxu1 %v4609_v18  ;;  %4992 = vmatprep.subr.bf16.mxu0 %v4611_v57  ;;  %v4197_v18 = vld [vmem:[#allocation3 + $0x2a8] sm:$0xff]  ;;  %v4199_v57 = vld [vmem:[#allocation3 + $0x2b8] sm:$0xff] }
 0xb4e   :  { %4829 = vmatpush1.bf16.msra.mxu1 %v4608_v29  ;;  %4993 = vmatpush1.bf16.msra.mxu0 %v4610_v53  ;;  %v4196_v29 = vld [vmem:[#allocation3 + $0x2a0] sm:$0xff]  ;;  %v4198_v53 = vld [vmem:[#allocation3 + $0x2b0] sm:$0xff] }
 0xb4f   :  { %4830 = vmatprep.subr.bf16.mxu1 %v4617_v20  ;;  %4994 = vmatprep.subr.bf16.mxu0 %v4619_v5  ;;  %v4205_v20 = vld [vmem:[#allocation3 + $0x2e8] sm:$0xff]  ;;  %v4207_v5 = vld [vmem:[#allocation3 + $0x2f8] sm:$0xff] }
 0xb52   :  { %4831 = vmatpush1.bf16.msra.mxu1 %v4616_v47  ;;  %4995 = vmatpush1.bf16.msra.mxu0 %v4618_v4  ;;  %v4204_v47 = vld [vmem:[#allocation3 + $0x2e0] sm:$0xff]  ;;  %v4206_v4 = vld [vmem:[#allocation3 + $0x2f0] sm:$0xff] }
 0xb53   :  { %5005 = vmatprep.subr.bf16.mxu1 %v4117_v12  ;;  %5169 = vmatprep.subr.bf16.mxu0 %v4119_v61  ;;  %v4213_v12 = vld [vmem:[#allocation3 + $0x328] sm:$0xff]  ;;  %v4215_v61 = vld [vmem:[#allocation3 + $0x338] sm:$0xff] }
 0xb55   :  { %4833 = vmatmul.mubr.bf16.vlgmr.msra.gmra.mrb[28].mxu1 %v7574_v51  ;;  %4997 = vmatmul.mubr.bf16.vlgmr.msra.gmra.mrb[32].mxu0 %v7574_v51 }
 0xb56   :  { %5006 = vmatpush1.bf16.msra.mxu1 %v4116_v22  ;;  %5170 = vmatpush1.bf16.msra.mxu0 %v4118_v59  ;;  %v4212_v22 = vld [vmem:[#allocation3 + $0x320] sm:$0xff]  ;;  %v4214_v59 = vld [vmem:[#allocation3 + $0x330] sm:$0xff] }
 0xb57   :  { %5007 = vmatprep.subr.bf16.mxu1 %v4125_v27  ;;  %5171 = vmatprep.subr.bf16.mxu0 %v4127_v14  ;;  %v4221_v27 = vld [vmem:[#allocation3 + $0x368] sm:$0xff]  ;;  %v4223_v14 = vld [vmem:[#allocation3 + $0x378] sm:$0xff] }
 0xb58   :  { %5037 = vmatprep.mubr.bf16.mxu1 %v7532_v62  ;;  %5201 = vmatprep.mubr.bf16.mxu0 %v7532_v62  ;;  %v4148_v62 = vld [vmem:[#allocation3 + $0x120] sm:$0xff] }
 0xb5a   :  { %5008 = vmatpush1.bf16.msra.mxu1 %v4124_v54  ;;  %5172 = vmatpush1.bf16.msra.mxu0 %v4126_v2  ;;  %v4220_v54 = vld [vmem:[#allocation3 + $0x360] sm:$0xff]  ;;  %v4222_v2 = vld [vmem:[#allocation3 + $0x370] sm:$0xff] }
 0xb5b   :  { %5009 = vmatprep.subr.bf16.mxu1 %v4133_v1  ;;  %5173 = vmatprep.subr.bf16.mxu0 %v4135_v35  ;;  %v4229_v1 = vld [vmem:[#allocation3 + $0x3a8] sm:$0xff]  ;;  %v4231_v35 = vld [vmem:[#allocation3 + $0x3b8] sm:$0xff] }
 0xb5e   :  { %5010 = vmatpush1.bf16.msra.mxu1 %v4132_v37  ;;  %5174 = vmatpush1.bf16.msra.mxu0 %v4134_v58  ;;  %v4228_v37 = vld [vmem:[#allocation3 + $0x3a0] sm:$0xff]  ;;  %v4230_v58 = vld [vmem:[#allocation3 + $0x3b0] sm:$0xff] }
 0xb5f   :  { %5011 = vmatprep.subr.bf16.mxu1 %v4141_v15  ;;  %5175 = vmatprep.subr.bf16.mxu0 %v4143_v23  ;;  %v4237_v15 = vld [vmem:[#allocation3 + $0x3e8] sm:$0xff]  ;;  %v4239_v23 = vld [vmem:[#allocation3 + $0x3f8] sm:$0xff] }
 0xb62   :  { %5012 = vmatpush1.bf16.msra.mxu1 %v4140_v3  ;;  %5176 = vmatpush1.bf16.msra.mxu0 %v4142_v16  ;;  %v4236_v3 = vld [vmem:[#allocation3 + $0x3e0] sm:$0xff]  ;;  %v4238_v16 = vld [vmem:[#allocation3 + $0x3f0] sm:$0xff] }
 0xb63   :  { %5013 = vmatprep.subr.bf16.mxu1 %v4149_v41  ;;  %5177 = vmatprep.subr.bf16.mxu0 %v4151_v42  ;;  %v4245_v41 = vld [vmem:[#allocation3 + $0x428] sm:$0xff]  ;;  %v4247_v42 = vld [vmem:[#allocation3 + $0x438] sm:$0xff] }
 0xb66   :  { %5014 = vmatpush1.bf16.msra.mxu1 %v4148_v62  ;;  %5178 = vmatpush1.bf16.msra.mxu0 %v4150_v24  ;;  %v4244_v62 = vld [vmem:[#allocation3 + $0x420] sm:$0xff]  ;;  %v4246_v24 = vld [vmem:[#allocation3 + $0x430] sm:$0xff] }
 0xb67   :  { %5015 = vmatprep.subr.bf16.mxu1 %v4157_v55  ;;  %5179 = vmatprep.subr.bf16.mxu0 %v4159_v43  ;;  %v4253_v55 = vld [vmem:[#allocation3 + $0x468] sm:$0xff]  ;;  %v4255_v43 = vld [vmem:[#allocation3 + $0x478] sm:$0xff] }
 0xb6a   :  { %5016 = vmatpush1.bf16.msra.mxu1 %v4156_v45  ;;  %5180 = vmatpush1.bf16.msra.mxu0 %v4158_v17  ;;  %v4252_v45 = vld [vmem:[#allocation3 + $0x460] sm:$0xff]  ;;  %v4254_v17 = vld [vmem:[#allocation3 + $0x470] sm:$0xff] }
 0xb6b   :  { %5017 = vmatprep.subr.bf16.mxu1 %v4165_v8  ;;  %5181 = vmatprep.subr.bf16.mxu0 %v4167_v49  ;;  %v4261_v8 = vld [vmem:[#allocation3 + $0x4a8] sm:$0xff]  ;;  %v4263_v49 = vld [vmem:[#allocation3 + $0x4b8] sm:$0xff] }
 0xb6e   :  { %5018 = vmatpush1.bf16.msra.mxu1 %v4164_v48  ;;  %5182 = vmatpush1.bf16.msra.mxu0 %v4166_v63  ;;  %v4260_v48 = vld [vmem:[#allocation3 + $0x4a0] sm:$0xff]  ;;  %v4262_v63 = vld [vmem:[#allocation3 + $0x4b0] sm:$0xff] }
 0xb6f   :  { %5019 = vmatprep.subr.bf16.mxu1 %v4173_v50  ;;  %5183 = vmatprep.subr.bf16.mxu0 %v4175_v10  ;;  %v4269_v50 = vld [vmem:[#allocation3 + $0x4e8] sm:$0xff]  ;;  %v4268_v10 = vld [vmem:[#allocation3 + $0x4e0] sm:$0xff] }
 0xb72   :  { %5020 = vmatpush1.bf16.msra.mxu1 %v4172_v28  ;;  %5184 = vmatpush1.bf16.msra.mxu0 %v4174_v40  ;;  %v4270_v28 = vld [vmem:[#allocation3 + $0x4f0] sm:$0xff]  ;;  %v4277_v40 = vld [vmem:[#allocation3 + $0x528] sm:$0xff] }
 0xb73   :  { %5021 = vmatprep.subr.bf16.mxu1 %v4181_v13  ;;  %5185 = vmatprep.subr.bf16.mxu0 %v4183_v52  ;;  %v4279_v13 = vld [vmem:[#allocation3 + $0x538] sm:$0xff]  ;;  %v4278_v52 = vld [vmem:[#allocation3 + $0x530] sm:$0xff] }
 0xb76   :  { %5022 = vmatpush1.bf16.msra.mxu1 %v4180_v36  ;;  %5186 = vmatpush1.bf16.msra.mxu0 %v4182_v56  ;;  %v4285_v36 = vld [vmem:[#allocation3 + $0x568] sm:$0xff]  ;;  %v4287_v56 = vld [vmem:[#allocation3 + $0x578] sm:$0xff] }
 0xb77   :  { %5023 = vmatprep.subr.bf16.mxu1 %v4189_v44  ;;  %5187 = vmatprep.subr.bf16.mxu0 %v4191_v46  ;;  %v4284_v44 = vld [vmem:[#allocation3 + $0x560] sm:$0xff]  ;;  %v4286_v46 = vld [vmem:[#allocation3 + $0x570] sm:$0xff] }
 0xb7a   :  { %5024 = vmatpush1.bf16.msra.mxu1 %v4188_v0  ;;  %5188 = vmatpush1.bf16.msra.mxu0 %v4190_v26  ;;  %v4293_v0 = vld [vmem:[#allocation3 + $0x5a8] sm:$0xff]  ;;  %v4295_v26 = vld [vmem:[#allocation3 + $0x5b8] sm:$0xff] }
 0xb7b   :  { %5025 = vmatprep.subr.bf16.mxu1 %v4197_v18  ;;  %5189 = vmatprep.subr.bf16.mxu0 %v4199_v57  ;;  %v4292_v18 = vld [vmem:[#allocation3 + $0x5a0] sm:$0xff]  ;;  %v4294_v57 = vld [vmem:[#allocation3 + $0x5b0] sm:$0xff] }
 0xb7e   :  { %5026 = vmatpush1.bf16.msra.mxu1 %v4196_v29  ;;  %5190 = vmatpush1.bf16.msra.mxu0 %v4198_v53  ;;  %v4301_v29 = vld [vmem:[#allocation3 + $0x5e8] sm:$0xff]  ;;  %v4303_v53 = vld [vmem:[#allocation3 + $0x5f8] sm:$0xff] }
 0xb7f   :  { %5027 = vmatprep.subr.bf16.mxu1 %v4205_v20  ;;  %5191 = vmatprep.subr.bf16.mxu0 %v4207_v5  ;;  %v4300_v20 = vld [vmem:[#allocation3 + $0x5e0] sm:$0xff]  ;;  %v4302_v5 = vld [vmem:[#allocation3 + $0x5f0] sm:$0xff] }
 0xb82   :  { %5028 = vmatpush1.bf16.msra.mxu1 %v4204_v47  ;;  %5192 = vmatpush1.bf16.msra.mxu0 %v4206_v4  ;;  %v4309_v47 = vld [vmem:[#allocation3 + $0x628] sm:$0xff]  ;;  %v4311_v4 = vld [vmem:[#allocation3 + $0x638] sm:$0xff] }
 0xb83   :  { %5029 = vmatprep.subr.bf16.mxu1 %v4213_v12  ;;  %5193 = vmatprep.subr.bf16.mxu0 %v4215_v61  ;;  %v4308_v12 = vld [vmem:[#allocation3 + $0x620] sm:$0xff]  ;;  %v4310_v61 = vld [vmem:[#allocation3 + $0x630] sm:$0xff] }
 0xb86   :  { %5030 = vmatpush1.bf16.msra.mxu1 %v4212_v22  ;;  %5194 = vmatpush1.bf16.msra.mxu0 %v4214_v59  ;;  %v4317_v22 = vld [vmem:[#allocation3 + $0x668] sm:$0xff]  ;;  %v4319_v59 = vld [vmem:[#allocation3 + $0x678] sm:$0xff] }
 0xb87   :  { %5031 = vmatprep.subr.bf16.mxu1 %v4221_v27  ;;  %5195 = vmatprep.subr.bf16.mxu0 %v4223_v14  ;;  %v4316_v27 = vld [vmem:[#allocation3 + $0x660] sm:$0xff]  ;;  %v4318_v14 = vld [vmem:[#allocation3 + $0x670] sm:$0xff] }
 0xb8a   :  { %5032 = vmatpush1.bf16.msra.mxu1 %v4220_v54  ;;  %5196 = vmatpush1.bf16.msra.mxu0 %v4222_v2  ;;  %v4325_v54 = vld [vmem:[#allocation3 + $0x6a8] sm:$0xff]  ;;  %v4327_v2 = vld [vmem:[#allocation3 + $0x6b8] sm:$0xff] }
 0xb8b   :  { %5033 = vmatprep.subr.bf16.mxu1 %v4229_v1  ;;  %5197 = vmatprep.subr.bf16.mxu0 %v4231_v35  ;;  %v4324_v1 = vld [vmem:[#allocation3 + $0x6a0] sm:$0xff]  ;;  %v4326_v35 = vld [vmem:[#allocation3 + $0x6b0] sm:$0xff] }
 0xb8e   :  { %5034 = vmatpush1.bf16.msra.mxu1 %v4228_v37  ;;  %5198 = vmatpush1.bf16.msra.mxu0 %v4230_v58  ;;  %v4333_v37 = vld [vmem:[#allocation3 + $0x6e8] sm:$0xff]  ;;  %v4335_v58 = vld [vmem:[#allocation3 + $0x6f8] sm:$0xff] }
 0xb8f   :  { %5035 = vmatprep.subr.bf16.mxu1 %v4237_v15  ;;  %5199 = vmatprep.subr.bf16.mxu0 %v4239_v23  ;;  %v4332_v15 = vld [vmem:[#allocation3 + $0x6e0] sm:$0xff]  ;;  %v4334_v23 = vld [vmem:[#allocation3 + $0x6f0] sm:$0xff] }
 0xb92   :  { %5036 = vmatpush1.bf16.msra.mxu1 %v4236_v3  ;;  %5200 = vmatpush1.bf16.msra.mxu0 %v4238_v16  ;;  %v4341_v3 = vld [vmem:[#allocation3 + $0x728] sm:$0xff]  ;;  %v4343_v16 = vld [vmem:[#allocation3 + $0x738] sm:$0xff] }
 0xb93   :  { %5046 = vmatprep.subr.bf16.mxu1 %v4245_v41  ;;  %5210 = vmatprep.subr.bf16.mxu0 %v4247_v42  ;;  %v4340_v41 = vld [vmem:[#allocation3 + $0x720] sm:$0xff]  ;;  %v4342_v42 = vld [vmem:[#allocation3 + $0x730] sm:$0xff] }
 0xb95   :  { %5038 = vmatmul.mubr.bf16.vlgmr.msra.gmra.mrb[32].mxu1 %v7538_v21  ;;  %5202 = vmatmul.mubr.bf16.vlgmr.msra.gmra.mrb[36].mxu0 %v7538_v21  ;;  %v4271_v21 = vld [vmem:[#allocation3 + $0x4f8] sm:$0xff] }
 0xb96   :  { %5047 = vmatpush1.bf16.msra.mxu1 %v4244_v62  ;;  %5211 = vmatpush1.bf16.msra.mxu0 %v4246_v24  ;;  %v4349_v62 = vld [vmem:[#allocation3 + $0x768] sm:$0xff]  ;;  %v4351_v24 = vld [vmem:[#allocation3 + $0x778] sm:$0xff] }
 0xb97   :  { %5048 = vmatprep.subr.bf16.mxu1 %v4253_v55  ;;  %5212 = vmatprep.subr.bf16.mxu0 %v4255_v43  ;;  %v4348_v55 = vld [vmem:[#allocation3 + $0x760] sm:$0xff]  ;;  %v4350_v43 = vld [vmem:[#allocation3 + $0x770] sm:$0xff] }
 0xb98   :  { %5078 = vmatprep.mubr.bf16.mxu1 %v7542_v25  ;;  %5242 = vmatprep.mubr.bf16.mxu0 %v7542_v25  ;;  %v4276_v25 = vld [vmem:[#allocation3 + $0x520] sm:$0xff] }
 0xb9a   :  { %5049 = vmatpush1.bf16.msra.mxu1 %v4252_v45  ;;  %5213 = vmatpush1.bf16.msra.mxu0 %v4254_v17  ;;  %v4357_v45 = vld [vmem:[#allocation3 + $0x7a8] sm:$0xff]  ;;  %v4359_v17 = vld [vmem:[#allocation3 + $0x7b8] sm:$0xff] }
 0xb9b   :  { %5050 = vmatprep.subr.bf16.mxu1 %v4261_v8  ;;  %5214 = vmatprep.subr.bf16.mxu0 %v4263_v49  ;;  %v4356_v8 = vld [vmem:[#allocation3 + $0x7a0] sm:$0xff]  ;;  %v4358_v49 = vld [vmem:[#allocation3 + $0x7b0] sm:$0xff] }
 0xb9e   :  { %5051 = vmatpush1.bf16.msra.mxu1 %v4260_v48  ;;  %5215 = vmatpush1.bf16.msra.mxu0 %v4262_v63  ;;  %v4365_v48 = vld [vmem:[#allocation3 + $0x7e8] sm:$0xff]  ;;  %v4367_v63 = vld [vmem:[#allocation3 + $0x7f8] sm:$0xff] }
 0xb9f   :  { %5052 = vmatprep.subr.bf16.mxu1 %v4269_v50  ;;  %5216 = vmatprep.subr.bf16.mxu0 %v4271_v21  ;;  %v4364_v50 = vld [vmem:[#allocation3 + $0x7e0] sm:$0xff]  ;;  %v4366_v21 = vld [vmem:[#allocation3 + $0x7f0] sm:$0xff] }
 0xba2   :  { %5053 = vmatpush1.bf16.msra.mxu1 %v4268_v10  ;;  %5217 = vmatpush1.bf16.msra.mxu0 %v4270_v28  ;;  %v4373_v10 = vld [vmem:[#allocation3 + $0x828] sm:$0xff]  ;;  %v4375_v28 = vld [vmem:[#allocation3 + $0x838] sm:$0xff] }
 0xba3   :  { %5054 = vmatprep.subr.bf16.mxu1 %v4277_v40  ;;  %5218 = vmatprep.subr.bf16.mxu0 %v4279_v13  ;;  %v4372_v40 = vld [vmem:[#allocation3 + $0x820] sm:$0xff]  ;;  %v4374_v13 = vld [vmem:[#allocation3 + $0x830] sm:$0xff] }
 0xba6   :  { %5055 = vmatpush1.bf16.msra.mxu1 %v4276_v25  ;;  %5219 = vmatpush1.bf16.msra.mxu0 %v4278_v52  ;;  %v4381_v25 = vld [vmem:[#allocation3 + $0x868] sm:$0xff]  ;;  %v4383_v52 = vld [vmem:[#allocation3 + $0x878] sm:$0xff] }
 0xba7   :  { %5056 = vmatprep.subr.bf16.mxu1 %v4285_v36  ;;  %5220 = vmatprep.subr.bf16.mxu0 %v4287_v56  ;;  %v4380_v36 = vld [vmem:[#allocation3 + $0x860] sm:$0xff]  ;;  %v4382_v56 = vld [vmem:[#allocation3 + $0x870] sm:$0xff] }
 0xbaa   :  { %5057 = vmatpush1.bf16.msra.mxu1 %v4284_v44  ;;  %5221 = vmatpush1.bf16.msra.mxu0 %v4286_v46  ;;  %v4389_v44 = vld [vmem:[#allocation3 + $0x8a8] sm:$0xff]  ;;  %v4391_v46 = vld [vmem:[#allocation3 + $0x8b8] sm:$0xff] }
 0xbab   :  { %5058 = vmatprep.subr.bf16.mxu1 %v4293_v0  ;;  %5222 = vmatprep.subr.bf16.mxu0 %v4295_v26  ;;  %v4388_v0 = vld [vmem:[#allocation3 + $0x8a0] sm:$0xff]  ;;  %v4390_v26 = vld [vmem:[#allocation3 + $0x8b0] sm:$0xff] }
 0xbae   :  { %5059 = vmatpush1.bf16.msra.mxu1 %v4292_v18  ;;  %5223 = vmatpush1.bf16.msra.mxu0 %v4294_v57  ;;  %v4397_v18 = vld [vmem:[#allocation3 + $0x8e8] sm:$0xff]  ;;  %v4396_v57 = vld [vmem:[#allocation3 + $0x8e0] sm:$0xff] }
 0xbaf   :  { %5060 = vmatprep.subr.bf16.mxu1 %v4301_v29  ;;  %5224 = vmatprep.subr.bf16.mxu0 %v4303_v53  ;;  %v4398_v29 = vld [vmem:[#allocation3 + $0x8f0] sm:$0xff]  ;;  %v4405_v53 = vld [vmem:[#allocation3 + $0x928] sm:$0xff] }
 0xbb2   :  { %5061 = vmatpush1.bf16.msra.mxu1 %v4300_v20  ;;  %5225 = vmatpush1.bf16.msra.mxu0 %v4302_v5  ;;  %v4407_v20 = vld [vmem:[#allocation3 + $0x938] sm:$0xff]  ;;  %v4406_v5 = vld [vmem:[#allocation3 + $0x930] sm:$0xff] }
 0xbb3   :  { %5062 = vmatprep.subr.bf16.mxu1 %v4309_v47  ;;  %5226 = vmatprep.subr.bf16.mxu0 %v4311_v4  ;;  %v4413_v47 = vld [vmem:[#allocation3 + $0x968] sm:$0xff]  ;;  %v4415_v4 = vld [vmem:[#allocation3 + $0x978] sm:$0xff] }
 0xbb6   :  { %5063 = vmatpush1.bf16.msra.mxu1 %v4308_v12  ;;  %5227 = vmatpush1.bf16.msra.mxu0 %v4310_v61  ;;  %v4412_v12 = vld [vmem:[#allocation3 + $0x960] sm:$0xff]  ;;  %v4414_v61 = vld [vmem:[#allocation3 + $0x970] sm:$0xff] }
 0xbb7   :  { %5064 = vmatprep.subr.bf16.mxu1 %v4317_v22  ;;  %5228 = vmatprep.subr.bf16.mxu0 %v4319_v59  ;;  %v4421_v22 = vld [vmem:[#allocation3 + $0x9a8] sm:$0xff]  ;;  %v4423_v59 = vld [vmem:[#allocation3 + $0x9b8] sm:$0xff] }
 0xbba   :  { %5065 = vmatpush1.bf16.msra.mxu1 %v4316_v27  ;;  %5229 = vmatpush1.bf16.msra.mxu0 %v4318_v14  ;;  %v4420_v27 = vld [vmem:[#allocation3 + $0x9a0] sm:$0xff]  ;;  %v4422_v14 = vld [vmem:[#allocation3 + $0x9b0] sm:$0xff] }
 0xbbb   :  { %5066 = vmatprep.subr.bf16.mxu1 %v4325_v54  ;;  %5230 = vmatprep.subr.bf16.mxu0 %v4327_v2  ;;  %v4429_v54 = vld [vmem:[#allocation3 + $0x9e8] sm:$0xff]  ;;  %v4431_v2 = vld [vmem:[#allocation3 + $0x9f8] sm:$0xff] }
 0xbbe   :  { %5067 = vmatpush1.bf16.msra.mxu1 %v4324_v1  ;;  %5231 = vmatpush1.bf16.msra.mxu0 %v4326_v35  ;;  %v4428_v1 = vld [vmem:[#allocation3 + $0x9e0] sm:$0xff]  ;;  %v4430_v35 = vld [vmem:[#allocation3 + $0x9f0] sm:$0xff] }
 0xbbf   :  { %5068 = vmatprep.subr.bf16.mxu1 %v4333_v37  ;;  %5232 = vmatprep.subr.bf16.mxu0 %v4335_v58  ;;  %v4437_v37 = vld [vmem:[#allocation3 + $0xa28] sm:$0xff]  ;;  %v4439_v58 = vld [vmem:[#allocation3 + $0xa38] sm:$0xff] }
 0xbc2   :  { %5069 = vmatpush1.bf16.msra.mxu1 %v4332_v15  ;;  %5233 = vmatpush1.bf16.msra.mxu0 %v4334_v23  ;;  %v4436_v15 = vld [vmem:[#allocation3 + $0xa20] sm:$0xff]  ;;  %v4438_v23 = vld [vmem:[#allocation3 + $0xa30] sm:$0xff] }
 0xbc3   :  { %5070 = vmatprep.subr.bf16.mxu1 %v4341_v3  ;;  %5234 = vmatprep.subr.bf16.mxu0 %v4343_v16  ;;  %v4445_v3 = vld [vmem:[#allocation3 + $0xa68] sm:$0xff]  ;;  %v4447_v16 = vld [vmem:[#allocation3 + $0xa78] sm:$0xff] }
 0xbc6   :  { %5071 = vmatpush1.bf16.msra.mxu1 %v4340_v41  ;;  %5235 = vmatpush1.bf16.msra.mxu0 %v4342_v42  ;;  %v4444_v41 = vld [vmem:[#allocation3 + $0xa60] sm:$0xff]  ;;  %v4446_v42 = vld [vmem:[#allocation3 + $0xa70] sm:$0xff] }
 0xbc7   :  { %5072 = vmatprep.subr.bf16.mxu1 %v4349_v62  ;;  %5236 = vmatprep.subr.bf16.mxu0 %v4351_v24  ;;  %v4453_v62 = vld [vmem:[#allocation3 + $0xaa8] sm:$0xff]  ;;  %v4455_v24 = vld [vmem:[#allocation3 + $0xab8] sm:$0xff] }
 0xbca   :  { %5073 = vmatpush1.bf16.msra.mxu1 %v4348_v55  ;;  %5237 = vmatpush1.bf16.msra.mxu0 %v4350_v43  ;;  %v4452_v55 = vld [vmem:[#allocation3 + $0xaa0] sm:$0xff]  ;;  %v4454_v43 = vld [vmem:[#allocation3 + $0xab0] sm:$0xff] }
 0xbcb   :  { %5074 = vmatprep.subr.bf16.mxu1 %v4357_v45  ;;  %5238 = vmatprep.subr.bf16.mxu0 %v4359_v17  ;;  %v4461_v45 = vld [vmem:[#allocation3 + $0xae8] sm:$0xff]  ;;  %v4463_v17 = vld [vmem:[#allocation3 + $0xaf8] sm:$0xff] }
 0xbce   :  { %5075 = vmatpush1.bf16.msra.mxu1 %v4356_v8  ;;  %5239 = vmatpush1.bf16.msra.mxu0 %v4358_v49  ;;  %v4460_v8 = vld [vmem:[#allocation3 + $0xae0] sm:$0xff]  ;;  %v4462_v49 = vld [vmem:[#allocation3 + $0xaf0] sm:$0xff] }
 0xbcf   :  { %5076 = vmatprep.subr.bf16.mxu1 %v4365_v48  ;;  %5240 = vmatprep.subr.bf16.mxu0 %v4367_v63  ;;  %v4469_v48 = vld [vmem:[#allocation3 + $0xb28] sm:$0xff]  ;;  %v4471_v63 = vld [vmem:[#allocation3 + $0xb38] sm:$0xff] }
 0xbd2   :  { %5077 = vmatpush1.bf16.msra.mxu1 %v4364_v50  ;;  %5241 = vmatpush1.bf16.msra.mxu0 %v4366_v21  ;;  %v4468_v50 = vld [vmem:[#allocation3 + $0xb20] sm:$0xff]  ;;  %v4470_v21 = vld [vmem:[#allocation3 + $0xb30] sm:$0xff] }
 0xbd3   :  { %5087 = vmatprep.subr.bf16.mxu1 %v4373_v10  ;;  %5251 = vmatprep.subr.bf16.mxu0 %v4375_v28  ;;  %v4477_v10 = vld [vmem:[#allocation3 + $0xb68] sm:$0xff]  ;;  %v4479_v28 = vld [vmem:[#allocation3 + $0xb78] sm:$0xff] }
 0xbd5   :  { %5079 = vmatmul.mubr.bf16.vlgmr.msra.gmra.mrb[32].mxu1 %v7550_v39  ;;  %5243 = vmatmul.mubr.bf16.vlgmr.msra.gmra.mrb[36].mxu0 %v7550_v39  ;;  %v4399_v39 = vld [vmem:[#allocation3 + $0x8f8] sm:$0xff] }
 0xbd6   :  { %5088 = vmatpush1.bf16.msra.mxu1 %v4372_v40  ;;  %5252 = vmatpush1.bf16.msra.mxu0 %v4374_v13  ;;  %v4476_v40 = vld [vmem:[#allocation3 + $0xb60] sm:$0xff]  ;;  %v4478_v13 = vld [vmem:[#allocation3 + $0xb70] sm:$0xff] }
 0xbd7   :  { %5089 = vmatprep.subr.bf16.mxu1 %v4381_v25  ;;  %5253 = vmatprep.subr.bf16.mxu0 %v4383_v52  ;;  %v4485_v25 = vld [vmem:[#allocation3 + $0xba8] sm:$0xff]  ;;  %v4487_v52 = vld [vmem:[#allocation3 + $0xbb8] sm:$0xff] }
 0xbd8   :  { %5119 = vmatprep.mubr.bf16.mxu1 %v7554_v19  ;;  %5283 = vmatprep.mubr.bf16.mxu0 %v7554_v19  ;;  %v4404_v19 = vld [vmem:[#allocation3 + $0x920] sm:$0xff] }
 0xbda   :  { %5090 = vmatpush1.bf16.msra.mxu1 %v4380_v36  ;;  %5254 = vmatpush1.bf16.msra.mxu0 %v4382_v56  ;;  %v4484_v36 = vld [vmem:[#allocation3 + $0xba0] sm:$0xff]  ;;  %v4486_v56 = vld [vmem:[#allocation3 + $0xbb0] sm:$0xff] }
 0xbdb   :  { %5091 = vmatprep.subr.bf16.mxu1 %v4389_v44  ;;  %5255 = vmatprep.subr.bf16.mxu0 %v4391_v46  ;;  %v4493_v44 = vld [vmem:[#allocation3 + $0xbe8] sm:$0xff]  ;;  %v4495_v46 = vld [vmem:[#allocation3 + $0xbf8] sm:$0xff] }
 0xbde   :  { %5092 = vmatpush1.bf16.msra.mxu1 %v4388_v0  ;;  %5256 = vmatpush1.bf16.msra.mxu0 %v4390_v26  ;;  %v4492_v0 = vld [vmem:[#allocation3 + $0xbe0] sm:$0xff]  ;;  %v4494_v26 = vld [vmem:[#allocation3 + $0xbf0] sm:$0xff] }
 0xbdf   :  { %5093 = vmatprep.subr.bf16.mxu1 %v4397_v18  ;;  %5257 = vmatprep.subr.bf16.mxu0 %v4399_v39  ;;  %v4501_v18 = vld [vmem:[#allocation3 + $0xc28] sm:$0xff]  ;;  %v4503_v39 = vld [vmem:[#allocation3 + $0xc38] sm:$0xff] }
 0xbe2   :  { %5094 = vmatpush1.bf16.msra.mxu1 %v4396_v57  ;;  %5258 = vmatpush1.bf16.msra.mxu0 %v4398_v29  ;;  %v4500_v57 = vld [vmem:[#allocation3 + $0xc20] sm:$0xff]  ;;  %v4502_v29 = vld [vmem:[#allocation3 + $0xc30] sm:$0xff] }
 0xbe3   :  { %5095 = vmatprep.subr.bf16.mxu1 %v4405_v53  ;;  %5259 = vmatprep.subr.bf16.mxu0 %v4407_v20  ;;  %v4509_v53 = vld [vmem:[#allocation3 + $0xc68] sm:$0xff]  ;;  %v4511_v20 = vld [vmem:[#allocation3 + $0xc78] sm:$0xff] }
 0xbe6   :  { %5096 = vmatpush1.bf16.msra.mxu1 %v4404_v19  ;;  %5260 = vmatpush1.bf16.msra.mxu0 %v4406_v5  ;;  %v4508_v19 = vld [vmem:[#allocation3 + $0xc60] sm:$0xff]  ;;  %v4510_v5 = vld [vmem:[#allocation3 + $0xc70] sm:$0xff] }
 0xbe7   :  { %5097 = vmatprep.subr.bf16.mxu1 %v4413_v47  ;;  %5261 = vmatprep.subr.bf16.mxu0 %v4415_v4  ;;  %v4517_v47 = vld [vmem:[#allocation3 + $0xca8] sm:$0xff]  ;;  %v4519_v4 = vld [vmem:[#allocation3 + $0xcb8] sm:$0xff] }
 0xbea   :  { %5098 = vmatpush1.bf16.msra.mxu1 %v4412_v12  ;;  %5262 = vmatpush1.bf16.msra.mxu0 %v4414_v61  ;;  %v4516_v12 = vld [vmem:[#allocation3 + $0xca0] sm:$0xff]  ;;  %v4518_v61 = vld [vmem:[#allocation3 + $0xcb0] sm:$0xff] }
 0xbeb   :  { %5099 = vmatprep.subr.bf16.mxu1 %v4421_v22  ;;  %5263 = vmatprep.subr.bf16.mxu0 %v4423_v59  ;;  %v4525_v22 = vld [vmem:[#allocation3 + $0xce8] sm:$0xff] }
 0xbec   :  { %v4633_v59 = vld [vmem:[#allocation12 + $0x5] ss:$8 sm:$0xf] }
 0xbee   :  { %5100 = vmatpush1.bf16.msra.mxu1 %v4420_v27  ;;  %5264 = vmatpush1.bf16.msra.mxu0 %v4422_v14  ;;  %v4634_v27 = vld [vmem:[#allocation12 + $0x5] ss:$8 sm:$0xf0] }
 0xbef   :  { %5101 = vmatprep.subr.bf16.mxu1 %v4429_v54  ;;  %5265 = vmatprep.subr.bf16.mxu0 %v4431_v2  ;;  %v4524_v14 = vld [vmem:[#allocation3 + $0xce0] sm:$0xff]  ;;  %v4526_v54 = vld [vmem:[#allocation3 + $0xcf0] sm:$0xff]  ;;  %v4533_v2 = vld [vmem:[#allocation3 + $0xd28] sm:$0xff] }
 0xbf2   :  { %5102 = vmatpush1.bf16.msra.mxu1 %v4428_v1  ;;  %5266 = vmatpush1.bf16.msra.mxu0 %v4430_v35  ;;  %v4535_v1 = vld [vmem:[#allocation3 + $0xd38] sm:$0xff]  ;;  %v7592_v35 = vor.u32 %v4634_v27, %v4633_v59 }
 0xbf3   :  { %5103 = vmatprep.subr.bf16.mxu1 %v4437_v37  ;;  %5267 = vmatprep.subr.bf16.mxu0 %v4439_v58  ;;  %v4534_v37 = vld [vmem:[#allocation3 + $0xd30] sm:$0xff]  ;;  %v4541_v58 = vld [vmem:[#allocation3 + $0xd68] sm:$0xff] }
 0xbf6   :  { %5104 = vmatpush1.bf16.msra.mxu1 %v4436_v15  ;;  %5268 = vmatpush1.bf16.msra.mxu0 %v4438_v23  ;;  %v4543_v15 = vld [vmem:[#allocation3 + $0xd78] sm:$0xff]  ;;  %v4640_v23 = vrot.slane %v7592_v35, %v7189_v9 }
 0xbf7   :  { %5105 = vmatprep.subr.bf16.mxu1 %v4445_v3  ;;  %5269 = vmatprep.subr.bf16.mxu0 %v4447_v16  ;;  %v4648_v3 = vrot.slane %v7592_v35, %v7197_v32  ;;  %v4644_v16 = vrot.slane %v7592_v35, %v7192_v11 }
 0xbfa   :  { %5106 = vmatpush1.bf16.msra.mxu1 %v4444_v41  ;;  %5270 = vmatpush1.bf16.msra.mxu0 %v4446_v42  ;;  %v4652_v41 = vrot.slane %v7592_v35, %v7200_v34  ;;  %v4540_v42 = vld [vmem:[#allocation3 + $0xd60] sm:$0xff] }
 0xbfb   :  { %5107 = vmatprep.subr.bf16.mxu1 %v4453_v62  ;;  %5271 = vmatprep.subr.bf16.mxu0 %v4455_v24  ;;  %v4542_v62 = vld [vmem:[#allocation3 + $0xd70] sm:$0xff] }
 0xbfe   :  { %5108 = vmatpush1.bf16.msra.mxu1 %v4452_v55  ;;  %5272 = vmatpush1.bf16.msra.mxu0 %v4454_v43  ;;  %v4549_v43 = vld [vmem:[#allocation3 + $0xda8] sm:$0xff] }
 0xbff   :  { %5109 = vmatprep.subr.bf16.mxu1 %v4461_v45  ;;  %5273 = vmatprep.subr.bf16.mxu0 %v4463_v17  ;;  %v4551_v45 = vld [vmem:[#allocation3 + $0xdb8] sm:$0xff] }
 0xc02   :  { %5110 = vmatpush1.bf16.msra.mxu1 %v4460_v8  ;;  %5274 = vmatpush1.bf16.msra.mxu0 %v4462_v49 }
 0xc03   :  { %5111 = vmatprep.subr.bf16.mxu1 %v4469_v48  ;;  %5275 = vmatprep.subr.bf16.mxu0 %v4471_v63 }
 0xc06   :  { %5112 = vmatpush1.bf16.msra.mxu1 %v4468_v50  ;;  %5276 = vmatpush1.bf16.msra.mxu0 %v4470_v21 }
 0xc07   :  { %5113 = vmatprep.subr.bf16.mxu1 %v4477_v10  ;;  %5277 = vmatprep.subr.bf16.mxu0 %v4479_v28  ;;  %v4548_v28 = vld [vmem:[#allocation3 + $0xda0] sm:$0xff] }
 0xc0a   :  { %5114 = vmatpush1.bf16.msra.mxu1 %v4476_v40  ;;  %5278 = vmatpush1.bf16.msra.mxu0 %v4478_v13  ;;  %v4550_v40 = vld [vmem:[#allocation3 + $0xdb0] sm:$0xff] }
 0xc0b   :  { %5115 = vmatprep.subr.bf16.mxu1 %v4485_v25  ;;  %5279 = vmatprep.subr.bf16.mxu0 %v4487_v52 }
 0xc0e   :  { %5116 = vmatpush1.bf16.msra.mxu1 %v4484_v36  ;;  %5280 = vmatpush1.bf16.msra.mxu0 %v4486_v56 }
 0xc0f   :  { %5117 = vmatprep.subr.bf16.mxu1 %v4493_v44  ;;  %5281 = vmatprep.subr.bf16.mxu0 %v4495_v46  ;;  %v4557_v46 = vld [vmem:[#allocation3 + $0xde8] sm:$0xff] }
 0xc12   :  { %5118 = vmatpush1.bf16.msra.mxu1 %v4492_v0  ;;  %5282 = vmatpush1.bf16.msra.mxu0 %v4494_v26  ;;  %v4559_v0 = vld [vmem:[#allocation3 + $0xdf8] sm:$0xff]  ;;  %v4556_v26 = vld [vmem:[#allocation3 + $0xde0] sm:$0xff] }
 0xc13   :  { %5128 = vmatprep.subr.bf16.mxu1 %v4501_v18  ;;  %5292 = vmatprep.subr.bf16.mxu0 %v4503_v39  ;;  %v4558_v18 = vld [vmem:[#allocation3 + $0xdf0] sm:$0xff]  ;;  %v4565_v39 = vld [vmem:[#allocation3 + $0xe28] sm:$0xff] }
 0xc15   :  { %5120 = vmatmul.mubr.bf16.vlgmr.msra.gmra.mrb[32].mxu1 %v7562_v38  ;;  %5284 = vmatmul.mubr.bf16.vlgmr.msra.gmra.mrb[36].mxu0 %v7562_v38  ;;  %v4527_v38 = vld [vmem:[#allocation3 + $0xcf8] sm:$0xff] }
 0xc16   :  { %5129 = vmatpush1.bf16.msra.mxu1 %v4500_v57  ;;  %5293 = vmatpush1.bf16.msra.mxu0 %v4502_v29  ;;  %v4567_v57 = vld [vmem:[#allocation3 + $0xe38] sm:$0xff]  ;;  %v4564_v29 = vld [vmem:[#allocation3 + $0xe20] sm:$0xff] }
 0xc17   :  { %5130 = vmatprep.subr.bf16.mxu1 %v4509_v53  ;;  %5294 = vmatprep.subr.bf16.mxu0 %v4511_v20  ;;  %v4566_v53 = vld [vmem:[#allocation3 + $0xe30] sm:$0xff]  ;;  %v4573_v20 = vld [vmem:[#allocation3 + $0xe68] sm:$0xff] }
 0xc18   :  { %5160 = vmatprep.mubr.bf16.mxu1 %v7566_v60  ;;  %5324 = vmatprep.mubr.bf16.mxu0 %v7566_v60  ;;  %v4532_v60 = vld [vmem:[#allocation3 + $0xd20] sm:$0xff] }
 0xc1a   :  { %5131 = vmatpush1.bf16.msra.mxu1 %v4508_v19  ;;  %5295 = vmatpush1.bf16.msra.mxu0 %v4510_v5  ;;  %v4575_v19 = vld [vmem:[#allocation3 + $0xe78] sm:$0xff] }
 0xc1b   :  { %5132 = vmatprep.subr.bf16.mxu1 %v4517_v47  ;;  %5296 = vmatprep.subr.bf16.mxu0 %v4519_v4  ;;  %v4572_v47 = vld [vmem:[#allocation3 + $0xe60] sm:$0xff]  ;;  %v4574_v4 = vld [vmem:[#allocation3 + $0xe70] sm:$0xff] }
 0xc1e   :  { %5133 = vmatpush1.bf16.msra.mxu1 %v4516_v12  ;;  %5297 = vmatpush1.bf16.msra.mxu0 %v4518_v61 }
 0xc1f   :  { %5134 = vmatprep.subr.bf16.mxu1 %v4525_v22  ;;  %5298 = vmatprep.subr.bf16.mxu0 %v4527_v38  ;;  %v4581_v22 = vld [vmem:[#allocation3 + $0xea8] sm:$0xff]  ;;  %v4583_v38 = vld [vmem:[#allocation3 + $0xeb8] sm:$0xff] }
 0xc22   :  { %5135 = vmatpush1.bf16.msra.mxu1 %v4524_v14  ;;  %5299 = vmatpush1.bf16.msra.mxu0 %v4526_v54 }
 0xc23   :  { %5136 = vmatprep.subr.bf16.mxu1 %v4533_v2  ;;  %5300 = vmatprep.subr.bf16.mxu0 %v4535_v1  ;;  %v4580_v1 = vld [vmem:[#allocation3 + $0xea0] sm:$0xff] }
 0xc26   :  { %5137 = vmatpush1.bf16.msra.mxu1 %v4532_v60  ;;  %5301 = vmatpush1.bf16.msra.mxu0 %v4534_v37  ;;  %v4582_v60 = vld [vmem:[#allocation3 + $0xeb0] sm:$0xff]  ;;  %v4589_v37 = vld [vmem:[#allocation3 + $0xee8] sm:$0xff] }
 0xc27   :  { %5138 = vmatprep.subr.bf16.mxu1 %v4541_v58  ;;  %5302 = vmatprep.subr.bf16.mxu0 %v4543_v15  ;;  %v4591_v58 = vld [vmem:[#allocation3 + $0xef8] sm:$0xff]  ;;  %v4588_v15 = vld [vmem:[#allocation3 + $0xee0] sm:$0xff] }
 0xc28   :  { %v4834_v24 = vpop.f32.mrb[28].mxu1  ;;  %v4998_v55 = vpop.f32.mrb[32].mxu0 }
 0xc29   :  { %v7602_v17 = vadd.f32 %v4834_v24, %v4640_v23  ;;  %v7604_v8 = vadd.f32 %v4998_v55, %v4648_v3  ;;  %v4836_v49 = vpop.f32.mrb[29].mxu1  ;;  %v5000_v48 = vpop.f32.mrb[33].mxu0  ;;  %v4590_v23 = vld [vmem:[#allocation3 + $0xef0] sm:$0xff]  ;;  %v4597_v3 = vld [vmem:[#allocation3 + $0xf28] sm:$0xff]  ;;  %v4607_v55 = vld [vmem:[#allocation3 + $0xf78] sm:$0xff] }
 0xc2a   :  { %v7606_v63 = vadd.f32 %v4836_v49, %v4644_v16  ;;  %v7608_v50 = vadd.f32 %v5000_v48, %v4652_v41  ;;  %v4838_v21 = vpop.f32.mrb[30].mxu1  ;;  %v5002_v10 = vpop.f32.mrb[34].mxu0  ;;  %5139 = vmatpush1.bf16.msra.mxu1 %v4540_v42  ;;  %5303 = vmatpush1.bf16.msra.mxu0 %v4542_v62  ;;  %v4599_v16 = vld [vmem:[#allocation3 + $0xf38] sm:$0xff]  ;;  %v4596_v41 = vld [vmem:[#allocation3 + $0xf20] sm:$0xff]  ;;  %v4598_v42 = vld [vmem:[#allocation3 + $0xf30] sm:$0xff] }
 0xc2b   :  { %v6264_v13 = vmul.f32 -1.442695, %v7602_v17  ;;  %v6266_v25 = vmul.f32 -1.442695, %v7604_v8  ;;  %v4839_v52 = vpop.f32.mrb[31].mxu1  ;;  %v5003_v36 = vpop.f32.mrb[35].mxu0  ;;  %5140 = vmatprep.subr.bf16.mxu1 %v4549_v43  ;;  %5304 = vmatprep.subr.bf16.mxu0 %v4551_v45 }
 0xc2c   :  { %v6265_v56 = vmul.f32 -1.442695, %v7606_v63  ;;  %v6267_v44 = vmul.f32 -1.442695, %v7608_v50  ;;  %v4605_v24 = vld [vmem:[#allocation3 + $0xf68] sm:$0xff]  ;;  %v4614_v52 = vld [vmem:[#allocation3 + $0xfb0] sm:$0xff] }
 0xc2d   :  { %6796 = vpow2.f32 %v6264_v13  ;;  %v4621_v36 = vld [vmem:[#allocation3 + $0xfe8] sm:$0xff] }
 0xc2e   :  { %6798 = vpow2.f32 %v6266_v25  ;;  %5141 = vmatpush1.bf16.msra.mxu1 %v4548_v28  ;;  %5305 = vmatpush1.bf16.msra.mxu0 %v4550_v40  ;;  %v4604_v28 = vld [vmem:[#allocation3 + $0xf60] sm:$0xff]  ;;  %v4606_v40 = vld [vmem:[#allocation3 + $0xf70] sm:$0xff]  ;;  %v4613_v25 = vld [vmem:[#allocation3 + $0xfa8] sm:$0xff] }
 0xc2f   :  { %6800 = vpow2.f32 %v6265_v56  ;;  %5142 = vmatprep.subr.bf16.mxu1 %v4557_v46  ;;  %5306 = vmatprep.subr.bf16.mxu0 %v4559_v0  ;;  %v4623_v56 = vld [vmem:[#allocation3 + $0xff8] sm:$0xff]  ;;  %v4664_v46 = vrot.slane %v7592_v35, %v7256_v31  ;;  %v4660_v0 = vrot.slane %v7592_v35, %v7259_v33 }
 0xc30   :  { %6802 = vpow2.f32 %v6267_v44  ;;  %v4622_v44 = vld [vmem:[#allocation3 + $0xff0] sm:$0xff] }
 0xc32   :  { %5143 = vmatpush1.bf16.msra.mxu1 %v4556_v26  ;;  %5307 = vmatpush1.bf16.msra.mxu0 %v4558_v18  ;;  %v4668_v26 = vrot.slane %v7592_v35, %v7262_v6 }
 0xc33   :  { %5144 = vmatprep.subr.bf16.mxu1 %v4565_v39  ;;  %5308 = vmatprep.subr.bf16.mxu0 %v4567_v57 }
 0xc36   :  { %5145 = vmatpush1.bf16.msra.mxu1 %v4564_v29  ;;  %5309 = vmatpush1.bf16.msra.mxu0 %v4566_v53 }
 0xc37   :  { %v6797_v5 = vpop.eup %6796  ;;  %5146 = vmatprep.subr.bf16.mxu1 %v4573_v20  ;;  %5310 = vmatprep.subr.bf16.mxu0 %v4575_v19 }
 0xc38   :  { %v6799_v12 = vpop.eup %6798  ;;  %v5357_v61 = vadd.f32 1.0, %v6797_v5 }
 0xc39   :  { %v6801_v59 = vpop.eup %6800  ;;  %v5359_v27 = vadd.f32 1.0, %v6799_v12 }
 0xc3a   :  { %v6803_v14 = vpop.eup %6802  ;;  %6804 = vrcp.f32 %v5357_v61  ;;  %v5358_v54 = vadd.f32 1.0, %v6801_v59  ;;  %5147 = vmatpush1.bf16.msra.mxu1 %v4572_v47  ;;  %5311 = vmatpush1.bf16.msra.mxu0 %v4574_v4 }
 0xc3b   :  { %6806 = vrcp.f32 %v5359_v27  ;;  %v5360_v2 = vadd.f32 1.0, %v6803_v14  ;;  %5148 = vmatprep.subr.bf16.mxu1 %v4581_v22  ;;  %5312 = vmatprep.subr.bf16.mxu0 %v4583_v38 }
 0xc3c   :  { %6808 = vrcp.f32 %v5358_v54 }
 0xc3d   :  { %6810 = vrcp.f32 %v5360_v2 }
 0xc3e   :  { %5149 = vmatpush1.bf16.msra.mxu1 %v4580_v1  ;;  %5313 = vmatpush1.bf16.msra.mxu0 %v4582_v60 }
 0xc3f   :  { %5150 = vmatprep.subr.bf16.mxu1 %v4589_v37  ;;  %5314 = vmatprep.subr.bf16.mxu0 %v4591_v58 }
 0xc42   :  { %5151 = vmatpush1.bf16.msra.mxu1 %v4588_v15  ;;  %5315 = vmatpush1.bf16.msra.mxu0 %v4590_v23 }
 0xc43   :  { %5152 = vmatprep.subr.bf16.mxu1 %v4597_v3  ;;  %5316 = vmatprep.subr.bf16.mxu0 %v4599_v16 }
 0xc44   :  { %v6805_v62 = vpop.eup %6804 }
 0xc45   :  { %v6807_v43 = vpop.eup %6806  ;;  %v7615_v45 = vmul.f32 %v6805_v62, %v7602_v17  ;;  %v4615_v17 = vld [vmem:[#allocation3 + $0xfb8] sm:$0xff] }
 0xc46   :  { %v6809_v49 = vpop.eup %6808  ;;  %v7618_v48 = vmul.f32 %v6807_v43, %v7604_v8  ;;  %5153 = vmatpush1.bf16.msra.mxu1 %v4596_v41  ;;  %5317 = vmatpush1.bf16.msra.mxu0 %v4598_v42  ;;  %v4612_v8 = vld [vmem:[#allocation3 + $0xfa0] sm:$0xff] }
 0xc47   :  { %v6811_v21 = vpop.eup %6810  ;;  %v7621_v10 = vmul.f32 %v6809_v49, %v7606_v63  ;;  %5154 = vmatprep.subr.bf16.mxu1 %v4605_v24  ;;  %5318 = vmatprep.subr.bf16.mxu0 %v4607_v55  ;;  %v4620_v63 = vld [vmem:[#allocation3 + $0xfe0] sm:$0xff] }
 0xc48   :  { %v7624_v13 = vmul.f32 %v6811_v21, %v7608_v50  ;;  %v4656_v50 = vrot.slane %v7592_v35, %v7253_v30 }
 0xc4a   :  { %5155 = vmatpush1.bf16.msra.mxu1 %v4604_v28  ;;  %5319 = vmatpush1.bf16.msra.mxu0 %v4606_v40 }
 0xc4b   :  { %5156 = vmatprep.subr.bf16.mxu1 %v4613_v25  ;;  %5320 = vmatprep.subr.bf16.mxu0 %v4615_v17 }
 0xc4e   :  { %5157 = vmatpush1.bf16.msra.mxu1 %v4612_v8  ;;  %5321 = vmatpush1.bf16.msra.mxu0 %v4614_v52 }
 0xc4f   :  { %5158 = vmatprep.subr.bf16.mxu1 %v4621_v36  ;;  %5322 = vmatprep.subr.bf16.mxu0 %v4623_v56 }
 0xc52   :  { %5159 = vmatpush1.bf16.msra.mxu1 %v4620_v63  ;;  %5323 = vmatpush1.bf16.msra.mxu0 %v4622_v44 }
 0xc55   :  { %5161 = vmatmul.mubr.bf16.vlgmr.msra.gmra.mrb[32].mxu1 %v7574_v51  ;;  %5325 = vmatmul.mubr.bf16.vlgmr.msra.gmra.mrb[36].mxu0 %v7574_v51 }
 0xd28   :  { %v5162_v18 = vpop.f32.mrb[32].mxu1  ;;  %v5326_v39 = vpop.f32.mrb[36].mxu0 }
 0xd29   :  { %v6385_v57 = vadd.f32 %v5162_v18, %v4656_v50  ;;  %v6387_v29 = vadd.f32 %v5326_v39, %v4664_v46  ;;  %v5164_v53 = vpop.f32.mrb[33].mxu1  ;;  %v5328_v20 = vpop.f32.mrb[37].mxu0 }
 0xd2a   :  { %v6386_v19 = vadd.f32 %v5164_v53, %v4660_v0  ;;  %v6388_v51 = vadd.f32 %v5328_v20, %v4668_v26  ;;  %v5166_v5 = vpop.f32.mrb[34].mxu1  ;;  %v5330_v47 = vpop.f32.mrb[38].mxu0 }
 0xd2b   :  { %v6268_v30 = vmul.f32 -1.442695, %v6385_v57  ;;  %v6270_v4 = vmul.f32 -1.442695, %v6387_v29  ;;  %v5167_v12 = vpop.f32.mrb[35].mxu1  ;;  %v5331_v31 = vpop.f32.mrb[39].mxu0 }
 0xd2c   :  { %v6269_v61 = vmul.f32 -1.442695, %v6386_v19  ;;  %v6271_v22 = vmul.f32 -1.442695, %v6388_v51 }
 0xd2d   :  { %6812 = vpow2.f32 %v6268_v30 }
 0xd2e   :  { %6814 = vpow2.f32 %v6270_v4 }
 0xd2f   :  { %6816 = vpow2.f32 %v6269_v61 }
 0xd30   :  { %6818 = vpow2.f32 %v6271_v22 }
 0xd37   :  { %v6813_v33 = vpop.eup %6812 }
 0xd38   :  { %v6815_v6 = vpop.eup %6814  ;;  %v5361_v35 = vadd.f32 1.0, %v6813_v33 }
 0xd39   :  { %v6817_v38 = vpop.eup %6816  ;;  %v5363_v59 = vadd.f32 1.0, %v6815_v6 }
 0xd3a   :  { %v6819_v27 = vpop.eup %6818  ;;  %6820 = vrcp.f32 %v5361_v35  ;;  %v5362_v14 = vadd.f32 1.0, %v6817_v38 }
 0xd3b   :  { %6822 = vrcp.f32 %v5363_v59  ;;  %v5364_v54 = vadd.f32 1.0, %v6819_v27 }
 0xd3c   :  { %6824 = vrcp.f32 %v5362_v14 }
 0xd3d   :  { %6826 = vrcp.f32 %v5364_v54 }
 0xd44   :  { %v6821_v2 = vpop.eup %6820 }
 0xd45   :  { %v6823_v1 = vpop.eup %6822  ;;  %v7636_v60 = vmul.f32 %v6821_v2, %v6385_v57 }
 0xd46   :  { %v6825_v37 = vpop.eup %6824  ;;  %v7638_v58 = vmul.f32 %v6823_v1, %v6387_v29 }
 0xd47   :  { %v6827_v15 = vpop.eup %6826  ;;  %v7640_v23 = vmul.f32 %v6825_v37, %v6386_v19 }
 0xd48   :  { %v7642_v3 = vmul.f32 %v6827_v15, %v6388_v51 }
 0xd49   :  { %7000 = dma.done.wait [#allocation5 + $0x4], 16384 }
 0xd4a   :  { %7001 = vsyncadd [#allocation5 + $0x4], 4294950912  ;;  %v5457_v16 = vpack.c.bf16 %v7621_v10, %v7621_v10  ;;  %v5459_v41 = vpack.c.bf16 %v7624_v13, %v7624_v13  ;;  %v5393_v42 = vld [vmem:[#allocation4 + $0x8] sm:$0xff]  ;;  %v5392_v24 = vld [vmem:[#allocation4] sm:$0xff] }
 0xd4b   :  { %v5425_v62 = vld [vmem:[#allocation4 + $0x108] sm:$0xff]  ;;  %5460 = vmatprep.subr.bf16.mxu1 %v5393_v42  ;;  %v5424_v55 = vld [vmem:[#allocation4 + $0x100] sm:$0xff]  ;;  %v5395_v43 = vld [vmem:[#allocation4 + $0x18] sm:$0xff] }
 0xd4c   :  { %5492 = vmatprep.mubr.bf16.mxu1 %v5457_v16  ;;  %5533 = vmatprep.mubr.bf16.mxu0 %v5459_v41  ;;  %v5427_v49 = vld [vmem:[#allocation4 + $0x118] sm:$0xff]  ;;  %v5394_v21 = vld [vmem:[#allocation4 + $0x10] sm:$0xff]  ;;  %v5397_v10 = vld [vmem:[#allocation4 + $0x28] sm:$0xff] }
 0xd4d   :  { %5501 = vmatprep.subr.bf16.mxu0 %v5425_v62  ;;  %5461 = vmatpush1.bf16.msra.mxu1 %v5392_v24  ;;  %v5426_v28 = vld [vmem:[#allocation4 + $0x110] sm:$0xff]  ;;  %v5429_v40 = vld [vmem:[#allocation4 + $0x128] sm:$0xff]  ;;  %v5396_v13 = vld [vmem:[#allocation4 + $0x20] sm:$0xff] }
 0xd4e   :  { %5502 = vmatpush1.bf16.msra.mxu0 %v5424_v55  ;;  %5462 = vmatprep.subr.bf16.mxu1 %v5395_v43  ;;  %v5428_v25 = vld [vmem:[#allocation4 + $0x120] sm:$0xff]  ;;  %v5399_v17 = vld [vmem:[#allocation4 + $0x38] sm:$0xff]  ;;  %v5398_v52 = vld [vmem:[#allocation4 + $0x30] sm:$0xff] }
 0xd4f   :  { %5503 = vmatprep.subr.bf16.mxu0 %v5427_v49  ;;  %v5431_v8 = vld [vmem:[#allocation4 + $0x138] sm:$0xff]  ;;  %v5430_v36 = vld [vmem:[#allocation4 + $0x130] sm:$0xff]  ;;  %v5401_v56 = vld [vmem:[#allocation4 + $0x48] sm:$0xff] }
 0xd50   :  { %v5433_v63 = vld [vmem:[#allocation4 + $0x148] sm:$0xff]  ;;  %v5400_v44 = vld [vmem:[#allocation4 + $0x40] sm:$0xff]  ;;  %v5403_v46 = vld [vmem:[#allocation4 + $0x58] sm:$0xff] }
 0xd51   :  { %5463 = vmatpush1.bf16.msra.mxu1 %v5394_v21  ;;  %v5432_v50 = vld [vmem:[#allocation4 + $0x140] sm:$0xff]  ;;  %v5435_v0 = vld [vmem:[#allocation4 + $0x158] sm:$0xff]  ;;  %v5402_v26 = vld [vmem:[#allocation4 + $0x50] sm:$0xff] }
 0xd52   :  { %5504 = vmatpush1.bf16.msra.mxu0 %v5426_v28  ;;  %5464 = vmatprep.subr.bf16.mxu1 %v5397_v10  ;;  %v5434_v18 = vld [vmem:[#allocation4 + $0x150] sm:$0xff]  ;;  %v5405_v39 = vld [vmem:[#allocation4 + $0x68] sm:$0xff]  ;;  %v5404_v29 = vld [vmem:[#allocation4 + $0x60] sm:$0xff] }
 0xd53   :  { %5505 = vmatprep.subr.bf16.mxu0 %v5429_v40  ;;  %v5437_v57 = vld [vmem:[#allocation4 + $0x168] sm:$0xff]  ;;  %v5436_v53 = vld [vmem:[#allocation4 + $0x160] sm:$0xff]  ;;  %v5407_v20 = vld [vmem:[#allocation4 + $0x78] sm:$0xff] }
 0xd54   :  { %v5439_v19 = vld [vmem:[#allocation4 + $0x178] sm:$0xff]  ;;  %v5406_v51 = vld [vmem:[#allocation4 + $0x70] sm:$0xff]  ;;  %v5409_v47 = vld [vmem:[#allocation4 + $0x88] sm:$0xff] }
 0xd55   :  { %5465 = vmatpush1.bf16.msra.mxu1 %v5396_v13  ;;  %v5438_v5 = vld [vmem:[#allocation4 + $0x170] sm:$0xff]  ;;  %v5441_v30 = vld [vmem:[#allocation4 + $0x188] sm:$0xff]  ;;  %v5408_v4 = vld [vmem:[#allocation4 + $0x80] sm:$0xff] }
 0xd56   :  { %5506 = vmatpush1.bf16.msra.mxu0 %v5428_v25  ;;  %5466 = vmatprep.subr.bf16.mxu1 %v5399_v17  ;;  %v5440_v12 = vld [vmem:[#allocation4 + $0x180] sm:$0xff]  ;;  %v5411_v31 = vld [vmem:[#allocation4 + $0x98] sm:$0xff]  ;;  %v5410_v22 = vld [vmem:[#allocation4 + $0x90] sm:$0xff] }
 0xd57   :  { %5507 = vmatprep.subr.bf16.mxu0 %v5431_v8  ;;  %v5443_v61 = vld [vmem:[#allocation4 + $0x198] sm:$0xff]  ;;  %v5442_v33 = vld [vmem:[#allocation4 + $0x190] sm:$0xff]  ;;  %v5413_v6 = vld [vmem:[#allocation4 + $0xa8] sm:$0xff]  ;;  %v5456_v8 = vpack.c.bf16 %v7615_v45, %v7615_v45 }
 0xd58   :  { %v5445_v35 = vld [vmem:[#allocation4 + $0x1a8] sm:$0xff]  ;;  %v5412_v38 = vld [vmem:[#allocation4 + $0xa0] sm:$0xff]  ;;  %v5415_v27 = vld [vmem:[#allocation4 + $0xb8] sm:$0xff] }
 0xd59   :  { %5467 = vmatpush1.bf16.msra.mxu1 %v5398_v52  ;;  %v5444_v59 = vld [vmem:[#allocation4 + $0x1a0] sm:$0xff]  ;;  %v5447_v14 = vld [vmem:[#allocation4 + $0x1b8] sm:$0xff]  ;;  %v5414_v54 = vld [vmem:[#allocation4 + $0xb0] sm:$0xff]  ;;  %v5458_v52 = vpack.c.bf16 %v7618_v48, %v7618_v48 }
 0xd5a   :  { %5508 = vmatpush1.bf16.msra.mxu0 %v5430_v36  ;;  %5468 = vmatprep.subr.bf16.mxu1 %v5401_v56  ;;  %v5446_v2 = vld [vmem:[#allocation4 + $0x1b0] sm:$0xff]  ;;  %v5417_v1 = vld [vmem:[#allocation4 + $0xc8] sm:$0xff]  ;;  %v5416_v15 = vld [vmem:[#allocation4 + $0xc0] sm:$0xff] }
 0xd5b   :  { %5509 = vmatprep.subr.bf16.mxu0 %v5433_v63  ;;  %v5449_v37 = vld [vmem:[#allocation4 + $0x1c8] sm:$0xff]  ;;  %v5448_v16 = vld [vmem:[#allocation4 + $0x1c0] sm:$0xff]  ;;  %v5419_v41 = vld [vmem:[#allocation4 + $0xd8] sm:$0xff] }
 0xd5c   :  { %v5451_v42 = vld [vmem:[#allocation4 + $0x1d8] sm:$0xff]  ;;  %v5418_v62 = vld [vmem:[#allocation4 + $0xd0] sm:$0xff]  ;;  %v5421_v55 = vld [vmem:[#allocation4 + $0xe8] sm:$0xff] }
 0xd5d   :  { %5469 = vmatpush1.bf16.msra.mxu1 %v5400_v44  ;;  %v5450_v24 = vld [vmem:[#allocation4 + $0x1d0] sm:$0xff]  ;;  %v5453_v43 = vld [vmem:[#allocation4 + $0x1e8] sm:$0xff]  ;;  %v5420_v49 = vld [vmem:[#allocation4 + $0xe0] sm:$0xff] }
 0xd5e   :  { %5510 = vmatpush1.bf16.msra.mxu0 %v5432_v50  ;;  %5470 = vmatprep.subr.bf16.mxu1 %v5403_v46  ;;  %v5452_v21 = vld [vmem:[#allocation4 + $0x1e0] sm:$0xff]  ;;  %v5423_v28 = vld [vmem:[#allocation4 + $0xf8] sm:$0xff]  ;;  %v5422_v40 = vld [vmem:[#allocation4 + $0xf0] sm:$0xff]  ;;  %v5607_v50 = vpack.c.bf16 %v7640_v23, %v7640_v23  ;;  %v5609_v46 = vpack.c.bf16 %v7642_v3, %v7642_v3 }
 0xd5f   :  { %5511 = vmatprep.subr.bf16.mxu0 %v5435_v0  ;;  %v5455_v10 = vld [vmem:[#allocation4 + $0x1f8] sm:$0xff]  ;;  %v5454_v13 = vld [vmem:[#allocation4 + $0x1f0] sm:$0xff]  ;;  %v5543_v25 = vld [vmem:[#allocation4 + $0x208] sm:$0xff] }
 0xd60   :  { %v5575_v17 = vld [vmem:[#allocation4 + $0x308] sm:$0xff]  ;;  %v5542_v36 = vld [vmem:[#allocation4 + $0x200] sm:$0xff]  ;;  %v5545_v63 = vld [vmem:[#allocation4 + $0x218] sm:$0xff] }
 0xd61   :  { %5471 = vmatpush1.bf16.msra.mxu1 %v5402_v26  ;;  %v5574_v56 = vld [vmem:[#allocation4 + $0x300] sm:$0xff]  ;;  %v5577_v44 = vld [vmem:[#allocation4 + $0x318] sm:$0xff]  ;;  %v5544_v45 = vld [vmem:[#allocation4 + $0x210] sm:$0xff] }
 0xd62   :  { %5512 = vmatpush1.bf16.msra.mxu0 %v5434_v18  ;;  %5472 = vmatprep.subr.bf16.mxu1 %v5405_v39  ;;  %v5576_v48 = vld [vmem:[#allocation4 + $0x310] sm:$0xff]  ;;  %v5547_v0 = vld [vmem:[#allocation4 + $0x228] sm:$0xff]  ;;  %v5546_v23 = vld [vmem:[#allocation4 + $0x220] sm:$0xff] }
 0xd63   :  { %5513 = vmatprep.subr.bf16.mxu0 %v5437_v57  ;;  %v5579_v26 = vld [vmem:[#allocation4 + $0x328] sm:$0xff]  ;;  %v5578_v18 = vld [vmem:[#allocation4 + $0x320] sm:$0xff]  ;;  %v5549_v39 = vld [vmem:[#allocation4 + $0x238] sm:$0xff] }
 0xd64   :  { %v5581_v3 = vld [vmem:[#allocation4 + $0x338] sm:$0xff]  ;;  %v5548_v57 = vld [vmem:[#allocation4 + $0x230] sm:$0xff] }
 0xd65   :  { %5473 = vmatpush1.bf16.msra.mxu1 %v5404_v29  ;;  %v5580_v29 = vld [vmem:[#allocation4 + $0x330] sm:$0xff] }
 0xd66   :  { %5514 = vmatpush1.bf16.msra.mxu0 %v5436_v53  ;;  %5474 = vmatprep.subr.bf16.mxu1 %v5407_v20  ;;  %v5551_v53 = vld [vmem:[#allocation4 + $0x248] sm:$0xff] }
 0xd67   :  { %5515 = vmatprep.subr.bf16.mxu0 %v5439_v19  ;;  %v5583_v20 = vld [vmem:[#allocation4 + $0x348] sm:$0xff]  ;;  %v5550_v19 = vld [vmem:[#allocation4 + $0x240] sm:$0xff] }
 0xd69   :  { %5475 = vmatpush1.bf16.msra.mxu1 %v5406_v51  ;;  %v5582_v51 = vld [vmem:[#allocation4 + $0x340] sm:$0xff] }
 0xd6a   :  { %5516 = vmatpush1.bf16.msra.mxu0 %v5438_v5  ;;  %5476 = vmatprep.subr.bf16.mxu1 %v5409_v47  ;;  %v5553_v5 = vld [vmem:[#allocation4 + $0x258] sm:$0xff] }
 0xd6b   :  { %5517 = vmatprep.subr.bf16.mxu0 %v5441_v30  ;;  %v5585_v47 = vld [vmem:[#allocation4 + $0x358] sm:$0xff]  ;;  %v5552_v30 = vld [vmem:[#allocation4 + $0x250] sm:$0xff] }
 0xd6d   :  { %5477 = vmatpush1.bf16.msra.mxu1 %v5408_v4  ;;  %v5584_v4 = vld [vmem:[#allocation4 + $0x350] sm:$0xff] }
 0xd6e   :  { %5518 = vmatpush1.bf16.msra.mxu0 %v5440_v12  ;;  %5478 = vmatprep.subr.bf16.mxu1 %v5411_v31  ;;  %v5555_v12 = vld [vmem:[#allocation4 + $0x268] sm:$0xff] }
 0xd6f   :  { %5519 = vmatprep.subr.bf16.mxu0 %v5443_v61  ;;  %v5587_v31 = vld [vmem:[#allocation4 + $0x368] sm:$0xff]  ;;  %v5554_v61 = vld [vmem:[#allocation4 + $0x260] sm:$0xff] }
 0xd71   :  { %5479 = vmatpush1.bf16.msra.mxu1 %v5410_v22  ;;  %v5586_v22 = vld [vmem:[#allocation4 + $0x360] sm:$0xff] }
 0xd72   :  { %5520 = vmatpush1.bf16.msra.mxu0 %v5442_v33  ;;  %5480 = vmatprep.subr.bf16.mxu1 %v5413_v6  ;;  %v5557_v33 = vld [vmem:[#allocation4 + $0x278] sm:$0xff] }
 0xd73   :  { %5521 = vmatprep.subr.bf16.mxu0 %v5445_v35  ;;  %v5589_v6 = vld [vmem:[#allocation4 + $0x378] sm:$0xff]  ;;  %v5556_v35 = vld [vmem:[#allocation4 + $0x270] sm:$0xff] }
 0xd75   :  { %5481 = vmatpush1.bf16.msra.mxu1 %v5412_v38  ;;  %v5588_v38 = vld [vmem:[#allocation4 + $0x370] sm:$0xff] }
 0xd76   :  { %5522 = vmatpush1.bf16.msra.mxu0 %v5444_v59  ;;  %5482 = vmatprep.subr.bf16.mxu1 %v5415_v27  ;;  %v5559_v59 = vld [vmem:[#allocation4 + $0x288] sm:$0xff] }
 0xd77   :  { %5523 = vmatprep.subr.bf16.mxu0 %v5447_v14  ;;  %v5591_v27 = vld [vmem:[#allocation4 + $0x388] sm:$0xff]  ;;  %v5558_v14 = vld [vmem:[#allocation4 + $0x280] sm:$0xff] }
 0xd79   :  { %5483 = vmatpush1.bf16.msra.mxu1 %v5414_v54  ;;  %v5590_v54 = vld [vmem:[#allocation4 + $0x380] sm:$0xff] }
 0xd7a   :  { %5524 = vmatpush1.bf16.msra.mxu0 %v5446_v2  ;;  %5484 = vmatprep.subr.bf16.mxu1 %v5417_v1  ;;  %v5561_v2 = vld [vmem:[#allocation4 + $0x298] sm:$0xff] }
 0xd7b   :  { %5525 = vmatprep.subr.bf16.mxu0 %v5449_v37  ;;  %v5593_v1 = vld [vmem:[#allocation4 + $0x398] sm:$0xff]  ;;  %v5560_v37 = vld [vmem:[#allocation4 + $0x290] sm:$0xff] }
 0xd7d   :  { %5485 = vmatpush1.bf16.msra.mxu1 %v5416_v15  ;;  %v5592_v15 = vld [vmem:[#allocation4 + $0x390] sm:$0xff] }
 0xd7e   :  { %5526 = vmatpush1.bf16.msra.mxu0 %v5448_v16  ;;  %5486 = vmatprep.subr.bf16.mxu1 %v5419_v41  ;;  %v5563_v16 = vld [vmem:[#allocation4 + $0x2a8] sm:$0xff] }
 0xd7f   :  { %5527 = vmatprep.subr.bf16.mxu0 %v5451_v42  ;;  %v5595_v41 = vld [vmem:[#allocation4 + $0x3a8] sm:$0xff]  ;;  %v5562_v42 = vld [vmem:[#allocation4 + $0x2a0] sm:$0xff] }
 0xd81   :  { %5487 = vmatpush1.bf16.msra.mxu1 %v5418_v62  ;;  %v5594_v62 = vld [vmem:[#allocation4 + $0x3a0] sm:$0xff] }
 0xd82   :  { %5528 = vmatpush1.bf16.msra.mxu0 %v5450_v24  ;;  %5488 = vmatprep.subr.bf16.mxu1 %v5421_v55  ;;  %v5565_v24 = vld [vmem:[#allocation4 + $0x2b8] sm:$0xff] }
 0xd83   :  { %5529 = vmatprep.subr.bf16.mxu0 %v5453_v43  ;;  %v5597_v55 = vld [vmem:[#allocation4 + $0x3b8] sm:$0xff]  ;;  %v5564_v43 = vld [vmem:[#allocation4 + $0x2b0] sm:$0xff] }
 0xd85   :  { %5489 = vmatpush1.bf16.msra.mxu1 %v5420_v49  ;;  %v5596_v49 = vld [vmem:[#allocation4 + $0x3b0] sm:$0xff] }
 0xd86   :  { %5530 = vmatpush1.bf16.msra.mxu0 %v5452_v21  ;;  %5490 = vmatprep.subr.bf16.mxu1 %v5423_v28  ;;  %v5567_v21 = vld [vmem:[#allocation4 + $0x2c8] sm:$0xff] }
 0xd87   :  { %5531 = vmatprep.subr.bf16.mxu0 %v5455_v10  ;;  %v5599_v28 = vld [vmem:[#allocation4 + $0x3c8] sm:$0xff]  ;;  %v5566_v10 = vld [vmem:[#allocation4 + $0x2c0] sm:$0xff] }
 0xd89   :  { %5491 = vmatpush1.bf16.msra.mxu1 %v5422_v40  ;;  %v5598_v40 = vld [vmem:[#allocation4 + $0x3c0] sm:$0xff] }
 0xd8a   :  { %5532 = vmatpush1.bf16.msra.mxu0 %v5454_v13  ;;  %5610 = vmatprep.subr.bf16.mxu1 %v5543_v25  ;;  %v5569_v13 = vld [vmem:[#allocation4 + $0x2d8] sm:$0xff] }
 0xd8b   :  { %5651 = vmatprep.subr.bf16.mxu0 %v5575_v17  ;;  %v5601_v25 = vld [vmem:[#allocation4 + $0x3d8] sm:$0xff]  ;;  %v5568_v17 = vld [vmem:[#allocation4 + $0x2d0] sm:$0xff] }
 0xd8c   :  { %5493 = vmatmul.mubr.bf16.vlgmr.msra.gmra.mrb[36].mxu1 %v5456_v8  ;;  %v5600_v8 = vld [vmem:[#allocation4 + $0x3d0] sm:$0xff] }
 0xd8d   :  { %5534 = vmatmul.mubr.bf16.vlgmr.msra.gmra.mrb[40].mxu0 %v5458_v52  ;;  %5611 = vmatpush1.bf16.msra.mxu1 %v5542_v36  ;;  %v5571_v52 = vld [vmem:[#allocation4 + $0x2e8] sm:$0xff] }
 0xd8e   :  { %5652 = vmatpush1.bf16.msra.mxu0 %v5574_v56  ;;  %5612 = vmatprep.subr.bf16.mxu1 %v5545_v63  ;;  %v5603_v36 = vld [vmem:[#allocation4 + $0x3e8] sm:$0xff]  ;;  %v5570_v56 = vld [vmem:[#allocation4 + $0x2e0] sm:$0xff] }
 0xd8f   :  { %5653 = vmatprep.subr.bf16.mxu0 %v5577_v44  ;;  %5642 = vmatprep.mubr.bf16.mxu1 %v5607_v50  ;;  %v5602_v63 = vld [vmem:[#allocation4 + $0x3e0] sm:$0xff]  ;;  %v5573_v44 = vld [vmem:[#allocation4 + $0x2f8] sm:$0xff] }
 0xd90   :  { %5683 = vmatprep.mubr.bf16.mxu0 %v5609_v46  ;;  %v5605_v50 = vld [vmem:[#allocation4 + $0x3f8] sm:$0xff]  ;;  %v5572_v46 = vld [vmem:[#allocation4 + $0x2f0] sm:$0xff] }
 0xd91   :  { %5613 = vmatpush1.bf16.msra.mxu1 %v5544_v45  ;;  %v5604_v45 = vld [vmem:[#allocation4 + $0x3f0] sm:$0xff] }
 0xd92   :  { %5654 = vmatpush1.bf16.msra.mxu0 %v5576_v48  ;;  %5614 = vmatprep.subr.bf16.mxu1 %v5547_v0  ;;  %v5606_v48 = vpack.c.bf16 %v7636_v60, %v7636_v60  ;;  %v5608_v0 = vpack.c.bf16 %v7638_v58, %v7638_v58  ;;  %v6830_v60 = vld [vmem:[%s7781_s3 + $0x48] sm:$0xff]  }
 0xd93   :  { %5655 = vmatprep.subr.bf16.mxu0 %v5579_v26  ;;  %v6828_v26 = vld [vmem:[%s7781_s3 + $0x40] sm:$0xff]   ;;  %v6831_v58 = vld [vmem:[%s7781_s3 + $0x8] sm:$0xff]  }
 0xd95   :  { %5615 = vmatpush1.bf16.msra.mxu1 %v5546_v23  ;;  %v6829_v23 = vld [vmem:[%s7781_s3] sm:$0xff]  }
 0xd96   :  { %5656 = vmatpush1.bf16.msra.mxu0 %v5578_v18  ;;  %5616 = vmatprep.subr.bf16.mxu1 %v5549_v39  ;;  %v6832_v18 = vld [vmem:[%s7781_s3 + $0x50] sm:$0xff]  }
 0xd97   :  { %5657 = vmatprep.subr.bf16.mxu0 %v5581_v3  ;;  %v6833_v39 = vld [vmem:[%s7781_s3 + $0x10] sm:$0xff]   ;;  %v6834_v3 = vld [vmem:[%s7781_s3 + $0x58] sm:$0xff]  }
 0xd99   :  { %5617 = vmatpush1.bf16.msra.mxu1 %v5548_v57  ;;  %v6835_v57 = vld [vmem:[%s7781_s3 + $0x18] sm:$0xff]  }
 0xd9a   :  { %5658 = vmatpush1.bf16.msra.mxu0 %v5580_v29  ;;  %5618 = vmatprep.subr.bf16.mxu1 %v5551_v53  ;;  %v6836_v29 = vld [vmem:[%s7781_s3 + $0x60] sm:$0xff]  }
 0xd9b   :  { %5659 = vmatprep.subr.bf16.mxu0 %v5583_v20  ;;  %v6837_v53 = vld [vmem:[%s7781_s3 + $0x20] sm:$0xff]   ;;  %v6838_v20 = vld [vmem:[%s7781_s3 + $0x68] sm:$0xff]  }
 0xd9d   :  { %5619 = vmatpush1.bf16.msra.mxu1 %v5550_v19  ;;  %v6839_v19 = vld [vmem:[%s7781_s3 + $0x28] sm:$0xff]  }
 0xd9e   :  { %5660 = vmatpush1.bf16.msra.mxu0 %v5582_v51  ;;  %5620 = vmatprep.subr.bf16.mxu1 %v5553_v5  ;;  %v6840_v51 = vld [vmem:[%s7781_s3 + $0x70] sm:$0xff]  }
 0xd9f   :  { %5661 = vmatprep.subr.bf16.mxu0 %v5585_v47  ;;  %v6841_v5 = vld [vmem:[%s7781_s3 + $0x30] sm:$0xff]   ;;  %v6842_v47 = vld [vmem:[%s7781_s3 + $0x78] sm:$0xff]  }
 0xda1   :  { %5621 = vmatpush1.bf16.msra.mxu1 %v5552_v30  ;;  %v6843_v30 = vld [vmem:[%s7781_s3 + $0x38] sm:$0xff]  }
 0xda2   :  { %5662 = vmatpush1.bf16.msra.mxu0 %v5584_v4  ;;  %5622 = vmatprep.subr.bf16.mxu1 %v5555_v12  ;;  %v6844_v4 = vld [vmem:[%s7781_s3 + $0xc0] sm:$0xff]  }
 0xda3   :  { %5663 = vmatprep.subr.bf16.mxu0 %v5587_v31  ;;  %v6845_v12 = vld [vmem:[%s7781_s3 + $0x80] sm:$0xff]   ;;  %v6846_v31 = vld [vmem:[%s7781_s3 + $0xc8] sm:$0xff]  }
 0xda5   :  { %5623 = vmatpush1.bf16.msra.mxu1 %v5554_v61  ;;  %v6847_v61 = vld [vmem:[%s7781_s3 + $0x88] sm:$0xff]  }
 0xda6   :  { %5664 = vmatpush1.bf16.msra.mxu0 %v5586_v22  ;;  %5624 = vmatprep.subr.bf16.mxu1 %v5557_v33  ;;  %v6848_v22 = vld [vmem:[%s7781_s3 + $0xd0] sm:$0xff]  }
 0xda7   :  { %5665 = vmatprep.subr.bf16.mxu0 %v5589_v6  ;;  %v6849_v33 = vld [vmem:[%s7781_s3 + $0x90] sm:$0xff]   ;;  %v6850_v6 = vld [vmem:[%s7781_s3 + $0xd8] sm:$0xff]  }
 0xda9   :  { %5625 = vmatpush1.bf16.msra.mxu1 %v5556_v35  ;;  %v6851_v35 = vld [vmem:[%s7781_s3 + $0x98] sm:$0xff]  }
 0xdaa   :  { %5666 = vmatpush1.bf16.msra.mxu0 %v5588_v38  ;;  %5626 = vmatprep.subr.bf16.mxu1 %v5559_v59  ;;  %v6852_v38 = vld [vmem:[%s7781_s3 + $0xe0] sm:$0xff]  }
 0xdab   :  { %5667 = vmatprep.subr.bf16.mxu0 %v5591_v27  ;;  %v6853_v59 = vld [vmem:[%s7781_s3 + $0xa0] sm:$0xff]   ;;  %v6854_v27 = vld [vmem:[%s7781_s3 + $0xe8] sm:$0xff]  }
 0xdad   :  { %5627 = vmatpush1.bf16.msra.mxu1 %v5558_v14  ;;  %v6855_v14 = vld [vmem:[%s7781_s3 + $0xa8] sm:$0xff]  }
 0xdae   :  { %5668 = vmatpush1.bf16.msra.mxu0 %v5590_v54  ;;  %5628 = vmatprep.subr.bf16.mxu1 %v5561_v2  ;;  %v6856_v54 = vld [vmem:[%s7781_s3 + $0xf0] sm:$0xff]  }
 0xdaf   :  { %5669 = vmatprep.subr.bf16.mxu0 %v5593_v1  ;;  %v6857_v2 = vld [vmem:[%s7781_s3 + $0xb0] sm:$0xff]   ;;  %v6858_v1 = vld [vmem:[%s7781_s3 + $0xf8] sm:$0xff]  }
 0xdb1   :  { %5629 = vmatpush1.bf16.msra.mxu1 %v5560_v37  ;;  %v6859_v37 = vld [vmem:[%s7781_s3 + $0xb8] sm:$0xff]   ;;  %s7032_s3 = smov [#allocation14]  }
 0xdb2   :  { %5670 = vmatpush1.bf16.msra.mxu0 %v5592_v15  ;;  %5630 = vmatprep.subr.bf16.mxu1 %v5563_v16  ;;  %v5693_v15 = vld [vmem:[#allocation12 + $0x6] ss:$8 sm:$0xf]  ;;  %s6111_s28 = sshll.u32 %s7032_s3, 4  ;;  %s6112_s28 = int_to_ptr.vmem [resolvable:$true] %s6111_s28 }
 0xdb3   :  { %5671 = vmatprep.subr.bf16.mxu0 %v5595_v41  ;;  %v5698_v16 = vrot.slane %v5693_v15, %v7189_v9  ;;  %s6964_s29 = scalar_lea.vmem %s6112_s28, 128  ;;  %p6969_p5 = scmp.lt.s32.totalorder %s6112_s28, %s6112_s28 }
 0xdb4   :  { %p6965_p4 = scmp.ne.s32.totalorder %s6112_s28, %s6964_s29  ;;  %p6970_p6 = scmp.lt.s32.totalorder %s6964_s29, %s6964_s29 }
 0xdb5   :  { %5631 = vmatpush1.bf16.msra.mxu1 %v5562_v42 }
 0xdb6   :  { %5672 = vmatpush1.bf16.msra.mxu0 %v5594_v62  ;;  %5632 = vmatprep.subr.bf16.mxu1 %v5565_v24  ;;  %v5702_v62 = vrot.slane %v5693_v15, %v7192_v11  ;;  %p6971_p7 = por %p6970_p6, %p6969_p5 }
 0xdb7   :  { %5673 = vmatprep.subr.bf16.mxu0 %v5597_v55 }
 0xdb8   :  { %p6972_p8 = pnand %p6971_p7, %p6965_p4 }
 0xdb9   :  { %5633 = vmatpush1.bf16.msra.mxu1 %v5564_v43 }
 0xdba   :  { %5674 = vmatpush1.bf16.msra.mxu0 %v5596_v49  ;;  %5634 = vmatprep.subr.bf16.mxu1 %v5567_v21 }
 0xdbb   :  { %5675 = vmatprep.subr.bf16.mxu0 %v5599_v28 }
 0xdbd   :  { %5635 = vmatpush1.bf16.msra.mxu1 %v5566_v10 }
 0xdbe   :  { %5676 = vmatpush1.bf16.msra.mxu0 %v5598_v40  ;;  %5636 = vmatprep.subr.bf16.mxu1 %v5569_v13 }
 0xdbf   :  { %5677 = vmatprep.subr.bf16.mxu0 %v5601_v25 }
 0xdc1   :  { %5637 = vmatpush1.bf16.msra.mxu1 %v5568_v17 }
 0xdc2   :  { %5678 = vmatpush1.bf16.msra.mxu0 %v5600_v8  ;;  %5638 = vmatprep.subr.bf16.mxu1 %v5571_v52 }
 0xdc3   :  { %5679 = vmatprep.subr.bf16.mxu0 %v5603_v36 }
 0xdc5   :  { %5639 = vmatpush1.bf16.msra.mxu1 %v5570_v56 }
 0xdc6   :  { %5680 = vmatpush1.bf16.msra.mxu0 %v5602_v63  ;;  %5640 = vmatprep.subr.bf16.mxu1 %v5573_v44 }
 0xdc7   :  { %5681 = vmatprep.subr.bf16.mxu0 %v5605_v50 }
 0xdc9   :  { %5641 = vmatpush1.bf16.msra.mxu1 %v5572_v46 }
 0xdca   :  { %5682 = vmatpush1.bf16.msra.mxu0 %v5604_v45  ;;  %6313 = vmatprep.subr.bf16.mxu1 %v6828_v26 }
 0xdcb   :  { %6335 = vmatprep.subr.bf16.mxu0 %v6844_v4 }
 0xdcc   :  { %5643 = vmatmul.mubr.bf16.vlgmr.msra.gmra.mrb[40].mxu1 %v5606_v48  ;;  %v5706_v48 = vrot.slane %v5693_v15, %v7197_v32 }
 0xdcd   :  { %5684 = vmatmul.mubr.bf16.vlgmr.msra.gmra.mrb[44].mxu0 %v5608_v0  ;;  %6314 = vmatpush3.bf16.msra.mxu1 %v6829_v23  ;;  %v5710_v23 = vrot.slane %v5693_v15, %v7200_v34 }
 0xdce   :  { %6315 = vmatprep.subr.bf16.mxu1 %v6830_v60  ;;  %6336 = vmatpush3.bf16.msra.mxu0 %v6845_v12 }
 0xdcf   :  { %6337 = vmatprep.subr.bf16.mxu0 %v6846_v31 }
 0xdd1   :  { %6316 = vmatpush3.bf16.msra.mxu1 %v6831_v58 }
 0xdd2   :  { %6317 = vmatprep.subr.bf16.mxu1 %v6832_v18  ;;  %6338 = vmatpush3.bf16.msra.mxu0 %v6847_v61 }
 0xdd3   :  { %6339 = vmatprep.subr.bf16.mxu0 %v6848_v22 }
 0xdd5   :  { %6318 = vmatpush3.bf16.msra.mxu1 %v6833_v39 }
 0xdd6   :  { %6319 = vmatprep.subr.bf16.mxu1 %v6834_v3  ;;  %6340 = vmatpush3.bf16.msra.mxu0 %v6849_v33 }
 0xdd7   :  { %6341 = vmatprep.subr.bf16.mxu0 %v6850_v6 }
 0xdd9   :  { %6320 = vmatpush3.bf16.msra.mxu1 %v6835_v57 }
 0xdda   :  { %6321 = vmatprep.subr.bf16.mxu1 %v6836_v29  ;;  %6342 = vmatpush3.bf16.msra.mxu0 %v6851_v35 }
 0xddb   :  { %6343 = vmatprep.subr.bf16.mxu0 %v6852_v38 }
 0xddd   :  { %6322 = vmatpush3.bf16.msra.mxu1 %v6837_v53 }
 0xdde   :  { %6323 = vmatprep.subr.bf16.mxu1 %v6838_v20  ;;  %6344 = vmatpush3.bf16.msra.mxu0 %v6853_v59 }
 0xddf   :  { %6345 = vmatprep.subr.bf16.mxu0 %v6854_v27 }
 0xde1   :  { %6324 = vmatpush3.bf16.msra.mxu1 %v6839_v19 }
 0xde2   :  { %6325 = vmatprep.subr.bf16.mxu1 %v6840_v51  ;;  %6346 = vmatpush3.bf16.msra.mxu0 %v6855_v14  ;;  %v5815_v14 = vld [vmem:[#allocation12 + $0x7] ss:$0 sm:$0xff] }
 0xde3   :  { %6347 = vmatprep.subr.bf16.mxu0 %v6856_v54  ;;  %v6089_v54 = vand.u32 127, %v186_v7 }
 0xde5   :  { %6326 = vmatpush3.bf16.msra.mxu1 %v6841_v5  ;;  %vm6090_vm2 = vcmp.lt.s32.totalorder %v6089_v54, 4  ;;  %vm6096_vm3 = vcmp.eq.s32.totalorder %v6089_v54, 4 }
 0xde6   :  { %6327 = vmatprep.subr.bf16.mxu1 %v6842_v47  ;;  %6348 = vmatpush3.bf16.msra.mxu0 %v6857_v2 }
 0xde7   :  { %6349 = vmatprep.subr.bf16.mxu0 %v6858_v1 }
 0xde9   :  { %6328 = vmatpush3.bf16.msra.mxu1 %v6843_v30 }
 0xdea   :  { %6350 = vmatpush3.bf16.msra.mxu0 %v6859_v37 }
 0xe5f   :  { %v5494_v41 = vpop.f32.mrb[36].mxu1 }
 0xe60   :  { %v5535_v42 = vpop.f32.mrb[40].mxu0  ;;  %v5496_v55 = vpop.f32.mrb[37].mxu1 }
 0xe61   :  { %v5536_v24 = vadd.f32 %v5535_v42, %v5494_v41  ;;  %v5537_v43 = vpop.f32.mrb[41].mxu0  ;;  %v5498_v21 = vpop.f32.mrb[38].mxu1 }
 0xe62   :  { %v5538_v49 = vadd.f32 %v5537_v43, %v5496_v55  ;;  %v5539_v28 = vpop.f32.mrb[42].mxu0  ;;  %v5499_v40 = vpop.f32.mrb[39].mxu1 }
 0xe63   :  { %v5715_v10 = vadd.f32 %v5698_v16, %v5536_v24  ;;  %v5540_v13 = vpop.f32.mrb[43].mxu0 }
 0xe64   :  { %v5716_v25 = vadd.f32 %v5702_v62, %v5538_v49 }
 0xe65   :  { %v6272_v17 = vmul.f32 -1.442695, %v5715_v10 }
 0xe66   :  { %v6273_v8 = vmul.f32 -1.442695, %v5716_v25 }
 0xe67   :  { %6860 = vpow2.f32 %v6272_v17 }
 0xe68   :  { %6862 = vpow2.f32 %v6273_v8 }
 0xe71   :  { %v6861_v52 = vpop.eup %6860 }
 0xe72   :  { %v6863_v9 = vpop.eup %6862  ;;  %v5731_v36 = vadd.f32 1.0, %v6861_v52 }
 0xe73   :  { %v5732_v56 = vadd.f32 1.0, %v6863_v9 }
 0xe74   :  { %6864 = vrcp.f32 %v5731_v36 }
 0xe75   :  { %6866 = vrcp.f32 %v5732_v56 }
 0xe7e   :  { %v6865_v11 = vpop.eup %6864 }
 0xe7f   :  { %v6867_v63 = vpop.eup %6866  ;;  %v5743_v44 = vmul.f32 %v6865_v11, %v5715_v10 }
 0xe80   :  { %v5744_v50 = vmul.f32 %v6867_v63, %v5716_v25 }
 0xe81   :  { %v5811_v45 = vpack.c.bf16 %v5743_v44, %v5743_v44 }
 0xe82   :  { %v5812_v46 = vpack.c.bf16 %v5744_v50, %v5744_v50 }
 0xe84   :  { %6040 = vmatprep.mubr.bf16.mxu1 %v5812_v46 }
 0xe85   :  { %6041 = vmatmul.mubr.bf16.vlgmr.msra.gmra.mrb[44].mxu1 %v5811_v45 }
 0xe9f   :  { %v5644_v0 = vpop.f32.mrb[40].mxu1 }
 0xea0   :  { %v5685_v26 = vpop.f32.mrb[44].mxu0  ;;  %v5646_v58 = vpop.f32.mrb[41].mxu1 }
 0xea1   :  { %v5686_v60 = vadd.f32 %v5685_v26, %v5644_v0  ;;  %v5687_v18 = vpop.f32.mrb[45].mxu0  ;;  %v5648_v3 = vpop.f32.mrb[42].mxu1 }
 0xea2   :  { %v5688_v39 = vadd.f32 %v5687_v18, %v5646_v58  ;;  %v5689_v57 = vpop.f32.mrb[46].mxu0  ;;  %v5649_v53 = vpop.f32.mrb[43].mxu1 }
 0xea3   :  { %v5717_v29 = vadd.f32 %v5706_v48, %v5686_v60  ;;  %v5690_v20 = vpop.f32.mrb[47].mxu0 }
 0xea4   :  { %v5718_v19 = vadd.f32 %v5710_v23, %v5688_v39 }
 0xea5   :  { %v6274_v51 = vmul.f32 -1.442695, %v5717_v29 }
 0xea6   :  { %v6275_v5 = vmul.f32 -1.442695, %v5718_v19 }
 0xea7   :  { %6868 = vpow2.f32 %v6274_v51 }
 0xea8   :  { %6870 = vpow2.f32 %v6275_v5 }
 0xeb1   :  { %v6869_v47 = vpop.eup %6868 }
 0xeb2   :  { %v6871_v32 = vpop.eup %6870  ;;  %v5733_v30 = vadd.f32 1.0, %v6869_v47 }
 0xeb3   :  { %v5734_v4 = vadd.f32 1.0, %v6871_v32 }
 0xeb4   :  { %6872 = vrcp.f32 %v5733_v30 }
 0xeb5   :  { %6874 = vrcp.f32 %v5734_v4 }
 0xebe   :  { %v6873_v34 = vpop.eup %6872 }
 0xebf   :  { %v6875_v12 = vpop.eup %6874  ;;  %v5745_v31 = vmul.f32 %v6873_v34, %v5717_v29 }
 0xec0   :  { %v5746_v61 = vmul.f32 %v6875_v12, %v5718_v19 }
 0xec1   :  { %v5813_v33 = vpack.c.bf16 %v5745_v31, %v5745_v31 }
 0xec2   :  { %v5814_v22 = vpack.c.bf16 %v5746_v61, %v5746_v61 }
 0xec4   :  { %6080 = vmatprep.mubr.bf16.mxu0 %v5814_v22 }
 0xec5   :  { %6081 = vmatmul.mubr.bf16.vlgmr.msra.gmra.mrb[48].mxu0 %v5813_v33 }
 0xf58   :  { %v6329_v6 = vpop.f32.mrb[44].mxu1 }
 0xf59   :  { %v6330_v35 = vpop.f32.mrb[45].mxu1 }
 0xf5a   :  { %v6331_v38 = vadd.f32 %v6330_v35, %v6329_v6  ;;  %v6332_v59 = vpop.f32.mrb[46].mxu1 }
 0xf5b   :  { %v6333_v27 = vpop.f32.mrb[47].mxu1 }
 0xf5c   :  { %v6043_v37 = vadd.f32 %v6331_v38, %v5815_v14 }
 0xf98   :  { %v6351_v2 = vpop.f32.mrb[48].mxu0 }
 0xf99   :  { %v6352_v1 = vpop.f32.mrb[49].mxu0 }
 0xf9a   :  { %v6353_v15 = vadd.f32 %v6352_v1, %v6351_v2  ;;  %v6354_v16 = vpop.f32.mrb[50].mxu0 }
 0xf9b   :  { %v6355_v41 = vpop.f32.mrb[51].mxu0 }
 0xf9c   :  { %v6083_v42 = vadd.f32 %v6353_v15, %v6043_v37 }
 0xf9e   :  { %v6091_v62 = vsel %vm6090_vm2, %v6083_v42, 0.0  ;;  %v6097_v55 = vsel %vm6096_vm3, %v6083_v42, 0.0 }
 0xf9f   :  { %v6092_v24 = vsel %vm201_vm1, %v6091_v62, 0.0  ;;  %v6098_v43 = vsel %vm201_vm1, %v6097_v55, 0.0 }
 0xfa0   :  { %6093 = vadd.xlane.f32.xlu0 %v6092_v24 }
 0xfa4   :  { %6099 = vadd.xlane.f32.xlu0 %v6098_v43 }
0x102d   :  { %v6094_v49 = vpop.xlane.xlu0 %6093 }
0x102e   :  { %v6095_v21 = vmul.f32 0.25, %v6094_v49 }
0x1031   :  { %v6100_v7 = vpop.xlane.xlu0 %6099 }
0x1032   :  { %v6101_v28 = vadd.f32 %v6100_v7, %v6083_v42 }
0x1034   :  { %v6102_v10 = vsub.f32 %v6101_v28, %v6095_v21 }
0x1036   :  { %v6103_v40 = vsel %vm6090_vm2, %v6102_v10, 0.0 }
0x1037   :  { %6104 = vst.msk [vmem:[#allocation14] sm:$0xff] %vm201_vm1, %v6103_v40 }
0x1038   :  { %6975 = shalt.err (!%p6972_p8)
}
0x1039   :  { %s6976_s14 = scalar_lea.hbm %s7788_s10, 128 }
0x103a   :  { %p6977_p9 = scmp.ne.s32.totalorder %s7788_s10, %s6976_s14  ;;  %p6980_p10 = scmp.lt.u32.totalorder %s6976_s14, %s7788_s10 }
0x103c   :  { %p6982_p11 = pnand %p6980_p10, %p6977_p9 }
0x103e   :  { %6985 = shalt.err (!%p6982_p11)
}
0x103f   :  { %6114 = dma.vmem_to_hbm [thread:$0]  %s6112_s28, 128, %s7788_s10, [#allocation8]  }
0x1040   :  { %7002 = dma.done.wait [#allocation8], 128  }
0x1041   :  { %7003 = vsyncadd [#allocation8], 4294967168 }
0x1042   :  { %6118 = vsyncpa [#allocation7], 1 }
0x1043   :  { %6119 = vsyncpa [#allocation10], 1 }
0x1044   :  { %6120 = vsyncpa [#allocation13], 1 }
0x1045   :  { %6121 = vsyncpa [#allocation8], 1 }
0x1046   :  { %6122 = vsyncmov [#allocation5] }
0x1049   :  { %s6123_s0 = vpop.sfrf %6122 }
0x104a   :  { %p6308_p12 = scmp.ne.s32.totalorder %s6123_s0, 0 }
0x104c   :  { %6127 = shalt.err (%p6308_p12)  }
0x104d   :  { %6129 = vsyncmov [#allocation5 + $0x1] }
0x1050   :  { %s6130_s22 = vpop.sfrf %6129 }
0x1051   :  { %p6309_p13 = scmp.ne.s32.totalorder %s6130_s22, 0 }
0x1053   :  { %6134 = shalt.err (%p6309_p13)  }
0x1054   :  { %6136 = vsyncmov [#allocation5 + $0x2] }
0x1057   :  { %s6137_s9 = vpop.sfrf %6136 }
0x1058   :  { %p6310_p0 = scmp.ne.s32.totalorder %s6137_s9, 0 }
0x105a   :  { %6141 = shalt.err (%p6310_p0)  }
0x105b   :  { %6143 = vsyncmov [#allocation5 + $0x3] }
0x105e   :  { %s6144_s10 = vpop.sfrf %6143 }
0x105f   :  { %p6311_p1 = scmp.ne.s32.totalorder %s6144_s10, 0 }
0x1061   :  { %6148 = shalt.err (%p6311_p1)  }
0x1062   :  { %6150 = vsyncmov [#allocation5 + $0x4] }
0x1065   :  { %s6151_s23 = vpop.sfrf %6150 }
0x1066   :  { %p6312_p2 = scmp.ne.s32.totalorder %s6151_s23, 0 }
0x1068   :  { %6155 = shalt.err (%p6312_p2)  }

</bundles_post_ra>
